<compile_context>
chip_gen: v7x
topology: tpu7x:2x2x1
jax: 0.10.0
libtpu: 0.0.40
codegen_flags: <defaults>
</compile_context>

<pallas_src>
import jax
import jax.numpy as jnp
import numpy as np
from jax.experimental import pallas as pl
from jax.experimental.pallas import tpu as pltpu


def _last_conv_kernel(xw_ref, wt_ref, bt_ref, w3_ref, b3_ref, w1_ref, b1_ref,
                      out_ref, upad_ref):
    """Fused ConvTranspose2d(k2,s2) + Conv2d(3x3,pad1) + ReLU + Conv2d(1x1).

    One batch element per grid step, everything in row-phase-split form.
      xw_ref  : [Cin, H, Wo]          (VMEM) input with each column duplicated
                                      (xw[ci, i, q] == x[ci, i, q//2])
      wt_ref  : [Cin*Cmid*4]          (SMEM) ConvT weights, flat [ci, co, kh, kw]
      bt_ref  : [Cmid]                (SMEM)
      w3_ref  : [Cmid*Cmid*9]         (SMEM) 3x3 weights, flat [o, c, dh, dw]
      b3_ref  : [Cmid]                (SMEM)
      w1_ref  : [Cout*Cmid]           (SMEM) 1x1 weights, flat [o, c]
      b1_ref  : [Cout]                (SMEM)
      out_ref : [2, Cout, H, Wo]      (VMEM) out_ref[a, o, i, q] = y[o, 2i+a, q]
      upad_ref: [2, Cmid, 24, 128]    scratch: zero-padded row-phase ConvT planes,
                                      image at offset (1, 1), lane/sublane aligned.
    """
    Cin, H, Wo = xw_ref.shape
    Cout = out_ref.shape[1]
    Cmid = upad_ref.shape[1]
    PR, PC = upad_ref.shape[2], upad_ref.shape[3]

    col_even = (jax.lax.broadcasted_iota(jnp.int32, (H, Wo), 1) & 1) == 0
    xw = [xw_ref[ci] for ci in range(Cin)]            # hoist 4 channel loads

    # ---- 1. ConvTranspose2d(k=2, s=2), per output-row phase a -------------------
    #   up[c, 2i+a, q] = bt[c] + sum_ci wt[ci, c, a, q%2] * x[ci, i, q//2]
    # even/odd-column weight accumulations + ONE select per plane; stored into the
    # zero-padded scratch so the 3x3 conv below gets its pad=1 border for free.
    for a in range(2):
        for c in range(Cmid):
            # bulk zero of this plane (border must be zero; interior overwritten).
            upad_ref[a, c] = jnp.zeros((PR, PC), jnp.float32)
            base0 = (0 * Cmid + c) * 4 + a * 2
            e = wt_ref[base0 + 0] * xw[0]             # even output columns (kw=0)
            o = wt_ref[base0 + 1] * xw[0]             # odd  output columns (kw=1)
            for ci in range(1, Cin):
                base = (ci * Cmid + c) * 4 + a * 2
                e = e + wt_ref[base + 0] * xw[ci]
                o = o + wt_ref[base + 1] * xw[ci]
            u = jnp.where(col_even, e, o) + bt_ref[c]
            upad_ref[a, c, 1:H + 1, 1:Wo + 1] = u

    # ---- 2. Conv2d(3x3, pad=1) + ReLU + Conv2d(1x1), per output-row phase --------
    # Sub-pixel identity: up row (2i + a + dh - 1) lives in row-phase (a+dh-1) & 1
    # at input-row i + (a+dh-1)//2, so every tap is a static shifted slice of the
    # padded row-phase planes.  All work stays on (H, Wo) = 32-lane planes.
    for a in range(2):
        z = [jnp.zeros((H, Wo), jnp.float32) + b3_ref[o] for o in range(Cmid)]
        for c in range(Cmid):
            for dh in range(3):
                r = a + dh - 1
                ap = r % 2                      # source row phase
                row0 = 1 + (r // 2)             # 0, 1 or 2 (row shift -1/0/+1)
                for dw in range(3):
                    patch = upad_ref[ap, c, row0:row0 + H, dw:dw + Wo]
                    for o in range(Cmid):
                        z[o] = z[o] + w3_ref[((o * Cmid + c) * 3 + dh) * 3 + dw] * patch
        zr = [jnp.maximum(v, 0.0) for v in z]                     # ReLU
        for o in range(Cout):                                     # 1x1 conv
            y = jnp.zeros((H, Wo), jnp.float32) + b1_ref[o]
            for c in range(Cmid):
                y = y + w1_ref[o * Cmid + c] * zr[c]
            out_ref[a, o] = y


def last_conv_forward(x_nchw, params):
    """x_nchw: [N, Cin, H, W] -> [N, Cout, 2H, 2W] (PyTorch LastConv semantics)."""
    N, Cin, H, W = x_nchw.shape
    Cmid = params['bt'].shape[0]                 # == Cin for LastConv
    Cout = params['b1'].shape[0]
    Ho, Wo = 2 * H, 2 * W

    # Channel-mixing weights are consumed as flat scalar tables in SMEM (exact f32).
    wt = params['wt'].reshape(-1).astype(jnp.float32)   # [Cin, Cmid, 2, 2] flat
    bt = params['bt'].astype(jnp.float32)
    w3 = params['w3'].reshape(-1).astype(jnp.float32)   # [Cmid, Cmid, 3, 3] flat
    b3 = params['b3'].astype(jnp.float32)
    w1 = params['w1'].reshape(-1).astype(jnp.float32)   # [Cout, Cmid, 1, 1] flat
    b1 = params['b1'].astype(jnp.float32)

    # Layout plumbing only (no arithmetic): duplicate each input column so the kernel
    # works on lane-width-Wo planes without any in-kernel gather / strided store.
    xw = jnp.repeat(x_nchw.astype(jnp.float32), 2, axis=3)        # [N, Cin, H, Wo]

    def smem():
        return pl.BlockSpec(memory_space=pltpu.MemorySpace.SMEM)

    out_phased = pl.pallas_call(
        _last_conv_kernel,
        out_shape=jax.ShapeDtypeStruct((N, 2, Cout, H, Wo), jnp.float32),
        grid=(N,),
        in_specs=[
            pl.BlockSpec((None, Cin, H, Wo), lambda n: (n, 0, 0, 0)),
            smem(), smem(), smem(), smem(), smem(), smem(),
        ],
        out_specs=pl.BlockSpec((None, 2, Cout, H, Wo), lambda n: (n, 0, 0, 0, 0)),
        scratch_shapes=[
            # padded row-phase ConvT planes, sublane (24) / lane (128) aligned
            pltpu.VMEM((2, Cmid, H + 8, 128), jnp.float32),
        ],
        compiler_params=pltpu.CompilerParams(
            # v7x: 2 TensorCores, N=2 -> one image per core.  On single-TC v5e/v6e
            # this is just a 2-step serial loop (fold N into the block if it matters).
            dimension_semantics=("parallel",)),
    )(xw, wt, bt, w3, b3, w1, b1)

    # Row-phase de-interleave (pure layout): [N, 2, Cout, H, Wo] -> [N, Cout, 2H, Wo].
    out = jnp.transpose(out_phased, (0, 2, 3, 1, 4)).reshape(N, Cout, Ho, Wo)
    return out


def init_params(key, in_channels, out_channels):
    """Deterministic synthetic parameters in PyTorch layouts."""
    ks = jax.random.split(key, 6)
    return dict(
        wt=jax.random.normal(ks[0], (in_channels, in_channels, 2, 2), jnp.float32) * 0.2,
        bt=jax.random.normal(ks[1], (in_channels,), jnp.float32) * 0.05,
        w3=jax.random.normal(ks[2], (in_channels, in_channels, 3, 3), jnp.float32) * 0.2,
        b3=jax.random.normal(ks[3], (in_channels,), jnp.float32) * 0.05,
        w1=jax.random.normal(ks[4], (out_channels, in_channels, 1, 1), jnp.float32) * 0.2,
        b1=jax.random.normal(ks[5], (out_channels,), jnp.float32) * 0.05,
    )


def reference_forward_np(x, p):
    """Direct NumPy transcription of the PyTorch forward (for verification)."""
    x = np.asarray(x, np.float32)
    wt = np.asarray(p['wt']); bt = np.asarray(p['bt'])
    w3 = np.asarray(p['w3']); b3 = np.asarray(p['b3'])
    w1 = np.asarray(p['w1']); b1 = np.asarray(p['b1'])
    N, C, H, W = x.shape
    up = np.zeros((N, C, 2 * H, 2 * W), np.float32)
    for kh in range(2):
        for kw in range(2):
            up[:, :, kh::2, kw::2] = np.einsum('nihw,io->nohw', x, wt[:, :, kh, kw])
    up += bt[None, :, None, None]
    xp = np.pad(up, ((0, 0), (0, 0), (1, 1), (1, 1)))
    z = np.zeros((N, C, 2 * H, 2 * W), np.float32)
    for kh in range(3):
        for kw in range(3):
            z += np.einsum('nihw,oi->nohw',
                           xp[:, :, kh:kh + 2 * H, kw:kw + 2 * W], w3[:, :, kh, kw])
    z += b3[None, :, None, None]
    z = np.maximum(z, 0.0)
    out = np.einsum('nihw,oi->nohw', z, w1[:, :, 0, 0]) + b1[None, :, None, None]
    return out


if __name__ == "__main__":
    key = jax.random.PRNGKey(0)
    N, Cin, Cout, H, W = 2, 4, 3, 16, 16            # input NCHW = [2, 4, 16, 16]
    kx, kp = jax.random.split(key)
    x = jax.random.normal(kx, (N, Cin, H, W), jnp.float32)
    params = init_params(kp, Cin, Cout)

    fwd = jax.jit(last_conv_forward)
    out = jax.block_until_ready(fwd(x, params))
    assert out.shape == (N, Cout, 2 * H, 2 * W), out.shape

    ref = reference_forward_np(np.asarray(x), {k: np.asarray(v) for k, v in params.items()})
    np.testing.assert_allclose(np.asarray(out), ref, atol=1e-4, rtol=1e-4)
    print("KERNEL_OK")
</pallas_src>

<mosaic_0001>
module attributes {stable_mosaic.version = 11 : i64} {
  func.func @_last_conv_kernel(%arg0: i32, %arg1: memref<1x4x16x32xf32, #tpu.memory_space<vmem>>, %arg2: memref<64xf32, #tpu.memory_space<smem>>, %arg3: memref<4xf32, #tpu.memory_space<smem>>, %arg4: memref<144xf32, #tpu.memory_space<smem>>, %arg5: memref<4xf32, #tpu.memory_space<smem>>, %arg6: memref<12xf32, #tpu.memory_space<smem>>, %arg7: memref<3xf32, #tpu.memory_space<smem>>, %arg8: memref<1x2x3x16x32xf32, #tpu.memory_space<vmem>>, %arg9: memref<2x4x24x128xf32, #tpu.memory_space<vmem>>) attributes {dimension_semantics = [#tpu.dimension_semantics<parallel>], iteration_bounds = array<i64: 2>, scalar_prefetch = 0 : i64, scratch_operands = 1 : i64, tpu.core_type = #tpu.core_type<tc>, window_params = [{transform_indices = @transform_0, window_bounds = array<i64: 1, 4, 16, 32>}, {transform_indices = @transform_1, window_bounds = array<i64: 64>}, {transform_indices = @transform_2, window_bounds = array<i64: 4>}, {transform_indices = @transform_3, window_bounds = array<i64: 144>}, {transform_indices = @transform_4, window_bounds = array<i64: 4>}, {transform_indices = @transform_5, window_bounds = array<i64: 12>}, {transform_indices = @transform_6, window_bounds = array<i64: 3>}, {transform_indices = @transform_7, window_bounds = array<i64: 1, 2, 3, 16, 32>}]} {
    %0 = tpu.iota {dimensions = array<i32: 1>} : vector<16x32xi32>
    %c1_i32 = arith.constant 1 : i32
    %1 = vector.broadcast %c1_i32 : i32 to vector<16x32xi32>
    %2 = arith.andi %0, %1 : vector<16x32xi32>
    %c0_i32 = arith.constant 0 : i32
    %3 = vector.broadcast %c0_i32 : i32 to vector<16x32xi32>
    %4 = arith.cmpi eq, %2, %3 : vector<16x32xi32>
    %c0 = arith.constant 0 : index
    %c0_0 = arith.constant 0 : index
    %c0_1 = arith.constant 0 : index
    %c0_2 = arith.constant 0 : index
    %5 = vector.load %arg1[%c0, %c0_0, %c0_1, %c0_2] : memref<1x4x16x32xf32, #tpu.memory_space<vmem>>, vector<1x1x16x32xf32>
    %6 = vector.shape_cast %5 : vector<1x1x16x32xf32> to vector<16x32xf32>
    %c0_3 = arith.constant 0 : index
    %c1 = arith.constant 1 : index
    %c0_4 = arith.constant 0 : index
    %c0_5 = arith.constant 0 : index
    %7 = vector.load %arg1[%c0_3, %c1, %c0_4, %c0_5] : memref<1x4x16x32xf32, #tpu.memory_space<vmem>>, vector<1x1x16x32xf32>
    %8 = vector.shape_cast %7 : vector<1x1x16x32xf32> to vector<16x32xf32>
    %c0_6 = arith.constant 0 : index
    %c2 = arith.constant 2 : index
    %c0_7 = arith.constant 0 : index
    %c0_8 = arith.constant 0 : index
    %9 = vector.load %arg1[%c0_6, %c2, %c0_7, %c0_8] : memref<1x4x16x32xf32, #tpu.memory_space<vmem>>, vector<1x1x16x32xf32>
    %10 = vector.shape_cast %9 : vector<1x1x16x32xf32> to vector<16x32xf32>
    %c0_9 = arith.constant 0 : index
    %c3 = arith.constant 3 : index
    %c0_10 = arith.constant 0 : index
    %c0_11 = arith.constant 0 : index
    %11 = vector.load %arg1[%c0_9, %c3, %c0_10, %c0_11] : memref<1x4x16x32xf32, #tpu.memory_space<vmem>>, vector<1x1x16x32xf32>
    %12 = vector.shape_cast %11 : vector<1x1x16x32xf32> to vector<16x32xf32>
    %cst = arith.constant 0.000000e+00 : f32
    %13 = vector.broadcast %cst : f32 to vector<24x128xf32>
    %c0_12 = arith.constant 0 : index
    %c0_13 = arith.constant 0 : index
    %c0_14 = arith.constant 0 : index
    %c0_15 = arith.constant 0 : index
    %14 = vector.load %arg9[%c0_12, %c0_13, %c0_14, %c0_15] : memref<2x4x24x128xf32, #tpu.memory_space<vmem>>, vector<1x1x24x128xf32>
    %15 = vector.shape_cast %14 : vector<1x1x24x128xf32> to vector<24x128xf32>
    %16 = vector.shape_cast %13 : vector<24x128xf32> to vector<1x1x24x128xf32>
    tpu.vector_store %arg9[%c0_12, %c0_13, %c0_14, %c0_15], %16 {strides = array<i32>} : memref<2x4x24x128xf32, #tpu.memory_space<vmem>>, vector<1x1x24x128xf32>,
    %c0_16 = arith.constant 0 : index
    %17 = memref.load %arg2[%c0_16] : memref<64xf32, #tpu.memory_space<smem>>
    %18 = vector.broadcast %17 : f32 to vector<16x32xf32>
    %19 = arith.mulf %18, %6 : vector<16x32xf32>
    %c1_17 = arith.constant 1 : index
    %20 = memref.load %arg2[%c1_17] : memref<64xf32, #tpu.memory_space<smem>>
    %21 = vector.broadcast %20 : f32 to vector<16x32xf32>
    %22 = arith.mulf %21, %6 : vector<16x32xf32>
    %c16 = arith.constant 16 : index
    %23 = memref.load %arg2[%c16] : memref<64xf32, #tpu.memory_space<smem>>
    %24 = vector.broadcast %23 : f32 to vector<16x32xf32>
    %25 = arith.mulf %24, %8 : vector<16x32xf32>
    %26 = arith.addf %19, %25 : vector<16x32xf32>
    %c17 = arith.constant 17 : index
    %27 = memref.load %arg2[%c17] : memref<64xf32, #tpu.memory_space<smem>>
    %28 = vector.broadcast %27 : f32 to vector<16x32xf32>
    %29 = arith.mulf %28, %8 : vector<16x32xf32>
    %30 = arith.addf %22, %29 : vector<16x32xf32>
    %c32 = arith.constant 32 : index
    %31 = memref.load %arg2[%c32] : memref<64xf32, #tpu.memory_space<smem>>
    %32 = vector.broadcast %31 : f32 to vector<16x32xf32>
    %33 = arith.mulf %32, %10 : vector<16x32xf32>
    %34 = arith.addf %26, %33 : vector<16x32xf32>
    %c33 = arith.constant 33 : index
    %35 = memref.load %arg2[%c33] : memref<64xf32, #tpu.memory_space<smem>>
    %36 = vector.broadcast %35 : f32 to vector<16x32xf32>
    %37 = arith.mulf %36, %10 : vector<16x32xf32>
    %38 = arith.addf %30, %37 : vector<16x32xf32>
    %c48 = arith.constant 48 : index
    %39 = memref.load %arg2[%c48] : memref<64xf32, #tpu.memory_space<smem>>
    %40 = vector.broadcast %39 : f32 to vector<16x32xf32>
    %41 = arith.mulf %40, %12 : vector<16x32xf32>
    %42 = arith.addf %34, %41 : vector<16x32xf32>
    %c49 = arith.constant 49 : index
    %43 = memref.load %arg2[%c49] : memref<64xf32, #tpu.memory_space<smem>>
    %44 = vector.broadcast %43 : f32 to vector<16x32xf32>
    %45 = arith.mulf %44, %12 : vector<16x32xf32>
    %46 = arith.addf %38, %45 : vector<16x32xf32>
    %47 = arith.select %4, %42, %46 : vector<16x32xi1>, vector<16x32xf32>
    %c0_18 = arith.constant 0 : index
    %48 = memref.load %arg3[%c0_18] : memref<4xf32, #tpu.memory_space<smem>>
    %49 = vector.broadcast %48 : f32 to vector<16x32xf32>
    %50 = arith.addf %47, %49 : vector<16x32xf32>
    %c0_19 = arith.constant 0 : index
    %c0_20 = arith.constant 0 : index
    %c1_21 = arith.constant 1 : index
    %c1_22 = arith.constant 1 : index
    %51 = vector.load %arg9[%c0_19, %c0_20, %c1_21, %c1_22] : memref<2x4x24x128xf32, #tpu.memory_space<vmem>>, vector<1x1x16x32xf32>
    %52 = vector.shape_cast %51 : vector<1x1x16x32xf32> to vector<16x32xf32>
    %53 = vector.shape_cast %50 : vector<16x32xf32> to vector<1x1x16x32xf32>
    tpu.vector_store %arg9[%c0_19, %c0_20, %c1_21, %c1_22], %53 {strides = array<i32>} : memref<2x4x24x128xf32, #tpu.memory_space<vmem>>, vector<1x1x16x32xf32>,
    %cst_23 = arith.constant 0.000000e+00 : f32
    %54 = vector.broadcast %cst_23 : f32 to vector<24x128xf32>
    %c0_24 = arith.constant 0 : index
    %c1_25 = arith.constant 1 : index
    %c0_26 = arith.constant 0 : index
    %c0_27 = arith.constant 0 : index
    %55 = vector.load %arg9[%c0_24, %c1_25, %c0_26, %c0_27] : memref<2x4x24x128xf32, #tpu.memory_space<vmem>>, vector<1x1x24x128xf32>
    %56 = vector.shape_cast %55 : vector<1x1x24x128xf32> to vector<24x128xf32>
    %57 = vector.shape_cast %54 : vector<24x128xf32> to vector<1x1x24x128xf32>
    tpu.vector_store %arg9[%c0_24, %c1_25, %c0_26, %c0_27], %57 {strides = array<i32>} : memref<2x4x24x128xf32, #tpu.memory_space<vmem>>, vector<1x1x24x128xf32>,
    %c4 = arith.constant 4 : index
    %58 = memref.load %arg2[%c4] : memref<64xf32, #tpu.memory_space<smem>>
    %59 = vector.broadcast %58 : f32 to vector<16x32xf32>
    %60 = arith.mulf %59, %6 : vector<16x32xf32>
    %c5 = arith.constant 5 : index
    %61 = memref.load %arg2[%c5] : memref<64xf32, #tpu.memory_space<smem>>
    %62 = vector.broadcast %61 : f32 to vector<16x32xf32>
    %63 = arith.mulf %62, %6 : vector<16x32xf32>
    %c20 = arith.constant 20 : index
    %64 = memref.load %arg2[%c20] : memref<64xf32, #tpu.memory_space<smem>>
    %65 = vector.broadcast %64 : f32 to vector<16x32xf32>
    %66 = arith.mulf %65, %8 : vector<16x32xf32>
    %67 = arith.addf %60, %66 : vector<16x32xf32>
    %c21 = arith.constant 21 : index
    %68 = memref.load %arg2[%c21] : memref<64xf32, #tpu.memory_space<smem>>
    %69 = vector.broadcast %68 : f32 to vector<16x32xf32>
    %70 = arith.mulf %69, %8 : vector<16x32xf32>
    %71 = arith.addf %63, %70 : vector<16x32xf32>
    %c36 = arith.constant 36 : index
    %72 = memref.load %arg2[%c36] : memref<64xf32, #tpu.memory_space<smem>>
    %73 = vector.broadcast %72 : f32 to vector<16x32xf32>
    %74 = arith.mulf %73, %10 : vector<16x32xf32>
    %75 = arith.addf %67, %74 : vector<16x32xf32>
    %c37 = arith.constant 37 : index
    %76 = memref.load %arg2[%c37] : memref<64xf32, #tpu.memory_space<smem>>
    %77 = vector.broadcast %76 : f32 to vector<16x32xf32>
    %78 = arith.mulf %77, %10 : vector<16x32xf32>
    %79 = arith.addf %71, %78 : vector<16x32xf32>
    %c52 = arith.constant 52 : index
    %80 = memref.load %arg2[%c52] : memref<64xf32, #tpu.memory_space<smem>>
    %81 = vector.broadcast %80 : f32 to vector<16x32xf32>
    %82 = arith.mulf %81, %12 : vector<16x32xf32>
    %83 = arith.addf %75, %82 : vector<16x32xf32>
    %c53 = arith.constant 53 : index
    %84 = memref.load %arg2[%c53] : memref<64xf32, #tpu.memory_space<smem>>
    %85 = vector.broadcast %84 : f32 to vector<16x32xf32>
    %86 = arith.mulf %85, %12 : vector<16x32xf32>
    %87 = arith.addf %79, %86 : vector<16x32xf32>
    %88 = arith.select %4, %83, %87 : vector<16x32xi1>, vector<16x32xf32>
    %c1_28 = arith.constant 1 : index
    %89 = memref.load %arg3[%c1_28] : memref<4xf32, #tpu.memory_space<smem>>
    %90 = vector.broadcast %89 : f32 to vector<16x32xf32>
    %91 = arith.addf %88, %90 : vector<16x32xf32>
    %c0_29 = arith.constant 0 : index
    %c1_30 = arith.constant 1 : index
    %c1_31 = arith.constant 1 : index
    %c1_32 = arith.constant 1 : index
    %92 = vector.load %arg9[%c0_29, %c1_30, %c1_31, %c1_32] : memref<2x4x24x128xf32, #tpu.memory_space<vmem>>, vector<1x1x16x32xf32>
    %93 = vector.shape_cast %92 : vector<1x1x16x32xf32> to vector<16x32xf32>
    %94 = vector.shape_cast %91 : vector<16x32xf32> to vector<1x1x16x32xf32>
    tpu.vector_store %arg9[%c0_29, %c1_30, %c1_31, %c1_32], %94 {strides = array<i32>} : memref<2x4x24x128xf32, #tpu.memory_space<vmem>>, vector<1x1x16x32xf32>,
    %cst_33 = arith.constant 0.000000e+00 : f32
    %95 = vector.broadcast %cst_33 : f32 to vector<24x128xf32>
    %c0_34 = arith.constant 0 : index
    %c2_35 = arith.constant 2 : index
    %c0_36 = arith.constant 0 : index
    %c0_37 = arith.constant 0 : index
    %96 = vector.load %arg9[%c0_34, %c2_35, %c0_36, %c0_37] : memref<2x4x24x128xf32, #tpu.memory_space<vmem>>, vector<1x1x24x128xf32>
    %97 = vector.shape_cast %96 : vector<1x1x24x128xf32> to vector<24x128xf32>
    %98 = vector.shape_cast %95 : vector<24x128xf32> to vector<1x1x24x128xf32>
    tpu.vector_store %arg9[%c0_34, %c2_35, %c0_36, %c0_37], %98 {strides = array<i32>} : memref<2x4x24x128xf32, #tpu.memory_space<vmem>>, vector<1x1x24x128xf32>,
    %c8 = arith.constant 8 : index
    %99 = memref.load %arg2[%c8] : memref<64xf32, #tpu.memory_space<smem>>
    %100 = vector.broadcast %99 : f32 to vector<16x32xf32>
    %101 = arith.mulf %100, %6 : vector<16x32xf32>
    %c9 = arith.constant 9 : index
    %102 = memref.load %arg2[%c9] : memref<64xf32, #tpu.memory_space<smem>>
    %103 = vector.broadcast %102 : f32 to vector<16x32xf32>
    %104 = arith.mulf %103, %6 : vector<16x32xf32>
    %c24 = arith.constant 24 : index
    %105 = memref.load %arg2[%c24] : memref<64xf32, #tpu.memory_space<smem>>
    %106 = vector.broadcast %105 : f32 to vector<16x32xf32>
    %107 = arith.mulf %106, %8 : vector<16x32xf32>
    %108 = arith.addf %101, %107 : vector<16x32xf32>
    %c25 = arith.constant 25 : index
    %109 = memref.load %arg2[%c25] : memref<64xf32, #tpu.memory_space<smem>>
    %110 = vector.broadcast %109 : f32 to vector<16x32xf32>
    %111 = arith.mulf %110, %8 : vector<16x32xf32>
    %112 = arith.addf %104, %111 : vector<16x32xf32>
    %c40 = arith.constant 40 : index
    %113 = memref.load %arg2[%c40] : memref<64xf32, #tpu.memory_space<smem>>
    %114 = vector.broadcast %113 : f32 to vector<16x32xf32>
    %115 = arith.mulf %114, %10 : vector<16x32xf32>
    %116 = arith.addf %108, %115 : vector<16x32xf32>
    %c41 = arith.constant 41 : index
    %117 = memref.load %arg2[%c41] : memref<64xf32, #tpu.memory_space<smem>>
    %118 = vector.broadcast %117 : f32 to vector<16x32xf32>
    %119 = arith.mulf %118, %10 : vector<16x32xf32>
    %120 = arith.addf %112, %119 : vector<16x32xf32>
    %c56 = arith.constant 56 : index
    %121 = memref.load %arg2[%c56] : memref<64xf32, #tpu.memory_space<smem>>
    %122 = vector.broadcast %121 : f32 to vector<16x32xf32>
    %123 = arith.mulf %122, %12 : vector<16x32xf32>
    %124 = arith.addf %116, %123 : vector<16x32xf32>
    %c57 = arith.constant 57 : index
    %125 = memref.load %arg2[%c57] : memref<64xf32, #tpu.memory_space<smem>>
    %126 = vector.broadcast %125 : f32 to vector<16x32xf32>
    %127 = arith.mulf %126, %12 : vector<16x32xf32>
    %128 = arith.addf %120, %127 : vector<16x32xf32>
    %129 = arith.select %4, %124, %128 : vector<16x32xi1>, vector<16x32xf32>
    %c2_38 = arith.constant 2 : index
    %130 = memref.load %arg3[%c2_38] : memref<4xf32, #tpu.memory_space<smem>>
    %131 = vector.broadcast %130 : f32 to vector<16x32xf32>
    %132 = arith.addf %129, %131 : vector<16x32xf32>
    %c0_39 = arith.constant 0 : index
    %c2_40 = arith.constant 2 : index
    %c1_41 = arith.constant 1 : index
    %c1_42 = arith.constant 1 : index
    %133 = vector.load %arg9[%c0_39, %c2_40, %c1_41, %c1_42] : memref<2x4x24x128xf32, #tpu.memory_space<vmem>>, vector<1x1x16x32xf32>
    %134 = vector.shape_cast %133 : vector<1x1x16x32xf32> to vector<16x32xf32>
    %135 = vector.shape_cast %132 : vector<16x32xf32> to vector<1x1x16x32xf32>
    tpu.vector_store %arg9[%c0_39, %c2_40, %c1_41, %c1_42], %135 {strides = array<i32>} : memref<2x4x24x128xf32, #tpu.memory_space<vmem>>, vector<1x1x16x32xf32>,
    %cst_43 = arith.constant 0.000000e+00 : f32
    %136 = vector.broadcast %cst_43 : f32 to vector<24x128xf32>
    %c0_44 = arith.constant 0 : index
    %c3_45 = arith.constant 3 : index
    %c0_46 = arith.constant 0 : index
    %c0_47 = arith.constant 0 : index
    %137 = vector.load %arg9[%c0_44, %c3_45, %c0_46, %c0_47] : memref<2x4x24x128xf32, #tpu.memory_space<vmem>>, vector<1x1x24x128xf32>
    %138 = vector.shape_cast %137 : vector<1x1x24x128xf32> to vector<24x128xf32>
    %139 = vector.shape_cast %136 : vector<24x128xf32> to vector<1x1x24x128xf32>
    tpu.vector_store %arg9[%c0_44, %c3_45, %c0_46, %c0_47], %139 {strides = array<i32>} : memref<2x4x24x128xf32, #tpu.memory_space<vmem>>, vector<1x1x24x128xf32>,
    %c12 = arith.constant 12 : index
    %140 = memref.load %arg2[%c12] : memref<64xf32, #tpu.memory_space<smem>>
    %141 = vector.broadcast %140 : f32 to vector<16x32xf32>
    %142 = arith.mulf %141, %6 : vector<16x32xf32>
    %c13 = arith.constant 13 : index
    %143 = memref.load %arg2[%c13] : memref<64xf32, #tpu.memory_space<smem>>
    %144 = vector.broadcast %143 : f32 to vector<16x32xf32>
    %145 = arith.mulf %144, %6 : vector<16x32xf32>
    %c28 = arith.constant 28 : index
    %146 = memref.load %arg2[%c28] : memref<64xf32, #tpu.memory_space<smem>>
    %147 = vector.broadcast %146 : f32 to vector<16x32xf32>
    %148 = arith.mulf %147, %8 : vector<16x32xf32>
    %149 = arith.addf %142, %148 : vector<16x32xf32>
    %c29 = arith.constant 29 : index
    %150 = memref.load %arg2[%c29] : memref<64xf32, #tpu.memory_space<smem>>
    %151 = vector.broadcast %150 : f32 to vector<16x32xf32>
    %152 = arith.mulf %151, %8 : vector<16x32xf32>
    %153 = arith.addf %145, %152 : vector<16x32xf32>
    %c44 = arith.constant 44 : index
    %154 = memref.load %arg2[%c44] : memref<64xf32, #tpu.memory_space<smem>>
    %155 = vector.broadcast %154 : f32 to vector<16x32xf32>
    %156 = arith.mulf %155, %10 : vector<16x32xf32>
    %157 = arith.addf %149, %156 : vector<16x32xf32>
    %c45 = arith.constant 45 : index
    %158 = memref.load %arg2[%c45] : memref<64xf32, #tpu.memory_space<smem>>
    %159 = vector.broadcast %158 : f32 to vector<16x32xf32>
    %160 = arith.mulf %159, %10 : vector<16x32xf32>
    %161 = arith.addf %153, %160 : vector<16x32xf32>
    %c60 = arith.constant 60 : index
    %162 = memref.load %arg2[%c60] : memref<64xf32, #tpu.memory_space<smem>>
    %163 = vector.broadcast %162 : f32 to vector<16x32xf32>
    %164 = arith.mulf %163, %12 : vector<16x32xf32>
    %165 = arith.addf %157, %164 : vector<16x32xf32>
    %c61 = arith.constant 61 : index
    %166 = memref.load %arg2[%c61] : memref<64xf32, #tpu.memory_space<smem>>
    %167 = vector.broadcast %166 : f32 to vector<16x32xf32>
    %168 = arith.mulf %167, %12 : vector<16x32xf32>
    %169 = arith.addf %161, %168 : vector<16x32xf32>
    %170 = arith.select %4, %165, %169 : vector<16x32xi1>, vector<16x32xf32>
    %c3_48 = arith.constant 3 : index
    %171 = memref.load %arg3[%c3_48] : memref<4xf32, #tpu.memory_space<smem>>
    %172 = vector.broadcast %171 : f32 to vector<16x32xf32>
    %173 = arith.addf %170, %172 : vector<16x32xf32>
    %c0_49 = arith.constant 0 : index
    %c3_50 = arith.constant 3 : index
    %c1_51 = arith.constant 1 : index
    %c1_52 = arith.constant 1 : index
    %174 = vector.load %arg9[%c0_49, %c3_50, %c1_51, %c1_52] : memref<2x4x24x128xf32, #tpu.memory_space<vmem>>, vector<1x1x16x32xf32>
    %175 = vector.shape_cast %174 : vector<1x1x16x32xf32> to vector<16x32xf32>
    %176 = vector.shape_cast %173 : vector<16x32xf32> to vector<1x1x16x32xf32>
    tpu.vector_store %arg9[%c0_49, %c3_50, %c1_51, %c1_52], %176 {strides = array<i32>} : memref<2x4x24x128xf32, #tpu.memory_space<vmem>>, vector<1x1x16x32xf32>,
    %cst_53 = arith.constant 0.000000e+00 : f32
    %177 = vector.broadcast %cst_53 : f32 to vector<24x128xf32>
    %c1_54 = arith.constant 1 : index
    %c0_55 = arith.constant 0 : index
    %c0_56 = arith.constant 0 : index
    %c0_57 = arith.constant 0 : index
    %178 = vector.load %arg9[%c1_54, %c0_55, %c0_56, %c0_57] : memref<2x4x24x128xf32, #tpu.memory_space<vmem>>, vector<1x1x24x128xf32>
    %179 = vector.shape_cast %178 : vector<1x1x24x128xf32> to vector<24x128xf32>
    %180 = vector.shape_cast %177 : vector<24x128xf32> to vector<1x1x24x128xf32>
    tpu.vector_store %arg9[%c1_54, %c0_55, %c0_56, %c0_57], %180 {strides = array<i32>} : memref<2x4x24x128xf32, #tpu.memory_space<vmem>>, vector<1x1x24x128xf32>,
    %c2_58 = arith.constant 2 : index
    %181 = memref.load %arg2[%c2_58] : memref<64xf32, #tpu.memory_space<smem>>
    %182 = vector.broadcast %181 : f32 to vector<16x32xf32>
    %183 = arith.mulf %182, %6 : vector<16x32xf32>
    %c3_59 = arith.constant 3 : index
    %184 = memref.load %arg2[%c3_59] : memref<64xf32, #tpu.memory_space<smem>>
    %185 = vector.broadcast %184 : f32 to vector<16x32xf32>
    %186 = arith.mulf %185, %6 : vector<16x32xf32>
    %c18 = arith.constant 18 : index
    %187 = memref.load %arg2[%c18] : memref<64xf32, #tpu.memory_space<smem>>
    %188 = vector.broadcast %187 : f32 to vector<16x32xf32>
    %189 = arith.mulf %188, %8 : vector<16x32xf32>
    %190 = arith.addf %183, %189 : vector<16x32xf32>
    %c19 = arith.constant 19 : index
    %191 = memref.load %arg2[%c19] : memref<64xf32, #tpu.memory_space<smem>>
    %192 = vector.broadcast %191 : f32 to vector<16x32xf32>
    %193 = arith.mulf %192, %8 : vector<16x32xf32>
    %194 = arith.addf %186, %193 : vector<16x32xf32>
    %c34 = arith.constant 34 : index
    %195 = memref.load %arg2[%c34] : memref<64xf32, #tpu.memory_space<smem>>
    %196 = vector.broadcast %195 : f32 to vector<16x32xf32>
    %197 = arith.mulf %196, %10 : vector<16x32xf32>
    %198 = arith.addf %190, %197 : vector<16x32xf32>
    %c35 = arith.constant 35 : index
    %199 = memref.load %arg2[%c35] : memref<64xf32, #tpu.memory_space<smem>>
    %200 = vector.broadcast %199 : f32 to vector<16x32xf32>
    %201 = arith.mulf %200, %10 : vector<16x32xf32>
    %202 = arith.addf %194, %201 : vector<16x32xf32>
    %c50 = arith.constant 50 : index
    %203 = memref.load %arg2[%c50] : memref<64xf32, #tpu.memory_space<smem>>
    %204 = vector.broadcast %203 : f32 to vector<16x32xf32>
    %205 = arith.mulf %204, %12 : vector<16x32xf32>
    %206 = arith.addf %198, %205 : vector<16x32xf32>
    %c51 = arith.constant 51 : index
    %207 = memref.load %arg2[%c51] : memref<64xf32, #tpu.memory_space<smem>>
    %208 = vector.broadcast %207 : f32 to vector<16x32xf32>
    %209 = arith.mulf %208, %12 : vector<16x32xf32>
    %210 = arith.addf %202, %209 : vector<16x32xf32>
    %211 = arith.select %4, %206, %210 : vector<16x32xi1>, vector<16x32xf32>
    %c0_60 = arith.constant 0 : index
    %212 = memref.load %arg3[%c0_60] : memref<4xf32, #tpu.memory_space<smem>>
    %213 = vector.broadcast %212 : f32 to vector<16x32xf32>
    %214 = arith.addf %211, %213 : vector<16x32xf32>
    %c1_61 = arith.constant 1 : index
    %c0_62 = arith.constant 0 : index
    %c1_63 = arith.constant 1 : index
    %c1_64 = arith.constant 1 : index
    %215 = vector.load %arg9[%c1_61, %c0_62, %c1_63, %c1_64] : memref<2x4x24x128xf32, #tpu.memory_space<vmem>>, vector<1x1x16x32xf32>
    %216 = vector.shape_cast %215 : vector<1x1x16x32xf32> to vector<16x32xf32>
    %217 = vector.shape_cast %214 : vector<16x32xf32> to vector<1x1x16x32xf32>
    tpu.vector_store %arg9[%c1_61, %c0_62, %c1_63, %c1_64], %217 {strides = array<i32>} : memref<2x4x24x128xf32, #tpu.memory_space<vmem>>, vector<1x1x16x32xf32>,
    %cst_65 = arith.constant 0.000000e+00 : f32
    %218 = vector.broadcast %cst_65 : f32 to vector<24x128xf32>
    %c1_66 = arith.constant 1 : index
    %c1_67 = arith.constant 1 : index
    %c0_68 = arith.constant 0 : index
    %c0_69 = arith.constant 0 : index
    %219 = vector.load %arg9[%c1_66, %c1_67, %c0_68, %c0_69] : memref<2x4x24x128xf32, #tpu.memory_space<vmem>>, vector<1x1x24x128xf32>
    %220 = vector.shape_cast %219 : vector<1x1x24x128xf32> to vector<24x128xf32>
    %221 = vector.shape_cast %218 : vector<24x128xf32> to vector<1x1x24x128xf32>
    tpu.vector_store %arg9[%c1_66, %c1_67, %c0_68, %c0_69], %221 {strides = array<i32>} : memref<2x4x24x128xf32, #tpu.memory_space<vmem>>, vector<1x1x24x128xf32>,
    %c6 = arith.constant 6 : index
    %222 = memref.load %arg2[%c6] : memref<64xf32, #tpu.memory_space<smem>>
    %223 = vector.broadcast %222 : f32 to vector<16x32xf32>
    %224 = arith.mulf %223, %6 : vector<16x32xf32>
    %c7 = arith.constant 7 : index
    %225 = memref.load %arg2[%c7] : memref<64xf32, #tpu.memory_space<smem>>
    %226 = vector.broadcast %225 : f32 to vector<16x32xf32>
    %227 = arith.mulf %226, %6 : vector<16x32xf32>
    %c22 = arith.constant 22 : index
    %228 = memref.load %arg2[%c22] : memref<64xf32, #tpu.memory_space<smem>>
    %229 = vector.broadcast %228 : f32 to vector<16x32xf32>
    %230 = arith.mulf %229, %8 : vector<16x32xf32>
    %231 = arith.addf %224, %230 : vector<16x32xf32>
    %c23 = arith.constant 23 : index
    %232 = memref.load %arg2[%c23] : memref<64xf32, #tpu.memory_space<smem>>
    %233 = vector.broadcast %232 : f32 to vector<16x32xf32>
    %234 = arith.mulf %233, %8 : vector<16x32xf32>
    %235 = arith.addf %227, %234 : vector<16x32xf32>
    %c38 = arith.constant 38 : index
    %236 = memref.load %arg2[%c38] : memref<64xf32, #tpu.memory_space<smem>>
    %237 = vector.broadcast %236 : f32 to vector<16x32xf32>
    %238 = arith.mulf %237, %10 : vector<16x32xf32>
    %239 = arith.addf %231, %238 : vector<16x32xf32>
    %c39 = arith.constant 39 : index
    %240 = memref.load %arg2[%c39] : memref<64xf32, #tpu.memory_space<smem>>
    %241 = vector.broadcast %240 : f32 to vector<16x32xf32>
    %242 = arith.mulf %241, %10 : vector<16x32xf32>
    %243 = arith.addf %235, %242 : vector<16x32xf32>
    %c54 = arith.constant 54 : index
    %244 = memref.load %arg2[%c54] : memref<64xf32, #tpu.memory_space<smem>>
    %245 = vector.broadcast %244 : f32 to vector<16x32xf32>
    %246 = arith.mulf %245, %12 : vector<16x32xf32>
    %247 = arith.addf %239, %246 : vector<16x32xf32>
    %c55 = arith.constant 55 : index
    %248 = memref.load %arg2[%c55] : memref<64xf32, #tpu.memory_space<smem>>
    %249 = vector.broadcast %248 : f32 to vector<16x32xf32>
    %250 = arith.mulf %249, %12 : vector<16x32xf32>
    %251 = arith.addf %243, %250 : vector<16x32xf32>
    %252 = arith.select %4, %247, %251 : vector<16x32xi1>, vector<16x32xf32>
    %c1_70 = arith.constant 1 : index
    %253 = memref.load %arg3[%c1_70] : memref<4xf32, #tpu.memory_space<smem>>
    %254 = vector.broadcast %253 : f32 to vector<16x32xf32>
    %255 = arith.addf %252, %254 : vector<16x32xf32>
    %c1_71 = arith.constant 1 : index
    %c1_72 = arith.constant 1 : index
    %c1_73 = arith.constant 1 : index
    %c1_74 = arith.constant 1 : index
    %256 = vector.load %arg9[%c1_71, %c1_72, %c1_73, %c1_74] : memref<2x4x24x128xf32, #tpu.memory_space<vmem>>, vector<1x1x16x32xf32>
    %257 = vector.shape_cast %256 : vector<1x1x16x32xf32> to vector<16x32xf32>
    %258 = vector.shape_cast %255 : vector<16x32xf32> to vector<1x1x16x32xf32>
    tpu.vector_store %arg9[%c1_71, %c1_72, %c1_73, %c1_74], %258 {strides = array<i32>} : memref<2x4x24x128xf32, #tpu.memory_space<vmem>>, vector<1x1x16x32xf32>,
    %cst_75 = arith.constant 0.000000e+00 : f32
    %259 = vector.broadcast %cst_75 : f32 to vector<24x128xf32>
    %c1_76 = arith.constant 1 : index
    %c2_77 = arith.constant 2 : index
    %c0_78 = arith.constant 0 : index
    %c0_79 = arith.constant 0 : index
    %260 = vector.load %arg9[%c1_76, %c2_77, %c0_78, %c0_79] : memref<2x4x24x128xf32, #tpu.memory_space<vmem>>, vector<1x1x24x128xf32>
    %261 = vector.shape_cast %260 : vector<1x1x24x128xf32> to vector<24x128xf32>
    %262 = vector.shape_cast %259 : vector<24x128xf32> to vector<1x1x24x128xf32>
    tpu.vector_store %arg9[%c1_76, %c2_77, %c0_78, %c0_79], %262 {strides = array<i32>} : memref<2x4x24x128xf32, #tpu.memory_space<vmem>>, vector<1x1x24x128xf32>,
    %c10 = arith.constant 10 : index
    %263 = memref.load %arg2[%c10] : memref<64xf32, #tpu.memory_space<smem>>
    %264 = vector.broadcast %263 : f32 to vector<16x32xf32>
    %265 = arith.mulf %264, %6 : vector<16x32xf32>
    %c11 = arith.constant 11 : index
    %266 = memref.load %arg2[%c11] : memref<64xf32, #tpu.memory_space<smem>>
    %267 = vector.broadcast %266 : f32 to vector<16x32xf32>
    %268 = arith.mulf %267, %6 : vector<16x32xf32>
    %c26 = arith.constant 26 : index
    %269 = memref.load %arg2[%c26] : memref<64xf32, #tpu.memory_space<smem>>
    %270 = vector.broadcast %269 : f32 to vector<16x32xf32>
    %271 = arith.mulf %270, %8 : vector<16x32xf32>
    %272 = arith.addf %265, %271 : vector<16x32xf32>
    %c27 = arith.constant 27 : index
    %273 = memref.load %arg2[%c27] : memref<64xf32, #tpu.memory_space<smem>>
    %274 = vector.broadcast %273 : f32 to vector<16x32xf32>
    %275 = arith.mulf %274, %8 : vector<16x32xf32>
    %276 = arith.addf %268, %275 : vector<16x32xf32>
    %c42 = arith.constant 42 : index
    %277 = memref.load %arg2[%c42] : memref<64xf32, #tpu.memory_space<smem>>
    %278 = vector.broadcast %277 : f32 to vector<16x32xf32>
    %279 = arith.mulf %278, %10 : vector<16x32xf32>
    %280 = arith.addf %272, %279 : vector<16x32xf32>
    %c43 = arith.constant 43 : index
    %281 = memref.load %arg2[%c43] : memref<64xf32, #tpu.memory_space<smem>>
    %282 = vector.broadcast %281 : f32 to vector<16x32xf32>
    %283 = arith.mulf %282, %10 : vector<16x32xf32>
    %284 = arith.addf %276, %283 : vector<16x32xf32>
    %c58 = arith.constant 58 : index
    %285 = memref.load %arg2[%c58] : memref<64xf32, #tpu.memory_space<smem>>
    %286 = vector.broadcast %285 : f32 to vector<16x32xf32>
    %287 = arith.mulf %286, %12 : vector<16x32xf32>
    %288 = arith.addf %280, %287 : vector<16x32xf32>
    %c59 = arith.constant 59 : index
    %289 = memref.load %arg2[%c59] : memref<64xf32, #tpu.memory_space<smem>>
    %290 = vector.broadcast %289 : f32 to vector<16x32xf32>
    %291 = arith.mulf %290, %12 : vector<16x32xf32>
    %292 = arith.addf %284, %291 : vector<16x32xf32>
    %293 = arith.select %4, %288, %292 : vector<16x32xi1>, vector<16x32xf32>
    %c2_80 = arith.constant 2 : index
    %294 = memref.load %arg3[%c2_80] : memref<4xf32, #tpu.memory_space<smem>>
    %295 = vector.broadcast %294 : f32 to vector<16x32xf32>
    %296 = arith.addf %293, %295 : vector<16x32xf32>
    %c1_81 = arith.constant 1 : index
    %c2_82 = arith.constant 2 : index
    %c1_83 = arith.constant 1 : index
    %c1_84 = arith.constant 1 : index
    %297 = vector.load %arg9[%c1_81, %c2_82, %c1_83, %c1_84] : memref<2x4x24x128xf32, #tpu.memory_space<vmem>>, vector<1x1x16x32xf32>
    %298 = vector.shape_cast %297 : vector<1x1x16x32xf32> to vector<16x32xf32>
    %299 = vector.shape_cast %296 : vector<16x32xf32> to vector<1x1x16x32xf32>
    tpu.vector_store %arg9[%c1_81, %c2_82, %c1_83, %c1_84], %299 {strides = array<i32>} : memref<2x4x24x128xf32, #tpu.memory_space<vmem>>, vector<1x1x16x32xf32>,
    %cst_85 = arith.constant 0.000000e+00 : f32
    %300 = vector.broadcast %cst_85 : f32 to vector<24x128xf32>
    %c1_86 = arith.constant 1 : index
    %c3_87 = arith.constant 3 : index
    %c0_88 = arith.constant 0 : index
    %c0_89 = arith.constant 0 : index
    %301 = vector.load %arg9[%c1_86, %c3_87, %c0_88, %c0_89] : memref<2x4x24x128xf32, #tpu.memory_space<vmem>>, vector<1x1x24x128xf32>
    %302 = vector.shape_cast %301 : vector<1x1x24x128xf32> to vector<24x128xf32>
    %303 = vector.shape_cast %300 : vector<24x128xf32> to vector<1x1x24x128xf32>
    tpu.vector_store %arg9[%c1_86, %c3_87, %c0_88, %c0_89], %303 {strides = array<i32>} : memref<2x4x24x128xf32, #tpu.memory_space<vmem>>, vector<1x1x24x128xf32>,
    %c14 = arith.constant 14 : index
    %304 = memref.load %arg2[%c14] : memref<64xf32, #tpu.memory_space<smem>>
    %305 = vector.broadcast %304 : f32 to vector<16x32xf32>
    %306 = arith.mulf %305, %6 : vector<16x32xf32>
    %c15 = arith.constant 15 : index
    %307 = memref.load %arg2[%c15] : memref<64xf32, #tpu.memory_space<smem>>
    %308 = vector.broadcast %307 : f32 to vector<16x32xf32>
    %309 = arith.mulf %308, %6 : vector<16x32xf32>
    %c30 = arith.constant 30 : index
    %310 = memref.load %arg2[%c30] : memref<64xf32, #tpu.memory_space<smem>>
    %311 = vector.broadcast %310 : f32 to vector<16x32xf32>
    %312 = arith.mulf %311, %8 : vector<16x32xf32>
    %313 = arith.addf %306, %312 : vector<16x32xf32>
    %c31 = arith.constant 31 : index
    %314 = memref.load %arg2[%c31] : memref<64xf32, #tpu.memory_space<smem>>
    %315 = vector.broadcast %314 : f32 to vector<16x32xf32>
    %316 = arith.mulf %315, %8 : vector<16x32xf32>
    %317 = arith.addf %309, %316 : vector<16x32xf32>
    %c46 = arith.constant 46 : index
    %318 = memref.load %arg2[%c46] : memref<64xf32, #tpu.memory_space<smem>>
    %319 = vector.broadcast %318 : f32 to vector<16x32xf32>
    %320 = arith.mulf %319, %10 : vector<16x32xf32>
    %321 = arith.addf %313, %320 : vector<16x32xf32>
    %c47 = arith.constant 47 : index
    %322 = memref.load %arg2[%c47] : memref<64xf32, #tpu.memory_space<smem>>
    %323 = vector.broadcast %322 : f32 to vector<16x32xf32>
    %324 = arith.mulf %323, %10 : vector<16x32xf32>
    %325 = arith.addf %317, %324 : vector<16x32xf32>
    %c62 = arith.constant 62 : index
    %326 = memref.load %arg2[%c62] : memref<64xf32, #tpu.memory_space<smem>>
    %327 = vector.broadcast %326 : f32 to vector<16x32xf32>
    %328 = arith.mulf %327, %12 : vector<16x32xf32>
    %329 = arith.addf %321, %328 : vector<16x32xf32>
    %c63 = arith.constant 63 : index
    %330 = memref.load %arg2[%c63] : memref<64xf32, #tpu.memory_space<smem>>
    %331 = vector.broadcast %330 : f32 to vector<16x32xf32>
    %332 = arith.mulf %331, %12 : vector<16x32xf32>
    %333 = arith.addf %325, %332 : vector<16x32xf32>
    %334 = arith.select %4, %329, %333 : vector<16x32xi1>, vector<16x32xf32>
    %c3_90 = arith.constant 3 : index
    %335 = memref.load %arg3[%c3_90] : memref<4xf32, #tpu.memory_space<smem>>
    %336 = vector.broadcast %335 : f32 to vector<16x32xf32>
    %337 = arith.addf %334, %336 : vector<16x32xf32>
    %c1_91 = arith.constant 1 : index
    %c3_92 = arith.constant 3 : index
    %c1_93 = arith.constant 1 : index
    %c1_94 = arith.constant 1 : index
    %338 = vector.load %arg9[%c1_91, %c3_92, %c1_93, %c1_94] : memref<2x4x24x128xf32, #tpu.memory_space<vmem>>, vector<1x1x16x32xf32>
    %339 = vector.shape_cast %338 : vector<1x1x16x32xf32> to vector<16x32xf32>
    %340 = vector.shape_cast %337 : vector<16x32xf32> to vector<1x1x16x32xf32>
    tpu.vector_store %arg9[%c1_91, %c3_92, %c1_93, %c1_94], %340 {strides = array<i32>} : memref<2x4x24x128xf32, #tpu.memory_space<vmem>>, vector<1x1x16x32xf32>,
    %cst_95 = arith.constant 0.000000e+00 : f32
    %341 = vector.broadcast %cst_95 : f32 to vector<16x32xf32>
    %c0_96 = arith.constant 0 : index
    %342 = memref.load %arg5[%c0_96] : memref<4xf32, #tpu.memory_space<smem>>
    %343 = vector.broadcast %342 : f32 to vector<16x32xf32>
    %344 = arith.addf %341, %343 : vector<16x32xf32>
    %cst_97 = arith.constant 0.000000e+00 : f32
    %345 = vector.broadcast %cst_97 : f32 to vector<16x32xf32>
    %c1_98 = arith.constant 1 : index
    %346 = memref.load %arg5[%c1_98] : memref<4xf32, #tpu.memory_space<smem>>
    %347 = vector.broadcast %346 : f32 to vector<16x32xf32>
    %348 = arith.addf %345, %347 : vector<16x32xf32>
    %cst_99 = arith.constant 0.000000e+00 : f32
    %349 = vector.broadcast %cst_99 : f32 to vector<16x32xf32>
    %c2_100 = arith.constant 2 : index
    %350 = memref.load %arg5[%c2_100] : memref<4xf32, #tpu.memory_space<smem>>
    %351 = vector.broadcast %350 : f32 to vector<16x32xf32>
    %352 = arith.addf %349, %351 : vector<16x32xf32>
    %cst_101 = arith.constant 0.000000e+00 : f32
    %353 = vector.broadcast %cst_101 : f32 to vector<16x32xf32>
    %c3_102 = arith.constant 3 : index
    %354 = memref.load %arg5[%c3_102] : memref<4xf32, #tpu.memory_space<smem>>
    %355 = vector.broadcast %354 : f32 to vector<16x32xf32>
    %356 = arith.addf %353, %355 : vector<16x32xf32>
    %c1_103 = arith.constant 1 : index
    %c0_104 = arith.constant 0 : index
    %c0_105 = arith.constant 0 : index
    %c0_106 = arith.constant 0 : index
    %357 = vector.load %arg9[%c1_103, %c0_104, %c0_105, %c0_106] : memref<2x4x24x128xf32, #tpu.memory_space<vmem>>, vector<1x1x16x32xf32>
    %358 = vector.shape_cast %357 : vector<1x1x16x32xf32> to vector<16x32xf32>
    %c0_107 = arith.constant 0 : index
    %359 = memref.load %arg4[%c0_107] : memref<144xf32, #tpu.memory_space<smem>>
    %360 = vector.broadcast %359 : f32 to vector<16x32xf32>
    %361 = arith.mulf %360, %358 : vector<16x32xf32>
    %362 = arith.addf %344, %361 : vector<16x32xf32>
    %c36_108 = arith.constant 36 : index
    %363 = memref.load %arg4[%c36_108] : memref<144xf32, #tpu.memory_space<smem>>
    %364 = vector.broadcast %363 : f32 to vector<16x32xf32>
    %365 = arith.mulf %364, %358 : vector<16x32xf32>
    %366 = arith.addf %348, %365 : vector<16x32xf32>
    %c72 = arith.constant 72 : index
    %367 = memref.load %arg4[%c72] : memref<144xf32, #tpu.memory_space<smem>>
    %368 = vector.broadcast %367 : f32 to vector<16x32xf32>
    %369 = arith.mulf %368, %358 : vector<16x32xf32>
    %370 = arith.addf %352, %369 : vector<16x32xf32>
    %c108 = arith.constant 108 : index
    %371 = memref.load %arg4[%c108] : memref<144xf32, #tpu.memory_space<smem>>
    %372 = vector.broadcast %371 : f32 to vector<16x32xf32>
    %373 = arith.mulf %372, %358 : vector<16x32xf32>
    %374 = arith.addf %356, %373 : vector<16x32xf32>
    %c1_109 = arith.constant 1 : index
    %c0_110 = arith.constant 0 : index
    %c0_111 = arith.constant 0 : index
    %c1_112 = arith.constant 1 : index
    %375 = vector.load %arg9[%c1_109, %c0_110, %c0_111, %c1_112] : memref<2x4x24x128xf32, #tpu.memory_space<vmem>>, vector<1x1x16x32xf32>
    %376 = vector.shape_cast %375 : vector<1x1x16x32xf32> to vector<16x32xf32>
    %c1_113 = arith.constant 1 : index
    %377 = memref.load %arg4[%c1_113] : memref<144xf32, #tpu.memory_space<smem>>
    %378 = vector.broadcast %377 : f32 to vector<16x32xf32>
    %379 = arith.mulf %378, %376 : vector<16x32xf32>
    %380 = arith.addf %362, %379 : vector<16x32xf32>
    %c37_114 = arith.constant 37 : index
    %381 = memref.load %arg4[%c37_114] : memref<144xf32, #tpu.memory_space<smem>>
    %382 = vector.broadcast %381 : f32 to vector<16x32xf32>
    %383 = arith.mulf %382, %376 : vector<16x32xf32>
    %384 = arith.addf %366, %383 : vector<16x32xf32>
    %c73 = arith.constant 73 : index
    %385 = memref.load %arg4[%c73] : memref<144xf32, #tpu.memory_space<smem>>
    %386 = vector.broadcast %385 : f32 to vector<16x32xf32>
    %387 = arith.mulf %386, %376 : vector<16x32xf32>
    %388 = arith.addf %370, %387 : vector<16x32xf32>
    %c109 = arith.constant 109 : index
    %389 = memref.load %arg4[%c109] : memref<144xf32, #tpu.memory_space<smem>>
    %390 = vector.broadcast %389 : f32 to vector<16x32xf32>
    %391 = arith.mulf %390, %376 : vector<16x32xf32>
    %392 = arith.addf %374, %391 : vector<16x32xf32>
    %c1_115 = arith.constant 1 : index
    %c0_116 = arith.constant 0 : index
    %c0_117 = arith.constant 0 : index
    %c2_118 = arith.constant 2 : index
    %393 = vector.load %arg9[%c1_115, %c0_116, %c0_117, %c2_118] : memref<2x4x24x128xf32, #tpu.memory_space<vmem>>, vector<1x1x16x32xf32>
    %394 = vector.shape_cast %393 : vector<1x1x16x32xf32> to vector<16x32xf32>
    %c2_119 = arith.constant 2 : index
    %395 = memref.load %arg4[%c2_119] : memref<144xf32, #tpu.memory_space<smem>>
    %396 = vector.broadcast %395 : f32 to vector<16x32xf32>
    %397 = arith.mulf %396, %394 : vector<16x32xf32>
    %398 = arith.addf %380, %397 : vector<16x32xf32>
    %c38_120 = arith.constant 38 : index
    %399 = memref.load %arg4[%c38_120] : memref<144xf32, #tpu.memory_space<smem>>
    %400 = vector.broadcast %399 : f32 to vector<16x32xf32>
    %401 = arith.mulf %400, %394 : vector<16x32xf32>
    %402 = arith.addf %384, %401 : vector<16x32xf32>
    %c74 = arith.constant 74 : index
    %403 = memref.load %arg4[%c74] : memref<144xf32, #tpu.memory_space<smem>>
    %404 = vector.broadcast %403 : f32 to vector<16x32xf32>
    %405 = arith.mulf %404, %394 : vector<16x32xf32>
    %406 = arith.addf %388, %405 : vector<16x32xf32>
    %c110 = arith.constant 110 : index
    %407 = memref.load %arg4[%c110] : memref<144xf32, #tpu.memory_space<smem>>
    %408 = vector.broadcast %407 : f32 to vector<16x32xf32>
    %409 = arith.mulf %408, %394 : vector<16x32xf32>
    %410 = arith.addf %392, %409 : vector<16x32xf32>
    %c0_121 = arith.constant 0 : index
    %c0_122 = arith.constant 0 : index
    %c1_123 = arith.constant 1 : index
    %c0_124 = arith.constant 0 : index
    %411 = vector.load %arg9[%c0_121, %c0_122, %c1_123, %c0_124] : memref<2x4x24x128xf32, #tpu.memory_space<vmem>>, vector<1x1x16x32xf32>
    %412 = vector.shape_cast %411 : vector<1x1x16x32xf32> to vector<16x32xf32>
    %c3_125 = arith.constant 3 : index
    %413 = memref.load %arg4[%c3_125] : memref<144xf32, #tpu.memory_space<smem>>
    %414 = vector.broadcast %413 : f32 to vector<16x32xf32>
    %415 = arith.mulf %414, %412 : vector<16x32xf32>
    %416 = arith.addf %398, %415 : vector<16x32xf32>
    %c39_126 = arith.constant 39 : index
    %417 = memref.load %arg4[%c39_126] : memref<144xf32, #tpu.memory_space<smem>>
    %418 = vector.broadcast %417 : f32 to vector<16x32xf32>
    %419 = arith.mulf %418, %412 : vector<16x32xf32>
    %420 = arith.addf %402, %419 : vector<16x32xf32>
    %c75 = arith.constant 75 : index
    %421 = memref.load %arg4[%c75] : memref<144xf32, #tpu.memory_space<smem>>
    %422 = vector.broadcast %421 : f32 to vector<16x32xf32>
    %423 = arith.mulf %422, %412 : vector<16x32xf32>
    %424 = arith.addf %406, %423 : vector<16x32xf32>
    %c111 = arith.constant 111 : index
    %425 = memref.load %arg4[%c111] : memref<144xf32, #tpu.memory_space<smem>>
    %426 = vector.broadcast %425 : f32 to vector<16x32xf32>
    %427 = arith.mulf %426, %412 : vector<16x32xf32>
    %428 = arith.addf %410, %427 : vector<16x32xf32>
    %c0_127 = arith.constant 0 : index
    %c0_128 = arith.constant 0 : index
    %c1_129 = arith.constant 1 : index
    %c1_130 = arith.constant 1 : index
    %429 = vector.load %arg9[%c0_127, %c0_128, %c1_129, %c1_130] : memref<2x4x24x128xf32, #tpu.memory_space<vmem>>, vector<1x1x16x32xf32>
    %430 = vector.shape_cast %429 : vector<1x1x16x32xf32> to vector<16x32xf32>
    %c4_131 = arith.constant 4 : index
    %431 = memref.load %arg4[%c4_131] : memref<144xf32, #tpu.memory_space<smem>>
    %432 = vector.broadcast %431 : f32 to vector<16x32xf32>
    %433 = arith.mulf %432, %430 : vector<16x32xf32>
    %434 = arith.addf %416, %433 : vector<16x32xf32>
    %c40_132 = arith.constant 40 : index
    %435 = memref.load %arg4[%c40_132] : memref<144xf32, #tpu.memory_space<smem>>
    %436 = vector.broadcast %435 : f32 to vector<16x32xf32>
    %437 = arith.mulf %436, %430 : vector<16x32xf32>
    %438 = arith.addf %420, %437 : vector<16x32xf32>
    %c76 = arith.constant 76 : index
    %439 = memref.load %arg4[%c76] : memref<144xf32, #tpu.memory_space<smem>>
    %440 = vector.broadcast %439 : f32 to vector<16x32xf32>
    %441 = arith.mulf %440, %430 : vector<16x32xf32>
    %442 = arith.addf %424, %441 : vector<16x32xf32>
    %c112 = arith.constant 112 : index
    %443 = memref.load %arg4[%c112] : memref<144xf32, #tpu.memory_space<smem>>
    %444 = vector.broadcast %443 : f32 to vector<16x32xf32>
    %445 = arith.mulf %444, %430 : vector<16x32xf32>
    %446 = arith.addf %428, %445 : vector<16x32xf32>
    %c0_133 = arith.constant 0 : index
    %c0_134 = arith.constant 0 : index
    %c1_135 = arith.constant 1 : index
    %c2_136 = arith.constant 2 : index
    %447 = vector.load %arg9[%c0_133, %c0_134, %c1_135, %c2_136] : memref<2x4x24x128xf32, #tpu.memory_space<vmem>>, vector<1x1x16x32xf32>
    %448 = vector.shape_cast %447 : vector<1x1x16x32xf32> to vector<16x32xf32>
    %c5_137 = arith.constant 5 : index
    %449 = memref.load %arg4[%c5_137] : memref<144xf32, #tpu.memory_space<smem>>
    %450 = vector.broadcast %449 : f32 to vector<16x32xf32>
    %451 = arith.mulf %450, %448 : vector<16x32xf32>
    %452 = arith.addf %434, %451 : vector<16x32xf32>
    %c41_138 = arith.constant 41 : index
    %453 = memref.load %arg4[%c41_138] : memref<144xf32, #tpu.memory_space<smem>>
    %454 = vector.broadcast %453 : f32 to vector<16x32xf32>
    %455 = arith.mulf %454, %448 : vector<16x32xf32>
    %456 = arith.addf %438, %455 : vector<16x32xf32>
    %c77 = arith.constant 77 : index
    %457 = memref.load %arg4[%c77] : memref<144xf32, #tpu.memory_space<smem>>
    %458 = vector.broadcast %457 : f32 to vector<16x32xf32>
    %459 = arith.mulf %458, %448 : vector<16x32xf32>
    %460 = arith.addf %442, %459 : vector<16x32xf32>
    %c113 = arith.constant 113 : index
    %461 = memref.load %arg4[%c113] : memref<144xf32, #tpu.memory_space<smem>>
    %462 = vector.broadcast %461 : f32 to vector<16x32xf32>
    %463 = arith.mulf %462, %448 : vector<16x32xf32>
    %464 = arith.addf %446, %463 : vector<16x32xf32>
    %c1_139 = arith.constant 1 : index
    %c0_140 = arith.constant 0 : index
    %c1_141 = arith.constant 1 : index
    %c0_142 = arith.constant 0 : index
    %465 = vector.load %arg9[%c1_139, %c0_140, %c1_141, %c0_142] : memref<2x4x24x128xf32, #tpu.memory_space<vmem>>, vector<1x1x16x32xf32>
    %466 = vector.shape_cast %465 : vector<1x1x16x32xf32> to vector<16x32xf32>
    %c6_143 = arith.constant 6 : index
    %467 = memref.load %arg4[%c6_143] : memref<144xf32, #tpu.memory_space<smem>>
    %468 = vector.broadcast %467 : f32 to vector<16x32xf32>
    %469 = arith.mulf %468, %466 : vector<16x32xf32>
    %470 = arith.addf %452, %469 : vector<16x32xf32>
    %c42_144 = arith.constant 42 : index
    %471 = memref.load %arg4[%c42_144] : memref<144xf32, #tpu.memory_space<smem>>
    %472 = vector.broadcast %471 : f32 to vector<16x32xf32>
    %473 = arith.mulf %472, %466 : vector<16x32xf32>
    %474 = arith.addf %456, %473 : vector<16x32xf32>
    %c78 = arith.constant 78 : index
    %475 = memref.load %arg4[%c78] : memref<144xf32, #tpu.memory_space<smem>>
    %476 = vector.broadcast %475 : f32 to vector<16x32xf32>
    %477 = arith.mulf %476, %466 : vector<16x32xf32>
    %478 = arith.addf %460, %477 : vector<16x32xf32>
    %c114 = arith.constant 114 : index
    %479 = memref.load %arg4[%c114] : memref<144xf32, #tpu.memory_space<smem>>
    %480 = vector.broadcast %479 : f32 to vector<16x32xf32>
    %481 = arith.mulf %480, %466 : vector<16x32xf32>
    %482 = arith.addf %464, %481 : vector<16x32xf32>
    %c1_145 = arith.constant 1 : index
    %c0_146 = arith.constant 0 : index
    %c1_147 = arith.constant 1 : index
    %c1_148 = arith.constant 1 : index
    %483 = vector.load %arg9[%c1_145, %c0_146, %c1_147, %c1_148] : memref<2x4x24x128xf32, #tpu.memory_space<vmem>>, vector<1x1x16x32xf32>
    %484 = vector.shape_cast %483 : vector<1x1x16x32xf32> to vector<16x32xf32>
    %c7_149 = arith.constant 7 : index
    %485 = memref.load %arg4[%c7_149] : memref<144xf32, #tpu.memory_space<smem>>
    %486 = vector.broadcast %485 : f32 to vector<16x32xf32>
    %487 = arith.mulf %486, %484 : vector<16x32xf32>
    %488 = arith.addf %470, %487 : vector<16x32xf32>
    %c43_150 = arith.constant 43 : index
    %489 = memref.load %arg4[%c43_150] : memref<144xf32, #tpu.memory_space<smem>>
    %490 = vector.broadcast %489 : f32 to vector<16x32xf32>
    %491 = arith.mulf %490, %484 : vector<16x32xf32>
    %492 = arith.addf %474, %491 : vector<16x32xf32>
    %c79 = arith.constant 79 : index
    %493 = memref.load %arg4[%c79] : memref<144xf32, #tpu.memory_space<smem>>
    %494 = vector.broadcast %493 : f32 to vector<16x32xf32>
    %495 = arith.mulf %494, %484 : vector<16x32xf32>
    %496 = arith.addf %478, %495 : vector<16x32xf32>
    %c115 = arith.constant 115 : index
    %497 = memref.load %arg4[%c115] : memref<144xf32, #tpu.memory_space<smem>>
    %498 = vector.broadcast %497 : f32 to vector<16x32xf32>
    %499 = arith.mulf %498, %484 : vector<16x32xf32>
    %500 = arith.addf %482, %499 : vector<16x32xf32>
    %c1_151 = arith.constant 1 : index
    %c0_152 = arith.constant 0 : index
    %c1_153 = arith.constant 1 : index
    %c2_154 = arith.constant 2 : index
    %501 = vector.load %arg9[%c1_151, %c0_152, %c1_153, %c2_154] : memref<2x4x24x128xf32, #tpu.memory_space<vmem>>, vector<1x1x16x32xf32>
    %502 = vector.shape_cast %501 : vector<1x1x16x32xf32> to vector<16x32xf32>
    %c8_155 = arith.constant 8 : index
    %503 = memref.load %arg4[%c8_155] : memref<144xf32, #tpu.memory_space<smem>>
    %504 = vector.broadcast %503 : f32 to vector<16x32xf32>
    %505 = arith.mulf %504, %502 : vector<16x32xf32>
    %506 = arith.addf %488, %505 : vector<16x32xf32>
    %c44_156 = arith.constant 44 : index
    %507 = memref.load %arg4[%c44_156] : memref<144xf32, #tpu.memory_space<smem>>
    %508 = vector.broadcast %507 : f32 to vector<16x32xf32>
    %509 = arith.mulf %508, %502 : vector<16x32xf32>
    %510 = arith.addf %492, %509 : vector<16x32xf32>
    %c80 = arith.constant 80 : index
    %511 = memref.load %arg4[%c80] : memref<144xf32, #tpu.memory_space<smem>>
    %512 = vector.broadcast %511 : f32 to vector<16x32xf32>
    %513 = arith.mulf %512, %502 : vector<16x32xf32>
    %514 = arith.addf %496, %513 : vector<16x32xf32>
    %c116 = arith.constant 116 : index
    %515 = memref.load %arg4[%c116] : memref<144xf32, #tpu.memory_space<smem>>
    %516 = vector.broadcast %515 : f32 to vector<16x32xf32>
    %517 = arith.mulf %516, %502 : vector<16x32xf32>
    %518 = arith.addf %500, %517 : vector<16x32xf32>
    %c1_157 = arith.constant 1 : index
    %c1_158 = arith.constant 1 : index
    %c0_159 = arith.constant 0 : index
    %c0_160 = arith.constant 0 : index
    %519 = vector.load %arg9[%c1_157, %c1_158, %c0_159, %c0_160] : memref<2x4x24x128xf32, #tpu.memory_space<vmem>>, vector<1x1x16x32xf32>
    %520 = vector.shape_cast %519 : vector<1x1x16x32xf32> to vector<16x32xf32>
    %c9_161 = arith.constant 9 : index
    %521 = memref.load %arg4[%c9_161] : memref<144xf32, #tpu.memory_space<smem>>
    %522 = vector.broadcast %521 : f32 to vector<16x32xf32>
    %523 = arith.mulf %522, %520 : vector<16x32xf32>
    %524 = arith.addf %506, %523 : vector<16x32xf32>
    %c45_162 = arith.constant 45 : index
    %525 = memref.load %arg4[%c45_162] : memref<144xf32, #tpu.memory_space<smem>>
    %526 = vector.broadcast %525 : f32 to vector<16x32xf32>
    %527 = arith.mulf %526, %520 : vector<16x32xf32>
    %528 = arith.addf %510, %527 : vector<16x32xf32>
    %c81 = arith.constant 81 : index
    %529 = memref.load %arg4[%c81] : memref<144xf32, #tpu.memory_space<smem>>
    %530 = vector.broadcast %529 : f32 to vector<16x32xf32>
    %531 = arith.mulf %530, %520 : vector<16x32xf32>
    %532 = arith.addf %514, %531 : vector<16x32xf32>
    %c117 = arith.constant 117 : index
    %533 = memref.load %arg4[%c117] : memref<144xf32, #tpu.memory_space<smem>>
    %534 = vector.broadcast %533 : f32 to vector<16x32xf32>
    %535 = arith.mulf %534, %520 : vector<16x32xf32>
    %536 = arith.addf %518, %535 : vector<16x32xf32>
    %c1_163 = arith.constant 1 : index
    %c1_164 = arith.constant 1 : index
    %c0_165 = arith.constant 0 : index
    %c1_166 = arith.constant 1 : index
    %537 = vector.load %arg9[%c1_163, %c1_164, %c0_165, %c1_166] : memref<2x4x24x128xf32, #tpu.memory_space<vmem>>, vector<1x1x16x32xf32>
    %538 = vector.shape_cast %537 : vector<1x1x16x32xf32> to vector<16x32xf32>
    %c10_167 = arith.constant 10 : index
    %539 = memref.load %arg4[%c10_167] : memref<144xf32, #tpu.memory_space<smem>>
    %540 = vector.broadcast %539 : f32 to vector<16x32xf32>
    %541 = arith.mulf %540, %538 : vector<16x32xf32>
    %542 = arith.addf %524, %541 : vector<16x32xf32>
    %c46_168 = arith.constant 46 : index
    %543 = memref.load %arg4[%c46_168] : memref<144xf32, #tpu.memory_space<smem>>
    %544 = vector.broadcast %543 : f32 to vector<16x32xf32>
    %545 = arith.mulf %544, %538 : vector<16x32xf32>
    %546 = arith.addf %528, %545 : vector<16x32xf32>
    %c82 = arith.constant 82 : index
    %547 = memref.load %arg4[%c82] : memref<144xf32, #tpu.memory_space<smem>>
    %548 = vector.broadcast %547 : f32 to vector<16x32xf32>
    %549 = arith.mulf %548, %538 : vector<16x32xf32>
    %550 = arith.addf %532, %549 : vector<16x32xf32>
    %c118 = arith.constant 118 : index
    %551 = memref.load %arg4[%c118] : memref<144xf32, #tpu.memory_space<smem>>
    %552 = vector.broadcast %551 : f32 to vector<16x32xf32>
    %553 = arith.mulf %552, %538 : vector<16x32xf32>
    %554 = arith.addf %536, %553 : vector<16x32xf32>
    %c1_169 = arith.constant 1 : index
    %c1_170 = arith.constant 1 : index
    %c0_171 = arith.constant 0 : index
    %c2_172 = arith.constant 2 : index
    %555 = vector.load %arg9[%c1_169, %c1_170, %c0_171, %c2_172] : memref<2x4x24x128xf32, #tpu.memory_space<vmem>>, vector<1x1x16x32xf32>
    %556 = vector.shape_cast %555 : vector<1x1x16x32xf32> to vector<16x32xf32>
    %c11_173 = arith.constant 11 : index
    %557 = memref.load %arg4[%c11_173] : memref<144xf32, #tpu.memory_space<smem>>
    %558 = vector.broadcast %557 : f32 to vector<16x32xf32>
    %559 = arith.mulf %558, %556 : vector<16x32xf32>
    %560 = arith.addf %542, %559 : vector<16x32xf32>
    %c47_174 = arith.constant 47 : index
    %561 = memref.load %arg4[%c47_174] : memref<144xf32, #tpu.memory_space<smem>>
    %562 = vector.broadcast %561 : f32 to vector<16x32xf32>
    %563 = arith.mulf %562, %556 : vector<16x32xf32>
    %564 = arith.addf %546, %563 : vector<16x32xf32>
    %c83 = arith.constant 83 : index
    %565 = memref.load %arg4[%c83] : memref<144xf32, #tpu.memory_space<smem>>
    %566 = vector.broadcast %565 : f32 to vector<16x32xf32>
    %567 = arith.mulf %566, %556 : vector<16x32xf32>
    %568 = arith.addf %550, %567 : vector<16x32xf32>
    %c119 = arith.constant 119 : index
    %569 = memref.load %arg4[%c119] : memref<144xf32, #tpu.memory_space<smem>>
    %570 = vector.broadcast %569 : f32 to vector<16x32xf32>
    %571 = arith.mulf %570, %556 : vector<16x32xf32>
    %572 = arith.addf %554, %571 : vector<16x32xf32>
    %c0_175 = arith.constant 0 : index
    %c1_176 = arith.constant 1 : index
    %c1_177 = arith.constant 1 : index
    %c0_178 = arith.constant 0 : index
    %573 = vector.load %arg9[%c0_175, %c1_176, %c1_177, %c0_178] : memref<2x4x24x128xf32, #tpu.memory_space<vmem>>, vector<1x1x16x32xf32>
    %574 = vector.shape_cast %573 : vector<1x1x16x32xf32> to vector<16x32xf32>
    %c12_179 = arith.constant 12 : index
    %575 = memref.load %arg4[%c12_179] : memref<144xf32, #tpu.memory_space<smem>>
    %576 = vector.broadcast %575 : f32 to vector<16x32xf32>
    %577 = arith.mulf %576, %574 : vector<16x32xf32>
    %578 = arith.addf %560, %577 : vector<16x32xf32>
    %c48_180 = arith.constant 48 : index
    %579 = memref.load %arg4[%c48_180] : memref<144xf32, #tpu.memory_space<smem>>
    %580 = vector.broadcast %579 : f32 to vector<16x32xf32>
    %581 = arith.mulf %580, %574 : vector<16x32xf32>
    %582 = arith.addf %564, %581 : vector<16x32xf32>
    %c84 = arith.constant 84 : index
    %583 = memref.load %arg4[%c84] : memref<144xf32, #tpu.memory_space<smem>>
    %584 = vector.broadcast %583 : f32 to vector<16x32xf32>
    %585 = arith.mulf %584, %574 : vector<16x32xf32>
    %586 = arith.addf %568, %585 : vector<16x32xf32>
    %c120 = arith.constant 120 : index
    %587 = memref.load %arg4[%c120] : memref<144xf32, #tpu.memory_space<smem>>
    %588 = vector.broadcast %587 : f32 to vector<16x32xf32>
    %589 = arith.mulf %588, %574 : vector<16x32xf32>
    %590 = arith.addf %572, %589 : vector<16x32xf32>
    %c0_181 = arith.constant 0 : index
    %c1_182 = arith.constant 1 : index
    %c1_183 = arith.constant 1 : index
    %c1_184 = arith.constant 1 : index
    %591 = vector.load %arg9[%c0_181, %c1_182, %c1_183, %c1_184] : memref<2x4x24x128xf32, #tpu.memory_space<vmem>>, vector<1x1x16x32xf32>
    %592 = vector.shape_cast %591 : vector<1x1x16x32xf32> to vector<16x32xf32>
    %c13_185 = arith.constant 13 : index
    %593 = memref.load %arg4[%c13_185] : memref<144xf32, #tpu.memory_space<smem>>
    %594 = vector.broadcast %593 : f32 to vector<16x32xf32>
    %595 = arith.mulf %594, %592 : vector<16x32xf32>
    %596 = arith.addf %578, %595 : vector<16x32xf32>
    %c49_186 = arith.constant 49 : index
    %597 = memref.load %arg4[%c49_186] : memref<144xf32, #tpu.memory_space<smem>>
    %598 = vector.broadcast %597 : f32 to vector<16x32xf32>
    %599 = arith.mulf %598, %592 : vector<16x32xf32>
    %600 = arith.addf %582, %599 : vector<16x32xf32>
    %c85 = arith.constant 85 : index
    %601 = memref.load %arg4[%c85] : memref<144xf32, #tpu.memory_space<smem>>
    %602 = vector.broadcast %601 : f32 to vector<16x32xf32>
    %603 = arith.mulf %602, %592 : vector<16x32xf32>
    %604 = arith.addf %586, %603 : vector<16x32xf32>
    %c121 = arith.constant 121 : index
    %605 = memref.load %arg4[%c121] : memref<144xf32, #tpu.memory_space<smem>>
    %606 = vector.broadcast %605 : f32 to vector<16x32xf32>
    %607 = arith.mulf %606, %592 : vector<16x32xf32>
    %608 = arith.addf %590, %607 : vector<16x32xf32>
    %c0_187 = arith.constant 0 : index
    %c1_188 = arith.constant 1 : index
    %c1_189 = arith.constant 1 : index
    %c2_190 = arith.constant 2 : index
    %609 = vector.load %arg9[%c0_187, %c1_188, %c1_189, %c2_190] : memref<2x4x24x128xf32, #tpu.memory_space<vmem>>, vector<1x1x16x32xf32>
    %610 = vector.shape_cast %609 : vector<1x1x16x32xf32> to vector<16x32xf32>
    %c14_191 = arith.constant 14 : index
    %611 = memref.load %arg4[%c14_191] : memref<144xf32, #tpu.memory_space<smem>>
    %612 = vector.broadcast %611 : f32 to vector<16x32xf32>
    %613 = arith.mulf %612, %610 : vector<16x32xf32>
    %614 = arith.addf %596, %613 : vector<16x32xf32>
    %c50_192 = arith.constant 50 : index
    %615 = memref.load %arg4[%c50_192] : memref<144xf32, #tpu.memory_space<smem>>
    %616 = vector.broadcast %615 : f32 to vector<16x32xf32>
    %617 = arith.mulf %616, %610 : vector<16x32xf32>
    %618 = arith.addf %600, %617 : vector<16x32xf32>
    %c86 = arith.constant 86 : index
    %619 = memref.load %arg4[%c86] : memref<144xf32, #tpu.memory_space<smem>>
    %620 = vector.broadcast %619 : f32 to vector<16x32xf32>
    %621 = arith.mulf %620, %610 : vector<16x32xf32>
    %622 = arith.addf %604, %621 : vector<16x32xf32>
    %c122 = arith.constant 122 : index
    %623 = memref.load %arg4[%c122] : memref<144xf32, #tpu.memory_space<smem>>
    %624 = vector.broadcast %623 : f32 to vector<16x32xf32>
    %625 = arith.mulf %624, %610 : vector<16x32xf32>
    %626 = arith.addf %608, %625 : vector<16x32xf32>
    %c1_193 = arith.constant 1 : index
    %c1_194 = arith.constant 1 : index
    %c1_195 = arith.constant 1 : index
    %c0_196 = arith.constant 0 : index
    %627 = vector.load %arg9[%c1_193, %c1_194, %c1_195, %c0_196] : memref<2x4x24x128xf32, #tpu.memory_space<vmem>>, vector<1x1x16x32xf32>
    %628 = vector.shape_cast %627 : vector<1x1x16x32xf32> to vector<16x32xf32>
    %c15_197 = arith.constant 15 : index
    %629 = memref.load %arg4[%c15_197] : memref<144xf32, #tpu.memory_space<smem>>
    %630 = vector.broadcast %629 : f32 to vector<16x32xf32>
    %631 = arith.mulf %630, %628 : vector<16x32xf32>
    %632 = arith.addf %614, %631 : vector<16x32xf32>
    %c51_198 = arith.constant 51 : index
    %633 = memref.load %arg4[%c51_198] : memref<144xf32, #tpu.memory_space<smem>>
    %634 = vector.broadcast %633 : f32 to vector<16x32xf32>
    %635 = arith.mulf %634, %628 : vector<16x32xf32>
    %636 = arith.addf %618, %635 : vector<16x32xf32>
    %c87 = arith.constant 87 : index
    %637 = memref.load %arg4[%c87] : memref<144xf32, #tpu.memory_space<smem>>
    %638 = vector.broadcast %637 : f32 to vector<16x32xf32>
    %639 = arith.mulf %638, %628 : vector<16x32xf32>
    %640 = arith.addf %622, %639 : vector<16x32xf32>
    %c123 = arith.constant 123 : index
    %641 = memref.load %arg4[%c123] : memref<144xf32, #tpu.memory_space<smem>>
    %642 = vector.broadcast %641 : f32 to vector<16x32xf32>
    %643 = arith.mulf %642, %628 : vector<16x32xf32>
    %644 = arith.addf %626, %643 : vector<16x32xf32>
    %c1_199 = arith.constant 1 : index
    %c1_200 = arith.constant 1 : index
    %c1_201 = arith.constant 1 : index
    %c1_202 = arith.constant 1 : index
    %645 = vector.load %arg9[%c1_199, %c1_200, %c1_201, %c1_202] : memref<2x4x24x128xf32, #tpu.memory_space<vmem>>, vector<1x1x16x32xf32>
    %646 = vector.shape_cast %645 : vector<1x1x16x32xf32> to vector<16x32xf32>
    %c16_203 = arith.constant 16 : index
    %647 = memref.load %arg4[%c16_203] : memref<144xf32, #tpu.memory_space<smem>>
    %648 = vector.broadcast %647 : f32 to vector<16x32xf32>
    %649 = arith.mulf %648, %646 : vector<16x32xf32>
    %650 = arith.addf %632, %649 : vector<16x32xf32>
    %c52_204 = arith.constant 52 : index
    %651 = memref.load %arg4[%c52_204] : memref<144xf32, #tpu.memory_space<smem>>
    %652 = vector.broadcast %651 : f32 to vector<16x32xf32>
    %653 = arith.mulf %652, %646 : vector<16x32xf32>
    %654 = arith.addf %636, %653 : vector<16x32xf32>
    %c88 = arith.constant 88 : index
    %655 = memref.load %arg4[%c88] : memref<144xf32, #tpu.memory_space<smem>>
    %656 = vector.broadcast %655 : f32 to vector<16x32xf32>
    %657 = arith.mulf %656, %646 : vector<16x32xf32>
    %658 = arith.addf %640, %657 : vector<16x32xf32>
    %c124 = arith.constant 124 : index
    %659 = memref.load %arg4[%c124] : memref<144xf32, #tpu.memory_space<smem>>
    %660 = vector.broadcast %659 : f32 to vector<16x32xf32>
    %661 = arith.mulf %660, %646 : vector<16x32xf32>
    %662 = arith.addf %644, %661 : vector<16x32xf32>
    %c1_205 = arith.constant 1 : index
    %c1_206 = arith.constant 1 : index
    %c1_207 = arith.constant 1 : index
    %c2_208 = arith.constant 2 : index
    %663 = vector.load %arg9[%c1_205, %c1_206, %c1_207, %c2_208] : memref<2x4x24x128xf32, #tpu.memory_space<vmem>>, vector<1x1x16x32xf32>
    %664 = vector.shape_cast %663 : vector<1x1x16x32xf32> to vector<16x32xf32>
    %c17_209 = arith.constant 17 : index
    %665 = memref.load %arg4[%c17_209] : memref<144xf32, #tpu.memory_space<smem>>
    %666 = vector.broadcast %665 : f32 to vector<16x32xf32>
    %667 = arith.mulf %666, %664 : vector<16x32xf32>
    %668 = arith.addf %650, %667 : vector<16x32xf32>
    %c53_210 = arith.constant 53 : index
    %669 = memref.load %arg4[%c53_210] : memref<144xf32, #tpu.memory_space<smem>>
    %670 = vector.broadcast %669 : f32 to vector<16x32xf32>
    %671 = arith.mulf %670, %664 : vector<16x32xf32>
    %672 = arith.addf %654, %671 : vector<16x32xf32>
    %c89 = arith.constant 89 : index
    %673 = memref.load %arg4[%c89] : memref<144xf32, #tpu.memory_space<smem>>
    %674 = vector.broadcast %673 : f32 to vector<16x32xf32>
    %675 = arith.mulf %674, %664 : vector<16x32xf32>
    %676 = arith.addf %658, %675 : vector<16x32xf32>
    %c125 = arith.constant 125 : index
    %677 = memref.load %arg4[%c125] : memref<144xf32, #tpu.memory_space<smem>>
    %678 = vector.broadcast %677 : f32 to vector<16x32xf32>
    %679 = arith.mulf %678, %664 : vector<16x32xf32>
    %680 = arith.addf %662, %679 : vector<16x32xf32>
    %c1_211 = arith.constant 1 : index
    %c2_212 = arith.constant 2 : index
    %c0_213 = arith.constant 0 : index
    %c0_214 = arith.constant 0 : index
    %681 = vector.load %arg9[%c1_211, %c2_212, %c0_213, %c0_214] : memref<2x4x24x128xf32, #tpu.memory_space<vmem>>, vector<1x1x16x32xf32>
    %682 = vector.shape_cast %681 : vector<1x1x16x32xf32> to vector<16x32xf32>
    %c18_215 = arith.constant 18 : index
    %683 = memref.load %arg4[%c18_215] : memref<144xf32, #tpu.memory_space<smem>>
    %684 = vector.broadcast %683 : f32 to vector<16x32xf32>
    %685 = arith.mulf %684, %682 : vector<16x32xf32>
    %686 = arith.addf %668, %685 : vector<16x32xf32>
    %c54_216 = arith.constant 54 : index
    %687 = memref.load %arg4[%c54_216] : memref<144xf32, #tpu.memory_space<smem>>
    %688 = vector.broadcast %687 : f32 to vector<16x32xf32>
    %689 = arith.mulf %688, %682 : vector<16x32xf32>
    %690 = arith.addf %672, %689 : vector<16x32xf32>
    %c90 = arith.constant 90 : index
    %691 = memref.load %arg4[%c90] : memref<144xf32, #tpu.memory_space<smem>>
    %692 = vector.broadcast %691 : f32 to vector<16x32xf32>
    %693 = arith.mulf %692, %682 : vector<16x32xf32>
    %694 = arith.addf %676, %693 : vector<16x32xf32>
    %c126 = arith.constant 126 : index
    %695 = memref.load %arg4[%c126] : memref<144xf32, #tpu.memory_space<smem>>
    %696 = vector.broadcast %695 : f32 to vector<16x32xf32>
    %697 = arith.mulf %696, %682 : vector<16x32xf32>
    %698 = arith.addf %680, %697 : vector<16x32xf32>
    %c1_217 = arith.constant 1 : index
    %c2_218 = arith.constant 2 : index
    %c0_219 = arith.constant 0 : index
    %c1_220 = arith.constant 1 : index
    %699 = vector.load %arg9[%c1_217, %c2_218, %c0_219, %c1_220] : memref<2x4x24x128xf32, #tpu.memory_space<vmem>>, vector<1x1x16x32xf32>
    %700 = vector.shape_cast %699 : vector<1x1x16x32xf32> to vector<16x32xf32>
    %c19_221 = arith.constant 19 : index
    %701 = memref.load %arg4[%c19_221] : memref<144xf32, #tpu.memory_space<smem>>
    %702 = vector.broadcast %701 : f32 to vector<16x32xf32>
    %703 = arith.mulf %702, %700 : vector<16x32xf32>
    %704 = arith.addf %686, %703 : vector<16x32xf32>
    %c55_222 = arith.constant 55 : index
    %705 = memref.load %arg4[%c55_222] : memref<144xf32, #tpu.memory_space<smem>>
    %706 = vector.broadcast %705 : f32 to vector<16x32xf32>
    %707 = arith.mulf %706, %700 : vector<16x32xf32>
    %708 = arith.addf %690, %707 : vector<16x32xf32>
    %c91 = arith.constant 91 : index
    %709 = memref.load %arg4[%c91] : memref<144xf32, #tpu.memory_space<smem>>
    %710 = vector.broadcast %709 : f32 to vector<16x32xf32>
    %711 = arith.mulf %710, %700 : vector<16x32xf32>
    %712 = arith.addf %694, %711 : vector<16x32xf32>
    %c127 = arith.constant 127 : index
    %713 = memref.load %arg4[%c127] : memref<144xf32, #tpu.memory_space<smem>>
    %714 = vector.broadcast %713 : f32 to vector<16x32xf32>
    %715 = arith.mulf %714, %700 : vector<16x32xf32>
    %716 = arith.addf %698, %715 : vector<16x32xf32>
    %c1_223 = arith.constant 1 : index
    %c2_224 = arith.constant 2 : index
    %c0_225 = arith.constant 0 : index
    %c2_226 = arith.constant 2 : index
    %717 = vector.load %arg9[%c1_223, %c2_224, %c0_225, %c2_226] : memref<2x4x24x128xf32, #tpu.memory_space<vmem>>, vector<1x1x16x32xf32>
    %718 = vector.shape_cast %717 : vector<1x1x16x32xf32> to vector<16x32xf32>
    %c20_227 = arith.constant 20 : index
    %719 = memref.load %arg4[%c20_227] : memref<144xf32, #tpu.memory_space<smem>>
    %720 = vector.broadcast %719 : f32 to vector<16x32xf32>
    %721 = arith.mulf %720, %718 : vector<16x32xf32>
    %722 = arith.addf %704, %721 : vector<16x32xf32>
    %c56_228 = arith.constant 56 : index
    %723 = memref.load %arg4[%c56_228] : memref<144xf32, #tpu.memory_space<smem>>
    %724 = vector.broadcast %723 : f32 to vector<16x32xf32>
    %725 = arith.mulf %724, %718 : vector<16x32xf32>
    %726 = arith.addf %708, %725 : vector<16x32xf32>
    %c92 = arith.constant 92 : index
    %727 = memref.load %arg4[%c92] : memref<144xf32, #tpu.memory_space<smem>>
    %728 = vector.broadcast %727 : f32 to vector<16x32xf32>
    %729 = arith.mulf %728, %718 : vector<16x32xf32>
    %730 = arith.addf %712, %729 : vector<16x32xf32>
    %c128 = arith.constant 128 : index
    %731 = memref.load %arg4[%c128] : memref<144xf32, #tpu.memory_space<smem>>
    %732 = vector.broadcast %731 : f32 to vector<16x32xf32>
    %733 = arith.mulf %732, %718 : vector<16x32xf32>
    %734 = arith.addf %716, %733 : vector<16x32xf32>
    %c0_229 = arith.constant 0 : index
    %c2_230 = arith.constant 2 : index
    %c1_231 = arith.constant 1 : index
    %c0_232 = arith.constant 0 : index
    %735 = vector.load %arg9[%c0_229, %c2_230, %c1_231, %c0_232] : memref<2x4x24x128xf32, #tpu.memory_space<vmem>>, vector<1x1x16x32xf32>
    %736 = vector.shape_cast %735 : vector<1x1x16x32xf32> to vector<16x32xf32>
    %c21_233 = arith.constant 21 : index
    %737 = memref.load %arg4[%c21_233] : memref<144xf32, #tpu.memory_space<smem>>
    %738 = vector.broadcast %737 : f32 to vector<16x32xf32>
    %739 = arith.mulf %738, %736 : vector<16x32xf32>
    %740 = arith.addf %722, %739 : vector<16x32xf32>
    %c57_234 = arith.constant 57 : index
    %741 = memref.load %arg4[%c57_234] : memref<144xf32, #tpu.memory_space<smem>>
    %742 = vector.broadcast %741 : f32 to vector<16x32xf32>
    %743 = arith.mulf %742, %736 : vector<16x32xf32>
    %744 = arith.addf %726, %743 : vector<16x32xf32>
    %c93 = arith.constant 93 : index
    %745 = memref.load %arg4[%c93] : memref<144xf32, #tpu.memory_space<smem>>
    %746 = vector.broadcast %745 : f32 to vector<16x32xf32>
    %747 = arith.mulf %746, %736 : vector<16x32xf32>
    %748 = arith.addf %730, %747 : vector<16x32xf32>
    %c129 = arith.constant 129 : index
    %749 = memref.load %arg4[%c129] : memref<144xf32, #tpu.memory_space<smem>>
    %750 = vector.broadcast %749 : f32 to vector<16x32xf32>
    %751 = arith.mulf %750, %736 : vector<16x32xf32>
    %752 = arith.addf %734, %751 : vector<16x32xf32>
    %c0_235 = arith.constant 0 : index
    %c2_236 = arith.constant 2 : index
    %c1_237 = arith.constant 1 : index
    %c1_238 = arith.constant 1 : index
    %753 = vector.load %arg9[%c0_235, %c2_236, %c1_237, %c1_238] : memref<2x4x24x128xf32, #tpu.memory_space<vmem>>, vector<1x1x16x32xf32>
    %754 = vector.shape_cast %753 : vector<1x1x16x32xf32> to vector<16x32xf32>
    %c22_239 = arith.constant 22 : index
    %755 = memref.load %arg4[%c22_239] : memref<144xf32, #tpu.memory_space<smem>>
    %756 = vector.broadcast %755 : f32 to vector<16x32xf32>
    %757 = arith.mulf %756, %754 : vector<16x32xf32>
    %758 = arith.addf %740, %757 : vector<16x32xf32>
    %c58_240 = arith.constant 58 : index
    %759 = memref.load %arg4[%c58_240] : memref<144xf32, #tpu.memory_space<smem>>
    %760 = vector.broadcast %759 : f32 to vector<16x32xf32>
    %761 = arith.mulf %760, %754 : vector<16x32xf32>
    %762 = arith.addf %744, %761 : vector<16x32xf32>
    %c94 = arith.constant 94 : index
    %763 = memref.load %arg4[%c94] : memref<144xf32, #tpu.memory_space<smem>>
    %764 = vector.broadcast %763 : f32 to vector<16x32xf32>
    %765 = arith.mulf %764, %754 : vector<16x32xf32>
    %766 = arith.addf %748, %765 : vector<16x32xf32>
    %c130 = arith.constant 130 : index
    %767 = memref.load %arg4[%c130] : memref<144xf32, #tpu.memory_space<smem>>
    %768 = vector.broadcast %767 : f32 to vector<16x32xf32>
    %769 = arith.mulf %768, %754 : vector<16x32xf32>
    %770 = arith.addf %752, %769 : vector<16x32xf32>
    %c0_241 = arith.constant 0 : index
    %c2_242 = arith.constant 2 : index
    %c1_243 = arith.constant 1 : index
    %c2_244 = arith.constant 2 : index
    %771 = vector.load %arg9[%c0_241, %c2_242, %c1_243, %c2_244] : memref<2x4x24x128xf32, #tpu.memory_space<vmem>>, vector<1x1x16x32xf32>
    %772 = vector.shape_cast %771 : vector<1x1x16x32xf32> to vector<16x32xf32>
    %c23_245 = arith.constant 23 : index
    %773 = memref.load %arg4[%c23_245] : memref<144xf32, #tpu.memory_space<smem>>
    %774 = vector.broadcast %773 : f32 to vector<16x32xf32>
    %775 = arith.mulf %774, %772 : vector<16x32xf32>
    %776 = arith.addf %758, %775 : vector<16x32xf32>
    %c59_246 = arith.constant 59 : index
    %777 = memref.load %arg4[%c59_246] : memref<144xf32, #tpu.memory_space<smem>>
    %778 = vector.broadcast %777 : f32 to vector<16x32xf32>
    %779 = arith.mulf %778, %772 : vector<16x32xf32>
    %780 = arith.addf %762, %779 : vector<16x32xf32>
    %c95 = arith.constant 95 : index
    %781 = memref.load %arg4[%c95] : memref<144xf32, #tpu.memory_space<smem>>
    %782 = vector.broadcast %781 : f32 to vector<16x32xf32>
    %783 = arith.mulf %782, %772 : vector<16x32xf32>
    %784 = arith.addf %766, %783 : vector<16x32xf32>
    %c131 = arith.constant 131 : index
    %785 = memref.load %arg4[%c131] : memref<144xf32, #tpu.memory_space<smem>>
    %786 = vector.broadcast %785 : f32 to vector<16x32xf32>
    %787 = arith.mulf %786, %772 : vector<16x32xf32>
    %788 = arith.addf %770, %787 : vector<16x32xf32>
    %c1_247 = arith.constant 1 : index
    %c2_248 = arith.constant 2 : index
    %c1_249 = arith.constant 1 : index
    %c0_250 = arith.constant 0 : index
    %789 = vector.load %arg9[%c1_247, %c2_248, %c1_249, %c0_250] : memref<2x4x24x128xf32, #tpu.memory_space<vmem>>, vector<1x1x16x32xf32>
    %790 = vector.shape_cast %789 : vector<1x1x16x32xf32> to vector<16x32xf32>
    %c24_251 = arith.constant 24 : index
    %791 = memref.load %arg4[%c24_251] : memref<144xf32, #tpu.memory_space<smem>>
    %792 = vector.broadcast %791 : f32 to vector<16x32xf32>
    %793 = arith.mulf %792, %790 : vector<16x32xf32>
    %794 = arith.addf %776, %793 : vector<16x32xf32>
    %c60_252 = arith.constant 60 : index
    %795 = memref.load %arg4[%c60_252] : memref<144xf32, #tpu.memory_space<smem>>
    %796 = vector.broadcast %795 : f32 to vector<16x32xf32>
    %797 = arith.mulf %796, %790 : vector<16x32xf32>
    %798 = arith.addf %780, %797 : vector<16x32xf32>
    %c96 = arith.constant 96 : index
    %799 = memref.load %arg4[%c96] : memref<144xf32, #tpu.memory_space<smem>>
    %800 = vector.broadcast %799 : f32 to vector<16x32xf32>
    %801 = arith.mulf %800, %790 : vector<16x32xf32>
    %802 = arith.addf %784, %801 : vector<16x32xf32>
    %c132 = arith.constant 132 : index
    %803 = memref.load %arg4[%c132] : memref<144xf32, #tpu.memory_space<smem>>
    %804 = vector.broadcast %803 : f32 to vector<16x32xf32>
    %805 = arith.mulf %804, %790 : vector<16x32xf32>
    %806 = arith.addf %788, %805 : vector<16x32xf32>
    %c1_253 = arith.constant 1 : index
    %c2_254 = arith.constant 2 : index
    %c1_255 = arith.constant 1 : index
    %c1_256 = arith.constant 1 : index
    %807 = vector.load %arg9[%c1_253, %c2_254, %c1_255, %c1_256] : memref<2x4x24x128xf32, #tpu.memory_space<vmem>>, vector<1x1x16x32xf32>
    %808 = vector.shape_cast %807 : vector<1x1x16x32xf32> to vector<16x32xf32>
    %c25_257 = arith.constant 25 : index
    %809 = memref.load %arg4[%c25_257] : memref<144xf32, #tpu.memory_space<smem>>
    %810 = vector.broadcast %809 : f32 to vector<16x32xf32>
    %811 = arith.mulf %810, %808 : vector<16x32xf32>
    %812 = arith.addf %794, %811 : vector<16x32xf32>
    %c61_258 = arith.constant 61 : index
    %813 = memref.load %arg4[%c61_258] : memref<144xf32, #tpu.memory_space<smem>>
    %814 = vector.broadcast %813 : f32 to vector<16x32xf32>
    %815 = arith.mulf %814, %808 : vector<16x32xf32>
    %816 = arith.addf %798, %815 : vector<16x32xf32>
    %c97 = arith.constant 97 : index
    %817 = memref.load %arg4[%c97] : memref<144xf32, #tpu.memory_space<smem>>
    %818 = vector.broadcast %817 : f32 to vector<16x32xf32>
    %819 = arith.mulf %818, %808 : vector<16x32xf32>
    %820 = arith.addf %802, %819 : vector<16x32xf32>
    %c133 = arith.constant 133 : index
    %821 = memref.load %arg4[%c133] : memref<144xf32, #tpu.memory_space<smem>>
    %822 = vector.broadcast %821 : f32 to vector<16x32xf32>
    %823 = arith.mulf %822, %808 : vector<16x32xf32>
    %824 = arith.addf %806, %823 : vector<16x32xf32>
    %c1_259 = arith.constant 1 : index
    %c2_260 = arith.constant 2 : index
    %c1_261 = arith.constant 1 : index
    %c2_262 = arith.constant 2 : index
    %825 = vector.load %arg9[%c1_259, %c2_260, %c1_261, %c2_262] : memref<2x4x24x128xf32, #tpu.memory_space<vmem>>, vector<1x1x16x32xf32>
    %826 = vector.shape_cast %825 : vector<1x1x16x32xf32> to vector<16x32xf32>
    %c26_263 = arith.constant 26 : index
    %827 = memref.load %arg4[%c26_263] : memref<144xf32, #tpu.memory_space<smem>>
    %828 = vector.broadcast %827 : f32 to vector<16x32xf32>
    %829 = arith.mulf %828, %826 : vector<16x32xf32>
    %830 = arith.addf %812, %829 : vector<16x32xf32>
    %c62_264 = arith.constant 62 : index
    %831 = memref.load %arg4[%c62_264] : memref<144xf32, #tpu.memory_space<smem>>
    %832 = vector.broadcast %831 : f32 to vector<16x32xf32>
    %833 = arith.mulf %832, %826 : vector<16x32xf32>
    %834 = arith.addf %816, %833 : vector<16x32xf32>
    %c98 = arith.constant 98 : index
    %835 = memref.load %arg4[%c98] : memref<144xf32, #tpu.memory_space<smem>>
    %836 = vector.broadcast %835 : f32 to vector<16x32xf32>
    %837 = arith.mulf %836, %826 : vector<16x32xf32>
    %838 = arith.addf %820, %837 : vector<16x32xf32>
    %c134 = arith.constant 134 : index
    %839 = memref.load %arg4[%c134] : memref<144xf32, #tpu.memory_space<smem>>
    %840 = vector.broadcast %839 : f32 to vector<16x32xf32>
    %841 = arith.mulf %840, %826 : vector<16x32xf32>
    %842 = arith.addf %824, %841 : vector<16x32xf32>
    %c1_265 = arith.constant 1 : index
    %c3_266 = arith.constant 3 : index
    %c0_267 = arith.constant 0 : index
    %c0_268 = arith.constant 0 : index
    %843 = vector.load %arg9[%c1_265, %c3_266, %c0_267, %c0_268] : memref<2x4x24x128xf32, #tpu.memory_space<vmem>>, vector<1x1x16x32xf32>
    %844 = vector.shape_cast %843 : vector<1x1x16x32xf32> to vector<16x32xf32>
    %c27_269 = arith.constant 27 : index
    %845 = memref.load %arg4[%c27_269] : memref<144xf32, #tpu.memory_space<smem>>
    %846 = vector.broadcast %845 : f32 to vector<16x32xf32>
    %847 = arith.mulf %846, %844 : vector<16x32xf32>
    %848 = arith.addf %830, %847 : vector<16x32xf32>
    %c63_270 = arith.constant 63 : index
    %849 = memref.load %arg4[%c63_270] : memref<144xf32, #tpu.memory_space<smem>>
    %850 = vector.broadcast %849 : f32 to vector<16x32xf32>
    %851 = arith.mulf %850, %844 : vector<16x32xf32>
    %852 = arith.addf %834, %851 : vector<16x32xf32>
    %c99 = arith.constant 99 : index
    %853 = memref.load %arg4[%c99] : memref<144xf32, #tpu.memory_space<smem>>
    %854 = vector.broadcast %853 : f32 to vector<16x32xf32>
    %855 = arith.mulf %854, %844 : vector<16x32xf32>
    %856 = arith.addf %838, %855 : vector<16x32xf32>
    %c135 = arith.constant 135 : index
    %857 = memref.load %arg4[%c135] : memref<144xf32, #tpu.memory_space<smem>>
    %858 = vector.broadcast %857 : f32 to vector<16x32xf32>
    %859 = arith.mulf %858, %844 : vector<16x32xf32>
    %860 = arith.addf %842, %859 : vector<16x32xf32>
    %c1_271 = arith.constant 1 : index
    %c3_272 = arith.constant 3 : index
    %c0_273 = arith.constant 0 : index
    %c1_274 = arith.constant 1 : index
    %861 = vector.load %arg9[%c1_271, %c3_272, %c0_273, %c1_274] : memref<2x4x24x128xf32, #tpu.memory_space<vmem>>, vector<1x1x16x32xf32>
    %862 = vector.shape_cast %861 : vector<1x1x16x32xf32> to vector<16x32xf32>
    %c28_275 = arith.constant 28 : index
    %863 = memref.load %arg4[%c28_275] : memref<144xf32, #tpu.memory_space<smem>>
    %864 = vector.broadcast %863 : f32 to vector<16x32xf32>
    %865 = arith.mulf %864, %862 : vector<16x32xf32>
    %866 = arith.addf %848, %865 : vector<16x32xf32>
    %c64 = arith.constant 64 : index
    %867 = memref.load %arg4[%c64] : memref<144xf32, #tpu.memory_space<smem>>
    %868 = vector.broadcast %867 : f32 to vector<16x32xf32>
    %869 = arith.mulf %868, %862 : vector<16x32xf32>
    %870 = arith.addf %852, %869 : vector<16x32xf32>
    %c100 = arith.constant 100 : index
    %871 = memref.load %arg4[%c100] : memref<144xf32, #tpu.memory_space<smem>>
    %872 = vector.broadcast %871 : f32 to vector<16x32xf32>
    %873 = arith.mulf %872, %862 : vector<16x32xf32>
    %874 = arith.addf %856, %873 : vector<16x32xf32>
    %c136 = arith.constant 136 : index
    %875 = memref.load %arg4[%c136] : memref<144xf32, #tpu.memory_space<smem>>
    %876 = vector.broadcast %875 : f32 to vector<16x32xf32>
    %877 = arith.mulf %876, %862 : vector<16x32xf32>
    %878 = arith.addf %860, %877 : vector<16x32xf32>
    %c1_276 = arith.constant 1 : index
    %c3_277 = arith.constant 3 : index
    %c0_278 = arith.constant 0 : index
    %c2_279 = arith.constant 2 : index
    %879 = vector.load %arg9[%c1_276, %c3_277, %c0_278, %c2_279] : memref<2x4x24x128xf32, #tpu.memory_space<vmem>>, vector<1x1x16x32xf32>
    %880 = vector.shape_cast %879 : vector<1x1x16x32xf32> to vector<16x32xf32>
    %c29_280 = arith.constant 29 : index
    %881 = memref.load %arg4[%c29_280] : memref<144xf32, #tpu.memory_space<smem>>
    %882 = vector.broadcast %881 : f32 to vector<16x32xf32>
    %883 = arith.mulf %882, %880 : vector<16x32xf32>
    %884 = arith.addf %866, %883 : vector<16x32xf32>
    %c65 = arith.constant 65 : index
    %885 = memref.load %arg4[%c65] : memref<144xf32, #tpu.memory_space<smem>>
    %886 = vector.broadcast %885 : f32 to vector<16x32xf32>
    %887 = arith.mulf %886, %880 : vector<16x32xf32>
    %888 = arith.addf %870, %887 : vector<16x32xf32>
    %c101 = arith.constant 101 : index
    %889 = memref.load %arg4[%c101] : memref<144xf32, #tpu.memory_space<smem>>
    %890 = vector.broadcast %889 : f32 to vector<16x32xf32>
    %891 = arith.mulf %890, %880 : vector<16x32xf32>
    %892 = arith.addf %874, %891 : vector<16x32xf32>
    %c137 = arith.constant 137 : index
    %893 = memref.load %arg4[%c137] : memref<144xf32, #tpu.memory_space<smem>>
    %894 = vector.broadcast %893 : f32 to vector<16x32xf32>
    %895 = arith.mulf %894, %880 : vector<16x32xf32>
    %896 = arith.addf %878, %895 : vector<16x32xf32>
    %c0_281 = arith.constant 0 : index
    %c3_282 = arith.constant 3 : index
    %c1_283 = arith.constant 1 : index
    %c0_284 = arith.constant 0 : index
    %897 = vector.load %arg9[%c0_281, %c3_282, %c1_283, %c0_284] : memref<2x4x24x128xf32, #tpu.memory_space<vmem>>, vector<1x1x16x32xf32>
    %898 = vector.shape_cast %897 : vector<1x1x16x32xf32> to vector<16x32xf32>
    %c30_285 = arith.constant 30 : index
    %899 = memref.load %arg4[%c30_285] : memref<144xf32, #tpu.memory_space<smem>>
    %900 = vector.broadcast %899 : f32 to vector<16x32xf32>
    %901 = arith.mulf %900, %898 : vector<16x32xf32>
    %902 = arith.addf %884, %901 : vector<16x32xf32>
    %c66 = arith.constant 66 : index
    %903 = memref.load %arg4[%c66] : memref<144xf32, #tpu.memory_space<smem>>
    %904 = vector.broadcast %903 : f32 to vector<16x32xf32>
    %905 = arith.mulf %904, %898 : vector<16x32xf32>
    %906 = arith.addf %888, %905 : vector<16x32xf32>
    %c102 = arith.constant 102 : index
    %907 = memref.load %arg4[%c102] : memref<144xf32, #tpu.memory_space<smem>>
    %908 = vector.broadcast %907 : f32 to vector<16x32xf32>
    %909 = arith.mulf %908, %898 : vector<16x32xf32>
    %910 = arith.addf %892, %909 : vector<16x32xf32>
    %c138 = arith.constant 138 : index
    %911 = memref.load %arg4[%c138] : memref<144xf32, #tpu.memory_space<smem>>
    %912 = vector.broadcast %911 : f32 to vector<16x32xf32>
    %913 = arith.mulf %912, %898 : vector<16x32xf32>
    %914 = arith.addf %896, %913 : vector<16x32xf32>
    %c0_286 = arith.constant 0 : index
    %c3_287 = arith.constant 3 : index
    %c1_288 = arith.constant 1 : index
    %c1_289 = arith.constant 1 : index
    %915 = vector.load %arg9[%c0_286, %c3_287, %c1_288, %c1_289] : memref<2x4x24x128xf32, #tpu.memory_space<vmem>>, vector<1x1x16x32xf32>
    %916 = vector.shape_cast %915 : vector<1x1x16x32xf32> to vector<16x32xf32>
    %c31_290 = arith.constant 31 : index
    %917 = memref.load %arg4[%c31_290] : memref<144xf32, #tpu.memory_space<smem>>
    %918 = vector.broadcast %917 : f32 to vector<16x32xf32>
    %919 = arith.mulf %918, %916 : vector<16x32xf32>
    %920 = arith.addf %902, %919 : vector<16x32xf32>
    %c67 = arith.constant 67 : index
    %921 = memref.load %arg4[%c67] : memref<144xf32, #tpu.memory_space<smem>>
    %922 = vector.broadcast %921 : f32 to vector<16x32xf32>
    %923 = arith.mulf %922, %916 : vector<16x32xf32>
    %924 = arith.addf %906, %923 : vector<16x32xf32>
    %c103 = arith.constant 103 : index
    %925 = memref.load %arg4[%c103] : memref<144xf32, #tpu.memory_space<smem>>
    %926 = vector.broadcast %925 : f32 to vector<16x32xf32>
    %927 = arith.mulf %926, %916 : vector<16x32xf32>
    %928 = arith.addf %910, %927 : vector<16x32xf32>
    %c139 = arith.constant 139 : index
    %929 = memref.load %arg4[%c139] : memref<144xf32, #tpu.memory_space<smem>>
    %930 = vector.broadcast %929 : f32 to vector<16x32xf32>
    %931 = arith.mulf %930, %916 : vector<16x32xf32>
    %932 = arith.addf %914, %931 : vector<16x32xf32>
    %c0_291 = arith.constant 0 : index
    %c3_292 = arith.constant 3 : index
    %c1_293 = arith.constant 1 : index
    %c2_294 = arith.constant 2 : index
    %933 = vector.load %arg9[%c0_291, %c3_292, %c1_293, %c2_294] : memref<2x4x24x128xf32, #tpu.memory_space<vmem>>, vector<1x1x16x32xf32>
    %934 = vector.shape_cast %933 : vector<1x1x16x32xf32> to vector<16x32xf32>
    %c32_295 = arith.constant 32 : index
    %935 = memref.load %arg4[%c32_295] : memref<144xf32, #tpu.memory_space<smem>>
    %936 = vector.broadcast %935 : f32 to vector<16x32xf32>
    %937 = arith.mulf %936, %934 : vector<16x32xf32>
    %938 = arith.addf %920, %937 : vector<16x32xf32>
    %c68 = arith.constant 68 : index
    %939 = memref.load %arg4[%c68] : memref<144xf32, #tpu.memory_space<smem>>
    %940 = vector.broadcast %939 : f32 to vector<16x32xf32>
    %941 = arith.mulf %940, %934 : vector<16x32xf32>
    %942 = arith.addf %924, %941 : vector<16x32xf32>
    %c104 = arith.constant 104 : index
    %943 = memref.load %arg4[%c104] : memref<144xf32, #tpu.memory_space<smem>>
    %944 = vector.broadcast %943 : f32 to vector<16x32xf32>
    %945 = arith.mulf %944, %934 : vector<16x32xf32>
    %946 = arith.addf %928, %945 : vector<16x32xf32>
    %c140 = arith.constant 140 : index
    %947 = memref.load %arg4[%c140] : memref<144xf32, #tpu.memory_space<smem>>
    %948 = vector.broadcast %947 : f32 to vector<16x32xf32>
    %949 = arith.mulf %948, %934 : vector<16x32xf32>
    %950 = arith.addf %932, %949 : vector<16x32xf32>
    %c1_296 = arith.constant 1 : index
    %c3_297 = arith.constant 3 : index
    %c1_298 = arith.constant 1 : index
    %c0_299 = arith.constant 0 : index
    %951 = vector.load %arg9[%c1_296, %c3_297, %c1_298, %c0_299] : memref<2x4x24x128xf32, #tpu.memory_space<vmem>>, vector<1x1x16x32xf32>
    %952 = vector.shape_cast %951 : vector<1x1x16x32xf32> to vector<16x32xf32>
    %c33_300 = arith.constant 33 : index
    %953 = memref.load %arg4[%c33_300] : memref<144xf32, #tpu.memory_space<smem>>
    %954 = vector.broadcast %953 : f32 to vector<16x32xf32>
    %955 = arith.mulf %954, %952 : vector<16x32xf32>
    %956 = arith.addf %938, %955 : vector<16x32xf32>
    %c69 = arith.constant 69 : index
    %957 = memref.load %arg4[%c69] : memref<144xf32, #tpu.memory_space<smem>>
    %958 = vector.broadcast %957 : f32 to vector<16x32xf32>
    %959 = arith.mulf %958, %952 : vector<16x32xf32>
    %960 = arith.addf %942, %959 : vector<16x32xf32>
    %c105 = arith.constant 105 : index
    %961 = memref.load %arg4[%c105] : memref<144xf32, #tpu.memory_space<smem>>
    %962 = vector.broadcast %961 : f32 to vector<16x32xf32>
    %963 = arith.mulf %962, %952 : vector<16x32xf32>
    %964 = arith.addf %946, %963 : vector<16x32xf32>
    %c141 = arith.constant 141 : index
    %965 = memref.load %arg4[%c141] : memref<144xf32, #tpu.memory_space<smem>>
    %966 = vector.broadcast %965 : f32 to vector<16x32xf32>
    %967 = arith.mulf %966, %952 : vector<16x32xf32>
    %968 = arith.addf %950, %967 : vector<16x32xf32>
    %c1_301 = arith.constant 1 : index
    %c3_302 = arith.constant 3 : index
    %c1_303 = arith.constant 1 : index
    %c1_304 = arith.constant 1 : index
    %969 = vector.load %arg9[%c1_301, %c3_302, %c1_303, %c1_304] : memref<2x4x24x128xf32, #tpu.memory_space<vmem>>, vector<1x1x16x32xf32>
    %970 = vector.shape_cast %969 : vector<1x1x16x32xf32> to vector<16x32xf32>
    %c34_305 = arith.constant 34 : index
    %971 = memref.load %arg4[%c34_305] : memref<144xf32, #tpu.memory_space<smem>>
    %972 = vector.broadcast %971 : f32 to vector<16x32xf32>
    %973 = arith.mulf %972, %970 : vector<16x32xf32>
    %974 = arith.addf %956, %973 : vector<16x32xf32>
    %c70 = arith.constant 70 : index
    %975 = memref.load %arg4[%c70] : memref<144xf32, #tpu.memory_space<smem>>
    %976 = vector.broadcast %975 : f32 to vector<16x32xf32>
    %977 = arith.mulf %976, %970 : vector<16x32xf32>
    %978 = arith.addf %960, %977 : vector<16x32xf32>
    %c106 = arith.constant 106 : index
    %979 = memref.load %arg4[%c106] : memref<144xf32, #tpu.memory_space<smem>>
    %980 = vector.broadcast %979 : f32 to vector<16x32xf32>
    %981 = arith.mulf %980, %970 : vector<16x32xf32>
    %982 = arith.addf %964, %981 : vector<16x32xf32>
    %c142 = arith.constant 142 : index
    %983 = memref.load %arg4[%c142] : memref<144xf32, #tpu.memory_space<smem>>
    %984 = vector.broadcast %983 : f32 to vector<16x32xf32>
    %985 = arith.mulf %984, %970 : vector<16x32xf32>
    %986 = arith.addf %968, %985 : vector<16x32xf32>
    %c1_306 = arith.constant 1 : index
    %c3_307 = arith.constant 3 : index
    %c1_308 = arith.constant 1 : index
    %c2_309 = arith.constant 2 : index
    %987 = vector.load %arg9[%c1_306, %c3_307, %c1_308, %c2_309] : memref<2x4x24x128xf32, #tpu.memory_space<vmem>>, vector<1x1x16x32xf32>
    %988 = vector.shape_cast %987 : vector<1x1x16x32xf32> to vector<16x32xf32>
    %c35_310 = arith.constant 35 : index
    %989 = memref.load %arg4[%c35_310] : memref<144xf32, #tpu.memory_space<smem>>
    %990 = vector.broadcast %989 : f32 to vector<16x32xf32>
    %991 = arith.mulf %990, %988 : vector<16x32xf32>
    %992 = arith.addf %974, %991 : vector<16x32xf32>
    %c71 = arith.constant 71 : index
    %993 = memref.load %arg4[%c71] : memref<144xf32, #tpu.memory_space<smem>>
    %994 = vector.broadcast %993 : f32 to vector<16x32xf32>
    %995 = arith.mulf %994, %988 : vector<16x32xf32>
    %996 = arith.addf %978, %995 : vector<16x32xf32>
    %c107 = arith.constant 107 : index
    %997 = memref.load %arg4[%c107] : memref<144xf32, #tpu.memory_space<smem>>
    %998 = vector.broadcast %997 : f32 to vector<16x32xf32>
    %999 = arith.mulf %998, %988 : vector<16x32xf32>
    %1000 = arith.addf %982, %999 : vector<16x32xf32>
    %c143 = arith.constant 143 : index
    %1001 = memref.load %arg4[%c143] : memref<144xf32, #tpu.memory_space<smem>>
    %1002 = vector.broadcast %1001 : f32 to vector<16x32xf32>
    %1003 = arith.mulf %1002, %988 : vector<16x32xf32>
    %1004 = arith.addf %986, %1003 : vector<16x32xf32>
    %cst_311 = arith.constant 0.000000e+00 : f32
    %1005 = vector.broadcast %cst_311 : f32 to vector<16x32xf32>
    %1006 = arith.maximumf %992, %1005 : vector<16x32xf32>
    %cst_312 = arith.constant 0.000000e+00 : f32
    %1007 = vector.broadcast %cst_312 : f32 to vector<16x32xf32>
    %1008 = arith.maximumf %996, %1007 : vector<16x32xf32>
    %cst_313 = arith.constant 0.000000e+00 : f32
    %1009 = vector.broadcast %cst_313 : f32 to vector<16x32xf32>
    %1010 = arith.maximumf %1000, %1009 : vector<16x32xf32>
    %cst_314 = arith.constant 0.000000e+00 : f32
    %1011 = vector.broadcast %cst_314 : f32 to vector<16x32xf32>
    %1012 = arith.maximumf %1004, %1011 : vector<16x32xf32>
    %cst_315 = arith.constant 0.000000e+00 : f32
    %1013 = vector.broadcast %cst_315 : f32 to vector<16x32xf32>
    %c0_316 = arith.constant 0 : index
    %1014 = memref.load %arg7[%c0_316] : memref<3xf32, #tpu.memory_space<smem>>
    %1015 = vector.broadcast %1014 : f32 to vector<16x32xf32>
    %1016 = arith.addf %1013, %1015 : vector<16x32xf32>
    %c0_317 = arith.constant 0 : index
    %1017 = memref.load %arg6[%c0_317] : memref<12xf32, #tpu.memory_space<smem>>
    %1018 = vector.broadcast %1017 : f32 to vector<16x32xf32>
    %1019 = arith.mulf %1018, %1006 : vector<16x32xf32>
    %1020 = arith.addf %1016, %1019 : vector<16x32xf32>
    %c1_318 = arith.constant 1 : index
    %1021 = memref.load %arg6[%c1_318] : memref<12xf32, #tpu.memory_space<smem>>
    %1022 = vector.broadcast %1021 : f32 to vector<16x32xf32>
    %1023 = arith.mulf %1022, %1008 : vector<16x32xf32>
    %1024 = arith.addf %1020, %1023 : vector<16x32xf32>
    %c2_319 = arith.constant 2 : index
    %1025 = memref.load %arg6[%c2_319] : memref<12xf32, #tpu.memory_space<smem>>
    %1026 = vector.broadcast %1025 : f32 to vector<16x32xf32>
    %1027 = arith.mulf %1026, %1010 : vector<16x32xf32>
    %1028 = arith.addf %1024, %1027 : vector<16x32xf32>
    %c3_320 = arith.constant 3 : index
    %1029 = memref.load %arg6[%c3_320] : memref<12xf32, #tpu.memory_space<smem>>
    %1030 = vector.broadcast %1029 : f32 to vector<16x32xf32>
    %1031 = arith.mulf %1030, %1012 : vector<16x32xf32>
    %1032 = arith.addf %1028, %1031 : vector<16x32xf32>
    %c0_321 = arith.constant 0 : index
    %c0_322 = arith.constant 0 : index
    %c0_323 = arith.constant 0 : index
    %c0_324 = arith.constant 0 : index
    %c0_325 = arith.constant 0 : index
    %1033 = vector.load %arg8[%c0_321, %c0_322, %c0_323, %c0_324, %c0_325] : memref<1x2x3x16x32xf32, #tpu.memory_space<vmem>>, vector<1x1x1x16x32xf32>
    %1034 = vector.shape_cast %1033 : vector<1x1x1x16x32xf32> to vector<16x32xf32>
    %1035 = vector.shape_cast %1032 : vector<16x32xf32> to vector<1x1x1x16x32xf32>
    tpu.vector_store %arg8[%c0_321, %c0_322, %c0_323, %c0_324, %c0_325], %1035 {strides = array<i32>} : memref<1x2x3x16x32xf32, #tpu.memory_space<vmem>>, vector<1x1x1x16x32xf32>,
    %cst_326 = arith.constant 0.000000e+00 : f32
    %1036 = vector.broadcast %cst_326 : f32 to vector<16x32xf32>
    %c1_327 = arith.constant 1 : index
    %1037 = memref.load %arg7[%c1_327] : memref<3xf32, #tpu.memory_space<smem>>
    %1038 = vector.broadcast %1037 : f32 to vector<16x32xf32>
    %1039 = arith.addf %1036, %1038 : vector<16x32xf32>
    %c4_328 = arith.constant 4 : index
    %1040 = memref.load %arg6[%c4_328] : memref<12xf32, #tpu.memory_space<smem>>
    %1041 = vector.broadcast %1040 : f32 to vector<16x32xf32>
    %1042 = arith.mulf %1041, %1006 : vector<16x32xf32>
    %1043 = arith.addf %1039, %1042 : vector<16x32xf32>
    %c5_329 = arith.constant 5 : index
    %1044 = memref.load %arg6[%c5_329] : memref<12xf32, #tpu.memory_space<smem>>
    %1045 = vector.broadcast %1044 : f32 to vector<16x32xf32>
    %1046 = arith.mulf %1045, %1008 : vector<16x32xf32>
    %1047 = arith.addf %1043, %1046 : vector<16x32xf32>
    %c6_330 = arith.constant 6 : index
    %1048 = memref.load %arg6[%c6_330] : memref<12xf32, #tpu.memory_space<smem>>
    %1049 = vector.broadcast %1048 : f32 to vector<16x32xf32>
    %1050 = arith.mulf %1049, %1010 : vector<16x32xf32>
    %1051 = arith.addf %1047, %1050 : vector<16x32xf32>
    %c7_331 = arith.constant 7 : index
    %1052 = memref.load %arg6[%c7_331] : memref<12xf32, #tpu.memory_space<smem>>
    %1053 = vector.broadcast %1052 : f32 to vector<16x32xf32>
    %1054 = arith.mulf %1053, %1012 : vector<16x32xf32>
    %1055 = arith.addf %1051, %1054 : vector<16x32xf32>
    %c0_332 = arith.constant 0 : index
    %c0_333 = arith.constant 0 : index
    %c1_334 = arith.constant 1 : index
    %c0_335 = arith.constant 0 : index
    %c0_336 = arith.constant 0 : index
    %1056 = vector.load %arg8[%c0_332, %c0_333, %c1_334, %c0_335, %c0_336] : memref<1x2x3x16x32xf32, #tpu.memory_space<vmem>>, vector<1x1x1x16x32xf32>
    %1057 = vector.shape_cast %1056 : vector<1x1x1x16x32xf32> to vector<16x32xf32>
    %1058 = vector.shape_cast %1055 : vector<16x32xf32> to vector<1x1x1x16x32xf32>
    tpu.vector_store %arg8[%c0_332, %c0_333, %c1_334, %c0_335, %c0_336], %1058 {strides = array<i32>} : memref<1x2x3x16x32xf32, #tpu.memory_space<vmem>>, vector<1x1x1x16x32xf32>,
    %cst_337 = arith.constant 0.000000e+00 : f32
    %1059 = vector.broadcast %cst_337 : f32 to vector<16x32xf32>
    %c2_338 = arith.constant 2 : index
    %1060 = memref.load %arg7[%c2_338] : memref<3xf32, #tpu.memory_space<smem>>
    %1061 = vector.broadcast %1060 : f32 to vector<16x32xf32>
    %1062 = arith.addf %1059, %1061 : vector<16x32xf32>
    %c8_339 = arith.constant 8 : index
    %1063 = memref.load %arg6[%c8_339] : memref<12xf32, #tpu.memory_space<smem>>
    %1064 = vector.broadcast %1063 : f32 to vector<16x32xf32>
    %1065 = arith.mulf %1064, %1006 : vector<16x32xf32>
    %1066 = arith.addf %1062, %1065 : vector<16x32xf32>
    %c9_340 = arith.constant 9 : index
    %1067 = memref.load %arg6[%c9_340] : memref<12xf32, #tpu.memory_space<smem>>
    %1068 = vector.broadcast %1067 : f32 to vector<16x32xf32>
    %1069 = arith.mulf %1068, %1008 : vector<16x32xf32>
    %1070 = arith.addf %1066, %1069 : vector<16x32xf32>
    %c10_341 = arith.constant 10 : index
    %1071 = memref.load %arg6[%c10_341] : memref<12xf32, #tpu.memory_space<smem>>
    %1072 = vector.broadcast %1071 : f32 to vector<16x32xf32>
    %1073 = arith.mulf %1072, %1010 : vector<16x32xf32>
    %1074 = arith.addf %1070, %1073 : vector<16x32xf32>
    %c11_342 = arith.constant 11 : index
    %1075 = memref.load %arg6[%c11_342] : memref<12xf32, #tpu.memory_space<smem>>
    %1076 = vector.broadcast %1075 : f32 to vector<16x32xf32>
    %1077 = arith.mulf %1076, %1012 : vector<16x32xf32>
    %1078 = arith.addf %1074, %1077 : vector<16x32xf32>
    %c0_343 = arith.constant 0 : index
    %c0_344 = arith.constant 0 : index
    %c2_345 = arith.constant 2 : index
    %c0_346 = arith.constant 0 : index
    %c0_347 = arith.constant 0 : index
    %1079 = vector.load %arg8[%c0_343, %c0_344, %c2_345, %c0_346, %c0_347] : memref<1x2x3x16x32xf32, #tpu.memory_space<vmem>>, vector<1x1x1x16x32xf32>
    %1080 = vector.shape_cast %1079 : vector<1x1x1x16x32xf32> to vector<16x32xf32>
    %1081 = vector.shape_cast %1078 : vector<16x32xf32> to vector<1x1x1x16x32xf32>
    tpu.vector_store %arg8[%c0_343, %c0_344, %c2_345, %c0_346, %c0_347], %1081 {strides = array<i32>} : memref<1x2x3x16x32xf32, #tpu.memory_space<vmem>>, vector<1x1x1x16x32xf32>,
    %cst_348 = arith.constant 0.000000e+00 : f32
    %1082 = vector.broadcast %cst_348 : f32 to vector<16x32xf32>
    %c0_349 = arith.constant 0 : index
    %1083 = memref.load %arg5[%c0_349] : memref<4xf32, #tpu.memory_space<smem>>
    %1084 = vector.broadcast %1083 : f32 to vector<16x32xf32>
    %1085 = arith.addf %1082, %1084 : vector<16x32xf32>
    %cst_350 = arith.constant 0.000000e+00 : f32
    %1086 = vector.broadcast %cst_350 : f32 to vector<16x32xf32>
    %c1_351 = arith.constant 1 : index
    %1087 = memref.load %arg5[%c1_351] : memref<4xf32, #tpu.memory_space<smem>>
    %1088 = vector.broadcast %1087 : f32 to vector<16x32xf32>
    %1089 = arith.addf %1086, %1088 : vector<16x32xf32>
    %cst_352 = arith.constant 0.000000e+00 : f32
    %1090 = vector.broadcast %cst_352 : f32 to vector<16x32xf32>
    %c2_353 = arith.constant 2 : index
    %1091 = memref.load %arg5[%c2_353] : memref<4xf32, #tpu.memory_space<smem>>
    %1092 = vector.broadcast %1091 : f32 to vector<16x32xf32>
    %1093 = arith.addf %1090, %1092 : vector<16x32xf32>
    %cst_354 = arith.constant 0.000000e+00 : f32
    %1094 = vector.broadcast %cst_354 : f32 to vector<16x32xf32>
    %c3_355 = arith.constant 3 : index
    %1095 = memref.load %arg5[%c3_355] : memref<4xf32, #tpu.memory_space<smem>>
    %1096 = vector.broadcast %1095 : f32 to vector<16x32xf32>
    %1097 = arith.addf %1094, %1096 : vector<16x32xf32>
    %c0_356 = arith.constant 0 : index
    %c0_357 = arith.constant 0 : index
    %c1_358 = arith.constant 1 : index
    %c0_359 = arith.constant 0 : index
    %1098 = vector.load %arg9[%c0_356, %c0_357, %c1_358, %c0_359] : memref<2x4x24x128xf32, #tpu.memory_space<vmem>>, vector<1x1x16x32xf32>
    %1099 = vector.shape_cast %1098 : vector<1x1x16x32xf32> to vector<16x32xf32>
    %c0_360 = arith.constant 0 : index
    %1100 = memref.load %arg4[%c0_360] : memref<144xf32, #tpu.memory_space<smem>>
    %1101 = vector.broadcast %1100 : f32 to vector<16x32xf32>
    %1102 = arith.mulf %1101, %1099 : vector<16x32xf32>
    %1103 = arith.addf %1085, %1102 : vector<16x32xf32>
    %c36_361 = arith.constant 36 : index
    %1104 = memref.load %arg4[%c36_361] : memref<144xf32, #tpu.memory_space<smem>>
    %1105 = vector.broadcast %1104 : f32 to vector<16x32xf32>
    %1106 = arith.mulf %1105, %1099 : vector<16x32xf32>
    %1107 = arith.addf %1089, %1106 : vector<16x32xf32>
    %c72_362 = arith.constant 72 : index
    %1108 = memref.load %arg4[%c72_362] : memref<144xf32, #tpu.memory_space<smem>>
    %1109 = vector.broadcast %1108 : f32 to vector<16x32xf32>
    %1110 = arith.mulf %1109, %1099 : vector<16x32xf32>
    %1111 = arith.addf %1093, %1110 : vector<16x32xf32>
    %c108_363 = arith.constant 108 : index
    %1112 = memref.load %arg4[%c108_363] : memref<144xf32, #tpu.memory_space<smem>>
    %1113 = vector.broadcast %1112 : f32 to vector<16x32xf32>
    %1114 = arith.mulf %1113, %1099 : vector<16x32xf32>
    %1115 = arith.addf %1097, %1114 : vector<16x32xf32>
    %c0_364 = arith.constant 0 : index
    %c0_365 = arith.constant 0 : index
    %c1_366 = arith.constant 1 : index
    %c1_367 = arith.constant 1 : index
    %1116 = vector.load %arg9[%c0_364, %c0_365, %c1_366, %c1_367] : memref<2x4x24x128xf32, #tpu.memory_space<vmem>>, vector<1x1x16x32xf32>
    %1117 = vector.shape_cast %1116 : vector<1x1x16x32xf32> to vector<16x32xf32>
    %c1_368 = arith.constant 1 : index
    %1118 = memref.load %arg4[%c1_368] : memref<144xf32, #tpu.memory_space<smem>>
    %1119 = vector.broadcast %1118 : f32 to vector<16x32xf32>
    %1120 = arith.mulf %1119, %1117 : vector<16x32xf32>
    %1121 = arith.addf %1103, %1120 : vector<16x32xf32>
    %c37_369 = arith.constant 37 : index
    %1122 = memref.load %arg4[%c37_369] : memref<144xf32, #tpu.memory_space<smem>>
    %1123 = vector.broadcast %1122 : f32 to vector<16x32xf32>
    %1124 = arith.mulf %1123, %1117 : vector<16x32xf32>
    %1125 = arith.addf %1107, %1124 : vector<16x32xf32>
    %c73_370 = arith.constant 73 : index
    %1126 = memref.load %arg4[%c73_370] : memref<144xf32, #tpu.memory_space<smem>>
    %1127 = vector.broadcast %1126 : f32 to vector<16x32xf32>
    %1128 = arith.mulf %1127, %1117 : vector<16x32xf32>
    %1129 = arith.addf %1111, %1128 : vector<16x32xf32>
    %c109_371 = arith.constant 109 : index
    %1130 = memref.load %arg4[%c109_371] : memref<144xf32, #tpu.memory_space<smem>>
    %1131 = vector.broadcast %1130 : f32 to vector<16x32xf32>
    %1132 = arith.mulf %1131, %1117 : vector<16x32xf32>
    %1133 = arith.addf %1115, %1132 : vector<16x32xf32>
    %c0_372 = arith.constant 0 : index
    %c0_373 = arith.constant 0 : index
    %c1_374 = arith.constant 1 : index
    %c2_375 = arith.constant 2 : index
    %1134 = vector.load %arg9[%c0_372, %c0_373, %c1_374, %c2_375] : memref<2x4x24x128xf32, #tpu.memory_space<vmem>>, vector<1x1x16x32xf32>
    %1135 = vector.shape_cast %1134 : vector<1x1x16x32xf32> to vector<16x32xf32>
    %c2_376 = arith.constant 2 : index
    %1136 = memref.load %arg4[%c2_376] : memref<144xf32, #tpu.memory_space<smem>>
    %1137 = vector.broadcast %1136 : f32 to vector<16x32xf32>
    %1138 = arith.mulf %1137, %1135 : vector<16x32xf32>
    %1139 = arith.addf %1121, %1138 : vector<16x32xf32>
    %c38_377 = arith.constant 38 : index
    %1140 = memref.load %arg4[%c38_377] : memref<144xf32, #tpu.memory_space<smem>>
    %1141 = vector.broadcast %1140 : f32 to vector<16x32xf32>
    %1142 = arith.mulf %1141, %1135 : vector<16x32xf32>
    %1143 = arith.addf %1125, %1142 : vector<16x32xf32>
    %c74_378 = arith.constant 74 : index
    %1144 = memref.load %arg4[%c74_378] : memref<144xf32, #tpu.memory_space<smem>>
    %1145 = vector.broadcast %1144 : f32 to vector<16x32xf32>
    %1146 = arith.mulf %1145, %1135 : vector<16x32xf32>
    %1147 = arith.addf %1129, %1146 : vector<16x32xf32>
    %c110_379 = arith.constant 110 : index
    %1148 = memref.load %arg4[%c110_379] : memref<144xf32, #tpu.memory_space<smem>>
    %1149 = vector.broadcast %1148 : f32 to vector<16x32xf32>
    %1150 = arith.mulf %1149, %1135 : vector<16x32xf32>
    %1151 = arith.addf %1133, %1150 : vector<16x32xf32>
    %c1_380 = arith.constant 1 : index
    %c0_381 = arith.constant 0 : index
    %c1_382 = arith.constant 1 : index
    %c0_383 = arith.constant 0 : index
    %1152 = vector.load %arg9[%c1_380, %c0_381, %c1_382, %c0_383] : memref<2x4x24x128xf32, #tpu.memory_space<vmem>>, vector<1x1x16x32xf32>
    %1153 = vector.shape_cast %1152 : vector<1x1x16x32xf32> to vector<16x32xf32>
    %c3_384 = arith.constant 3 : index
    %1154 = memref.load %arg4[%c3_384] : memref<144xf32, #tpu.memory_space<smem>>
    %1155 = vector.broadcast %1154 : f32 to vector<16x32xf32>
    %1156 = arith.mulf %1155, %1153 : vector<16x32xf32>
    %1157 = arith.addf %1139, %1156 : vector<16x32xf32>
    %c39_385 = arith.constant 39 : index
    %1158 = memref.load %arg4[%c39_385] : memref<144xf32, #tpu.memory_space<smem>>
    %1159 = vector.broadcast %1158 : f32 to vector<16x32xf32>
    %1160 = arith.mulf %1159, %1153 : vector<16x32xf32>
    %1161 = arith.addf %1143, %1160 : vector<16x32xf32>
    %c75_386 = arith.constant 75 : index
    %1162 = memref.load %arg4[%c75_386] : memref<144xf32, #tpu.memory_space<smem>>
    %1163 = vector.broadcast %1162 : f32 to vector<16x32xf32>
    %1164 = arith.mulf %1163, %1153 : vector<16x32xf32>
    %1165 = arith.addf %1147, %1164 : vector<16x32xf32>
    %c111_387 = arith.constant 111 : index
    %1166 = memref.load %arg4[%c111_387] : memref<144xf32, #tpu.memory_space<smem>>
    %1167 = vector.broadcast %1166 : f32 to vector<16x32xf32>
    %1168 = arith.mulf %1167, %1153 : vector<16x32xf32>
    %1169 = arith.addf %1151, %1168 : vector<16x32xf32>
    %c1_388 = arith.constant 1 : index
    %c0_389 = arith.constant 0 : index
    %c1_390 = arith.constant 1 : index
    %c1_391 = arith.constant 1 : index
    %1170 = vector.load %arg9[%c1_388, %c0_389, %c1_390, %c1_391] : memref<2x4x24x128xf32, #tpu.memory_space<vmem>>, vector<1x1x16x32xf32>
    %1171 = vector.shape_cast %1170 : vector<1x1x16x32xf32> to vector<16x32xf32>
    %c4_392 = arith.constant 4 : index
    %1172 = memref.load %arg4[%c4_392] : memref<144xf32, #tpu.memory_space<smem>>
    %1173 = vector.broadcast %1172 : f32 to vector<16x32xf32>
    %1174 = arith.mulf %1173, %1171 : vector<16x32xf32>
    %1175 = arith.addf %1157, %1174 : vector<16x32xf32>
    %c40_393 = arith.constant 40 : index
    %1176 = memref.load %arg4[%c40_393] : memref<144xf32, #tpu.memory_space<smem>>
    %1177 = vector.broadcast %1176 : f32 to vector<16x32xf32>
    %1178 = arith.mulf %1177, %1171 : vector<16x32xf32>
    %1179 = arith.addf %1161, %1178 : vector<16x32xf32>
    %c76_394 = arith.constant 76 : index
    %1180 = memref.load %arg4[%c76_394] : memref<144xf32, #tpu.memory_space<smem>>
    %1181 = vector.broadcast %1180 : f32 to vector<16x32xf32>
    %1182 = arith.mulf %1181, %1171 : vector<16x32xf32>
    %1183 = arith.addf %1165, %1182 : vector<16x32xf32>
    %c112_395 = arith.constant 112 : index
    %1184 = memref.load %arg4[%c112_395] : memref<144xf32, #tpu.memory_space<smem>>
    %1185 = vector.broadcast %1184 : f32 to vector<16x32xf32>
    %1186 = arith.mulf %1185, %1171 : vector<16x32xf32>
    %1187 = arith.addf %1169, %1186 : vector<16x32xf32>
    %c1_396 = arith.constant 1 : index
    %c0_397 = arith.constant 0 : index
    %c1_398 = arith.constant 1 : index
    %c2_399 = arith.constant 2 : index
    %1188 = vector.load %arg9[%c1_396, %c0_397, %c1_398, %c2_399] : memref<2x4x24x128xf32, #tpu.memory_space<vmem>>, vector<1x1x16x32xf32>
    %1189 = vector.shape_cast %1188 : vector<1x1x16x32xf32> to vector<16x32xf32>
    %c5_400 = arith.constant 5 : index
    %1190 = memref.load %arg4[%c5_400] : memref<144xf32, #tpu.memory_space<smem>>
    %1191 = vector.broadcast %1190 : f32 to vector<16x32xf32>
    %1192 = arith.mulf %1191, %1189 : vector<16x32xf32>
    %1193 = arith.addf %1175, %1192 : vector<16x32xf32>
    %c41_401 = arith.constant 41 : index
    %1194 = memref.load %arg4[%c41_401] : memref<144xf32, #tpu.memory_space<smem>>
    %1195 = vector.broadcast %1194 : f32 to vector<16x32xf32>
    %1196 = arith.mulf %1195, %1189 : vector<16x32xf32>
    %1197 = arith.addf %1179, %1196 : vector<16x32xf32>
    %c77_402 = arith.constant 77 : index
    %1198 = memref.load %arg4[%c77_402] : memref<144xf32, #tpu.memory_space<smem>>
    %1199 = vector.broadcast %1198 : f32 to vector<16x32xf32>
    %1200 = arith.mulf %1199, %1189 : vector<16x32xf32>
    %1201 = arith.addf %1183, %1200 : vector<16x32xf32>
    %c113_403 = arith.constant 113 : index
    %1202 = memref.load %arg4[%c113_403] : memref<144xf32, #tpu.memory_space<smem>>
    %1203 = vector.broadcast %1202 : f32 to vector<16x32xf32>
    %1204 = arith.mulf %1203, %1189 : vector<16x32xf32>
    %1205 = arith.addf %1187, %1204 : vector<16x32xf32>
    %c0_404 = arith.constant 0 : index
    %c0_405 = arith.constant 0 : index
    %c2_406 = arith.constant 2 : index
    %c0_407 = arith.constant 0 : index
    %1206 = vector.load %arg9[%c0_404, %c0_405, %c2_406, %c0_407] : memref<2x4x24x128xf32, #tpu.memory_space<vmem>>, vector<1x1x16x32xf32>
    %1207 = vector.shape_cast %1206 : vector<1x1x16x32xf32> to vector<16x32xf32>
    %c6_408 = arith.constant 6 : index
    %1208 = memref.load %arg4[%c6_408] : memref<144xf32, #tpu.memory_space<smem>>
    %1209 = vector.broadcast %1208 : f32 to vector<16x32xf32>
    %1210 = arith.mulf %1209, %1207 : vector<16x32xf32>
    %1211 = arith.addf %1193, %1210 : vector<16x32xf32>
    %c42_409 = arith.constant 42 : index
    %1212 = memref.load %arg4[%c42_409] : memref<144xf32, #tpu.memory_space<smem>>
    %1213 = vector.broadcast %1212 : f32 to vector<16x32xf32>
    %1214 = arith.mulf %1213, %1207 : vector<16x32xf32>
    %1215 = arith.addf %1197, %1214 : vector<16x32xf32>
    %c78_410 = arith.constant 78 : index
    %1216 = memref.load %arg4[%c78_410] : memref<144xf32, #tpu.memory_space<smem>>
    %1217 = vector.broadcast %1216 : f32 to vector<16x32xf32>
    %1218 = arith.mulf %1217, %1207 : vector<16x32xf32>
    %1219 = arith.addf %1201, %1218 : vector<16x32xf32>
    %c114_411 = arith.constant 114 : index
    %1220 = memref.load %arg4[%c114_411] : memref<144xf32, #tpu.memory_space<smem>>
    %1221 = vector.broadcast %1220 : f32 to vector<16x32xf32>
    %1222 = arith.mulf %1221, %1207 : vector<16x32xf32>
    %1223 = arith.addf %1205, %1222 : vector<16x32xf32>
    %c0_412 = arith.constant 0 : index
    %c0_413 = arith.constant 0 : index
    %c2_414 = arith.constant 2 : index
    %c1_415 = arith.constant 1 : index
    %1224 = vector.load %arg9[%c0_412, %c0_413, %c2_414, %c1_415] : memref<2x4x24x128xf32, #tpu.memory_space<vmem>>, vector<1x1x16x32xf32>
    %1225 = vector.shape_cast %1224 : vector<1x1x16x32xf32> to vector<16x32xf32>
    %c7_416 = arith.constant 7 : index
    %1226 = memref.load %arg4[%c7_416] : memref<144xf32, #tpu.memory_space<smem>>
    %1227 = vector.broadcast %1226 : f32 to vector<16x32xf32>
    %1228 = arith.mulf %1227, %1225 : vector<16x32xf32>
    %1229 = arith.addf %1211, %1228 : vector<16x32xf32>
    %c43_417 = arith.constant 43 : index
    %1230 = memref.load %arg4[%c43_417] : memref<144xf32, #tpu.memory_space<smem>>
    %1231 = vector.broadcast %1230 : f32 to vector<16x32xf32>
    %1232 = arith.mulf %1231, %1225 : vector<16x32xf32>
    %1233 = arith.addf %1215, %1232 : vector<16x32xf32>
    %c79_418 = arith.constant 79 : index
    %1234 = memref.load %arg4[%c79_418] : memref<144xf32, #tpu.memory_space<smem>>
    %1235 = vector.broadcast %1234 : f32 to vector<16x32xf32>
    %1236 = arith.mulf %1235, %1225 : vector<16x32xf32>
    %1237 = arith.addf %1219, %1236 : vector<16x32xf32>
    %c115_419 = arith.constant 115 : index
    %1238 = memref.load %arg4[%c115_419] : memref<144xf32, #tpu.memory_space<smem>>
    %1239 = vector.broadcast %1238 : f32 to vector<16x32xf32>
    %1240 = arith.mulf %1239, %1225 : vector<16x32xf32>
    %1241 = arith.addf %1223, %1240 : vector<16x32xf32>
    %c0_420 = arith.constant 0 : index
    %c0_421 = arith.constant 0 : index
    %c2_422 = arith.constant 2 : index
    %c2_423 = arith.constant 2 : index
    %1242 = vector.load %arg9[%c0_420, %c0_421, %c2_422, %c2_423] : memref<2x4x24x128xf32, #tpu.memory_space<vmem>>, vector<1x1x16x32xf32>
    %1243 = vector.shape_cast %1242 : vector<1x1x16x32xf32> to vector<16x32xf32>
    %c8_424 = arith.constant 8 : index
    %1244 = memref.load %arg4[%c8_424] : memref<144xf32, #tpu.memory_space<smem>>
    %1245 = vector.broadcast %1244 : f32 to vector<16x32xf32>
    %1246 = arith.mulf %1245, %1243 : vector<16x32xf32>
    %1247 = arith.addf %1229, %1246 : vector<16x32xf32>
    %c44_425 = arith.constant 44 : index
    %1248 = memref.load %arg4[%c44_425] : memref<144xf32, #tpu.memory_space<smem>>
    %1249 = vector.broadcast %1248 : f32 to vector<16x32xf32>
    %1250 = arith.mulf %1249, %1243 : vector<16x32xf32>
    %1251 = arith.addf %1233, %1250 : vector<16x32xf32>
    %c80_426 = arith.constant 80 : index
    %1252 = memref.load %arg4[%c80_426] : memref<144xf32, #tpu.memory_space<smem>>
    %1253 = vector.broadcast %1252 : f32 to vector<16x32xf32>
    %1254 = arith.mulf %1253, %1243 : vector<16x32xf32>
    %1255 = arith.addf %1237, %1254 : vector<16x32xf32>
    %c116_427 = arith.constant 116 : index
    %1256 = memref.load %arg4[%c116_427] : memref<144xf32, #tpu.memory_space<smem>>
    %1257 = vector.broadcast %1256 : f32 to vector<16x32xf32>
    %1258 = arith.mulf %1257, %1243 : vector<16x32xf32>
    %1259 = arith.addf %1241, %1258 : vector<16x32xf32>
    %c0_428 = arith.constant 0 : index
    %c1_429 = arith.constant 1 : index
    %c1_430 = arith.constant 1 : index
    %c0_431 = arith.constant 0 : index
    %1260 = vector.load %arg9[%c0_428, %c1_429, %c1_430, %c0_431] : memref<2x4x24x128xf32, #tpu.memory_space<vmem>>, vector<1x1x16x32xf32>
    %1261 = vector.shape_cast %1260 : vector<1x1x16x32xf32> to vector<16x32xf32>
    %c9_432 = arith.constant 9 : index
    %1262 = memref.load %arg4[%c9_432] : memref<144xf32, #tpu.memory_space<smem>>
    %1263 = vector.broadcast %1262 : f32 to vector<16x32xf32>
    %1264 = arith.mulf %1263, %1261 : vector<16x32xf32>
    %1265 = arith.addf %1247, %1264 : vector<16x32xf32>
    %c45_433 = arith.constant 45 : index
    %1266 = memref.load %arg4[%c45_433] : memref<144xf32, #tpu.memory_space<smem>>
    %1267 = vector.broadcast %1266 : f32 to vector<16x32xf32>
    %1268 = arith.mulf %1267, %1261 : vector<16x32xf32>
    %1269 = arith.addf %1251, %1268 : vector<16x32xf32>
    %c81_434 = arith.constant 81 : index
    %1270 = memref.load %arg4[%c81_434] : memref<144xf32, #tpu.memory_space<smem>>
    %1271 = vector.broadcast %1270 : f32 to vector<16x32xf32>
    %1272 = arith.mulf %1271, %1261 : vector<16x32xf32>
    %1273 = arith.addf %1255, %1272 : vector<16x32xf32>
    %c117_435 = arith.constant 117 : index
    %1274 = memref.load %arg4[%c117_435] : memref<144xf32, #tpu.memory_space<smem>>
    %1275 = vector.broadcast %1274 : f32 to vector<16x32xf32>
    %1276 = arith.mulf %1275, %1261 : vector<16x32xf32>
    %1277 = arith.addf %1259, %1276 : vector<16x32xf32>
    %c0_436 = arith.constant 0 : index
    %c1_437 = arith.constant 1 : index
    %c1_438 = arith.constant 1 : index
    %c1_439 = arith.constant 1 : index
    %1278 = vector.load %arg9[%c0_436, %c1_437, %c1_438, %c1_439] : memref<2x4x24x128xf32, #tpu.memory_space<vmem>>, vector<1x1x16x32xf32>
    %1279 = vector.shape_cast %1278 : vector<1x1x16x32xf32> to vector<16x32xf32>
    %c10_440 = arith.constant 10 : index
    %1280 = memref.load %arg4[%c10_440] : memref<144xf32, #tpu.memory_space<smem>>
    %1281 = vector.broadcast %1280 : f32 to vector<16x32xf32>
    %1282 = arith.mulf %1281, %1279 : vector<16x32xf32>
    %1283 = arith.addf %1265, %1282 : vector<16x32xf32>
    %c46_441 = arith.constant 46 : index
    %1284 = memref.load %arg4[%c46_441] : memref<144xf32, #tpu.memory_space<smem>>
    %1285 = vector.broadcast %1284 : f32 to vector<16x32xf32>
    %1286 = arith.mulf %1285, %1279 : vector<16x32xf32>
    %1287 = arith.addf %1269, %1286 : vector<16x32xf32>
    %c82_442 = arith.constant 82 : index
    %1288 = memref.load %arg4[%c82_442] : memref<144xf32, #tpu.memory_space<smem>>
    %1289 = vector.broadcast %1288 : f32 to vector<16x32xf32>
    %1290 = arith.mulf %1289, %1279 : vector<16x32xf32>
    %1291 = arith.addf %1273, %1290 : vector<16x32xf32>
    %c118_443 = arith.constant 118 : index
    %1292 = memref.load %arg4[%c118_443] : memref<144xf32, #tpu.memory_space<smem>>
    %1293 = vector.broadcast %1292 : f32 to vector<16x32xf32>
    %1294 = arith.mulf %1293, %1279 : vector<16x32xf32>
    %1295 = arith.addf %1277, %1294 : vector<16x32xf32>
    %c0_444 = arith.constant 0 : index
    %c1_445 = arith.constant 1 : index
    %c1_446 = arith.constant 1 : index
    %c2_447 = arith.constant 2 : index
    %1296 = vector.load %arg9[%c0_444, %c1_445, %c1_446, %c2_447] : memref<2x4x24x128xf32, #tpu.memory_space<vmem>>, vector<1x1x16x32xf32>
    %1297 = vector.shape_cast %1296 : vector<1x1x16x32xf32> to vector<16x32xf32>
    %c11_448 = arith.constant 11 : index
    %1298 = memref.load %arg4[%c11_448] : memref<144xf32, #tpu.memory_space<smem>>
    %1299 = vector.broadcast %1298 : f32 to vector<16x32xf32>
    %1300 = arith.mulf %1299, %1297 : vector<16x32xf32>
    %1301 = arith.addf %1283, %1300 : vector<16x32xf32>
    %c47_449 = arith.constant 47 : index
    %1302 = memref.load %arg4[%c47_449] : memref<144xf32, #tpu.memory_space<smem>>
    %1303 = vector.broadcast %1302 : f32 to vector<16x32xf32>
    %1304 = arith.mulf %1303, %1297 : vector<16x32xf32>
    %1305 = arith.addf %1287, %1304 : vector<16x32xf32>
    %c83_450 = arith.constant 83 : index
    %1306 = memref.load %arg4[%c83_450] : memref<144xf32, #tpu.memory_space<smem>>
    %1307 = vector.broadcast %1306 : f32 to vector<16x32xf32>
    %1308 = arith.mulf %1307, %1297 : vector<16x32xf32>
    %1309 = arith.addf %1291, %1308 : vector<16x32xf32>
    %c119_451 = arith.constant 119 : index
    %1310 = memref.load %arg4[%c119_451] : memref<144xf32, #tpu.memory_space<smem>>
    %1311 = vector.broadcast %1310 : f32 to vector<16x32xf32>
    %1312 = arith.mulf %1311, %1297 : vector<16x32xf32>
    %1313 = arith.addf %1295, %1312 : vector<16x32xf32>
    %c1_452 = arith.constant 1 : index
    %c1_453 = arith.constant 1 : index
    %c1_454 = arith.constant 1 : index
    %c0_455 = arith.constant 0 : index
    %1314 = vector.load %arg9[%c1_452, %c1_453, %c1_454, %c0_455] : memref<2x4x24x128xf32, #tpu.memory_space<vmem>>, vector<1x1x16x32xf32>
    %1315 = vector.shape_cast %1314 : vector<1x1x16x32xf32> to vector<16x32xf32>
    %c12_456 = arith.constant 12 : index
    %1316 = memref.load %arg4[%c12_456] : memref<144xf32, #tpu.memory_space<smem>>
    %1317 = vector.broadcast %1316 : f32 to vector<16x32xf32>
    %1318 = arith.mulf %1317, %1315 : vector<16x32xf32>
    %1319 = arith.addf %1301, %1318 : vector<16x32xf32>
    %c48_457 = arith.constant 48 : index
    %1320 = memref.load %arg4[%c48_457] : memref<144xf32, #tpu.memory_space<smem>>
    %1321 = vector.broadcast %1320 : f32 to vector<16x32xf32>
    %1322 = arith.mulf %1321, %1315 : vector<16x32xf32>
    %1323 = arith.addf %1305, %1322 : vector<16x32xf32>
    %c84_458 = arith.constant 84 : index
    %1324 = memref.load %arg4[%c84_458] : memref<144xf32, #tpu.memory_space<smem>>
    %1325 = vector.broadcast %1324 : f32 to vector<16x32xf32>
    %1326 = arith.mulf %1325, %1315 : vector<16x32xf32>
    %1327 = arith.addf %1309, %1326 : vector<16x32xf32>
    %c120_459 = arith.constant 120 : index
    %1328 = memref.load %arg4[%c120_459] : memref<144xf32, #tpu.memory_space<smem>>
    %1329 = vector.broadcast %1328 : f32 to vector<16x32xf32>
    %1330 = arith.mulf %1329, %1315 : vector<16x32xf32>
    %1331 = arith.addf %1313, %1330 : vector<16x32xf32>
    %c1_460 = arith.constant 1 : index
    %c1_461 = arith.constant 1 : index
    %c1_462 = arith.constant 1 : index
    %c1_463 = arith.constant 1 : index
    %1332 = vector.load %arg9[%c1_460, %c1_461, %c1_462, %c1_463] : memref<2x4x24x128xf32, #tpu.memory_space<vmem>>, vector<1x1x16x32xf32>
    %1333 = vector.shape_cast %1332 : vector<1x1x16x32xf32> to vector<16x32xf32>
    %c13_464 = arith.constant 13 : index
    %1334 = memref.load %arg4[%c13_464] : memref<144xf32, #tpu.memory_space<smem>>
    %1335 = vector.broadcast %1334 : f32 to vector<16x32xf32>
    %1336 = arith.mulf %1335, %1333 : vector<16x32xf32>
    %1337 = arith.addf %1319, %1336 : vector<16x32xf32>
    %c49_465 = arith.constant 49 : index
    %1338 = memref.load %arg4[%c49_465] : memref<144xf32, #tpu.memory_space<smem>>
    %1339 = vector.broadcast %1338 : f32 to vector<16x32xf32>
    %1340 = arith.mulf %1339, %1333 : vector<16x32xf32>
    %1341 = arith.addf %1323, %1340 : vector<16x32xf32>
    %c85_466 = arith.constant 85 : index
    %1342 = memref.load %arg4[%c85_466] : memref<144xf32, #tpu.memory_space<smem>>
    %1343 = vector.broadcast %1342 : f32 to vector<16x32xf32>
    %1344 = arith.mulf %1343, %1333 : vector<16x32xf32>
    %1345 = arith.addf %1327, %1344 : vector<16x32xf32>
    %c121_467 = arith.constant 121 : index
    %1346 = memref.load %arg4[%c121_467] : memref<144xf32, #tpu.memory_space<smem>>
    %1347 = vector.broadcast %1346 : f32 to vector<16x32xf32>
    %1348 = arith.mulf %1347, %1333 : vector<16x32xf32>
    %1349 = arith.addf %1331, %1348 : vector<16x32xf32>
    %c1_468 = arith.constant 1 : index
    %c1_469 = arith.constant 1 : index
    %c1_470 = arith.constant 1 : index
    %c2_471 = arith.constant 2 : index
    %1350 = vector.load %arg9[%c1_468, %c1_469, %c1_470, %c2_471] : memref<2x4x24x128xf32, #tpu.memory_space<vmem>>, vector<1x1x16x32xf32>
    %1351 = vector.shape_cast %1350 : vector<1x1x16x32xf32> to vector<16x32xf32>
    %c14_472 = arith.constant 14 : index
    %1352 = memref.load %arg4[%c14_472] : memref<144xf32, #tpu.memory_space<smem>>
    %1353 = vector.broadcast %1352 : f32 to vector<16x32xf32>
    %1354 = arith.mulf %1353, %1351 : vector<16x32xf32>
    %1355 = arith.addf %1337, %1354 : vector<16x32xf32>
    %c50_473 = arith.constant 50 : index
    %1356 = memref.load %arg4[%c50_473] : memref<144xf32, #tpu.memory_space<smem>>
    %1357 = vector.broadcast %1356 : f32 to vector<16x32xf32>
    %1358 = arith.mulf %1357, %1351 : vector<16x32xf32>
    %1359 = arith.addf %1341, %1358 : vector<16x32xf32>
    %c86_474 = arith.constant 86 : index
    %1360 = memref.load %arg4[%c86_474] : memref<144xf32, #tpu.memory_space<smem>>
    %1361 = vector.broadcast %1360 : f32 to vector<16x32xf32>
    %1362 = arith.mulf %1361, %1351 : vector<16x32xf32>
    %1363 = arith.addf %1345, %1362 : vector<16x32xf32>
    %c122_475 = arith.constant 122 : index
    %1364 = memref.load %arg4[%c122_475] : memref<144xf32, #tpu.memory_space<smem>>
    %1365 = vector.broadcast %1364 : f32 to vector<16x32xf32>
    %1366 = arith.mulf %1365, %1351 : vector<16x32xf32>
    %1367 = arith.addf %1349, %1366 : vector<16x32xf32>
    %c0_476 = arith.constant 0 : index
    %c1_477 = arith.constant 1 : index
    %c2_478 = arith.constant 2 : index
    %c0_479 = arith.constant 0 : index
    %1368 = vector.load %arg9[%c0_476, %c1_477, %c2_478, %c0_479] : memref<2x4x24x128xf32, #tpu.memory_space<vmem>>, vector<1x1x16x32xf32>
    %1369 = vector.shape_cast %1368 : vector<1x1x16x32xf32> to vector<16x32xf32>
    %c15_480 = arith.constant 15 : index
    %1370 = memref.load %arg4[%c15_480] : memref<144xf32, #tpu.memory_space<smem>>
    %1371 = vector.broadcast %1370 : f32 to vector<16x32xf32>
    %1372 = arith.mulf %1371, %1369 : vector<16x32xf32>
    %1373 = arith.addf %1355, %1372 : vector<16x32xf32>
    %c51_481 = arith.constant 51 : index
    %1374 = memref.load %arg4[%c51_481] : memref<144xf32, #tpu.memory_space<smem>>
    %1375 = vector.broadcast %1374 : f32 to vector<16x32xf32>
    %1376 = arith.mulf %1375, %1369 : vector<16x32xf32>
    %1377 = arith.addf %1359, %1376 : vector<16x32xf32>
    %c87_482 = arith.constant 87 : index
    %1378 = memref.load %arg4[%c87_482] : memref<144xf32, #tpu.memory_space<smem>>
    %1379 = vector.broadcast %1378 : f32 to vector<16x32xf32>
    %1380 = arith.mulf %1379, %1369 : vector<16x32xf32>
    %1381 = arith.addf %1363, %1380 : vector<16x32xf32>
    %c123_483 = arith.constant 123 : index
    %1382 = memref.load %arg4[%c123_483] : memref<144xf32, #tpu.memory_space<smem>>
    %1383 = vector.broadcast %1382 : f32 to vector<16x32xf32>
    %1384 = arith.mulf %1383, %1369 : vector<16x32xf32>
    %1385 = arith.addf %1367, %1384 : vector<16x32xf32>
    %c0_484 = arith.constant 0 : index
    %c1_485 = arith.constant 1 : index
    %c2_486 = arith.constant 2 : index
    %c1_487 = arith.constant 1 : index
    %1386 = vector.load %arg9[%c0_484, %c1_485, %c2_486, %c1_487] : memref<2x4x24x128xf32, #tpu.memory_space<vmem>>, vector<1x1x16x32xf32>
    %1387 = vector.shape_cast %1386 : vector<1x1x16x32xf32> to vector<16x32xf32>
    %c16_488 = arith.constant 16 : index
    %1388 = memref.load %arg4[%c16_488] : memref<144xf32, #tpu.memory_space<smem>>
    %1389 = vector.broadcast %1388 : f32 to vector<16x32xf32>
    %1390 = arith.mulf %1389, %1387 : vector<16x32xf32>
    %1391 = arith.addf %1373, %1390 : vector<16x32xf32>
    %c52_489 = arith.constant 52 : index
    %1392 = memref.load %arg4[%c52_489] : memref<144xf32, #tpu.memory_space<smem>>
    %1393 = vector.broadcast %1392 : f32 to vector<16x32xf32>
    %1394 = arith.mulf %1393, %1387 : vector<16x32xf32>
    %1395 = arith.addf %1377, %1394 : vector<16x32xf32>
    %c88_490 = arith.constant 88 : index
    %1396 = memref.load %arg4[%c88_490] : memref<144xf32, #tpu.memory_space<smem>>
    %1397 = vector.broadcast %1396 : f32 to vector<16x32xf32>
    %1398 = arith.mulf %1397, %1387 : vector<16x32xf32>
    %1399 = arith.addf %1381, %1398 : vector<16x32xf32>
    %c124_491 = arith.constant 124 : index
    %1400 = memref.load %arg4[%c124_491] : memref<144xf32, #tpu.memory_space<smem>>
    %1401 = vector.broadcast %1400 : f32 to vector<16x32xf32>
    %1402 = arith.mulf %1401, %1387 : vector<16x32xf32>
    %1403 = arith.addf %1385, %1402 : vector<16x32xf32>
    %c0_492 = arith.constant 0 : index
    %c1_493 = arith.constant 1 : index
    %c2_494 = arith.constant 2 : index
    %c2_495 = arith.constant 2 : index
    %1404 = vector.load %arg9[%c0_492, %c1_493, %c2_494, %c2_495] : memref<2x4x24x128xf32, #tpu.memory_space<vmem>>, vector<1x1x16x32xf32>
    %1405 = vector.shape_cast %1404 : vector<1x1x16x32xf32> to vector<16x32xf32>
    %c17_496 = arith.constant 17 : index
    %1406 = memref.load %arg4[%c17_496] : memref<144xf32, #tpu.memory_space<smem>>
    %1407 = vector.broadcast %1406 : f32 to vector<16x32xf32>
    %1408 = arith.mulf %1407, %1405 : vector<16x32xf32>
    %1409 = arith.addf %1391, %1408 : vector<16x32xf32>
    %c53_497 = arith.constant 53 : index
    %1410 = memref.load %arg4[%c53_497] : memref<144xf32, #tpu.memory_space<smem>>
    %1411 = vector.broadcast %1410 : f32 to vector<16x32xf32>
    %1412 = arith.mulf %1411, %1405 : vector<16x32xf32>
    %1413 = arith.addf %1395, %1412 : vector<16x32xf32>
    %c89_498 = arith.constant 89 : index
    %1414 = memref.load %arg4[%c89_498] : memref<144xf32, #tpu.memory_space<smem>>
    %1415 = vector.broadcast %1414 : f32 to vector<16x32xf32>
    %1416 = arith.mulf %1415, %1405 : vector<16x32xf32>
    %1417 = arith.addf %1399, %1416 : vector<16x32xf32>
    %c125_499 = arith.constant 125 : index
    %1418 = memref.load %arg4[%c125_499] : memref<144xf32, #tpu.memory_space<smem>>
    %1419 = vector.broadcast %1418 : f32 to vector<16x32xf32>
    %1420 = arith.mulf %1419, %1405 : vector<16x32xf32>
    %1421 = arith.addf %1403, %1420 : vector<16x32xf32>
    %c0_500 = arith.constant 0 : index
    %c2_501 = arith.constant 2 : index
    %c1_502 = arith.constant 1 : index
    %c0_503 = arith.constant 0 : index
    %1422 = vector.load %arg9[%c0_500, %c2_501, %c1_502, %c0_503] : memref<2x4x24x128xf32, #tpu.memory_space<vmem>>, vector<1x1x16x32xf32>
    %1423 = vector.shape_cast %1422 : vector<1x1x16x32xf32> to vector<16x32xf32>
    %c18_504 = arith.constant 18 : index
    %1424 = memref.load %arg4[%c18_504] : memref<144xf32, #tpu.memory_space<smem>>
    %1425 = vector.broadcast %1424 : f32 to vector<16x32xf32>
    %1426 = arith.mulf %1425, %1423 : vector<16x32xf32>
    %1427 = arith.addf %1409, %1426 : vector<16x32xf32>
    %c54_505 = arith.constant 54 : index
    %1428 = memref.load %arg4[%c54_505] : memref<144xf32, #tpu.memory_space<smem>>
    %1429 = vector.broadcast %1428 : f32 to vector<16x32xf32>
    %1430 = arith.mulf %1429, %1423 : vector<16x32xf32>
    %1431 = arith.addf %1413, %1430 : vector<16x32xf32>
    %c90_506 = arith.constant 90 : index
    %1432 = memref.load %arg4[%c90_506] : memref<144xf32, #tpu.memory_space<smem>>
    %1433 = vector.broadcast %1432 : f32 to vector<16x32xf32>
    %1434 = arith.mulf %1433, %1423 : vector<16x32xf32>
    %1435 = arith.addf %1417, %1434 : vector<16x32xf32>
    %c126_507 = arith.constant 126 : index
    %1436 = memref.load %arg4[%c126_507] : memref<144xf32, #tpu.memory_space<smem>>
    %1437 = vector.broadcast %1436 : f32 to vector<16x32xf32>
    %1438 = arith.mulf %1437, %1423 : vector<16x32xf32>
    %1439 = arith.addf %1421, %1438 : vector<16x32xf32>
    %c0_508 = arith.constant 0 : index
    %c2_509 = arith.constant 2 : index
    %c1_510 = arith.constant 1 : index
    %c1_511 = arith.constant 1 : index
    %1440 = vector.load %arg9[%c0_508, %c2_509, %c1_510, %c1_511] : memref<2x4x24x128xf32, #tpu.memory_space<vmem>>, vector<1x1x16x32xf32>
    %1441 = vector.shape_cast %1440 : vector<1x1x16x32xf32> to vector<16x32xf32>
    %c19_512 = arith.constant 19 : index
    %1442 = memref.load %arg4[%c19_512] : memref<144xf32, #tpu.memory_space<smem>>
    %1443 = vector.broadcast %1442 : f32 to vector<16x32xf32>
    %1444 = arith.mulf %1443, %1441 : vector<16x32xf32>
    %1445 = arith.addf %1427, %1444 : vector<16x32xf32>
    %c55_513 = arith.constant 55 : index
    %1446 = memref.load %arg4[%c55_513] : memref<144xf32, #tpu.memory_space<smem>>
    %1447 = vector.broadcast %1446 : f32 to vector<16x32xf32>
    %1448 = arith.mulf %1447, %1441 : vector<16x32xf32>
    %1449 = arith.addf %1431, %1448 : vector<16x32xf32>
    %c91_514 = arith.constant 91 : index
    %1450 = memref.load %arg4[%c91_514] : memref<144xf32, #tpu.memory_space<smem>>
    %1451 = vector.broadcast %1450 : f32 to vector<16x32xf32>
    %1452 = arith.mulf %1451, %1441 : vector<16x32xf32>
    %1453 = arith.addf %1435, %1452 : vector<16x32xf32>
    %c127_515 = arith.constant 127 : index
    %1454 = memref.load %arg4[%c127_515] : memref<144xf32, #tpu.memory_space<smem>>
    %1455 = vector.broadcast %1454 : f32 to vector<16x32xf32>
    %1456 = arith.mulf %1455, %1441 : vector<16x32xf32>
    %1457 = arith.addf %1439, %1456 : vector<16x32xf32>
    %c0_516 = arith.constant 0 : index
    %c2_517 = arith.constant 2 : index
    %c1_518 = arith.constant 1 : index
    %c2_519 = arith.constant 2 : index
    %1458 = vector.load %arg9[%c0_516, %c2_517, %c1_518, %c2_519] : memref<2x4x24x128xf32, #tpu.memory_space<vmem>>, vector<1x1x16x32xf32>
    %1459 = vector.shape_cast %1458 : vector<1x1x16x32xf32> to vector<16x32xf32>
    %c20_520 = arith.constant 20 : index
    %1460 = memref.load %arg4[%c20_520] : memref<144xf32, #tpu.memory_space<smem>>
    %1461 = vector.broadcast %1460 : f32 to vector<16x32xf32>
    %1462 = arith.mulf %1461, %1459 : vector<16x32xf32>
    %1463 = arith.addf %1445, %1462 : vector<16x32xf32>
    %c56_521 = arith.constant 56 : index
    %1464 = memref.load %arg4[%c56_521] : memref<144xf32, #tpu.memory_space<smem>>
    %1465 = vector.broadcast %1464 : f32 to vector<16x32xf32>
    %1466 = arith.mulf %1465, %1459 : vector<16x32xf32>
    %1467 = arith.addf %1449, %1466 : vector<16x32xf32>
    %c92_522 = arith.constant 92 : index
    %1468 = memref.load %arg4[%c92_522] : memref<144xf32, #tpu.memory_space<smem>>
    %1469 = vector.broadcast %1468 : f32 to vector<16x32xf32>
    %1470 = arith.mulf %1469, %1459 : vector<16x32xf32>
    %1471 = arith.addf %1453, %1470 : vector<16x32xf32>
    %c128_523 = arith.constant 128 : index
    %1472 = memref.load %arg4[%c128_523] : memref<144xf32, #tpu.memory_space<smem>>
    %1473 = vector.broadcast %1472 : f32 to vector<16x32xf32>
    %1474 = arith.mulf %1473, %1459 : vector<16x32xf32>
    %1475 = arith.addf %1457, %1474 : vector<16x32xf32>
    %c1_524 = arith.constant 1 : index
    %c2_525 = arith.constant 2 : index
    %c1_526 = arith.constant 1 : index
    %c0_527 = arith.constant 0 : index
    %1476 = vector.load %arg9[%c1_524, %c2_525, %c1_526, %c0_527] : memref<2x4x24x128xf32, #tpu.memory_space<vmem>>, vector<1x1x16x32xf32>
    %1477 = vector.shape_cast %1476 : vector<1x1x16x32xf32> to vector<16x32xf32>
    %c21_528 = arith.constant 21 : index
    %1478 = memref.load %arg4[%c21_528] : memref<144xf32, #tpu.memory_space<smem>>
    %1479 = vector.broadcast %1478 : f32 to vector<16x32xf32>
    %1480 = arith.mulf %1479, %1477 : vector<16x32xf32>
    %1481 = arith.addf %1463, %1480 : vector<16x32xf32>
    %c57_529 = arith.constant 57 : index
    %1482 = memref.load %arg4[%c57_529] : memref<144xf32, #tpu.memory_space<smem>>
    %1483 = vector.broadcast %1482 : f32 to vector<16x32xf32>
    %1484 = arith.mulf %1483, %1477 : vector<16x32xf32>
    %1485 = arith.addf %1467, %1484 : vector<16x32xf32>
    %c93_530 = arith.constant 93 : index
    %1486 = memref.load %arg4[%c93_530] : memref<144xf32, #tpu.memory_space<smem>>
    %1487 = vector.broadcast %1486 : f32 to vector<16x32xf32>
    %1488 = arith.mulf %1487, %1477 : vector<16x32xf32>
    %1489 = arith.addf %1471, %1488 : vector<16x32xf32>
    %c129_531 = arith.constant 129 : index
    %1490 = memref.load %arg4[%c129_531] : memref<144xf32, #tpu.memory_space<smem>>
    %1491 = vector.broadcast %1490 : f32 to vector<16x32xf32>
    %1492 = arith.mulf %1491, %1477 : vector<16x32xf32>
    %1493 = arith.addf %1475, %1492 : vector<16x32xf32>
    %c1_532 = arith.constant 1 : index
    %c2_533 = arith.constant 2 : index
    %c1_534 = arith.constant 1 : index
    %c1_535 = arith.constant 1 : index
    %1494 = vector.load %arg9[%c1_532, %c2_533, %c1_534, %c1_535] : memref<2x4x24x128xf32, #tpu.memory_space<vmem>>, vector<1x1x16x32xf32>
    %1495 = vector.shape_cast %1494 : vector<1x1x16x32xf32> to vector<16x32xf32>
    %c22_536 = arith.constant 22 : index
    %1496 = memref.load %arg4[%c22_536] : memref<144xf32, #tpu.memory_space<smem>>
    %1497 = vector.broadcast %1496 : f32 to vector<16x32xf32>
    %1498 = arith.mulf %1497, %1495 : vector<16x32xf32>
    %1499 = arith.addf %1481, %1498 : vector<16x32xf32>
    %c58_537 = arith.constant 58 : index
    %1500 = memref.load %arg4[%c58_537] : memref<144xf32, #tpu.memory_space<smem>>
    %1501 = vector.broadcast %1500 : f32 to vector<16x32xf32>
    %1502 = arith.mulf %1501, %1495 : vector<16x32xf32>
    %1503 = arith.addf %1485, %1502 : vector<16x32xf32>
    %c94_538 = arith.constant 94 : index
    %1504 = memref.load %arg4[%c94_538] : memref<144xf32, #tpu.memory_space<smem>>
    %1505 = vector.broadcast %1504 : f32 to vector<16x32xf32>
    %1506 = arith.mulf %1505, %1495 : vector<16x32xf32>
    %1507 = arith.addf %1489, %1506 : vector<16x32xf32>
    %c130_539 = arith.constant 130 : index
    %1508 = memref.load %arg4[%c130_539] : memref<144xf32, #tpu.memory_space<smem>>
    %1509 = vector.broadcast %1508 : f32 to vector<16x32xf32>
    %1510 = arith.mulf %1509, %1495 : vector<16x32xf32>
    %1511 = arith.addf %1493, %1510 : vector<16x32xf32>
    %c1_540 = arith.constant 1 : index
    %c2_541 = arith.constant 2 : index
    %c1_542 = arith.constant 1 : index
    %c2_543 = arith.constant 2 : index
    %1512 = vector.load %arg9[%c1_540, %c2_541, %c1_542, %c2_543] : memref<2x4x24x128xf32, #tpu.memory_space<vmem>>, vector<1x1x16x32xf32>
    %1513 = vector.shape_cast %1512 : vector<1x1x16x32xf32> to vector<16x32xf32>
    %c23_544 = arith.constant 23 : index
    %1514 = memref.load %arg4[%c23_544] : memref<144xf32, #tpu.memory_space<smem>>
    %1515 = vector.broadcast %1514 : f32 to vector<16x32xf32>
    %1516 = arith.mulf %1515, %1513 : vector<16x32xf32>
    %1517 = arith.addf %1499, %1516 : vector<16x32xf32>
    %c59_545 = arith.constant 59 : index
    %1518 = memref.load %arg4[%c59_545] : memref<144xf32, #tpu.memory_space<smem>>
    %1519 = vector.broadcast %1518 : f32 to vector<16x32xf32>
    %1520 = arith.mulf %1519, %1513 : vector<16x32xf32>
    %1521 = arith.addf %1503, %1520 : vector<16x32xf32>
    %c95_546 = arith.constant 95 : index
    %1522 = memref.load %arg4[%c95_546] : memref<144xf32, #tpu.memory_space<smem>>
    %1523 = vector.broadcast %1522 : f32 to vector<16x32xf32>
    %1524 = arith.mulf %1523, %1513 : vector<16x32xf32>
    %1525 = arith.addf %1507, %1524 : vector<16x32xf32>
    %c131_547 = arith.constant 131 : index
    %1526 = memref.load %arg4[%c131_547] : memref<144xf32, #tpu.memory_space<smem>>
    %1527 = vector.broadcast %1526 : f32 to vector<16x32xf32>
    %1528 = arith.mulf %1527, %1513 : vector<16x32xf32>
    %1529 = arith.addf %1511, %1528 : vector<16x32xf32>
    %c0_548 = arith.constant 0 : index
    %c2_549 = arith.constant 2 : index
    %c2_550 = arith.constant 2 : index
    %c0_551 = arith.constant 0 : index
    %1530 = vector.load %arg9[%c0_548, %c2_549, %c2_550, %c0_551] : memref<2x4x24x128xf32, #tpu.memory_space<vmem>>, vector<1x1x16x32xf32>
    %1531 = vector.shape_cast %1530 : vector<1x1x16x32xf32> to vector<16x32xf32>
    %c24_552 = arith.constant 24 : index
    %1532 = memref.load %arg4[%c24_552] : memref<144xf32, #tpu.memory_space<smem>>
    %1533 = vector.broadcast %1532 : f32 to vector<16x32xf32>
    %1534 = arith.mulf %1533, %1531 : vector<16x32xf32>
    %1535 = arith.addf %1517, %1534 : vector<16x32xf32>
    %c60_553 = arith.constant 60 : index
    %1536 = memref.load %arg4[%c60_553] : memref<144xf32, #tpu.memory_space<smem>>
    %1537 = vector.broadcast %1536 : f32 to vector<16x32xf32>
    %1538 = arith.mulf %1537, %1531 : vector<16x32xf32>
    %1539 = arith.addf %1521, %1538 : vector<16x32xf32>
    %c96_554 = arith.constant 96 : index
    %1540 = memref.load %arg4[%c96_554] : memref<144xf32, #tpu.memory_space<smem>>
    %1541 = vector.broadcast %1540 : f32 to vector<16x32xf32>
    %1542 = arith.mulf %1541, %1531 : vector<16x32xf32>
    %1543 = arith.addf %1525, %1542 : vector<16x32xf32>
    %c132_555 = arith.constant 132 : index
    %1544 = memref.load %arg4[%c132_555] : memref<144xf32, #tpu.memory_space<smem>>
    %1545 = vector.broadcast %1544 : f32 to vector<16x32xf32>
    %1546 = arith.mulf %1545, %1531 : vector<16x32xf32>
    %1547 = arith.addf %1529, %1546 : vector<16x32xf32>
    %c0_556 = arith.constant 0 : index
    %c2_557 = arith.constant 2 : index
    %c2_558 = arith.constant 2 : index
    %c1_559 = arith.constant 1 : index
    %1548 = vector.load %arg9[%c0_556, %c2_557, %c2_558, %c1_559] : memref<2x4x24x128xf32, #tpu.memory_space<vmem>>, vector<1x1x16x32xf32>
    %1549 = vector.shape_cast %1548 : vector<1x1x16x32xf32> to vector<16x32xf32>
    %c25_560 = arith.constant 25 : index
    %1550 = memref.load %arg4[%c25_560] : memref<144xf32, #tpu.memory_space<smem>>
    %1551 = vector.broadcast %1550 : f32 to vector<16x32xf32>
    %1552 = arith.mulf %1551, %1549 : vector<16x32xf32>
    %1553 = arith.addf %1535, %1552 : vector<16x32xf32>
    %c61_561 = arith.constant 61 : index
    %1554 = memref.load %arg4[%c61_561] : memref<144xf32, #tpu.memory_space<smem>>
    %1555 = vector.broadcast %1554 : f32 to vector<16x32xf32>
    %1556 = arith.mulf %1555, %1549 : vector<16x32xf32>
    %1557 = arith.addf %1539, %1556 : vector<16x32xf32>
    %c97_562 = arith.constant 97 : index
    %1558 = memref.load %arg4[%c97_562] : memref<144xf32, #tpu.memory_space<smem>>
    %1559 = vector.broadcast %1558 : f32 to vector<16x32xf32>
    %1560 = arith.mulf %1559, %1549 : vector<16x32xf32>
    %1561 = arith.addf %1543, %1560 : vector<16x32xf32>
    %c133_563 = arith.constant 133 : index
    %1562 = memref.load %arg4[%c133_563] : memref<144xf32, #tpu.memory_space<smem>>
    %1563 = vector.broadcast %1562 : f32 to vector<16x32xf32>
    %1564 = arith.mulf %1563, %1549 : vector<16x32xf32>
    %1565 = arith.addf %1547, %1564 : vector<16x32xf32>
    %c0_564 = arith.constant 0 : index
    %c2_565 = arith.constant 2 : index
    %c2_566 = arith.constant 2 : index
    %c2_567 = arith.constant 2 : index
    %1566 = vector.load %arg9[%c0_564, %c2_565, %c2_566, %c2_567] : memref<2x4x24x128xf32, #tpu.memory_space<vmem>>, vector<1x1x16x32xf32>
    %1567 = vector.shape_cast %1566 : vector<1x1x16x32xf32> to vector<16x32xf32>
    %c26_568 = arith.constant 26 : index
    %1568 = memref.load %arg4[%c26_568] : memref<144xf32, #tpu.memory_space<smem>>
    %1569 = vector.broadcast %1568 : f32 to vector<16x32xf32>
    %1570 = arith.mulf %1569, %1567 : vector<16x32xf32>
    %1571 = arith.addf %1553, %1570 : vector<16x32xf32>
    %c62_569 = arith.constant 62 : index
    %1572 = memref.load %arg4[%c62_569] : memref<144xf32, #tpu.memory_space<smem>>
    %1573 = vector.broadcast %1572 : f32 to vector<16x32xf32>
    %1574 = arith.mulf %1573, %1567 : vector<16x32xf32>
    %1575 = arith.addf %1557, %1574 : vector<16x32xf32>
    %c98_570 = arith.constant 98 : index
    %1576 = memref.load %arg4[%c98_570] : memref<144xf32, #tpu.memory_space<smem>>
    %1577 = vector.broadcast %1576 : f32 to vector<16x32xf32>
    %1578 = arith.mulf %1577, %1567 : vector<16x32xf32>
    %1579 = arith.addf %1561, %1578 : vector<16x32xf32>
    %c134_571 = arith.constant 134 : index
    %1580 = memref.load %arg4[%c134_571] : memref<144xf32, #tpu.memory_space<smem>>
    %1581 = vector.broadcast %1580 : f32 to vector<16x32xf32>
    %1582 = arith.mulf %1581, %1567 : vector<16x32xf32>
    %1583 = arith.addf %1565, %1582 : vector<16x32xf32>
    %c0_572 = arith.constant 0 : index
    %c3_573 = arith.constant 3 : index
    %c1_574 = arith.constant 1 : index
    %c0_575 = arith.constant 0 : index
    %1584 = vector.load %arg9[%c0_572, %c3_573, %c1_574, %c0_575] : memref<2x4x24x128xf32, #tpu.memory_space<vmem>>, vector<1x1x16x32xf32>
    %1585 = vector.shape_cast %1584 : vector<1x1x16x32xf32> to vector<16x32xf32>
    %c27_576 = arith.constant 27 : index
    %1586 = memref.load %arg4[%c27_576] : memref<144xf32, #tpu.memory_space<smem>>
    %1587 = vector.broadcast %1586 : f32 to vector<16x32xf32>
    %1588 = arith.mulf %1587, %1585 : vector<16x32xf32>
    %1589 = arith.addf %1571, %1588 : vector<16x32xf32>
    %c63_577 = arith.constant 63 : index
    %1590 = memref.load %arg4[%c63_577] : memref<144xf32, #tpu.memory_space<smem>>
    %1591 = vector.broadcast %1590 : f32 to vector<16x32xf32>
    %1592 = arith.mulf %1591, %1585 : vector<16x32xf32>
    %1593 = arith.addf %1575, %1592 : vector<16x32xf32>
    %c99_578 = arith.constant 99 : index
    %1594 = memref.load %arg4[%c99_578] : memref<144xf32, #tpu.memory_space<smem>>
    %1595 = vector.broadcast %1594 : f32 to vector<16x32xf32>
    %1596 = arith.mulf %1595, %1585 : vector<16x32xf32>
    %1597 = arith.addf %1579, %1596 : vector<16x32xf32>
    %c135_579 = arith.constant 135 : index
    %1598 = memref.load %arg4[%c135_579] : memref<144xf32, #tpu.memory_space<smem>>
    %1599 = vector.broadcast %1598 : f32 to vector<16x32xf32>
    %1600 = arith.mulf %1599, %1585 : vector<16x32xf32>
    %1601 = arith.addf %1583, %1600 : vector<16x32xf32>
    %c0_580 = arith.constant 0 : index
    %c3_581 = arith.constant 3 : index
    %c1_582 = arith.constant 1 : index
    %c1_583 = arith.constant 1 : index
    %1602 = vector.load %arg9[%c0_580, %c3_581, %c1_582, %c1_583] : memref<2x4x24x128xf32, #tpu.memory_space<vmem>>, vector<1x1x16x32xf32>
    %1603 = vector.shape_cast %1602 : vector<1x1x16x32xf32> to vector<16x32xf32>
    %c28_584 = arith.constant 28 : index
    %1604 = memref.load %arg4[%c28_584] : memref<144xf32, #tpu.memory_space<smem>>
    %1605 = vector.broadcast %1604 : f32 to vector<16x32xf32>
    %1606 = arith.mulf %1605, %1603 : vector<16x32xf32>
    %1607 = arith.addf %1589, %1606 : vector<16x32xf32>
    %c64_585 = arith.constant 64 : index
    %1608 = memref.load %arg4[%c64_585] : memref<144xf32, #tpu.memory_space<smem>>
    %1609 = vector.broadcast %1608 : f32 to vector<16x32xf32>
    %1610 = arith.mulf %1609, %1603 : vector<16x32xf32>
    %1611 = arith.addf %1593, %1610 : vector<16x32xf32>
    %c100_586 = arith.constant 100 : index
    %1612 = memref.load %arg4[%c100_586] : memref<144xf32, #tpu.memory_space<smem>>
    %1613 = vector.broadcast %1612 : f32 to vector<16x32xf32>
    %1614 = arith.mulf %1613, %1603 : vector<16x32xf32>
    %1615 = arith.addf %1597, %1614 : vector<16x32xf32>
    %c136_587 = arith.constant 136 : index
    %1616 = memref.load %arg4[%c136_587] : memref<144xf32, #tpu.memory_space<smem>>
    %1617 = vector.broadcast %1616 : f32 to vector<16x32xf32>
    %1618 = arith.mulf %1617, %1603 : vector<16x32xf32>
    %1619 = arith.addf %1601, %1618 : vector<16x32xf32>
    %c0_588 = arith.constant 0 : index
    %c3_589 = arith.constant 3 : index
    %c1_590 = arith.constant 1 : index
    %c2_591 = arith.constant 2 : index
    %1620 = vector.load %arg9[%c0_588, %c3_589, %c1_590, %c2_591] : memref<2x4x24x128xf32, #tpu.memory_space<vmem>>, vector<1x1x16x32xf32>
    %1621 = vector.shape_cast %1620 : vector<1x1x16x32xf32> to vector<16x32xf32>
    %c29_592 = arith.constant 29 : index
    %1622 = memref.load %arg4[%c29_592] : memref<144xf32, #tpu.memory_space<smem>>
    %1623 = vector.broadcast %1622 : f32 to vector<16x32xf32>
    %1624 = arith.mulf %1623, %1621 : vector<16x32xf32>
    %1625 = arith.addf %1607, %1624 : vector<16x32xf32>
    %c65_593 = arith.constant 65 : index
    %1626 = memref.load %arg4[%c65_593] : memref<144xf32, #tpu.memory_space<smem>>
    %1627 = vector.broadcast %1626 : f32 to vector<16x32xf32>
    %1628 = arith.mulf %1627, %1621 : vector<16x32xf32>
    %1629 = arith.addf %1611, %1628 : vector<16x32xf32>
    %c101_594 = arith.constant 101 : index
    %1630 = memref.load %arg4[%c101_594] : memref<144xf32, #tpu.memory_space<smem>>
    %1631 = vector.broadcast %1630 : f32 to vector<16x32xf32>
    %1632 = arith.mulf %1631, %1621 : vector<16x32xf32>
    %1633 = arith.addf %1615, %1632 : vector<16x32xf32>
    %c137_595 = arith.constant 137 : index
    %1634 = memref.load %arg4[%c137_595] : memref<144xf32, #tpu.memory_space<smem>>
    %1635 = vector.broadcast %1634 : f32 to vector<16x32xf32>
    %1636 = arith.mulf %1635, %1621 : vector<16x32xf32>
    %1637 = arith.addf %1619, %1636 : vector<16x32xf32>
    %c1_596 = arith.constant 1 : index
    %c3_597 = arith.constant 3 : index
    %c1_598 = arith.constant 1 : index
    %c0_599 = arith.constant 0 : index
    %1638 = vector.load %arg9[%c1_596, %c3_597, %c1_598, %c0_599] : memref<2x4x24x128xf32, #tpu.memory_space<vmem>>, vector<1x1x16x32xf32>
    %1639 = vector.shape_cast %1638 : vector<1x1x16x32xf32> to vector<16x32xf32>
    %c30_600 = arith.constant 30 : index
    %1640 = memref.load %arg4[%c30_600] : memref<144xf32, #tpu.memory_space<smem>>
    %1641 = vector.broadcast %1640 : f32 to vector<16x32xf32>
    %1642 = arith.mulf %1641, %1639 : vector<16x32xf32>
    %1643 = arith.addf %1625, %1642 : vector<16x32xf32>
    %c66_601 = arith.constant 66 : index
    %1644 = memref.load %arg4[%c66_601] : memref<144xf32, #tpu.memory_space<smem>>
    %1645 = vector.broadcast %1644 : f32 to vector<16x32xf32>
    %1646 = arith.mulf %1645, %1639 : vector<16x32xf32>
    %1647 = arith.addf %1629, %1646 : vector<16x32xf32>
    %c102_602 = arith.constant 102 : index
    %1648 = memref.load %arg4[%c102_602] : memref<144xf32, #tpu.memory_space<smem>>
    %1649 = vector.broadcast %1648 : f32 to vector<16x32xf32>
    %1650 = arith.mulf %1649, %1639 : vector<16x32xf32>
    %1651 = arith.addf %1633, %1650 : vector<16x32xf32>
    %c138_603 = arith.constant 138 : index
    %1652 = memref.load %arg4[%c138_603] : memref<144xf32, #tpu.memory_space<smem>>
    %1653 = vector.broadcast %1652 : f32 to vector<16x32xf32>
    %1654 = arith.mulf %1653, %1639 : vector<16x32xf32>
    %1655 = arith.addf %1637, %1654 : vector<16x32xf32>
    %c1_604 = arith.constant 1 : index
    %c3_605 = arith.constant 3 : index
    %c1_606 = arith.constant 1 : index
    %c1_607 = arith.constant 1 : index
    %1656 = vector.load %arg9[%c1_604, %c3_605, %c1_606, %c1_607] : memref<2x4x24x128xf32, #tpu.memory_space<vmem>>, vector<1x1x16x32xf32>
    %1657 = vector.shape_cast %1656 : vector<1x1x16x32xf32> to vector<16x32xf32>
    %c31_608 = arith.constant 31 : index
    %1658 = memref.load %arg4[%c31_608] : memref<144xf32, #tpu.memory_space<smem>>
    %1659 = vector.broadcast %1658 : f32 to vector<16x32xf32>
    %1660 = arith.mulf %1659, %1657 : vector<16x32xf32>
    %1661 = arith.addf %1643, %1660 : vector<16x32xf32>
    %c67_609 = arith.constant 67 : index
    %1662 = memref.load %arg4[%c67_609] : memref<144xf32, #tpu.memory_space<smem>>
    %1663 = vector.broadcast %1662 : f32 to vector<16x32xf32>
    %1664 = arith.mulf %1663, %1657 : vector<16x32xf32>
    %1665 = arith.addf %1647, %1664 : vector<16x32xf32>
    %c103_610 = arith.constant 103 : index
    %1666 = memref.load %arg4[%c103_610] : memref<144xf32, #tpu.memory_space<smem>>
    %1667 = vector.broadcast %1666 : f32 to vector<16x32xf32>
    %1668 = arith.mulf %1667, %1657 : vector<16x32xf32>
    %1669 = arith.addf %1651, %1668 : vector<16x32xf32>
    %c139_611 = arith.constant 139 : index
    %1670 = memref.load %arg4[%c139_611] : memref<144xf32, #tpu.memory_space<smem>>
    %1671 = vector.broadcast %1670 : f32 to vector<16x32xf32>
    %1672 = arith.mulf %1671, %1657 : vector<16x32xf32>
    %1673 = arith.addf %1655, %1672 : vector<16x32xf32>
    %c1_612 = arith.constant 1 : index
    %c3_613 = arith.constant 3 : index
    %c1_614 = arith.constant 1 : index
    %c2_615 = arith.constant 2 : index
    %1674 = vector.load %arg9[%c1_612, %c3_613, %c1_614, %c2_615] : memref<2x4x24x128xf32, #tpu.memory_space<vmem>>, vector<1x1x16x32xf32>
    %1675 = vector.shape_cast %1674 : vector<1x1x16x32xf32> to vector<16x32xf32>
    %c32_616 = arith.constant 32 : index
    %1676 = memref.load %arg4[%c32_616] : memref<144xf32, #tpu.memory_space<smem>>
    %1677 = vector.broadcast %1676 : f32 to vector<16x32xf32>
    %1678 = arith.mulf %1677, %1675 : vector<16x32xf32>
    %1679 = arith.addf %1661, %1678 : vector<16x32xf32>
    %c68_617 = arith.constant 68 : index
    %1680 = memref.load %arg4[%c68_617] : memref<144xf32, #tpu.memory_space<smem>>
    %1681 = vector.broadcast %1680 : f32 to vector<16x32xf32>
    %1682 = arith.mulf %1681, %1675 : vector<16x32xf32>
    %1683 = arith.addf %1665, %1682 : vector<16x32xf32>
    %c104_618 = arith.constant 104 : index
    %1684 = memref.load %arg4[%c104_618] : memref<144xf32, #tpu.memory_space<smem>>
    %1685 = vector.broadcast %1684 : f32 to vector<16x32xf32>
    %1686 = arith.mulf %1685, %1675 : vector<16x32xf32>
    %1687 = arith.addf %1669, %1686 : vector<16x32xf32>
    %c140_619 = arith.constant 140 : index
    %1688 = memref.load %arg4[%c140_619] : memref<144xf32, #tpu.memory_space<smem>>
    %1689 = vector.broadcast %1688 : f32 to vector<16x32xf32>
    %1690 = arith.mulf %1689, %1675 : vector<16x32xf32>
    %1691 = arith.addf %1673, %1690 : vector<16x32xf32>
    %c0_620 = arith.constant 0 : index
    %c3_621 = arith.constant 3 : index
    %c2_622 = arith.constant 2 : index
    %c0_623 = arith.constant 0 : index
    %1692 = vector.load %arg9[%c0_620, %c3_621, %c2_622, %c0_623] : memref<2x4x24x128xf32, #tpu.memory_space<vmem>>, vector<1x1x16x32xf32>
    %1693 = vector.shape_cast %1692 : vector<1x1x16x32xf32> to vector<16x32xf32>
    %c33_624 = arith.constant 33 : index
    %1694 = memref.load %arg4[%c33_624] : memref<144xf32, #tpu.memory_space<smem>>
    %1695 = vector.broadcast %1694 : f32 to vector<16x32xf32>
    %1696 = arith.mulf %1695, %1693 : vector<16x32xf32>
    %1697 = arith.addf %1679, %1696 : vector<16x32xf32>
    %c69_625 = arith.constant 69 : index
    %1698 = memref.load %arg4[%c69_625] : memref<144xf32, #tpu.memory_space<smem>>
    %1699 = vector.broadcast %1698 : f32 to vector<16x32xf32>
    %1700 = arith.mulf %1699, %1693 : vector<16x32xf32>
    %1701 = arith.addf %1683, %1700 : vector<16x32xf32>
    %c105_626 = arith.constant 105 : index
    %1702 = memref.load %arg4[%c105_626] : memref<144xf32, #tpu.memory_space<smem>>
    %1703 = vector.broadcast %1702 : f32 to vector<16x32xf32>
    %1704 = arith.mulf %1703, %1693 : vector<16x32xf32>
    %1705 = arith.addf %1687, %1704 : vector<16x32xf32>
    %c141_627 = arith.constant 141 : index
    %1706 = memref.load %arg4[%c141_627] : memref<144xf32, #tpu.memory_space<smem>>
    %1707 = vector.broadcast %1706 : f32 to vector<16x32xf32>
    %1708 = arith.mulf %1707, %1693 : vector<16x32xf32>
    %1709 = arith.addf %1691, %1708 : vector<16x32xf32>
    %c0_628 = arith.constant 0 : index
    %c3_629 = arith.constant 3 : index
    %c2_630 = arith.constant 2 : index
    %c1_631 = arith.constant 1 : index
    %1710 = vector.load %arg9[%c0_628, %c3_629, %c2_630, %c1_631] : memref<2x4x24x128xf32, #tpu.memory_space<vmem>>, vector<1x1x16x32xf32>
    %1711 = vector.shape_cast %1710 : vector<1x1x16x32xf32> to vector<16x32xf32>
    %c34_632 = arith.constant 34 : index
    %1712 = memref.load %arg4[%c34_632] : memref<144xf32, #tpu.memory_space<smem>>
    %1713 = vector.broadcast %1712 : f32 to vector<16x32xf32>
    %1714 = arith.mulf %1713, %1711 : vector<16x32xf32>
    %1715 = arith.addf %1697, %1714 : vector<16x32xf32>
    %c70_633 = arith.constant 70 : index
    %1716 = memref.load %arg4[%c70_633] : memref<144xf32, #tpu.memory_space<smem>>
    %1717 = vector.broadcast %1716 : f32 to vector<16x32xf32>
    %1718 = arith.mulf %1717, %1711 : vector<16x32xf32>
    %1719 = arith.addf %1701, %1718 : vector<16x32xf32>
    %c106_634 = arith.constant 106 : index
    %1720 = memref.load %arg4[%c106_634] : memref<144xf32, #tpu.memory_space<smem>>
    %1721 = vector.broadcast %1720 : f32 to vector<16x32xf32>
    %1722 = arith.mulf %1721, %1711 : vector<16x32xf32>
    %1723 = arith.addf %1705, %1722 : vector<16x32xf32>
    %c142_635 = arith.constant 142 : index
    %1724 = memref.load %arg4[%c142_635] : memref<144xf32, #tpu.memory_space<smem>>
    %1725 = vector.broadcast %1724 : f32 to vector<16x32xf32>
    %1726 = arith.mulf %1725, %1711 : vector<16x32xf32>
    %1727 = arith.addf %1709, %1726 : vector<16x32xf32>
    %c0_636 = arith.constant 0 : index
    %c3_637 = arith.constant 3 : index
    %c2_638 = arith.constant 2 : index
    %c2_639 = arith.constant 2 : index
    %1728 = vector.load %arg9[%c0_636, %c3_637, %c2_638, %c2_639] : memref<2x4x24x128xf32, #tpu.memory_space<vmem>>, vector<1x1x16x32xf32>
    %1729 = vector.shape_cast %1728 : vector<1x1x16x32xf32> to vector<16x32xf32>
    %c35_640 = arith.constant 35 : index
    %1730 = memref.load %arg4[%c35_640] : memref<144xf32, #tpu.memory_space<smem>>
    %1731 = vector.broadcast %1730 : f32 to vector<16x32xf32>
    %1732 = arith.mulf %1731, %1729 : vector<16x32xf32>
    %1733 = arith.addf %1715, %1732 : vector<16x32xf32>
    %c71_641 = arith.constant 71 : index
    %1734 = memref.load %arg4[%c71_641] : memref<144xf32, #tpu.memory_space<smem>>
    %1735 = vector.broadcast %1734 : f32 to vector<16x32xf32>
    %1736 = arith.mulf %1735, %1729 : vector<16x32xf32>
    %1737 = arith.addf %1719, %1736 : vector<16x32xf32>
    %c107_642 = arith.constant 107 : index
    %1738 = memref.load %arg4[%c107_642] : memref<144xf32, #tpu.memory_space<smem>>
    %1739 = vector.broadcast %1738 : f32 to vector<16x32xf32>
    %1740 = arith.mulf %1739, %1729 : vector<16x32xf32>
    %1741 = arith.addf %1723, %1740 : vector<16x32xf32>
    %c143_643 = arith.constant 143 : index
    %1742 = memref.load %arg4[%c143_643] : memref<144xf32, #tpu.memory_space<smem>>
    %1743 = vector.broadcast %1742 : f32 to vector<16x32xf32>
    %1744 = arith.mulf %1743, %1729 : vector<16x32xf32>
    %1745 = arith.addf %1727, %1744 : vector<16x32xf32>
    %cst_644 = arith.constant 0.000000e+00 : f32
    %1746 = vector.broadcast %cst_644 : f32 to vector<16x32xf32>
    %1747 = arith.maximumf %1733, %1746 : vector<16x32xf32>
    %cst_645 = arith.constant 0.000000e+00 : f32
    %1748 = vector.broadcast %cst_645 : f32 to vector<16x32xf32>
    %1749 = arith.maximumf %1737, %1748 : vector<16x32xf32>
    %cst_646 = arith.constant 0.000000e+00 : f32
    %1750 = vector.broadcast %cst_646 : f32 to vector<16x32xf32>
    %1751 = arith.maximumf %1741, %1750 : vector<16x32xf32>
    %cst_647 = arith.constant 0.000000e+00 : f32
    %1752 = vector.broadcast %cst_647 : f32 to vector<16x32xf32>
    %1753 = arith.maximumf %1745, %1752 : vector<16x32xf32>
    %cst_648 = arith.constant 0.000000e+00 : f32
    %1754 = vector.broadcast %cst_648 : f32 to vector<16x32xf32>
    %c0_649 = arith.constant 0 : index
    %1755 = memref.load %arg7[%c0_649] : memref<3xf32, #tpu.memory_space<smem>>
    %1756 = vector.broadcast %1755 : f32 to vector<16x32xf32>
    %1757 = arith.addf %1754, %1756 : vector<16x32xf32>
    %c0_650 = arith.constant 0 : index
    %1758 = memref.load %arg6[%c0_650] : memref<12xf32, #tpu.memory_space<smem>>
    %1759 = vector.broadcast %1758 : f32 to vector<16x32xf32>
    %1760 = arith.mulf %1759, %1747 : vector<16x32xf32>
    %1761 = arith.addf %1757, %1760 : vector<16x32xf32>
    %c1_651 = arith.constant 1 : index
    %1762 = memref.load %arg6[%c1_651] : memref<12xf32, #tpu.memory_space<smem>>
    %1763 = vector.broadcast %1762 : f32 to vector<16x32xf32>
    %1764 = arith.mulf %1763, %1749 : vector<16x32xf32>
    %1765 = arith.addf %1761, %1764 : vector<16x32xf32>
    %c2_652 = arith.constant 2 : index
    %1766 = memref.load %arg6[%c2_652] : memref<12xf32, #tpu.memory_space<smem>>
    %1767 = vector.broadcast %1766 : f32 to vector<16x32xf32>
    %1768 = arith.mulf %1767, %1751 : vector<16x32xf32>
    %1769 = arith.addf %1765, %1768 : vector<16x32xf32>
    %c3_653 = arith.constant 3 : index
    %1770 = memref.load %arg6[%c3_653] : memref<12xf32, #tpu.memory_space<smem>>
    %1771 = vector.broadcast %1770 : f32 to vector<16x32xf32>
    %1772 = arith.mulf %1771, %1753 : vector<16x32xf32>
    %1773 = arith.addf %1769, %1772 : vector<16x32xf32>
    %c0_654 = arith.constant 0 : index
    %c1_655 = arith.constant 1 : index
    %c0_656 = arith.constant 0 : index
    %c0_657 = arith.constant 0 : index
    %c0_658 = arith.constant 0 : index
    %1774 = vector.load %arg8[%c0_654, %c1_655, %c0_656, %c0_657, %c0_658] : memref<1x2x3x16x32xf32, #tpu.memory_space<vmem>>, vector<1x1x1x16x32xf32>
    %1775 = vector.shape_cast %1774 : vector<1x1x1x16x32xf32> to vector<16x32xf32>
    %1776 = vector.shape_cast %1773 : vector<16x32xf32> to vector<1x1x1x16x32xf32>
    tpu.vector_store %arg8[%c0_654, %c1_655, %c0_656, %c0_657, %c0_658], %1776 {strides = array<i32>} : memref<1x2x3x16x32xf32, #tpu.memory_space<vmem>>, vector<1x1x1x16x32xf32>,
    %cst_659 = arith.constant 0.000000e+00 : f32
    %1777 = vector.broadcast %cst_659 : f32 to vector<16x32xf32>
    %c1_660 = arith.constant 1 : index
    %1778 = memref.load %arg7[%c1_660] : memref<3xf32, #tpu.memory_space<smem>>
    %1779 = vector.broadcast %1778 : f32 to vector<16x32xf32>
    %1780 = arith.addf %1777, %1779 : vector<16x32xf32>
    %c4_661 = arith.constant 4 : index
    %1781 = memref.load %arg6[%c4_661] : memref<12xf32, #tpu.memory_space<smem>>
    %1782 = vector.broadcast %1781 : f32 to vector<16x32xf32>
    %1783 = arith.mulf %1782, %1747 : vector<16x32xf32>
    %1784 = arith.addf %1780, %1783 : vector<16x32xf32>
    %c5_662 = arith.constant 5 : index
    %1785 = memref.load %arg6[%c5_662] : memref<12xf32, #tpu.memory_space<smem>>
    %1786 = vector.broadcast %1785 : f32 to vector<16x32xf32>
    %1787 = arith.mulf %1786, %1749 : vector<16x32xf32>
    %1788 = arith.addf %1784, %1787 : vector<16x32xf32>
    %c6_663 = arith.constant 6 : index
    %1789 = memref.load %arg6[%c6_663] : memref<12xf32, #tpu.memory_space<smem>>
    %1790 = vector.broadcast %1789 : f32 to vector<16x32xf32>
    %1791 = arith.mulf %1790, %1751 : vector<16x32xf32>
    %1792 = arith.addf %1788, %1791 : vector<16x32xf32>
    %c7_664 = arith.constant 7 : index
    %1793 = memref.load %arg6[%c7_664] : memref<12xf32, #tpu.memory_space<smem>>
    %1794 = vector.broadcast %1793 : f32 to vector<16x32xf32>
    %1795 = arith.mulf %1794, %1753 : vector<16x32xf32>
    %1796 = arith.addf %1792, %1795 : vector<16x32xf32>
    %c0_665 = arith.constant 0 : index
    %c1_666 = arith.constant 1 : index
    %c1_667 = arith.constant 1 : index
    %c0_668 = arith.constant 0 : index
    %c0_669 = arith.constant 0 : index
    %1797 = vector.load %arg8[%c0_665, %c1_666, %c1_667, %c0_668, %c0_669] : memref<1x2x3x16x32xf32, #tpu.memory_space<vmem>>, vector<1x1x1x16x32xf32>
    %1798 = vector.shape_cast %1797 : vector<1x1x1x16x32xf32> to vector<16x32xf32>
    %1799 = vector.shape_cast %1796 : vector<16x32xf32> to vector<1x1x1x16x32xf32>
    tpu.vector_store %arg8[%c0_665, %c1_666, %c1_667, %c0_668, %c0_669], %1799 {strides = array<i32>} : memref<1x2x3x16x32xf32, #tpu.memory_space<vmem>>, vector<1x1x1x16x32xf32>,
    %cst_670 = arith.constant 0.000000e+00 : f32
    %1800 = vector.broadcast %cst_670 : f32 to vector<16x32xf32>
    %c2_671 = arith.constant 2 : index
    %1801 = memref.load %arg7[%c2_671] : memref<3xf32, #tpu.memory_space<smem>>
    %1802 = vector.broadcast %1801 : f32 to vector<16x32xf32>
    %1803 = arith.addf %1800, %1802 : vector<16x32xf32>
    %c8_672 = arith.constant 8 : index
    %1804 = memref.load %arg6[%c8_672] : memref<12xf32, #tpu.memory_space<smem>>
    %1805 = vector.broadcast %1804 : f32 to vector<16x32xf32>
    %1806 = arith.mulf %1805, %1747 : vector<16x32xf32>
    %1807 = arith.addf %1803, %1806 : vector<16x32xf32>
    %c9_673 = arith.constant 9 : index
    %1808 = memref.load %arg6[%c9_673] : memref<12xf32, #tpu.memory_space<smem>>
    %1809 = vector.broadcast %1808 : f32 to vector<16x32xf32>
    %1810 = arith.mulf %1809, %1749 : vector<16x32xf32>
    %1811 = arith.addf %1807, %1810 : vector<16x32xf32>
    %c10_674 = arith.constant 10 : index
    %1812 = memref.load %arg6[%c10_674] : memref<12xf32, #tpu.memory_space<smem>>
    %1813 = vector.broadcast %1812 : f32 to vector<16x32xf32>
    %1814 = arith.mulf %1813, %1751 : vector<16x32xf32>
    %1815 = arith.addf %1811, %1814 : vector<16x32xf32>
    %c11_675 = arith.constant 11 : index
    %1816 = memref.load %arg6[%c11_675] : memref<12xf32, #tpu.memory_space<smem>>
    %1817 = vector.broadcast %1816 : f32 to vector<16x32xf32>
    %1818 = arith.mulf %1817, %1753 : vector<16x32xf32>
    %1819 = arith.addf %1815, %1818 : vector<16x32xf32>
    %c0_676 = arith.constant 0 : index
    %c1_677 = arith.constant 1 : index
    %c2_678 = arith.constant 2 : index
    %c0_679 = arith.constant 0 : index
    %c0_680 = arith.constant 0 : index
    %1820 = vector.load %arg8[%c0_676, %c1_677, %c2_678, %c0_679, %c0_680] : memref<1x2x3x16x32xf32, #tpu.memory_space<vmem>>, vector<1x1x1x16x32xf32>
    %1821 = vector.shape_cast %1820 : vector<1x1x1x16x32xf32> to vector<16x32xf32>
    %1822 = vector.shape_cast %1819 : vector<16x32xf32> to vector<1x1x1x16x32xf32>
    tpu.vector_store %arg8[%c0_676, %c1_677, %c2_678, %c0_679, %c0_680], %1822 {strides = array<i32>} : memref<1x2x3x16x32xf32, #tpu.memory_space<vmem>>, vector<1x1x1x16x32xf32>,
    return
  }
  func.func @transform_0(%arg0: i32) -> (i32, i32, i32, i32) {
    %c0_i32 = arith.constant 0 : i32
    %c0_i32_0 = arith.constant 0 : i32
    %c0_i32_1 = arith.constant 0 : i32
    %c0_i32_2 = arith.constant 0 : i32
    return %arg0, %c0_i32, %c0_i32_0, %c0_i32_1 : i32, i32, i32, i32
  }
  func.func @transform_1(%arg0: i32) -> i32 {
    %c0_i32 = arith.constant 0 : i32
    %c0_i32_0 = arith.constant 0 : i32
    return %c0_i32 : i32
  }
  func.func @transform_2(%arg0: i32) -> i32 {
    %c0_i32 = arith.constant 0 : i32
    %c0_i32_0 = arith.constant 0 : i32
    return %c0_i32 : i32
  }
  func.func @transform_3(%arg0: i32) -> i32 {
    %c0_i32 = arith.constant 0 : i32
    %c0_i32_0 = arith.constant 0 : i32
    return %c0_i32 : i32
  }
  func.func @transform_4(%arg0: i32) -> i32 {
    %c0_i32 = arith.constant 0 : i32
    %c0_i32_0 = arith.constant 0 : i32
    return %c0_i32 : i32
  }
  func.func @transform_5(%arg0: i32) -> i32 {
    %c0_i32 = arith.constant 0 : i32
    %c0_i32_0 = arith.constant 0 : i32
    return %c0_i32 : i32
  }
  func.func @transform_6(%arg0: i32) -> i32 {
    %c0_i32 = arith.constant 0 : i32
    %c0_i32_0 = arith.constant 0 : i32
    return %c0_i32 : i32
  }
  func.func @transform_7(%arg0: i32) -> (i32, i32, i32, i32, i32) {
    %c0_i32 = arith.constant 0 : i32
    %c0_i32_0 = arith.constant 0 : i32
    %c0_i32_1 = arith.constant 0 : i32
    %c0_i32_2 = arith.constant 0 : i32
    %c0_i32_3 = arith.constant 0 : i32
    return %arg0, %c0_i32, %c0_i32_0, %c0_i32_1, %c0_i32_2 : i32, i32, i32, i32, i32
  }
}

</mosaic_0001>

<bundles_post_ra>
// kernel: last_conv_forward.1
= control target key start
LH: loop header
LB: loop body
LE: loop exit
PB: predicated region body
PF: predicated region fallthrough
CT: control target
= control target key end

     0   :  { %s8761_s0 = inlined_call_operand.vmem [shape: f32[2,4,16,32], index: 0, kind: input, shape index: {}]   ;;  %s8762_s1 = inlined_call_operand.vmem [shape: f32[64], index: 1, kind: input, shape index: {}]   ;;  %s8763_s2 = inlined_call_operand.vmem [shape: f32[4], index: 2, kind: input, shape index: {}]   ;;  %s8764_s3 = inlined_call_operand.vmem [shape: f32[144], index: 3, kind: input, shape index: {}]   ;;  %s8765_s4 = inlined_call_operand.vmem [shape: f32[4], index: 4, kind: input, shape index: {}]   ;;  %s8766_s5 = inlined_call_operand.vmem [shape: f32[12], index: 5, kind: input, shape index: {}]   ;;  %s8767_s6 = inlined_call_operand.vmem [shape: f32[3], index: 6, kind: input, shape index: {}]   ;;  %s8768_s7 = inlined_call_operand.vmem [shape: f32[2,2,3,16,32], index: 7, kind: output, shape index: {}]  }
   0x1   :  { %8797 = sst [smem:[#allocation83_spill]] %s8761_s0 }
   0x2   :  { %12 = vsyncpa [#allocation4], 0 }
   0x3   :  { %13 = vsyncpa [#allocation6], 0 }
   0x4   :  { %14 = vsyncpa [#allocation9], 0 }
   0x5   :  { %15 = vsyncpa [#allocation12], 0  ;;  %s5226_s24 = smov 0  }
   0x6 LB: > { %s228_s27 = sshll.u32 %s8763_s2, 4  ;;  %s5235_s28 = sadd.s32 4294967295, %s5174_s24   ;;  %s5174_s24 = sphi %s5226_s24, %s21_s24   ;;  %s229_s27 = int_to_ptr.vmem [resolvable:$true] %s228_s27 }
   0x7   : > { %p4532_p0 = scmp.ge.s32.totalorder %s5174_s24, 1  ;;  %p204_p1 = scmp.lt.s32.totalorder %s5174_s24, 3 }
   0x8   : > { %p8769_p2 = scmp.eq.s32.totalorder %s5235_s28, 0  ;;  %s250_s9 = sshll.u32 %s8765_s4, 4  ;;  %s5247_s9 = int_to_ptr.vmem [resolvable:$true] %s250_s9 }
   0x9   : > { %p5240_p3 = pnand %p4532_p0, %p204_p1  ;;  %s217_s12 = sshll.u32 %s8762_s1, 4  ;;  %s5254_s12 = int_to_ptr.vmem [resolvable:$true] %s217_s12 }
   0xa   : > { %s239_s16 = sshll.u32 %s8764_s3, 4  ;;  %s261_s19 = sshll.u32 %s8766_s5, 4  ;;  %s5265_s16 = int_to_ptr.vmem [resolvable:$true] %s239_s16  ;;  %s262_s19 = int_to_ptr.vmem [resolvable:$true] %s261_s19 }
   0xb   : > { %p4981_p4 = pneg %p5240_p3  ;;  %s5062_s20 = scalar_lea.vmem %s229_s27, 16 }
   0xc   : > { %p5063_p6 = scmp.ne.s32.totalorder %s229_s27, %s5062_s20  ;;  %p5070_p10 = scmp.lt.s32.totalorder %s229_s27, %s229_s27 }
   0xd   : > { %p5258_p5 = pnand %p8769_p2, %p4981_p4  ;;  %p5071_p11 = scmp.lt.s32.totalorder %s5062_s20, %s5062_s20 }
   0xf   : > { %p5272_p7 = pneg %p5258_p5  ;;  %p5072_p12 = por %p5071_p11, %p5070_p10 }
  0x11   : > { %p5065_p8 = pnand %p5272_p7, %p5063_p6 }
  0x13   : > { %p5066_p9 = pneg %p5065_p8 }
  0x15   : > { %p5073_p13 = pnand %p5072_p12, %p5066_p9 }
  0x17   : > { %5076 = shalt.err (!%p5073_p13)
}
  0x18   : > { %s5176_s22 = smov [#allocation5]   ;;  %s5077_s23 = scalar_lea.vmem %s5247_s9, 16 }
  0x19   : > { %4987 = dma.vmem_to_smem (!%p5258_p5), %s229_s27, 16, %s5176_s22, [#allocation6]  }
  0x1a   : > { %p5078_p0 = scmp.ne.s32.totalorder %s5247_s9, %s5077_s23  ;;  %p5085_p6 = scmp.lt.s32.totalorder %s5247_s9, %s5247_s9 }
  0x1b   : > { %p5086_p8 = scmp.lt.s32.totalorder %s5077_s23, %s5077_s23 }
  0x1c   : > { %p5080_p1 = pnand %p5078_p0, %p5272_p7 }
  0x1d   : > { %p5087_p2 = por %p5086_p8, %p5085_p6 }
  0x1e   : > { %p5081_p4 = pneg %p5080_p1 }
  0x20   : > { %p5088_p10 = pnand %p5087_p2, %p5081_p4 }
  0x22   : > { %5091 = shalt.err (!%p5088_p10)
}
  0x23   : > { %s5177_s25 = smov [#allocation8]   ;;  %s5092_s26 = scalar_lea.vmem %s5254_s12, 16 }
  0x24   : > { %4993 = dma.vmem_to_smem (!%p5258_p5), %s5247_s9, 16, %s5177_s25, [#allocation9]  }
  0x25   : > { %p5093_p9 = scmp.ne.s32.totalorder %s5254_s12, %s5092_s26  ;;  %p5100_p13 = scmp.lt.s32.totalorder %s5254_s12, %s5254_s12 }
  0x26   : > { %p5101_p0 = scmp.lt.s32.totalorder %s5092_s26, %s5092_s26 }
  0x27   : > { %p5095_p11 = pnand %p5093_p9, %p5272_p7 }
  0x28   : > { %p5102_p1 = por %p5101_p0, %p5100_p13 }
  0x29   : > { %p5096_p12 = pneg %p5095_p11 }
  0x2b   : > { %p5103_p2 = pnand %p5102_p1, %p5096_p12 }
  0x2d   : > { %5106 = shalt.err (!%p5103_p2)
}
  0x2e   : > { %s5178_s27 = smov [#allocation3]   ;;  %s5107_s30 = scalar_lea.vmem %s5265_s16, 32 }
  0x2f   : > { %4984 = dma.vmem_to_smem (!%p5258_p5), %s5254_s12, 16, %s5178_s27, [#allocation4]  }
  0x30   : > { %p5108_p4 = scmp.ne.s32.totalorder %s5265_s16, %s5107_s30  ;;  %p5115_p10 = scmp.lt.s32.totalorder %s5265_s16, %s5265_s16 }
  0x31   : > { %p5116_p9 = scmp.lt.s32.totalorder %s5107_s30, %s5107_s30 }
  0x32   : > { %p5110_p6 = pnand %p5108_p4, %p5272_p7 }
  0x33   : > { %p5117_p11 = por %p5116_p9, %p5115_p10 }
  0x34   : > { %p5111_p8 = pneg %p5110_p6 }
  0x36   : > { %p5118_p12 = pnand %p5117_p11, %p5111_p8 }
  0x38   : > { %5121 = shalt.err (!%p5118_p12)
}
  0x39   : > { %s5179_s8 = smov [#allocation7]   ;;  %s5122_s11 = scalar_lea.vmem %s262_s19, 16 }
  0x3a   : > { %4990 = dma.vmem_to_smem (!%p5258_p5), %s5265_s16, 32, %s5179_s8, [#allocation6]  }
  0x3b   : > { %p5123_p13 = scmp.ne.s32.totalorder %s262_s19, %s5122_s11  ;;  %p5130_p2 = scmp.lt.s32.totalorder %s262_s19, %s262_s19 }
  0x3c   : > { %p5131_p4 = scmp.lt.s32.totalorder %s5122_s11, %s5122_s11 }
  0x3d   : > { %p5125_p0 = pnand %p5123_p13, %p5272_p7 }
  0x3e   : > { %p5132_p6 = por %p5131_p4, %p5130_p2 }
  0x3f   : > { %p5126_p1 = pneg %p5125_p0 }
  0x41   : > { %p5133_p8 = pnand %p5132_p6, %p5126_p1 }
  0x43   : > { %5136 = shalt.err (!%p5133_p8)
}
  0x44   : > { %s5180_s12 = smov [#allocation10]   ;;  %s272_s16 = sshll.u32 %s8767_s6, 4  ;;  %s273_s16 = int_to_ptr.vmem [resolvable:$true] %s272_s16 }
  0x45   : > { %4996 = dma.vmem_to_smem (!%p5258_p5), %s262_s19, 16, %s5180_s12, [#allocation9]  }
  0x46   : > { %s5137_s17 = scalar_lea.vmem %s273_s16, 16  ;;  %p5145_p12 = scmp.lt.s32.totalorder %s273_s16, %s273_s16 }
  0x47   : > { %p5138_p10 = scmp.ne.s32.totalorder %s273_s16, %s5137_s17  ;;  %p5146_p13 = scmp.lt.s32.totalorder %s5137_s17, %s5137_s17 }
  0x49   : > { %p5140_p9 = pnand %p5138_p10, %p5272_p7  ;;  %p5147_p0 = por %p5146_p13, %p5145_p12 }
  0x4b   : > { %p5141_p11 = pneg %p5140_p9 }
  0x4d   : > { %p5148_p1 = pnand %p5147_p0, %p5141_p11 }
  0x4f   : > { %5151 = shalt.err (!%p5148_p1)
}
  0x50   : > { %s5181_s18 = smov [#allocation11]   ;;  %293 = sbr.rel (%p5240_p3) target bundleno = 1185 (0x4a1), region = 48 }
  0x51   : > { %4999 = dma.vmem_to_smem (!%p5258_p5), %s273_s16, 16, %s5181_s18, [#allocation12]  }
  0x57   : > { %p8801_p2 = scmp.eq.s32.totalorder %s5235_s28, 0 }
  0x59   : > { %5157 = dma.done.wait (%p8801_p2), [#allocation4], 16   ;;  %p8802_p4 = pmov %p8801_p2 }
  0x5a   : > { %p8803_p7 = pmov %p8801_p2 }
  0x5b   : > { %5159 = vsyncadd (%p8802_p4), [#allocation4], 4294967280 }
  0x5c   : > { %5161 = dma.done.wait (%p8803_p7), [#allocation6], 48   ;;  %p8804_p6 = pmov %p8801_p2 }
  0x5d   : > { %p8805_p8 = pmov %p8801_p2 }
  0x5e   : > { %5163 = vsyncadd (%p8804_p6), [#allocation6], 4294967248 }
  0x5f   : > { %5165 = dma.done.wait (%p8805_p8), [#allocation9], 32   ;;  %p8806_p5 = pmov %p8801_p2 }
  0x60   : > { %p8807_p3 = pmov %p8801_p2 }
  0x61   : > { %5167 = vsyncadd (%p8806_p5), [#allocation9], 4294967264 }
  0x62   : > { %5169 = dma.done.wait (%p8807_p3), [#allocation12], 16   ;;  %p8808_p10 = pmov %p8801_p2 }
  0x64   : > { %5171 = vsyncadd (%p8808_p10), [#allocation12], 4294967280 }
  0x65   : > { %319 = sfence }
  0x66   : > { %p346_p9 = scmp.lt.s32.totalorder %s5235_s28, 1  ;;  %v356_v0 = vlaneseq  ;;  %s5341_s29 = sld [smem:[#allocation3 + $0x4]]  ;;  %v5182_v1 = vmov 0.0   ;;  %vm432_vm1 = vcmask 269320   ;;  %vm2586_vm2 = vcmask 261120  }
  0x67   : > { %s5343_s13 = sld [smem:[#allocation3 + $0x5]]  ;;  %436 = vst [vmem:[#allocation2 + $0x18] sm:$0xff] %v5182_v1  ;;  %437 = vst [vmem:[#allocation2 + $0x20] sm:$0xff] %v5182_v1  ;;  %s4565_s19 = sld [smem:[#allocation3 + $0x14]] }
  0x68   : > { %371 = vst [vmem:[#allocation2] sm:$0xff] %v5182_v1  ;;  %372 = vst [vmem:[#allocation2 + $0x8] sm:$0xff] %v5182_v1  ;;  %s9069_s28 = smov (!%p346_p9, %s5235_s28), 1  ;;  %v357_v2 = vand.u32 127, %v356_v0  ;;  %s4566_s20 = sld [smem:[#allocation3 + $0x15]] }
  0x69   : > { %373 = vst [vmem:[#allocation2 + $0x10] sm:$0xff] %v5182_v1  ;;  %438 = vst [vmem:[#allocation2 + $0x28] sm:$0xff] %v5182_v1  ;;  %s4955_s21 = sshll.u32 %s9069_s28, 6  ;;  %s5351_s22 = sld [smem:[#allocation3 + $0x24]] }
  0x6a   : > { %500 = vst [vmem:[#allocation2 + $0x30] sm:$0xff] %v5182_v1  ;;  %501 = vst [vmem:[#allocation2 + $0x38] sm:$0xff] %v5182_v1  ;;  %s8809_s0 = sld [smem:[#allocation83_spill]]  ;;  %s5358_s27 = sld [smem:[#allocation3 + $0x25]]  ;;  %v358_v5 = vand.u32 1, %v357_v2 }
  0x6b   : > { %502 = vst [vmem:[#allocation2 + $0x40] sm:$0xff] %v5182_v1  ;;  %564 = vst [vmem:[#allocation2 + $0x48] sm:$0xff] %v5182_v1  ;;  %s5366_s30 = sld [smem:[#allocation3 + $0x34]]  ;;  %s5375_s8 = sld [smem:[#allocation3 + $0x35]] }
  0x6c   : > { %565 = vst [vmem:[#allocation2 + $0x50] sm:$0xff] %v5182_v1  ;;  %566 = vst [vmem:[#allocation2 + $0x58] sm:$0xff] %v5182_v1  ;;  %v440_v8 = vstv %s5341_s29  ;;  %s5380_s9 = sld [smem:[#allocation5 + $0x1]]  ;;  %s5382_s10 = sld [smem:[#allocation3]]  ;;  %vm5400_vm0 = vcmp.eq.s32.totalorder %v358_v5, 0 }
  0x6d   : > { %628 = vst [vmem:[#allocation2 + $0x60] sm:$0xff] %v5182_v1  ;;  %629 = vst [vmem:[#allocation2 + $0x68] sm:$0xff] %v5182_v1  ;;  %v444_v11 = vstv %s5343_s13  ;;  %v448_v14 = vstv %s4565_s19  ;;  %s5386_s11 = sld [smem:[#allocation3 + $0x1]]  ;;  %s5388_s12 = sld [smem:[#allocation3 + $0x10]] }
  0x6e   : > { %630 = vst [vmem:[#allocation2 + $0x70] sm:$0xff] %v5182_v1  ;;  %692 = vst [vmem:[#allocation2 + $0x78] sm:$0xff] %v5182_v1  ;;  %v454_v15 = vstv %s4566_s20  ;;  %s5406_s14 = sld [smem:[#allocation3 + $0x11]]  ;;  %s5408_s15 = sld [smem:[#allocation3 + $0x20]] }
  0x6f   : > { %693 = vst [vmem:[#allocation2 + $0x80] sm:$0xff] %v5182_v1  ;;  %694 = vst [vmem:[#allocation2 + $0x88] sm:$0xff] %v5182_v1  ;;  %v460_v23 = vstv %s5351_s22  ;;  %s5426_s16 = sld [smem:[#allocation3 + $0x21]]  ;;  %s5428_s17 = sld [smem:[#allocation3 + $0x30]] }
  0x70   : > { %756 = vst [vmem:[#allocation2 + $0x90] sm:$0xff] %v5182_v1  ;;  %757 = vst [vmem:[#allocation2 + $0x98] sm:$0xff] %v5182_v1  ;;  %s5356_s26 = scalar_lea.vmem %s8809_s0, %s4955_s21  ;;  %v466_v24 = vstv %s5358_s27  ;;  %s5430_s18 = sld [smem:[#allocation3 + $0x31]] }
  0x71   : > { %758 = vst [vmem:[#allocation2 + $0xa0] sm:$0xff] %v5182_v1  ;;  %820 = vst [vmem:[#allocation2 + $0xa8] sm:$0xff] %v5182_v1  ;;  %v5361_v3 = vld [vmem:[%s5356_s26] sm:$0xff]  ;;  %v5364_v4 = vld [vmem:[%s5356_s26 + $0x8] sm:$0xff]  ;;  %v472_v35 = vstv %s5366_s30  ;;  %v478_v36 = vstv %s5375_s8  ;;  %s5440_s29 = sld [smem:[#allocation5]]  ;;  %s5448_s19 = sld [smem:[#allocation3 + $0x9]] }
  0x72   : > { %821 = vst [vmem:[#allocation2 + $0xb0] sm:$0xff] %v5182_v1  ;;  %822 = vst [vmem:[#allocation2 + $0xb8] sm:$0xff] %v5182_v1  ;;  %v5369_v6 = vld [vmem:[%s5356_s26 + $0x10] sm:$0xff]  ;;  %v5372_v7 = vld [vmem:[%s5356_s26 + $0x18] sm:$0xff]  ;;  %v441_v9 = vmul.f32 %v440_v8, %v5361_v3  ;;  %v442_v10 = vmul.f32 %v440_v8, %v5364_v4  ;;  %v445_v12 = vmul.f32 %v444_v11, %v5361_v3  ;;  %v5423_v37 = vstv %s5380_s9  ;;  %s5442_s13 = sld [smem:[#allocation3 + $0x8]]  ;;  %s5458_s21 = sld [smem:[#allocation3 + $0x19]] }
  0x73   : > { %v446_v13 = vmul.f32 %v444_v11, %v5364_v4  ;;  %v5391_v16 = vld [vmem:[%s5356_s26 + $0x20] sm:$0xff]  ;;  %v5394_v17 = vld [vmem:[%s5356_s26 + $0x28] sm:$0xff]  ;;  %v449_v18 = vmul.f32 %v5369_v6, %v448_v14  ;;  %v450_v19 = vmul.f32 %v5372_v7, %v448_v14  ;;  %v455_v20 = vmul.f32 %v5369_v6, %v454_v15  ;;  %v5411_v29 = vld [vmem:[%s5356_s26 + $0x30] sm:$0xff]  ;;  %s5456_s20 = sld [smem:[#allocation3 + $0x18]]  ;;  %s5467_s23 = sld [smem:[#allocation3 + $0x29]] }
  0x74   : > { %v456_v21 = vmul.f32 %v5372_v7, %v454_v15  ;;  %v5414_v30 = vld [vmem:[%s5356_s26 + $0x38] sm:$0xff]  ;;  %v461_v31 = vmul.f32 %v5391_v16, %v460_v23  ;;  %v462_v32 = vmul.f32 %v5394_v17, %v460_v23  ;;  %v467_v33 = vmul.f32 %v5391_v16, %v466_v24  ;;  %s5461_s22 = sld [smem:[#allocation3 + $0x28]]  ;;  %s5183_s26 = smov 1  }
  0x75   : > { %v451_v25 = vadd.f32 %v449_v18, %v441_v9  ;;  %v452_v26 = vadd.f32 %v450_v19, %v442_v10  ;;  %v457_v27 = vadd.f32 %v455_v20, %v445_v12  ;;  %v468_v34 = vmul.f32 %v5394_v17, %v466_v24  ;;  %s5469_s25 = sld [smem:[#allocation3 + $0x38]]  ;;  %s5480_s27 = sld [smem:[#allocation3 + $0x39]] }
  0x76   : > { %v458_v28 = vadd.f32 %v456_v21, %v446_v13  ;;  %v375_v38 = vstv %s5382_s10  ;;  %v473_v43 = vmul.f32 %v5411_v29, %v472_v35  ;;  %v474_v44 = vmul.f32 %v5414_v30, %v472_v35  ;;  %s5482_s30 = sld [smem:[#allocation5 + $0x2]]  ;;  %s5497_s8 = sld [smem:[#allocation3 + $0xc]] }
  0x77   : > { %v463_v39 = vadd.f32 %v461_v31, %v451_v25  ;;  %v464_v40 = vadd.f32 %v462_v32, %v452_v26  ;;  %v469_v41 = vadd.f32 %v467_v33, %v457_v27  ;;  %v479_v45 = vmul.f32 %v5411_v29, %v478_v36  ;;  %s5499_s9 = sld [smem:[#allocation3 + $0xd]]  ;;  %s5505_s10 = sld [smem:[#allocation3 + $0x1c]] }
  0x78   : > { %v470_v42 = vadd.f32 %v468_v34, %v458_v28  ;;  %v480_v46 = vmul.f32 %v5414_v30, %v478_v36  ;;  %v376_v47 = vmul.f32 %v375_v38, %v5361_v3  ;;  %v377_v48 = vmul.f32 %v375_v38, %v5364_v4  ;;  %s7940_s0 = sld [smem:[#allocation7 + $0x6f]] }
  0x79   : > { %v379_v49 = vstv %s5386_s11  ;;  %v383_v50 = vstv %s5388_s12  ;;  %v475_v51 = vadd.f32 %v473_v43, %v463_v39  ;;  %v476_v52 = vadd.f32 %v474_v44, %v464_v40  ;;  %s5512_s11 = sld [smem:[#allocation3 + $0x1d]]  ;;  %s5514_s12 = sld [smem:[#allocation3 + $0x2c]] }
  0x7a   : > { %v481_v53 = vadd.f32 %v479_v45, %v469_v41  ;;  %v482_v54 = vadd.f32 %v480_v46, %v470_v42  ;;  %v380_v55 = vmul.f32 %v379_v49, %v5361_v3  ;;  %v381_v56 = vmul.f32 %v379_v49, %v5364_v4 }
  0x7b   : > { %v384_v57 = vmul.f32 %v5369_v6, %v383_v50  ;;  %v385_v58 = vmul.f32 %v5372_v7, %v383_v50  ;;  %v389_v61 = vstv %s5406_s14  ;;  %v395_v62 = vstv %s5408_s15  ;;  %s5519_s14 = sld [smem:[#allocation3 + $0x2d]]  ;;  %s5521_s15 = sld [smem:[#allocation3 + $0x3c]] }
  0x7c   : > { %v483_v59 = vsel %vm5400_vm0, %v475_v51, %v481_v53  ;;  %v484_v60 = vsel %vm5400_vm0, %v476_v52, %v482_v54  ;;  %v390_v2 = vmul.f32 %v5369_v6, %v389_v61  ;;  %v391_v5 = vmul.f32 %v5372_v7, %v389_v61 }
  0x7d   : > { %v487_v63 = vadd.f32 %v5423_v37, %v483_v59  ;;  %v386_v0 = vadd.f32 %v384_v57, %v376_v47  ;;  %v387_v1 = vadd.f32 %v385_v58, %v377_v48  ;;  %v396_v8 = vmul.f32 %v5391_v16, %v395_v62 }
  0x7e   : > { %v397_v9 = vmul.f32 %v5394_v17, %v395_v62  ;;  %v488_v10 = vadd.f32 %v5423_v37, %v484_v60  ;;  %v401_v11 = vstv %s5426_s16  ;;  %v407_v12 = vstv %s5428_s17  ;;  %s5532_s16 = sld [smem:[#allocation3 + $0x3d]]  ;;  %s5537_s17 = sld [smem:[#allocation5 + $0x3]] }
  0x7f   : > { %491 = vrot.lane.b32.xlu1 %v487_v63, %s5183_s26  ;;  %v413_v13 = vstv %s5430_s18  ;;  %v392_v14 = vadd.f32 %v390_v2, %v380_v55  ;;  %v393_v15 = vadd.f32 %v391_v5, %v381_v56  ;;  %v398_v18 = vadd.f32 %v396_v8, %v386_v0  ;;  %s5552_s18 = sld [smem:[#allocation3 + $0x2]] }
  0x80   : > { %v399_v19 = vadd.f32 %v397_v9, %v387_v1  ;;  %v402_v20 = vmul.f32 %v5391_v16, %v401_v11  ;;  %v403_v21 = vmul.f32 %v5394_v17, %v401_v11  ;;  %v408_v23 = vmul.f32 %v5411_v29, %v407_v12 }
  0x81   : > { %v409_v24 = vmul.f32 %v5414_v30, %v407_v12  ;;  %v414_v25 = vmul.f32 %v5411_v29, %v413_v13  ;;  %v415_v26 = vmul.f32 %v5414_v30, %v413_v13  ;;  %v5487_v27 = vstv %s5440_s29  ;;  %s5554_s29 = sld [smem:[#allocation3 + $0x3]] }
  0x82   : > { %v504_v28 = vstv %s5442_s13  ;;  %v404_v31 = vadd.f32 %v402_v20, %v392_v14  ;;  %v405_v32 = vadd.f32 %v403_v21, %v393_v15  ;;  %v410_v33 = vadd.f32 %v408_v23, %v398_v18  ;;  %s5560_s13 = sld [smem:[#allocation3 + $0x12]] }
  0x83   : > { %v411_v34 = vadd.f32 %v409_v24, %v399_v19  ;;  %493 = vrot.lane.b32.xlu1 %v488_v10, %s5183_s26  ;;  %v506_v35 = vmul.f32 %v504_v28, %v5364_v4  ;;  %v508_v36 = vstv %s5448_s19  ;;  %v512_v38 = vstv %s5456_s20  ;;  %s5562_s19 = sld [smem:[#allocation3 + $0x13]]  ;;  %s5570_s20 = sld [smem:[#allocation3 + $0x22]] }
  0x84   : > { %v518_v39 = vstv %s5458_s21  ;;  %v416_v40 = vadd.f32 %v414_v25, %v404_v31  ;;  %v417_v41 = vadd.f32 %v415_v26, %v405_v32  ;;  %v510_v42 = vmul.f32 %v508_v36, %v5364_v4  ;;  %s5578_s21 = sld [smem:[#allocation3 + $0x23]] }
  0x85   : > { %v514_v43 = vmul.f32 %v5372_v7, %v512_v38  ;;  %v520_v44 = vmul.f32 %v5372_v7, %v518_v39  ;;  %v524_v45 = vstv %s5461_s22  ;;  %v530_v46 = vstv %s5467_s23  ;;  %s5583_s22 = sld [smem:[#allocation3 + $0x32]]  ;;  %s5588_s23 = sld [smem:[#allocation3 + $0x33]] }
  0x86   : > { %v536_v47 = vstv %s5469_s25  ;;  %v418_v48 = vsel %vm5400_vm0, %v410_v33, %v416_v40  ;;  %v419_v49 = vsel %vm5400_vm0, %v411_v34, %v417_v41  ;;  %v526_v51 = vmul.f32 %v5394_v17, %v524_v45  ;;  %s5602_s25 = sld [smem:[#allocation3 + $0x6]] }
  0x87   : > { %v516_v50 = vadd.f32 %v514_v43, %v506_v35  ;;  %v422_v52 = vadd.f32 %v5487_v27, %v418_v48  ;;  %v423_v53 = vadd.f32 %v5487_v27, %v419_v49  ;;  %v522_v54 = vadd.f32 %v520_v44, %v510_v42 }
  0x88   : > { %v532_v55 = vmul.f32 %v5394_v17, %v530_v46  ;;  %v538_v57 = vmul.f32 %v5414_v30, %v536_v47  ;;  %v542_v58 = vstv %s5480_s27  ;;  %v5526_v59 = vstv %s5482_s30  ;;  %s5608_s27 = sld [smem:[#allocation3 + $0x7]]  ;;  %s5610_s30 = sld [smem:[#allocation3 + $0x16]] }
  0x89   : > { %v528_v56 = vadd.f32 %v526_v51, %v516_v50  ;;  %426 = vrot.lane.b32.xlu0 %v422_v52, %s5183_s26  ;;  %v544_v61 = vmul.f32 %v5414_v30, %v542_v58  ;;  %v505_v62 = vmul.f32 %v504_v28, %v5361_v3  ;;  %v509_v63 = vmul.f32 %v508_v36, %v5361_v3 }
  0x8a   : > { %v534_v60 = vadd.f32 %v532_v55, %v522_v54  ;;  %v513_v1 = vmul.f32 %v5369_v6, %v512_v38  ;;  %v519_v2 = vmul.f32 %v5369_v6, %v518_v39  ;;  %v525_v5 = vmul.f32 %v5391_v16, %v524_v45 }
  0x8b   : > { %v540_v0 = vadd.f32 %v538_v57, %v528_v56  ;;  %v531_v9 = vmul.f32 %v5391_v16, %v530_v46  ;;  %v537_v10 = vmul.f32 %v5411_v29, %v536_v47  ;;  %v543_v11 = vmul.f32 %v5411_v29, %v542_v58 }
  0x8c   : > { %v546_v8 = vadd.f32 %v544_v61, %v534_v60  ;;  %v515_v12 = vadd.f32 %v513_v1, %v505_v62  ;;  %v521_v13 = vadd.f32 %v519_v2, %v509_v63  ;;  %v568_v14 = vstv %s5497_s8  ;;  %s5614_s8 = sld [smem:[#allocation3 + $0x17]] }
  0x8d   : > { %v572_v15 = vstv %s5499_s9  ;;  %428 = vrot.lane.b32.xlu0 %v423_v53, %s5183_s26  ;;  %v570_v19 = vmul.f32 %v568_v14, %v5364_v4  ;;  %v576_v21 = vstv %s5505_s10  ;;  %v582_v28 = vstv %s5512_s11  ;;  %s5619_s9 = sld [smem:[#allocation3 + $0x26]]  ;;  %s5621_s10 = sld [smem:[#allocation3 + $0x27]] }
  0x8e   : > { %v548_v18 = vsel %vm5400_vm0, %v540_v0, %v546_v8  ;;  %v574_v20 = vmul.f32 %v572_v15, %v5364_v4  ;;  %v527_v24 = vadd.f32 %v525_v5, %v515_v12  ;;  %v533_v25 = vadd.f32 %v531_v9, %v521_v13  ;;  %s5630_s11 = sld [smem:[#allocation3 + $0x36]] }
  0x8f   : > { %v552_v23 = vadd.f32 %v5526_v59, %v548_v18  ;;  %v578_v26 = vmul.f32 %v5372_v7, %v576_v21  ;;  %v588_v31 = vstv %s5514_s12  ;;  %v594_v32 = vstv %s5519_s14  ;;  %s5632_s12 = sld [smem:[#allocation3 + $0x37]]  ;;  %s5650_s14 = sld [smem:[#allocation3 + $0xa]] }
  0x90   : > { %v600_v33 = vstv %s5521_s15  ;;  %v539_v34 = vadd.f32 %v537_v10, %v527_v24  ;;  %v545_v35 = vadd.f32 %v543_v11, %v533_v25  ;;  %v584_v38 = vmul.f32 %v5372_v7, %v582_v28  ;;  %s5652_s15 = sld [smem:[#allocation3 + $0xb]] }
  0x91   : > { %557 = vrot.lane.b32.xlu1 %v552_v23, %s5183_s26  ;;  %v580_v36 = vadd.f32 %v578_v26, %v570_v19  ;;  %v590_v39 = vmul.f32 %v5394_v17, %v588_v31  ;;  %v596_v40 = vmul.f32 %v5394_v17, %v594_v32  ;;  %v602_v41 = vmul.f32 %v5414_v30, %v600_v33 }
  0x92   : > { %v606_v42 = vstv %s5532_s16  ;;  %v547_v43 = vsel %vm5400_vm0, %v539_v34, %v545_v35  ;;  %v586_v44 = vadd.f32 %v584_v38, %v574_v20  ;;  %v5576_v46 = vstv %s5537_s17  ;;  %s5658_s16 = sld [smem:[#allocation3 + $0x1a]]  ;;  %s5660_s17 = sld [smem:[#allocation3 + $0x1b]] }
  0x93   : > { %v608_v45 = vmul.f32 %v5414_v30, %v606_v42  ;;  %v551_v47 = vadd.f32 %v5526_v59, %v547_v43  ;;  %v592_v48 = vadd.f32 %v590_v39, %v580_v36  ;;  %v569_v49 = vmul.f32 %v568_v14, %v5361_v3 }
  0x94   : > { %v573_v50 = vmul.f32 %v572_v15, %v5361_v3  ;;  %v598_v51 = vadd.f32 %v596_v40, %v586_v44  ;;  %v577_v52 = vmul.f32 %v5369_v6, %v576_v21  ;;  %v583_v53 = vmul.f32 %v5369_v6, %v582_v28 }
  0x95   : > { %v589_v54 = vmul.f32 %v5391_v16, %v588_v31  ;;  %555 = vrot.lane.b32.xlu0 %v551_v47, %s5183_s26  ;;  %v604_v55 = vadd.f32 %v602_v41, %v592_v48  ;;  %v595_v56 = vmul.f32 %v5391_v16, %v594_v32  ;;  %v601_v57 = vmul.f32 %v5411_v29, %v600_v33 }
  0x96   : > { %v607_v58 = vmul.f32 %v5411_v29, %v606_v42  ;;  %v610_v60 = vadd.f32 %v608_v45, %v598_v51  ;;  %v579_v61 = vadd.f32 %v577_v52, %v569_v49  ;;  %v585_v62 = vadd.f32 %v583_v53, %v573_v50 }
  0x97   : > { %v632_v63 = vstv %s5552_s18  ;;  %v636_v1 = vstv %s5554_s29  ;;  %v640_v2 = vstv %s5560_s13  ;;  %v646_v5 = vstv %s5562_s19  ;;  %s5668_s18 = sld [smem:[#allocation3 + $0x2a]]  ;;  %s5674_s29 = sld [smem:[#allocation3 + $0x2b]] }
  0x98   : > { %v634_v0 = vmul.f32 %v632_v63, %v5364_v4  ;;  %v612_v8 = vsel %vm5400_vm0, %v604_v55, %v610_v60  ;;  %v591_v9 = vadd.f32 %v589_v54, %v579_v61  ;;  %v597_v10 = vadd.f32 %v595_v56, %v585_v62  ;;  %s5679_s13 = sld [smem:[#allocation3 + $0x3a]]  ;;  %s5684_s19 = sld [smem:[#allocation3 + $0x3b]] }
  0x99   : > { %v638_v11 = vmul.f32 %v636_v1, %v5364_v4  ;;  %v616_v12 = vadd.f32 %v5576_v46, %v612_v8  ;;  %v642_v13 = vmul.f32 %v5372_v7, %v640_v2  ;;  %v648_v14 = vmul.f32 %v5372_v7, %v646_v5 }
  0x9a   : > { %v652_v15 = vstv %s5570_s20  ;;  %v603_v18 = vadd.f32 %v601_v57, %v591_v9  ;;  %v609_v19 = vadd.f32 %v607_v58, %v597_v10  ;;  %v658_v21 = vstv %s5578_s21  ;;  %s5698_s20 = sld [smem:[#allocation3 + $0xe]]  ;;  %s5704_s21 = sld [smem:[#allocation3 + $0xf]] }
  0x9b   : > { %v654_v20 = vmul.f32 %v5394_v17, %v652_v15  ;;  %621 = vrot.lane.b32.xlu1 %v616_v12, %s5183_s26  ;;  %v644_v23 = vadd.f32 %v642_v13, %v634_v0  ;;  %v650_v24 = vadd.f32 %v648_v14, %v638_v11  ;;  %v660_v25 = vmul.f32 %v5394_v17, %v658_v21 }
  0x9c   : > { %v664_v26 = vstv %s5583_s22  ;;  %v611_v28 = vsel %vm5400_vm0, %v603_v18, %v609_v19  ;;  %v670_v32 = vstv %s5588_s23  ;;  %v633_v33 = vmul.f32 %v632_v63, %v5361_v3  ;;  %s5706_s22 = sld [smem:[#allocation3 + $0x1e]]  ;;  %s5710_s23 = sld [smem:[#allocation3 + $0x1f]] }
  0x9d   : > { %v666_v31 = vmul.f32 %v5414_v30, %v664_v26  ;;  %v615_v34 = vadd.f32 %v5576_v46, %v611_v28  ;;  %v656_v35 = vadd.f32 %v654_v20, %v644_v23  ;;  %v662_v36 = vadd.f32 %v660_v25, %v650_v24 }
  0x9e   : > { %v672_v38 = vmul.f32 %v5414_v30, %v670_v32  ;;  %v637_v39 = vmul.f32 %v636_v1, %v5361_v3  ;;  %v641_v40 = vmul.f32 %v5369_v6, %v640_v2  ;;  %v647_v41 = vmul.f32 %v5369_v6, %v646_v5 }
  0x9f   : > { %v653_v42 = vmul.f32 %v5391_v16, %v652_v15  ;;  %619 = vrot.lane.b32.xlu0 %v615_v34, %s5183_s26  ;;  %v668_v43 = vadd.f32 %v666_v31, %v656_v35  ;;  %v659_v45 = vmul.f32 %v5391_v16, %v658_v21  ;;  %v665_v47 = vmul.f32 %v5411_v29, %v664_v26 }
  0xa0   : > { %v674_v44 = vadd.f32 %v672_v38, %v662_v36  ;;  %v643_v48 = vadd.f32 %v641_v40, %v633_v33  ;;  %v649_v49 = vadd.f32 %v647_v41, %v637_v39  ;;  %v671_v50 = vmul.f32 %v5411_v29, %v670_v32 }
  0xa1   : > { %v696_v51 = vstv %s5602_s25  ;;  %v700_v54 = vstv %s5608_s27  ;;  %v704_v55 = vstv %s5610_s30  ;;  %v710_v62 = vstv %s5614_s8  ;;  %s5715_s25 = sld [smem:[#allocation3 + $0x2e]]  ;;  %s5717_s27 = sld [smem:[#allocation3 + $0x2f]] }
  0xa2   : > { %v676_v52 = vsel %vm5400_vm0, %v668_v43, %v674_v44  ;;  %v698_v53 = vmul.f32 %v696_v51, %v5364_v4  ;;  %v655_v57 = vadd.f32 %v653_v42, %v643_v48  ;;  %v661_v58 = vadd.f32 %v659_v45, %v649_v49  ;;  %s5726_s30 = sld [smem:[#allocation3 + $0x3e]]  ;;  %s5728_s8 = sld [smem:[#allocation3 + $0x3f]] }
  0xa3   : > { %v680_v56 = vadd.f32 %v676_v52, %v5487_v27  ;;  %v702_v60 = vmul.f32 %v700_v54, %v5364_v4  ;;  %v706_v61 = vmul.f32 %v5372_v7, %v704_v55  ;;  %v716_v63 = vstv %s5619_s9  ;;  %s4632_s9 = sld [smem:[#allocation7 + $0x25]] }
  0xa4   : > { %v722_v0 = vstv %s5621_s10  ;;  %v667_v1 = vadd.f32 %v665_v47, %v655_v57  ;;  %v673_v2 = vadd.f32 %v671_v50, %v661_v58  ;;  %v712_v5 = vmul.f32 %v5372_v7, %v710_v62  ;;  %s4633_s10 = sld [smem:[#allocation7 + $0x49]] }
  0xa5   : > { %685 = vrot.lane.b32.xlu1 %v680_v56, %s5183_s26  ;;  %v718_v8 = vmul.f32 %v5394_v17, %v716_v63  ;;  %v708_v9 = vadd.f32 %v706_v61, %v698_v53  ;;  %v724_v10 = vmul.f32 %v5394_v17, %v722_v0  ;;  %v728_v11 = vstv %s5630_s11  ;;  %s4634_s11 = sld [smem:[#allocation7 + $0x6d]] }
  0xa6   : > { %v734_v12 = vstv %s5632_s12  ;;  %v675_v13 = vsel %vm5400_vm0, %v667_v1, %v673_v2  ;;  %v714_v14 = vadd.f32 %v712_v5, %v702_v60  ;;  %v730_v15 = vmul.f32 %v5414_v30, %v728_v11  ;;  %s5184_s12 = smov 127  }
  0xa7   : > { %v736_v18 = vmul.f32 %v5414_v30, %v734_v12  ;;  %v679_v19 = vadd.f32 %v675_v13, %v5487_v27  ;;  %v720_v20 = vadd.f32 %v718_v8, %v708_v9  ;;  %v697_v21 = vmul.f32 %v696_v51, %v5361_v3 }
  0xa8   : > { %v701_v23 = vmul.f32 %v700_v54, %v5361_v3  ;;  %v726_v24 = vadd.f32 %v724_v10, %v714_v14  ;;  %v705_v25 = vmul.f32 %v5369_v6, %v704_v55  ;;  %v711_v26 = vmul.f32 %v5369_v6, %v710_v62 }
  0xa9   : > { %v717_v28 = vmul.f32 %v5391_v16, %v716_v63  ;;  %683 = vrot.lane.b32.xlu0 %v679_v19, %s5183_s26  ;;  %v732_v27 = vadd.f32 %v730_v15, %v720_v20  ;;  %v723_v31 = vmul.f32 %v5391_v16, %v722_v0  ;;  %v729_v32 = vmul.f32 %v5411_v29, %v728_v11 }
  0xaa   : > { %v735_v33 = vmul.f32 %v5411_v29, %v734_v12  ;;  %v738_v34 = vadd.f32 %v736_v18, %v726_v24  ;;  %v707_v35 = vadd.f32 %v705_v25, %v697_v21  ;;  %v713_v36 = vadd.f32 %v711_v26, %v701_v23 }
  0xab   : > { %v760_v38 = vstv %s5650_s14  ;;  %v764_v40 = vstv %s5652_s15  ;;  %v768_v41 = vstv %s5658_s16  ;;  %v774_v42 = vstv %s5660_s17  ;;  %s4635_s14 = sld [smem:[#allocation7 + $0x2]]  ;;  %s4636_s15 = sld [smem:[#allocation7 + $0x26]] }
  0xac   : > { %v762_v39 = vmul.f32 %v760_v38, %v5364_v4  ;;  %v740_v43 = vsel %vm5400_vm0, %v732_v27, %v738_v34  ;;  %v719_v44 = vadd.f32 %v717_v28, %v707_v35  ;;  %v725_v45 = vadd.f32 %v723_v31, %v713_v36  ;;  %s4637_s16 = sld [smem:[#allocation7 + $0x4a]]  ;;  %s4638_s17 = sld [smem:[#allocation7 + $0x6e]] }
  0xad   : > { %v766_v47 = vmul.f32 %v764_v40, %v5364_v4  ;;  %v744_v48 = vadd.f32 %v740_v43, %v5423_v37  ;;  %v770_v49 = vmul.f32 %v5372_v7, %v768_v41  ;;  %v776_v50 = vmul.f32 %v5372_v7, %v774_v42 }
  0xae   : > { %v780_v51 = vstv %s5668_s18  ;;  %v731_v52 = vadd.f32 %v729_v32, %v719_v44  ;;  %v737_v53 = vadd.f32 %v735_v33, %v725_v45  ;;  %v786_v55 = vstv %s5674_s29  ;;  %s8770_s18 = smov 126   ;;  %s4643_s29 = sld [smem:[#allocation7 + $0x4]] }
  0xaf   : > { %v782_v54 = vmul.f32 %v5394_v17, %v780_v51  ;;  %749 = vrot.lane.b32.xlu1 %v744_v48, %s5183_s26  ;;  %v772_v56 = vadd.f32 %v770_v49, %v762_v39  ;;  %v778_v57 = vadd.f32 %v776_v50, %v766_v47  ;;  %v788_v58 = vmul.f32 %v5394_v17, %v786_v55 }
  0xb0   : > { %v792_v60 = vstv %s5679_s13  ;;  %v739_v61 = vsel %vm5400_vm0, %v731_v52, %v737_v53  ;;  %v798_v63 = vstv %s5684_s19  ;;  %v761_v0 = vmul.f32 %v760_v38, %v5361_v3  ;;  %s4644_s13 = sld [smem:[#allocation7 + $0x28]]  ;;  %s4645_s19 = sld [smem:[#allocation7 + $0x4c]] }
  0xb1   : > { %v794_v62 = vmul.f32 %v5414_v30, %v792_v60  ;;  %v743_v1 = vadd.f32 %v739_v61, %v5423_v37  ;;  %v784_v2 = vadd.f32 %v782_v54, %v772_v56  ;;  %v790_v5 = vadd.f32 %v788_v58, %v778_v57 }
  0xb2   : > { %v800_v8 = vmul.f32 %v5414_v30, %v798_v63  ;;  %v765_v9 = vmul.f32 %v764_v40, %v5361_v3  ;;  %v769_v10 = vmul.f32 %v5369_v6, %v768_v41  ;;  %v775_v11 = vmul.f32 %v5369_v6, %v774_v42 }
  0xb3   : > { %v781_v12 = vmul.f32 %v5391_v16, %v780_v51  ;;  %747 = vrot.lane.b32.xlu0 %v743_v1, %s5183_s26  ;;  %v796_v37 = vadd.f32 %v794_v62, %v784_v2  ;;  %v787_v14 = vmul.f32 %v5391_v16, %v786_v55  ;;  %v793_v15 = vmul.f32 %v5411_v29, %v792_v60 }
  0xb4   : > { %v802_v13 = vadd.f32 %v800_v8, %v790_v5  ;;  %v771_v18 = vadd.f32 %v769_v10, %v761_v0  ;;  %v777_v19 = vadd.f32 %v775_v11, %v765_v9  ;;  %v799_v20 = vmul.f32 %v5411_v29, %v798_v63 }
  0xb5   : > { %v824_v21 = vstv %s5698_s20  ;;  %v828_v25 = vstv %s5704_s21  ;;  %v832_v26 = vstv %s5706_s22  ;;  %v838_v34 = vstv %s5710_s23  ;;  %s4646_s20 = sld [smem:[#allocation7 + $0x70]]  ;;  %s4647_s21 = sld [smem:[#allocation7 + $0x5]] }
  0xb6   : > { %v804_v23 = vsel %vm5400_vm0, %v796_v37, %v802_v13  ;;  %v826_v24 = vmul.f32 %v824_v21, %v5364_v4  ;;  %v783_v27 = vadd.f32 %v781_v12, %v771_v18  ;;  %v789_v31 = vadd.f32 %v787_v14, %v777_v19  ;;  %s4648_s22 = sld [smem:[#allocation7 + $0x29]]  ;;  %s4649_s23 = sld [smem:[#allocation7 + $0x4d]] }
  0xb7   : > { %v808_v28 = vadd.f32 %v804_v23, %v5526_v59  ;;  %v830_v32 = vmul.f32 %v828_v25, %v5364_v4  ;;  %v834_v33 = vmul.f32 %v5372_v7, %v832_v26  ;;  %v844_v35 = vstv %s5715_s25  ;;  %s4650_s25 = sld [smem:[#allocation7 + $0x71]] }
  0xb8   : > { %v850_v36 = vstv %s5717_s27  ;;  %v795_v38 = vadd.f32 %v793_v15, %v783_v27  ;;  %v801_v39 = vadd.f32 %v799_v20, %v789_v31  ;;  %v840_v40 = vmul.f32 %v5372_v7, %v838_v34  ;;  %s4655_s27 = sld [smem:[#allocation7 + $0x7]] }
  0xb9   : > { %813 = vrot.lane.b32.xlu1 %v808_v28, %s5183_s26  ;;  %v846_v41 = vmul.f32 %v5394_v17, %v844_v35  ;;  %v836_v42 = vadd.f32 %v834_v33, %v826_v24  ;;  %v852_v43 = vmul.f32 %v5394_v17, %v850_v36  ;;  %v856_v44 = vstv %s5726_s30  ;;  %s4656_s30 = sld [smem:[#allocation7 + $0x2b]] }
  0xba   : > { %v862_v45 = vstv %s5728_s8  ;;  %v803_v4 = vsel %vm5400_vm0, %v795_v38, %v801_v39  ;;  %v842_v47 = vadd.f32 %v840_v40, %v830_v32  ;;  %v858_v48 = vmul.f32 %v5414_v30, %v856_v44  ;;  %s4657_s8 = sld [smem:[#allocation7 + $0x4f]] }
  0xbb   : > { %v864_v49 = vmul.f32 %v5414_v30, %v862_v45  ;;  %v807_v50 = vadd.f32 %v803_v4, %v5526_v59  ;;  %v848_v51 = vadd.f32 %v846_v41, %v836_v42  ;;  %v825_v7 = vmul.f32 %v824_v21, %v5361_v3 }
  0xbc   : > { %v829_v52 = vmul.f32 %v828_v25, %v5361_v3  ;;  %v854_v53 = vadd.f32 %v852_v43, %v842_v47  ;;  %v833_v17 = vmul.f32 %v5369_v6, %v832_v26  ;;  %v839_v54 = vmul.f32 %v5369_v6, %v838_v34 }
  0xbd   : > { %v845_v55 = vmul.f32 %v5391_v16, %v844_v35  ;;  %811 = vrot.lane.b32.xlu0 %v807_v50, %s5183_s26  ;;  %v860_v56 = vadd.f32 %v858_v48, %v848_v51  ;;  %v851_v57 = vmul.f32 %v5391_v16, %v850_v36  ;;  %v857_v30 = vmul.f32 %v5411_v29, %v856_v44 }
  0xbe   : > { %v866_v59 = vadd.f32 %v864_v49, %v854_v53  ;;  %v835_v58 = vadd.f32 %v833_v17, %v825_v7  ;;  %v841_v60 = vadd.f32 %v839_v54, %v829_v52  ;;  %v863_v61 = vmul.f32 %v5411_v29, %v862_v45 }
  0xbf   : > { %v936_v21 = vstv %s4632_s9  ;;  %v950_v26 = vstv %s4633_s10  ;;  %v964_v32 = vstv %s4634_s11  ;;  %v978_v36 = vstv %s4635_s14  ;;  %s4659_s9 = sld [smem:[#allocation7 + $0x8]]  ;;  %s4660_s10 = sld [smem:[#allocation7 + $0x2c]] }
  0xc0   : > { %v868_v3 = vsel %vm5400_vm0, %v860_v56, %v866_v59  ;;  %v847_v62 = vadd.f32 %v845_v55, %v835_v58  ;;  %v853_v63 = vadd.f32 %v851_v57, %v841_v60  ;;  %v992_v40 = vstv %s4636_s15  ;;  %s4661_s11 = sld [smem:[#allocation7 + $0x50]]  ;;  %s4662_s14 = sld [smem:[#allocation7 + $0x74]] }
  0xc1   : > { %v872_v6 = vadd.f32 %v868_v3, %v5576_v46  ;;  %v1006_v44 = vstv %s4637_s16  ;;  %v1020_v48 = vstv %s4638_s17  ;;  %v1060_v52 = vstv %s4643_s29  ;;  %s4667_s15 = sld [smem:[#allocation7 + $0xa]]  ;;  %s4668_s16 = sld [smem:[#allocation7 + $0x2e]] }
  0xc2   : > { %v859_v0 = vadd.f32 %v857_v30, %v847_v62  ;;  %v865_v1 = vadd.f32 %v863_v61, %v853_v63  ;;  %v1074_v54 = vstv %s4644_s13  ;;  %v1088_v57 = vstv %s4645_s19  ;;  %s4669_s17 = sld [smem:[#allocation7 + $0x52]]  ;;  %s4670_s29 = sld [smem:[#allocation7 + $0x76]] }
  0xc3   : > { %877 = vrot.lane.b32.xlu1 %v872_v6, %s5183_s26  ;;  %v1102_v58 = vstv %s4646_s20  ;;  %v1116_v3 = vstv %s4647_s21  ;;  %v1130_v6 = vstv %s4648_s22  ;;  %s4671_s13 = sld [smem:[#allocation7 + $0xb]]  ;;  %s4672_s19 = sld [smem:[#allocation7 + $0x2f]] }
  0xc4   : > { %v867_v16 = vsel %vm5400_vm0, %v859_v0, %v865_v1  ;;  %s4673_s20 = sld [smem:[#allocation7 + $0x53]]  ;;  %s4674_s21 = sld [smem:[#allocation7 + $0x77]] }
  0xc5   : > { %v871_v2 = vadd.f32 %v867_v16, %v5576_v46  ;;  %v1144_v16 = vstv %s4649_s23  ;;  %s4679_s22 = sld [smem:[#allocation7 + $0xd]]  ;;  %s4680_s23 = sld [smem:[#allocation7 + $0x31]] }
  0xc7   : > { %875 = vrot.lane.b32.xlu0 %v871_v2, %s5183_s26  ;;  %s4631_s26 = sld [smem:[#allocation7 + $0x1]] }
  0xcd   : > { %v922_v13 = vstv %s4631_s26  ;;  %s4658_s26 = sld [smem:[#allocation7 + $0x73]] }
  0xf1   : > { %v492_v29 = vpop.permute.xlu1 %491 }
  0xf2   : > { %497 = vst.msk [vmem:[#allocation2 + $0x19] sm:$0xff] %vm432_vm1, %v492_v29 }
  0xf5   : > { %v494_v5 = vpop.permute.xlu1 %493 }
  0xf6   : > { %498 = vst.msk [vmem:[#allocation2 + $0x21] sm:$0xff] %vm432_vm1, %v494_v5  ;;  %v1158_v5 = vstv %s4650_s25  ;;  %s4681_s25 = sld [smem:[#allocation7 + $0x55]] }
  0xfb   : > { %v427_v8 = vpop.permute.xlu0 %426 }
  0xfc   : > { %433 = vst.msk [vmem:[#allocation2 + $0x1] sm:$0xff] %vm432_vm1, %v427_v8 }
  0xff   : > { %v429_v9 = vpop.permute.xlu0 %428 }
 0x100   : > { %434 = vst.msk [vmem:[#allocation2 + $0x9] sm:$0xff] %vm432_vm1, %v429_v9 }
 0x103   : > { %v558_v10 = vpop.permute.xlu1 %557  ;;  %v5828_v51 = vld [vmem:[#allocation2 + $0x1] sm:$0xff] }
 0x104   : > { %562 = vst.msk [vmem:[#allocation2 + $0x39] sm:$0xff] %vm432_vm1, %v558_v10  ;;  %v1061_v17 = vmul.f32 %v1060_v52, %v5828_v51  ;;  %v1075_v56 = vmul.f32 %v1074_v54, %v5828_v51  ;;  %v1089_v59 = vmul.f32 %v1088_v57, %v5828_v51  ;;  %v1103_v61 = vmul.f32 %v1102_v58, %v5828_v51 }
 0x105   : > { %v1117_v63 = vmul.f32 %v1116_v3, %v5828_v51  ;;  %v1131_v1 = vmul.f32 %v1130_v6, %v5828_v51  ;;  %v1145_v29 = vmul.f32 %v1144_v16, %v5828_v51  ;;  %v1159_v9 = vmul.f32 %v1158_v5, %v5828_v51 }
 0x107   : > { %v556_v22 = vpop.permute.xlu0 %555  ;;  %v5830_v7 = vld [vmem:[#allocation2 + $0x9] sm:$0xff] }
 0x108   : > { %561 = vst.msk [vmem:[#allocation2 + $0x31] sm:$0xff] %vm432_vm1, %v556_v22  ;;  %v1062_v53 = vmul.f32 %v1060_v52, %v5830_v7  ;;  %v1076_v55 = vmul.f32 %v1074_v54, %v5830_v7  ;;  %v1090_v30 = vmul.f32 %v1088_v57, %v5830_v7  ;;  %v1104_v60 = vmul.f32 %v1102_v58, %v5830_v7 }
 0x109   : > { %v1118_v62 = vmul.f32 %v1116_v3, %v5830_v7  ;;  %v1132_v0 = vmul.f32 %v1130_v6, %v5830_v7  ;;  %v1146_v2 = vmul.f32 %v1144_v16, %v5830_v7  ;;  %v1160_v8 = vmul.f32 %v1158_v5, %v5830_v7 }
 0x10a   : > { %v1420_v3 = vstv %s4673_s20  ;;  %s6041_s20 = sld [smem:[#allocation8 + $0x2]] }
 0x10d   : > { %v622_v46 = vpop.permute.xlu1 %621 }
 0x10e   : > { %626 = vst.msk [vmem:[#allocation2 + $0x51] sm:$0xff] %vm432_vm1, %v622_v46  ;;  %v1198_v46 = vstv %s4655_s27  ;;  %s4682_s27 = sld [smem:[#allocation7 + $0x79]] }
 0x111   : > { %v620_v11 = vpop.permute.xlu0 %619 }
 0x112   : > { %625 = vst.msk [vmem:[#allocation2 + $0x49] sm:$0xff] %vm432_vm1, %v620_v11 }
 0x117   : > { %v686_v12 = vpop.permute.xlu1 %685 }
 0x118   : > { %690 = vst.msk [vmem:[#allocation2 + $0x69] sm:$0xff] %vm432_vm1, %v686_v12 }
 0x11b   : > { %v684_v37 = vpop.permute.xlu0 %683 }
 0x11c   : > { %689 = vst.msk [vmem:[#allocation2 + $0x61] sm:$0xff] %vm432_vm1, %v684_v37  ;;  %v1212_v37 = vstv %s4656_s30  ;;  %s4683_s30 = sld [smem:[#allocation7 + $0xe]] }
 0x11f   : > { %v5864_v10 = vld [vmem:[#allocation2 + $0x69] sm:$0xff] }
 0x120   : > { %v1200_v11 = vmul.f32 %v1198_v46, %v5864_v10 }
 0x121   : > { %v750_v14 = vpop.permute.xlu1 %749 }
 0x122   : > { %754 = vst.msk [vmem:[#allocation2 + $0x81] sm:$0xff] %vm432_vm1, %v750_v14 }
 0x123   : > { %v5789_v15 = vld [vmem:[#allocation2 + $0x60] sm:$0xff]  ;;  %v5791_v18 = vld [vmem:[#allocation2 + $0x68] sm:$0xff] }
 0x124   : > { %v924_v19 = vmul.f32 %v922_v13, %v5791_v18  ;;  %v923_v20 = vmul.f32 %v922_v13, %v5789_v15  ;;  %v938_v24 = vmul.f32 %v936_v21, %v5791_v18  ;;  %v937_v25 = vmul.f32 %v936_v21, %v5789_v15  ;;  %v5866_v22 = vld [vmem:[#allocation2 + $0x61] sm:$0xff] }
 0x125   : > { %v748_v23 = vpop.permute.xlu0 %747  ;;  %v952_v27 = vmul.f32 %v950_v26, %v5791_v18  ;;  %v951_v31 = vmul.f32 %v950_v26, %v5789_v15  ;;  %v966_v34 = vmul.f32 %v964_v32, %v5791_v18  ;;  %v965_v35 = vmul.f32 %v964_v32, %v5789_v15 }
 0x126   : > { %929 = vrot.lane.b32.xlu1 %v924_v19, %s5184_s12  ;;  %927 = vrot.lane.b32.xlu0 %v923_v20, %s5184_s12  ;;  %753 = vst.msk [vmem:[#allocation2 + $0x79] sm:$0xff] %vm432_vm1, %v748_v23  ;;  %v980_v38 = vmul.f32 %v978_v36, %v5791_v18  ;;  %v979_v39 = vmul.f32 %v978_v36, %v5789_v15  ;;  %v1226_v19 = vstv %s4657_s8  ;;  %v1240_v23 = vstv %s4658_s26  ;;  %s4684_s8 = sld [smem:[#allocation7 + $0x32]]  ;;  %s4685_s26 = sld [smem:[#allocation7 + $0x56]] }
 0x127   : > { %v994_v42 = vmul.f32 %v992_v40, %v5791_v18  ;;  %v993_v43 = vmul.f32 %v992_v40, %v5789_v15  ;;  %v1008_v4 = vmul.f32 %v1006_v44, %v5791_v18  ;;  %v1007_v47 = vmul.f32 %v1006_v44, %v5789_v15 }
 0x128   : > { %v1022_v49 = vmul.f32 %v1020_v48, %v5791_v18  ;;  %v1021_v50 = vmul.f32 %v1020_v48, %v5789_v15  ;;  %v1199_v12 = vmul.f32 %v1198_v46, %v5866_v22  ;;  %v1214_v13 = vmul.f32 %v1212_v37, %v5864_v10 }
 0x129   : > { %v1213_v14 = vmul.f32 %v1212_v37, %v5866_v22  ;;  %v1228_v20 = vmul.f32 %v1226_v19, %v5864_v10  ;;  %v1227_v21 = vmul.f32 %v1226_v19, %v5866_v22  ;;  %v1254_v26 = vstv %s4659_s9  ;;  %s4686_s9 = sld [smem:[#allocation7 + $0x7a]] }
 0x12a   : > { %943 = vrot.lane.b32.xlu1 %v938_v24, %s5184_s12  ;;  %941 = vrot.lane.b32.xlu0 %v937_v25, %s5184_s12  ;;  %v1242_v24 = vmul.f32 %v1240_v23, %v5864_v10  ;;  %v1241_v25 = vmul.f32 %v1240_v23, %v5866_v22  ;;  %v1474_v46 = vstv %s4679_s22  ;;  %s6051_s22 = sld [smem:[#allocation8 + $0x3]] }
 0x12b   : > { %v814_v28 = vpop.permute.xlu1 %813 }
 0x12c   : > { %818 = vst.msk [vmem:[#allocation2 + $0x99] sm:$0xff] %vm432_vm1, %v814_v28  ;;  %v1256_v28 = vmul.f32 %v1254_v26, %v5864_v10 }
 0x12d   : > { %v5900_v40 = vld [vmem:[#allocation2 + $0x80] sm:$0xff] }
 0x12e   : > { %957 = vrot.lane.b32.xlu1 %v952_v27, %s5184_s12  ;;  %955 = vrot.lane.b32.xlu0 %v951_v31, %s5184_s12  ;;  %v1255_v27 = vmul.f32 %v1254_v26, %v5866_v22  ;;  %v1268_v31 = vstv %s4660_s10  ;;  %v1422_v6 = vmul.f32 %v1420_v3, %v5900_v40  ;;  %s6000_s10 = sld [smem:[#allocation7 + $0x10]] }
 0x12f   : > { %v812_v33 = vpop.permute.xlu0 %811  ;;  %v1270_v32 = vmul.f32 %v1268_v31, %v5864_v10 }
 0x130   : > { %817 = vst.msk [vmem:[#allocation2 + $0x91] sm:$0xff] %vm432_vm1, %v812_v33  ;;  %v1269_v33 = vmul.f32 %v1268_v31, %v5866_v22  ;;  %v1516_v31 = vstv %s4682_s27  ;;  %s6058_s27 = sld [smem:[#allocation7 + $0x4b]] }
 0x132   : > { %971 = vrot.lane.b32.xlu1 %v966_v34, %s5184_s12  ;;  %969 = vrot.lane.b32.xlu0 %v965_v35, %s5184_s12  ;;  %v1282_v34 = vstv %s4661_s11  ;;  %s6010_s11 = sld [smem:[#allocation7 + $0x34]] }
 0x133   : > { %v1284_v35 = vmul.f32 %v1282_v34, %v5864_v10  ;;  %v1283_v36 = vmul.f32 %v1282_v34, %v5866_v22 }
 0x135   : > { %v878_v41 = vpop.permute.xlu1 %877 }
 0x136   : > { %985 = vrot.lane.b32.xlu1 %v980_v38, %s8770_s18  ;;  %983 = vrot.lane.b32.xlu0 %v979_v39, %s8770_s18  ;;  %882 = vst.msk [vmem:[#allocation2 + $0xb1] sm:$0xff] %vm432_vm1, %v878_v41  ;;  %v1296_v38 = vstv %s4662_s14  ;;  %v5898_v39 = vld [vmem:[#allocation2 + $0x78] sm:$0xff]  ;;  %v1336_v41 = vstv %s4667_s15  ;;  %s6014_s14 = sld [smem:[#allocation7 + $0x3]]  ;;  %s6026_s15 = sld [smem:[#allocation7 + $0x27]] }
 0x137   : > { %v1338_v44 = vmul.f32 %v1336_v41, %v5900_v40 }
 0x139   : > { %v876_v45 = vpop.permute.xlu0 %875 }
 0x13a   : > { %999 = vrot.lane.b32.xlu1 %v994_v42, %s8770_s18  ;;  %997 = vrot.lane.b32.xlu0 %v993_v43, %s8770_s18  ;;  %881 = vst.msk [vmem:[#allocation2 + $0xa9] sm:$0xff] %vm432_vm1, %v876_v45  ;;  %v1298_v42 = vmul.f32 %v1296_v38, %v5864_v10  ;;  %v1297_v43 = vmul.f32 %v1296_v38, %v5866_v22 }
 0x13b   : > { %v1337_v45 = vmul.f32 %v1336_v41, %v5898_v39 }
 0x13e   : > { %1013 = vrot.lane.b32.xlu1 %v1008_v4, %s8770_s18  ;;  %1011 = vrot.lane.b32.xlu0 %v1007_v47, %s8770_s18  ;;  %v1350_v4 = vstv %s4668_s16  ;;  %s6029_s16 = sld [smem:[#allocation7 + $0x58]] }
 0x13f   : > { %v1352_v47 = vmul.f32 %v1350_v4, %v5900_v40  ;;  %v1351_v48 = vmul.f32 %v1350_v4, %v5898_v39 }
 0x142   : > { %1027 = vrot.lane.b32.xlu1 %v1022_v49, %s8770_s18  ;;  %1025 = vrot.lane.b32.xlu0 %v1021_v50, %s8770_s18  ;;  %v1364_v49 = vstv %s4669_s17  ;;  %s6031_s17 = sld [smem:[#allocation8]] }
 0x143   : > { %v1366_v50 = vmul.f32 %v1364_v49, %v5900_v40  ;;  %v1365_v52 = vmul.f32 %v1364_v49, %v5898_v39  ;;  %v1558_v49 = vstv %s4685_s26  ;;  %s6072_s26 = sld [smem:[#allocation7 + $0x2a]] }
 0x146   : > { %1067 = vrot.lane.b32.xlu1 %v1062_v53, %s5184_s12  ;;  %1065 = vrot.lane.b32.xlu0 %v1061_v17, %s5184_s12  ;;  %v1378_v53 = vstv %s4670_s29  ;;  %s6033_s29 = sld [smem:[#allocation7]] }
 0x147   : > { %v1380_v17 = vmul.f32 %v1378_v53, %v5900_v40  ;;  %v1379_v54 = vmul.f32 %v1378_v53, %v5898_v39 }
 0x14a   : > { %1081 = vrot.lane.b32.xlu1 %v1076_v55, %s5184_s12  ;;  %1079 = vrot.lane.b32.xlu0 %v1075_v56, %s5184_s12  ;;  %v1392_v55 = vstv %s4671_s13  ;;  %s6037_s13 = sld [smem:[#allocation8 + $0x1]] }
 0x14b   : > { %v1394_v56 = vmul.f32 %v1392_v55, %v5900_v40  ;;  %v1393_v57 = vmul.f32 %v1392_v55, %v5898_v39 }
 0x14e   : > { %1095 = vrot.lane.b32.xlu1 %v1090_v30, %s5184_s12  ;;  %1093 = vrot.lane.b32.xlu0 %v1089_v59, %s5184_s12  ;;  %v1406_v30 = vstv %s4672_s19  ;;  %s6039_s19 = sld [smem:[#allocation7 + $0x24]] }
 0x152   : > { %1109 = vrot.lane.b32.xlu1 %v1104_v60, %s5184_s12  ;;  %1107 = vrot.lane.b32.xlu0 %v1103_v61, %s5184_s12  ;;  %v1408_v60 = vmul.f32 %v1406_v30, %v5900_v40  ;;  %v1407_v61 = vmul.f32 %v1406_v30, %v5898_v39 }
 0x156   : > { %1123 = vrot.lane.b32.xlu1 %v1118_v62, %s8770_s18  ;;  %1121 = vrot.lane.b32.xlu0 %v1117_v63, %s8770_s18 }
 0x15a   : > { %1137 = vrot.lane.b32.xlu1 %v1132_v0, %s8770_s18  ;;  %1135 = vrot.lane.b32.xlu0 %v1131_v1, %s8770_s18  ;;  %v1421_v0 = vmul.f32 %v1420_v3, %v5898_v39  ;;  %v1434_v1 = vstv %s4674_s21  ;;  %v1612_v3 = vstv %s6000_s10  ;;  %s6043_s21 = sld [smem:[#allocation7 + $0x48]]  ;;  %s6077_s10 = sld [smem:[#allocation7 + $0x11]] }
 0x15b   : > { %v1435_v5 = vmul.f32 %v1434_v1, %v5898_v39 }
 0x15e   : > { %1151 = vrot.lane.b32.xlu1 %v1146_v2, %s8770_s18  ;;  %1149 = vrot.lane.b32.xlu0 %v1145_v29, %s8770_s18  ;;  %v1436_v29 = vmul.f32 %v1434_v1, %v5900_v40 }
 0x162   : > { %1165 = vrot.lane.b32.xlu1 %v1160_v8, %s8770_s18  ;;  %1163 = vrot.lane.b32.xlu0 %v1159_v9, %s8770_s18  ;;  %v5948_v8 = vld [vmem:[#allocation2 + $0x19] sm:$0xff]  ;;  %v5950_v9 = vld [vmem:[#allocation2 + $0x21] sm:$0xff] }
 0x163   : > { %8812 = vst [vmem:[#allocation17_spill] sm:$0xff] %v5948_v8  ;;  %8813 = vst [vmem:[#allocation18_spill] sm:$0xff] %v5950_v9  ;;  %v1476_v37 = vmul.f32 %v1474_v46, %v5950_v9  ;;  %v1518_v34 = vmul.f32 %v1516_v31, %v5950_v9  ;;  %v1560_v53 = vmul.f32 %v1558_v49, %v5950_v9 }
 0x166   : > { %1205 = vrot.lane.b32.xlu1 %v1200_v11, %s5184_s12  ;;  %1203 = vrot.lane.b32.xlu0 %v1199_v12, %s5184_s12 }
 0x16a   : > { %1219 = vrot.lane.b32.xlu1 %v1214_v13, %s5184_s12  ;;  %1217 = vrot.lane.b32.xlu0 %v1213_v14, %s5184_s12  ;;  %v1475_v13 = vmul.f32 %v1474_v46, %v5948_v8  ;;  %v1488_v14 = vstv %s4680_s23  ;;  %s6054_s23 = sld [smem:[#allocation7 + $0x7c]] }
 0x16b   : > { %v1489_v23 = vmul.f32 %v1488_v14, %v5948_v8 }
 0x16e   : > { %1233 = vrot.lane.b32.xlu1 %v1228_v20, %s5184_s12  ;;  %1231 = vrot.lane.b32.xlu0 %v1227_v21, %s5184_s12  ;;  %v1490_v21 = vmul.f32 %v1488_v14, %v5950_v9 }
 0x172   : > { %1247 = vrot.lane.b32.xlu1 %v1242_v24, %s5184_s12  ;;  %1245 = vrot.lane.b32.xlu0 %v1241_v25, %s5184_s12  ;;  %v1502_v24 = vstv %s4681_s25  ;;  %s6056_s25 = sld [smem:[#allocation7 + $0x6c]] }
 0x176   : > { %1261 = vrot.lane.b32.xlu1 %v1256_v28, %s8770_s18  ;;  %1259 = vrot.lane.b32.xlu0 %v1255_v27, %s8770_s18  ;;  %v1504_v28 = vmul.f32 %v1502_v24, %v5950_v9  ;;  %v1503_v27 = vmul.f32 %v1502_v24, %v5948_v8  ;;  %v898_v24 = vstv %s6033_s29  ;;  %s6107_s29 = sld [smem:[#allocation7 + $0x9]] }
 0x17a   : > { %1275 = vrot.lane.b32.xlu1 %v1270_v32, %s8770_s18  ;;  %1273 = vrot.lane.b32.xlu0 %v1269_v33, %s8770_s18 }
 0x17e   : > { %1289 = vrot.lane.b32.xlu1 %v1284_v35, %s8770_s18  ;;  %1287 = vrot.lane.b32.xlu0 %v1283_v36, %s8770_s18  ;;  %v1517_v35 = vmul.f32 %v1516_v31, %v5948_v8  ;;  %v1530_v36 = vstv %s4683_s30  ;;  %s6062_s30 = sld [smem:[#allocation7 + $0x6f]] }
 0x182   : > { %1303 = vrot.lane.b32.xlu1 %v1298_v42, %s8770_s18  ;;  %1301 = vrot.lane.b32.xlu0 %v1297_v43, %s8770_s18  ;;  %v1532_v42 = vmul.f32 %v1530_v36, %v5950_v9  ;;  %v1531_v43 = vmul.f32 %v1530_v36, %v5948_v8 }
 0x186   : > { %1343 = vrot.lane.b32.xlu1 %v1338_v44, %s5184_s12  ;;  %1341 = vrot.lane.b32.xlu0 %v1337_v45, %s5184_s12  ;;  %v1544_v44 = vstv %s4684_s8  ;;  %s6064_s8 = sld [smem:[#allocation7 + $0x6]] }
 0x18a   : > { %1357 = vrot.lane.b32.xlu1 %v1352_v47, %s5184_s12  ;;  %1355 = vrot.lane.b32.xlu0 %v1351_v48, %s5184_s12  ;;  %v1546_v47 = vmul.f32 %v1544_v44, %v5950_v9  ;;  %v1545_v48 = vmul.f32 %v1544_v44, %v5948_v8 }
 0x18e   : > { %1371 = vrot.lane.b32.xlu1 %v1366_v50, %s5184_s12  ;;  %1369 = vrot.lane.b32.xlu0 %v1365_v52, %s5184_s12 }
 0x192   : > { %1385 = vrot.lane.b32.xlu1 %v1380_v17, %s5184_s12  ;;  %1383 = vrot.lane.b32.xlu0 %v1379_v54, %s5184_s12  ;;  %v1559_v17 = vmul.f32 %v1558_v49, %v5948_v8  ;;  %v1572_v54 = vstv %s4686_s9  ;;  %s6074_s9 = sld [smem:[#allocation7 + $0x4e]]  ;;  %v1036_v49 = vstv %s6014_s14  ;;  %s6139_s14 = sld [smem:[#allocation7 + $0x2d]] }
 0x193   : > { %v1573_v30 = vmul.f32 %v1572_v54, %v5948_v8 }
 0x196   : > { %1399 = vrot.lane.b32.xlu1 %v1394_v56, %s8770_s18  ;;  %1397 = vrot.lane.b32.xlu0 %v1393_v57, %s8770_s18  ;;  %v1574_v57 = vmul.f32 %v1572_v54, %v5950_v9  ;;  %v1054_v54 = vstv %s6062_s30  ;;  %s4710_s30 = sld [smem:[#allocation7 + $0x80]] }
 0x198   : > { %v5926_v59 = vpop.permute.xlu1 %929  ;;  %v5928_v58 = vpop.permute.xlu0 %927 }
 0x19a   : > { %1413 = vrot.lane.b32.xlu1 %v1408_v60, %s8770_s18  ;;  %1411 = vrot.lane.b32.xlu0 %v1407_v61, %s8770_s18  ;;  %v6022_v60 = vld [vmem:[#allocation2 + $0x81] sm:$0xff]  ;;  %v6024_v61 = vld [vmem:[#allocation2 + $0x79] sm:$0xff] }
 0x19b   : > { %v1614_v1 = vmul.f32 %v1612_v3, %v6022_v60 }
 0x19c   : > { %v5934_v62 = vpop.permute.xlu1 %943  ;;  %v5936_v63 = vpop.permute.xlu0 %941 }
 0x19e   : > { %1427 = vrot.lane.b32.xlu1 %v1422_v6, %s8770_s18  ;;  %1425 = vrot.lane.b32.xlu0 %v1421_v0, %s8770_s18 }
 0x1a0   : > { %v5942_v16 = vpop.permute.xlu1 %957  ;;  %v5944_v2 = vpop.permute.xlu0 %955 }
 0x1a2   : > { %1441 = vrot.lane.b32.xlu1 %v1436_v29, %s8770_s18  ;;  %1439 = vrot.lane.b32.xlu0 %v1435_v5, %s8770_s18  ;;  %v1613_v29 = vmul.f32 %v1612_v3, %v6024_v61  ;;  %v1626_v5 = vstv %s6010_s11  ;;  %s6081_s11 = sld [smem:[#allocation7 + $0x72]] }
 0x1a3   : > { %v1627_v14 = vmul.f32 %v1626_v5, %v6024_v61 }
 0x1a4   : > { %v5954_v11 = vpop.permute.xlu1 %971  ;;  %v5956_v12 = vpop.permute.xlu0 %969 }
 0x1a6   : > { %1481 = vrot.lane.b32.xlu1 %v1476_v37, %s5184_s12  ;;  %1479 = vrot.lane.b32.xlu0 %v1475_v13, %s5184_s12  ;;  %v1628_v13 = vmul.f32 %v1626_v5, %v6022_v60 }
 0x1a8   : > { %v5962_v19 = vpop.permute.xlu1 %985  ;;  %v5964_v20 = vpop.permute.xlu0 %983 }
 0x1aa   : > { %1495 = vrot.lane.b32.xlu1 %v1490_v21, %s5184_s12  ;;  %1493 = vrot.lane.b32.xlu0 %v1489_v23, %s5184_s12  ;;  %v1640_v21 = vstv %s6029_s16  ;;  %v884_v23 = vstv %s6031_s17  ;;  %s6093_s16 = sld [smem:[#allocation7 + $0x35]] }
 0x1ab   : > { %v1641_v36 = vmul.f32 %v1640_v21, %v6024_v61  ;;  %s6105_s17 = sld [smem:[#allocation7 + $0x7d]] }
 0x1ac   : > { %v5970_v25 = vpop.permute.xlu1 %999  ;;  %v5972_v26 = vpop.permute.xlu0 %997 }
 0x1ae   : > { %1509 = vrot.lane.b32.xlu1 %v1504_v28, %s5184_s12  ;;  %1507 = vrot.lane.b32.xlu0 %v1503_v27, %s5184_s12  ;;  %v904_v27 = vstv %s6039_s19  ;;  %s8822_s19 = smov 126  }
 0x1b0   : > { %v5978_v32 = vpop.permute.xlu1 %1013  ;;  %v5980_v33 = vpop.permute.xlu0 %1011 }
 0x1b2   : > { %1523 = vrot.lane.b32.xlu1 %v1518_v34, %s5184_s12  ;;  %1521 = vrot.lane.b32.xlu0 %v1517_v35, %s5184_s12  ;;  %v1642_v35 = vmul.f32 %v1640_v21, %v6022_v60  ;;  %v899_v21 = vmul.f32 %v898_v24, %v5789_v15 }
 0x1b4   : > { %v5986_v38 = vpop.permute.xlu1 %1027  ;;  %v5988_v41 = vpop.permute.xlu0 %1025  ;;  %v901_v9 = vadd.f32 %v899_v21, %v884_v23 }
 0x1b6   : > { %1537 = vrot.lane.b32.xlu1 %v1532_v42, %s8770_s18  ;;  %1535 = vrot.lane.b32.xlu0 %v1531_v43, %s8770_s18  ;;  %v910_v43 = vstv %s6043_s21  ;;  %s6168_s21 = sld [smem:[#allocation7 + $0x37]] }
 0x1b7   : > { %v912_v8 = vmul.f32 %v910_v43, %v5791_v18 }
 0x1b8   : > { %v5994_v45 = vpop.permute.xlu1 %1067  ;;  %v5996_v4 = vpop.permute.xlu0 %1065 }
 0x1ba   : > { %1551 = vrot.lane.b32.xlu1 %v1546_v47, %s8770_s18  ;;  %1549 = vrot.lane.b32.xlu0 %v1545_v48, %s8770_s18  ;;  %v1654_v47 = vstv %s6054_s23  ;;  %v916_v48 = vstv %s6056_s25  ;;  %s6314_s23 = sld [smem:[#allocation7 + $0x75]]  ;;  %s6324_s25 = sld [smem:[#allocation7 + $0x38]] }
 0x1bb   : > { %v918_v21 = vmul.f32 %v916_v48, %v5791_v18 }
 0x1bc   : > { %v6004_v50 = vpop.permute.xlu1 %1081  ;;  %v6006_v52 = vpop.permute.xlu0 %1079 }
 0x1be   : > { %1565 = vrot.lane.b32.xlu1 %v1560_v53, %s8770_s18  ;;  %1563 = vrot.lane.b32.xlu0 %v1559_v17, %s8770_s18  ;;  %v1042_v53 = vstv %s6026_s15  ;;  %v1048_v17 = vstv %s6058_s27  ;;  %s6151_s15 = sld [smem:[#allocation7 + $0x13]]  ;;  %s6353_s27 = sld [smem:[#allocation7 + $0x5c]] }
 0x1bf   : > { %v6128_v44 = vmul.f32 %v1042_v53, %v5828_v51  ;;  %v6131_v42 = vmul.f32 %v1048_v17, %v5828_v51  ;;  %v6143_v28 = vmul.f32 %v1042_v53, %v5830_v7  ;;  %v6146_v5 = vmul.f32 %v1048_v17, %v5830_v7 }
 0x1c0   : > { %v6016_v55 = vpop.permute.xlu1 %1095  ;;  %v6018_v56 = vpop.permute.xlu0 %1093  ;;  %v1682_v53 = vstv %s6093_s16  ;;  %s4720_s16 = sld [smem:[#allocation7 + $0x3b]] }
 0x1c2   : > { %1579 = vrot.lane.b32.xlu1 %v1574_v57, %s8770_s18  ;;  %1577 = vrot.lane.b32.xlu0 %v1573_v30, %s8770_s18  ;;  %s6095_s18 = sld [smem:[#allocation7 + $0x59]]  ;;  %v6149_v57 = vmul.f32 %v1054_v54, %v5830_v7 }
 0x1c4   : > { %v6045_v6 = vpop.permute.xlu1 %1109  ;;  %v6047_v0 = vpop.permute.xlu0 %1107  ;;  %8819 = vst [vmem:[#allocation24_spill] sm:$0xff] %v6149_v57 }
 0x1c5   : > { %8814 = vst [vmem:[#allocation19_spill] sm:$0xff] %v6045_v6  ;;  %8815 = vst [vmem:[#allocation20_spill] sm:$0xff] %v6047_v0 }
 0x1c6   : > { %1619 = vrot.lane.b32.xlu1 %v1614_v1, %s5184_s12  ;;  %1617 = vrot.lane.b32.xlu0 %v1613_v29, %s5184_s12  ;;  %v1656_v1 = vmul.f32 %v1654_v47, %v6022_v60  ;;  %v1655_v29 = vmul.f32 %v1654_v47, %v6024_v61  ;;  %v6134_v47 = vmul.f32 %v1054_v54, %v5828_v51 }
 0x1c7   : > { %v905_v54 = vmul.f32 %v904_v27, %v5789_v15 }
 0x1c8   : > { %v6066_v46 = vpop.permute.xlu1 %1123  ;;  %v6068_v37 = vpop.permute.xlu0 %1121  ;;  %8818 = vst [vmem:[#allocation23_spill] sm:$0xff] %v6134_v47 }
 0x1ca   : > { %1633 = vrot.lane.b32.xlu1 %v1628_v13, %s5184_s12  ;;  %1631 = vrot.lane.b32.xlu0 %v1627_v14, %s5184_s12  ;;  %v900_v14 = vmul.f32 %v898_v24, %v5791_v18  ;;  %v1038_v13 = vmul.f32 %v1036_v49, %v5830_v7  ;;  %v1696_v24 = vstv %s6095_s18  ;;  %v906_v7 = vmul.f32 %v904_v27, %v5791_v18  ;;  %s6208_s18 = sld [smem:[#allocation7 + $0x5b]] }
 0x1cb   : > { %v933_v27 = vadd.f32 %v5928_v58, %v901_v9  ;;  %v8824_v58 = vstv %s6072_s26  ;;  %v8825_v9 = vstv %s6037_s13  ;;  %s6240_s13 = sld [smem:[#allocation7 + $0x51]] }
 0x1cc   : > { %v6087_v31 = vpop.permute.xlu1 %1137  ;;  %v6089_v34 = vpop.permute.xlu0 %1135  ;;  %v902_v17 = vadd.f32 %v900_v14, %v884_v23  ;;  %v1684_v23 = vmul.f32 %v1682_v53, %v6022_v60  ;;  %v6189_v18 = vmul.f32 %v8824_v58, %v5864_v10 }
 0x1cd   : > { %v989_v6 = vadd.f32 %v5964_v20, %v933_v27  ;;  %v8830_v20 = vstv %s6051_s22  ;;  %s6305_s22 = sld [smem:[#allocation7 + $0x14]] }
 0x1ce   : > { %1647 = vrot.lane.b32.xlu1 %v1642_v35, %s5184_s12  ;;  %1645 = vrot.lane.b32.xlu0 %v1641_v36, %s5184_s12  ;;  %v6124_v35 = vmul.f32 %v1036_v49, %v5828_v51  ;;  %v1668_v36 = vstv %s6077_s10  ;;  %v934_v14 = vadd.f32 %v5926_v59, %v902_v17  ;;  %v1683_v59 = vmul.f32 %v1682_v53, %v6024_v61  ;;  %s4718_s10 = sld [smem:[#allocation7 + $0x82]] }
 0x1cf   : > { %v1669_v49 = vmul.f32 %v1668_v36, %v6024_v61  ;;  %v908_v17 = vadd.f32 %v906_v7, %v8825_v9  ;;  %v8829_v53 = vstv %s6074_s9  ;;  %v1318_v7 = vstv %s6139_s14  ;;  %s4727_s14 = sld [smem:[#allocation7 + $0x19]] }
 0x1d0   : > { %v6113_v30 = vpop.permute.xlu1 %1151  ;;  %v6115_v3 = vpop.permute.xlu0 %1149  ;;  %v6206_v58 = vmul.f32 %v8829_v53, %v5864_v10 }
 0x1d1   : > { %8816 = vst [vmem:[#allocation21_spill] sm:$0xff] %v6113_v30  ;;  %8817 = vst [vmem:[#allocation22_spill] sm:$0xff] %v6115_v3  ;;  %v8827_v3 = vstv %s6041_s20  ;;  %s6270_s20 = sld [smem:[#allocation7 + $0x7f]] }
 0x1d2   : > { %1661 = vrot.lane.b32.xlu1 %v1656_v1, %s5184_s12  ;;  %1659 = vrot.lane.b32.xlu0 %v1655_v29, %s5184_s12  ;;  %v1670_v29 = vmul.f32 %v1668_v36, %v6022_v60  ;;  %v1710_v36 = vstv %s6105_s17  ;;  %v914_v30 = vadd.f32 %v912_v8, %v8827_v3  ;;  %v8828_v47 = vmov %v8827_v3  ;;  %s4721_s17 = sld [smem:[#allocation7 + $0x5f]] }
 0x1d3   : > { %v920_v8 = vadd.f32 %v918_v21, %v8830_v20  ;;  %v1750_v3 = vstv %s6151_s15  ;;  %s4728_s15 = sld [smem:[#allocation7 + $0x3d]] }
 0x1d4   : > { %v6153_v51 = vpop.permute.xlu1 %1165  ;;  %v6155_v1 = vpop.permute.xlu0 %1163 }
 0x1d5   : > { %8820 = vst [vmem:[#allocation25_spill] sm:$0xff] %v6153_v51  ;;  %8821 = vst [vmem:[#allocation26_spill] sm:$0xff] %v6155_v1  ;;  %v911_v51 = vmul.f32 %v910_v43, %v5789_v15  ;;  %v8823_v43 = vstv %s6064_s8 }
 0x1d6   : > { %1675 = vrot.lane.b32.xlu1 %v1670_v29, %s8822_s19  ;;  %1673 = vrot.lane.b32.xlu0 %v1669_v49, %s8822_s19  ;;  %v6177_v1 = vmul.f32 %v8823_v43, %v5864_v10  ;;  %v917_v29 = vmul.f32 %v916_v48, %v5789_v15  ;;  %v8826_v43 = vmov %v8825_v9  ;;  %v990_v48 = vadd.f32 %v5962_v19, %v934_v14 }
 0x1d7   : > { %v907_v15 = vadd.f32 %v905_v54, %v8826_v43  ;;  %v913_v57 = vadd.f32 %v911_v51, %v8828_v47  ;;  %v948_v54 = vadd.f32 %v5934_v62, %v908_v17  ;;  %v8831_v47 = vmov %v8830_v20 }
 0x1d8   : > { %v6180_v49 = vpop.permute.xlu1 %1205  ;;  %v6182_v0 = vpop.permute.xlu0 %1203  ;;  %v919_v51 = vadd.f32 %v917_v29, %v8831_v47  ;;  %v1698_v9 = vmul.f32 %v1696_v24, %v6022_v60  ;;  %v1697_v62 = vmul.f32 %v1696_v24, %v6024_v61  ;;  %v1040_v29 = vadd.f32 %v1038_v13, %v990_v48 }
 0x1d9   : > { %v947_v19 = vadd.f32 %v5936_v63, %v907_v15  ;;  %v6227_v63 = vld [vmem:[#allocation2 + $0x98] sm:$0xff]  ;;  %v1004_v21 = vadd.f32 %v5970_v25, %v948_v54  ;;  %v1039_v43 = vadd.f32 %v6124_v35, %v989_v6  ;;  %v962_v15 = vadd.f32 %v5942_v16, %v914_v30  ;;  %v6242_v25 = vld [vmem:[#allocation2 + $0x90] sm:$0xff] }
 0x1da   : > { %1689 = vrot.lane.b32.xlu1 %v1684_v23, %s8822_s19  ;;  %1687 = vrot.lane.b32.xlu0 %v1683_v59, %s8822_s19  ;;  %v8832_v23 = vstv %s6064_s8  ;;  %v961_v53 = vadd.f32 %v5944_v2, %v913_v57  ;;  %v8833_v20 = vstv %s6072_s26  ;;  %v1712_v2 = vmul.f32 %v1710_v36, %v6022_v60  ;;  %s4715_s8 = sld [smem:[#allocation7 + $0x16]]  ;;  %s4716_s26 = sld [smem:[#allocation7 + $0x3a]] }
 0x1db   : > { %v1175_v14 = vmul.f32 %v8832_v23, %v5866_v22  ;;  %v1003_v17 = vadd.f32 %v5972_v26, %v947_v19  ;;  %v1181_v47 = vmul.f32 %v8833_v20, %v5866_v22  ;;  %v1764_v24 = vstv %s6168_s21  ;;  %s4729_s21 = sld [smem:[#allocation7 + $0x61]] }
 0x1dc   : > { %v6221_v27 = vpop.permute.xlu1 %1219  ;;  %v6223_v59 = vpop.permute.xlu0 %1217  ;;  %v1072_v26 = vadd.f32 %v5994_v45, %v1040_v29  ;;  %v1071_v6 = vadd.f32 %v5996_v4, %v1039_v43  ;;  %v8834_v16 = vstv %s6074_s9  ;;  %v1018_v57 = vadd.f32 %v5978_v32, %v962_v15  ;;  %s4717_s9 = sld [smem:[#allocation7 + $0x5e]] }
 0x1dd   : > { %v6249_v30 = vmul.f32 %v8834_v16, %v5866_v22  ;;  %v1017_v13 = vadd.f32 %v5980_v33, %v961_v53  ;;  %v1711_v54 = vmul.f32 %v1710_v36, %v6024_v61  ;;  %v1752_v45 = vmul.f32 %v1750_v3, %v6227_v63 }
 0x1de   : > { %1703 = vrot.lane.b32.xlu1 %v1698_v9, %s8822_s19  ;;  %1701 = vrot.lane.b32.xlu0 %v1697_v62, %s8822_s19  ;;  %v1046_v4 = vadd.f32 %v6143_v28, %v1004_v21  ;;  %v1045_v19 = vadd.f32 %v6128_v44, %v1003_v17  ;;  %v1128_v23 = vadd.f32 %v6066_v46, %v1072_v26  ;;  %v1778_v62 = vstv %s6208_s18  ;;  %s4730_s18 = sld [smem:[#allocation7 + $0x85]] }
 0x1df   : > { %v1127_v9 = vadd.f32 %v6068_v37, %v1071_v6  ;;  %v976_v32 = vadd.f32 %v5954_v11, %v920_v8  ;;  %v975_v33 = vadd.f32 %v5956_v12, %v919_v51  ;;  %v1751_v36 = vmul.f32 %v1750_v3, %v6242_v25  ;;  %v8840_v6 = vld [vmem:[#allocation22_spill] sm:$0xff] }
 0x1e0   : > { %v6254_v35 = vpop.permute.xlu1 %1233  ;;  %v6256_v48 = vpop.permute.xlu0 %1231  ;;  %v1086_v28 = vadd.f32 %v6004_v50, %v1046_v4  ;;  %v1085_v44 = vadd.f32 %v6006_v52, %v1045_v19  ;;  %v1766_v46 = vmul.f32 %v1764_v24, %v6227_v63  ;;  %v1765_v37 = vmul.f32 %v1764_v24, %v6242_v25  ;;  %v8839_v24 = vld [vmem:[#allocation21_spill] sm:$0xff]  ;;  %v8842_v19 = vld [vmem:[#allocation20_spill] sm:$0xff] }
 0x1e1   : > { %v1032_v11 = vadd.f32 %v5986_v38, %v976_v32  ;;  %v1031_v12 = vadd.f32 %v5988_v41, %v975_v33  ;;  %v1052_v8 = vadd.f32 %v6146_v5, %v1018_v57  ;;  %v1051_v3 = vadd.f32 %v6131_v42, %v1017_v13 }
 0x1e2   : > { %1717 = vrot.lane.b32.xlu1 %v1712_v2, %s8822_s19  ;;  %1715 = vrot.lane.b32.xlu0 %v1711_v54, %s8822_s19  ;;  %v1142_v52 = vadd.f32 %v6087_v31, %v1086_v28  ;;  %v1141_v21 = vadd.f32 %v6089_v34, %v1085_v44  ;;  %v1178_v17 = vadd.f32 %v6177_v1, %v1128_v23  ;;  %v1324_v5 = vstv %s6240_s13  ;;  %s6480_s13 = sld [smem:[#allocation7 + $0xc]] }
 0x1e3   : > { %v1177_v29 = vadd.f32 %v1175_v14, %v1127_v9  ;;  %v1100_v38 = vadd.f32 %v6016_v55, %v1052_v8  ;;  %v1099_v41 = vadd.f32 %v6018_v56, %v1051_v3  ;;  %v1780_v42 = vmul.f32 %v1778_v62, %v6227_v63  ;;  %v8837_v55 = vld [vmem:[#allocation24_spill] sm:$0xff]  ;;  %v8838_v56 = vld [vmem:[#allocation23_spill] sm:$0xff] }
 0x1e4   : > { %v6280_v51 = vpop.permute.xlu1 %1247  ;;  %v6282_v50 = vpop.permute.xlu0 %1245  ;;  %v1210_v43 = vadd.f32 %v6180_v49, %v1178_v17  ;;  %v8835_v34 = vstv %s6107_s29  ;;  %v1058_v53 = vadd.f32 %v8837_v55, %v1032_v11  ;;  %v1057_v20 = vadd.f32 %v8838_v56, %v1031_v12  ;;  %v8843_v11 = vld [vmem:[#allocation25_spill] sm:$0xff]  ;;  %v8844_v12 = vld [vmem:[#allocation26_spill] sm:$0xff]  ;;  %s4722_s29 = sld [smem:[#allocation7 + $0x83]] }
 0x1e5   : > { %v1209_v31 = vadd.f32 %v6182_v0, %v1177_v29  ;;  %v1314_v15 = vmul.f32 %v8835_v34, %v5900_v40  ;;  %v8836_v1 = vmov %v8835_v34  ;;  %v1156_v26 = vadd.f32 %v8839_v24, %v1100_v38 }
 0x1e6   : > { %1757 = vrot.lane.b32.xlu1 %v1752_v45, %s5184_s12  ;;  %1755 = vrot.lane.b32.xlu0 %v1751_v36, %s5184_s12  ;;  %v1313_v14 = vmul.f32 %v8836_v1, %v5898_v39  ;;  %v1155_v16 = vadd.f32 %v8840_v6, %v1099_v41  ;;  %v1184_v0 = vadd.f32 %v6189_v18, %v1142_v52  ;;  %v8841_v45 = vld [vmem:[#allocation19_spill] sm:$0xff]  ;;  %v1792_v32 = vstv %s6270_s20  ;;  %s6482_s20 = sld [smem:[#allocation7 + $0x30]] }
 0x1e7   : > { %v1183_v49 = vadd.f32 %v1181_v47, %v1141_v21  ;;  %v1114_v4 = vadd.f32 %v8841_v45, %v1058_v53  ;;  %v1113_v23 = vadd.f32 %v8842_v19, %v1057_v20  ;;  %v1779_v9 = vmul.f32 %v1778_v62, %v6242_v25 }
 0x1e8   : > { %v1262_v2 = vpop.permute.xlu1 %1261  ;;  %v1260_v57 = vpop.permute.xlu0 %1259  ;;  %v1224_v18 = vadd.f32 %v6221_v27, %v1184_v0  ;;  %v1190_v28 = vadd.f32 %v6206_v58, %v1156_v26  ;;  %v1189_v44 = vadd.f32 %v6249_v30, %v1155_v16  ;;  %v1320_v62 = vmul.f32 %v1318_v7, %v5900_v40 }
 0x1e9   : > { %v1266_v13 = vadd.f32 %v1262_v2, %v1210_v43  ;;  %v1265_v54 = vadd.f32 %v1260_v57, %v1209_v31  ;;  %v1223_v47 = vadd.f32 %v6223_v59, %v1183_v49  ;;  %v1319_v27 = vmul.f32 %v1318_v7, %v5898_v39 }
 0x1ea   : > { %1771 = vrot.lane.b32.xlu1 %v1766_v46, %s5184_s12  ;;  %1769 = vrot.lane.b32.xlu0 %v1765_v37, %s5184_s12  ;;  %v1170_v59 = vadd.f32 %v8843_v11, %v1114_v4  ;;  %v1169_v8 = vadd.f32 %v8844_v12, %v1113_v23  ;;  %v8845_v58 = vstv %s6081_s11  ;;  %v1794_v29 = vmul.f32 %v1792_v32, %v6227_v63  ;;  %s4719_s11 = sld [smem:[#allocation7 + $0x17]] }
 0x1eb   : > { %v6318_v33 = vadd.f32 %v1314_v15, %v1266_v13  ;;  %v6320_v36 = vadd.f32 %v1313_v14, %v1265_v54  ;;  %v1194_v30 = vmul.f32 %v8845_v58, %v5864_v10  ;;  %v8846_v21 = vmov %v8845_v58 }
 0x1ec   : > { %v1276_v46 = vpop.permute.xlu1 %1275  ;;  %v1274_v37 = vpop.permute.xlu0 %1273  ;;  %v1193_v17 = vmul.f32 %v8846_v21, %v5866_v22  ;;  %v1238_v7 = vadd.f32 %v6254_v35, %v1190_v28  ;;  %v1237_v38 = vadd.f32 %v6256_v48, %v1189_v44  ;;  %v1793_v34 = vmul.f32 %v1792_v32, %v6242_v25 }
 0x1ed   : > { %v1280_v3 = vadd.f32 %v1276_v46, %v1224_v18  ;;  %v1279_v52 = vadd.f32 %v1274_v37, %v1223_v47  ;;  %v1806_v22 = vstv %s6305_s22  ;;  %v1325_v15 = vmul.f32 %v1324_v5, %v5898_v39  ;;  %v6398_v37 = vld [vmem:[#allocation2 + $0x39] sm:$0xff]  ;;  %s6490_s22 = sld [smem:[#allocation7 + $0x54]] }
 0x1ee   : > { %1785 = vrot.lane.b32.xlu1 %v1780_v42, %s5184_s12  ;;  %1783 = vrot.lane.b32.xlu0 %v1779_v9, %s5184_s12  ;;  %v1326_v42 = vmul.f32 %v1324_v5, %v5900_v40  ;;  %v1196_v1 = vadd.f32 %v1194_v30, %v1170_v59  ;;  %v1195_v14 = vadd.f32 %v1193_v17, %v1169_v8  ;;  %v1330_v48 = vstv %s6314_s23  ;;  %s6492_s23 = sld [smem:[#allocation7 + $0x1a]] }
 0x1ef   : > { %v6345_v41 = vadd.f32 %v1320_v62, %v1280_v3  ;;  %v6347_v43 = vadd.f32 %v1319_v27, %v1279_v52  ;;  %v1808_v6 = vmul.f32 %v1806_v22, %v6227_v63  ;;  %v1807_v16 = vmul.f32 %v1806_v22, %v6242_v25  ;;  %8847 = vst [vmem:[#allocation24_spill] sm:$0xff] %v6398_v37  ;;  %v6400_v62 = vld [vmem:[#allocation2 + $0x31] sm:$0xff] }
 0x1f0   : > { %v1290_v31 = vpop.permute.xlu1 %1289  ;;  %v1288_v10 = vpop.permute.xlu0 %1287  ;;  %v1252_v53 = vadd.f32 %v6280_v51, %v1196_v1  ;;  %v1251_v56 = vadd.f32 %v6282_v50, %v1195_v14  ;;  %v1820_v2 = vstv %s6324_s25  ;;  %v1332_v49 = vmul.f32 %v1330_v48, %v5900_v40  ;;  %8848 = vst [vmem:[#allocation23_spill] sm:$0xff] %v6400_v62  ;;  %s6494_s25 = sld [smem:[#allocation7 + $0x78]] }
 0x1f1   : > { %v1294_v35 = vadd.f32 %v1290_v31, %v1238_v7  ;;  %v1293_v55 = vadd.f32 %v1288_v10, %v1237_v38  ;;  %v1331_v51 = vmul.f32 %v1330_v48, %v5898_v39  ;;  %v1822_v4 = vmul.f32 %v1820_v2, %v6227_v63 }
 0x1f2   : > { %1799 = vrot.lane.b32.xlu1 %v1794_v29, %s5184_s12  ;;  %1797 = vrot.lane.b32.xlu0 %v1793_v34, %s5184_s12  ;;  %v1821_v19 = vmul.f32 %v1820_v2, %v6242_v25  ;;  %v1834_v23 = vstv %s6353_s27  ;;  %v1848_v18 = vstv %s4710_s30  ;;  %s6504_s27 = sld [smem:[#allocation7 + $0xf]]  ;;  %s6506_s30 = sld [smem:[#allocation7 + $0x3e]] }
 0x1f3   : > { %v6360_v20 = vadd.f32 %v1326_v42, %v1294_v35  ;;  %v6362_v24 = vadd.f32 %v1325_v15, %v1293_v55  ;;  %v1836_v9 = vmul.f32 %v1834_v23, %v6227_v63  ;;  %v1835_v32 = vmul.f32 %v1834_v23, %v6242_v25 }
 0x1f4   : > { %v1304_v5 = vpop.permute.xlu1 %1303  ;;  %v1302_v26 = vpop.permute.xlu0 %1301  ;;  %v1850_v44 = vmul.f32 %v1848_v18, %v6227_v63  ;;  %v1849_v46 = vmul.f32 %v1848_v18, %v6242_v25  ;;  %v1888_v27 = vstv %s4715_s8  ;;  %v1902_v3 = vstv %s4716_s26  ;;  %v6468_v18 = vld [vmem:[#allocation2 + $0x91] sm:$0xff]  ;;  %s6510_s8 = sld [smem:[#allocation7 + $0x33]]  ;;  %s6512_s26 = sld [smem:[#allocation7 + $0x57]] }
 0x1f5   : > { %v1308_v57 = vadd.f32 %v1304_v5, %v1252_v53  ;;  %v1307_v0 = vadd.f32 %v1302_v26, %v1251_v56  ;;  %v1890_v12 = vmul.f32 %v1888_v27, %v6398_v37  ;;  %v1889_v8 = vmul.f32 %v1888_v27, %v6400_v62 }
 0x1f6   : > { %1813 = vrot.lane.b32.xlu1 %v1808_v6, %s8822_s19  ;;  %1811 = vrot.lane.b32.xlu0 %v1807_v16, %s8822_s19  ;;  %v1904_v30 = vmul.f32 %v1902_v3, %v6398_v37  ;;  %v1903_v21 = vmul.f32 %v1902_v3, %v6400_v62  ;;  %v1916_v17 = vstv %s4717_s9  ;;  %v1930_v10 = vstv %s4718_s10  ;;  %s6521_s9 = sld [smem:[#allocation7 + $0x62]]  ;;  %s6526_s10 = sld [smem:[#allocation7 + $0x86]] }
 0x1f7   : > { %v6371_v50 = vadd.f32 %v1332_v49, %v1308_v57  ;;  %v6373_v13 = vadd.f32 %v1331_v51, %v1307_v0  ;;  %v1918_v38 = vmul.f32 %v1916_v17, %v6398_v37  ;;  %v1917_v31 = vmul.f32 %v1916_v17, %v6400_v62 }
 0x1f8   : > { %v6375_v54 = vpop.permute.xlu1 %1343  ;;  %v6377_v45 = vpop.permute.xlu0 %1341  ;;  %v1932_v42 = vmul.f32 %v1930_v10, %v6398_v37  ;;  %v1931_v15 = vmul.f32 %v1930_v10, %v6400_v62  ;;  %v1944_v1 = vstv %s4719_s11  ;;  %v1958_v53 = vstv %s4720_s16  ;;  %s6544_s11 = sld [smem:[#allocation7 + $0x1c]]  ;;  %s6546_s16 = sld [smem:[#allocation7 + $0x40]] }
 0x1f9   : > { %v1946_v55 = vmul.f32 %v1944_v1, %v6398_v37  ;;  %v1945_v48 = vmul.f32 %v1944_v1, %v6400_v62  ;;  %v1960_v26 = vmul.f32 %v1958_v53, %v6398_v37  ;;  %v1959_v6 = vmul.f32 %v1958_v53, %v6400_v62 }
 0x1fa   : > { %1827 = vrot.lane.b32.xlu1 %v1822_v4, %s8822_s19  ;;  %1825 = vrot.lane.b32.xlu0 %v1821_v19, %s8822_s19  ;;  %v1972_v16 = vstv %s4721_s17  ;;  %v1986_v51 = vstv %s4722_s29  ;;  %s6579_s17 = sld [smem:[#allocation7 + $0x64]]  ;;  %s6598_s29 = sld [smem:[#allocation7 + $0x7b]] }
 0x1fb   : > { %v1974_v0 = vmul.f32 %v1972_v16, %v6398_v37  ;;  %v1973_v49 = vmul.f32 %v1972_v16, %v6400_v62  ;;  %v1988_v23 = vmul.f32 %v1986_v51, %v6398_v37  ;;  %v2040_v3 = vstv %s4728_s15  ;;  %s6631_s15 = sld [smem:[#allocation7 + $0x88]] }
 0x1fc   : > { %v6384_v39 = vpop.permute.xlu1 %1357  ;;  %v6386_v40 = vpop.permute.xlu0 %1355 }
 0x1fe   : > { %1841 = vrot.lane.b32.xlu1 %v1836_v9, %s8822_s19  ;;  %1839 = vrot.lane.b32.xlu0 %v1835_v32, %s8822_s19  ;;  %v1987_v9 = vmul.f32 %v1986_v51, %v6400_v62  ;;  %v6466_v32 = vld [vmem:[#allocation2 + $0x99] sm:$0xff]  ;;  %v2082_v51 = vstv %s6492_s23  ;;  %s6733_s23 = sld [smem:[#allocation7 + $0x65]] }
 0x1ff   : > { %v2042_v17 = vmul.f32 %v2040_v3, %v6466_v32 }
 0x200   : > { %v6392_v47 = vpop.permute.xlu1 %1371  ;;  %v6394_v28 = vpop.permute.xlu0 %1369 }
 0x202   : > { %1855 = vrot.lane.b32.xlu1 %v1850_v44, %s8822_s19  ;;  %1853 = vrot.lane.b32.xlu0 %v1849_v46, %s8822_s19  ;;  %v2026_v44 = vstv %s4727_s14  ;;  %s6608_s14 = sld [smem:[#allocation7 + $0x12]] }
 0x204   : > { %v6404_v11 = vpop.permute.xlu1 %1385  ;;  %v6406_v59 = vpop.permute.xlu0 %1383 }
 0x206   : > { %1895 = vrot.lane.b32.xlu1 %v1890_v12, %s5184_s12  ;;  %1893 = vrot.lane.b32.xlu0 %v1889_v8, %s5184_s12  ;;  %v2028_v12 = vmul.f32 %v2026_v44, %v6466_v32  ;;  %v2027_v8 = vmul.f32 %v2026_v44, %v6468_v18 }
 0x208   : > { %v6412_v52 = vpop.permute.xlu1 %1399  ;;  %v6414_v58 = vpop.permute.xlu0 %1397 }
 0x20a   : > { %1909 = vrot.lane.b32.xlu1 %v1904_v30, %s5184_s12  ;;  %1907 = vrot.lane.b32.xlu0 %v1903_v21, %s5184_s12 }
 0x20c   : > { %v6420_v29 = vpop.permute.xlu1 %1413  ;;  %v6422_v7 = vpop.permute.xlu0 %1411 }
 0x20e   : > { %1923 = vrot.lane.b32.xlu1 %v1918_v38, %s5184_s12  ;;  %1921 = vrot.lane.b32.xlu0 %v1917_v31, %s5184_s12  ;;  %v2041_v38 = vmul.f32 %v2040_v3, %v6468_v18  ;;  %v2054_v31 = vstv %s4729_s21  ;;  %s6637_s21 = sld [smem:[#allocation7 + $0x36]] }
 0x20f   : > { %v2055_v1 = vmul.f32 %v2054_v31, %v6468_v18 }
 0x210   : > { %v6428_v34 = vpop.permute.xlu1 %1427  ;;  %v6430_v22 = vpop.permute.xlu0 %1425 }
 0x212   : > { %1937 = vrot.lane.b32.xlu1 %v1932_v42, %s5184_s12  ;;  %1935 = vrot.lane.b32.xlu0 %v1931_v15, %s5184_s12  ;;  %v2056_v15 = vmul.f32 %v2054_v31, %v6466_v32  ;;  %v2083_v31 = vmul.f32 %v2082_v51, %v6468_v18 }
 0x214   : > { %v6436_v14 = vpop.permute.xlu1 %1441  ;;  %v6438_v35 = vpop.permute.xlu0 %1439 }
 0x216   : > { %1951 = vrot.lane.b32.xlu1 %v1946_v55, %s8822_s19  ;;  %1949 = vrot.lane.b32.xlu0 %v1945_v48, %s8822_s19  ;;  %v2068_v55 = vstv %s4730_s18  ;;  %v1450_v48 = vstv %s6480_s13  ;;  %s6658_s18 = sld [smem:[#allocation7 + $0x5a]]  ;;  %s6690_s13 = sld [smem:[#allocation7 + $0x1d]] }
 0x217   : > { %v2069_v16 = vmul.f32 %v2068_v55, %v6468_v18 }
 0x218   : > { %v6444_v56 = vpop.permute.xlu1 %1481  ;;  %v6446_v5 = vpop.permute.xlu0 %1479 }
 0x21a   : > { %1965 = vrot.lane.b32.xlu1 %v1960_v26, %s8822_s19  ;;  %1963 = vrot.lane.b32.xlu0 %v1959_v6, %s8822_s19  ;;  %v2070_v6 = vmul.f32 %v2068_v55, %v6466_v32 }
 0x21c   : > { %v6452_v2 = vpop.permute.xlu1 %1495  ;;  %v6454_v57 = vpop.permute.xlu0 %1493 }
 0x21e   : > { %1979 = vrot.lane.b32.xlu1 %v1974_v0, %s8822_s19  ;;  %1977 = vrot.lane.b32.xlu0 %v1973_v49, %s8822_s19  ;;  %v1456_v0 = vstv %s6482_s20  ;;  %v1462_v49 = vstv %s6490_s22  ;;  %s6700_s20 = sld [smem:[#allocation7 + $0x7e]]  ;;  %s6710_s22 = sld [smem:[#allocation7 + $0x41]] }
 0x220   : > { %v6460_v4 = vpop.permute.xlu1 %1509  ;;  %v6462_v19 = vpop.permute.xlu0 %1507 }
 0x222   : > { %1993 = vrot.lane.b32.xlu1 %v1988_v23, %s8822_s19  ;;  %1991 = vrot.lane.b32.xlu0 %v1987_v9, %s8822_s19  ;;  %v1468_v23 = vstv %s6494_s25  ;;  %v8851_v9 = vld [vmem:[#allocation17_spill] sm:$0xff]  ;;  %s4746_s25 = sld [smem:[#allocation7 + $0x89]] }
 0x223   : > { %v1451_v44 = vmul.f32 %v1450_v48, %v8851_v9  ;;  %v6550_v55 = vmul.f32 %v1468_v23, %v8851_v9 }
 0x224   : > { %v6472_v46 = vpop.permute.xlu1 %1523  ;;  %v6474_v27 = vpop.permute.xlu0 %1521 }
 0x225   : > { %8849 = vst [vmem:[#allocation21_spill] sm:$0xff] %v6472_v46  ;;  %8850 = vst [vmem:[#allocation22_spill] sm:$0xff] %v6474_v27  ;;  %v1376_v46 = vadd.f32 %v6392_v47, %v6360_v20 }
 0x226   : > { %2033 = vrot.lane.b32.xlu1 %v2028_v12, %s5184_s12  ;;  %2031 = vrot.lane.b32.xlu0 %v2027_v8, %s5184_s12  ;;  %v6533_v12 = vmul.f32 %v1456_v0, %v8851_v9  ;;  %v6536_v8 = vmul.f32 %v1462_v49, %v8851_v9  ;;  %v1594_v9 = vstv %s6510_s8  ;;  %s4753_s8 = sld [smem:[#allocation7 + $0x67]] }
 0x227   : > { %v6590_v27 = vmul.f32 %v1594_v9, %v6022_v60 }
 0x228   : > { %v6484_v30 = vpop.permute.xlu1 %1537  ;;  %v6486_v21 = vpop.permute.xlu0 %1535 }
 0x22a   : > { %2047 = vrot.lane.b32.xlu1 %v2042_v17, %s5184_s12  ;;  %2045 = vrot.lane.b32.xlu0 %v2041_v38, %s5184_s12  ;;  %v2084_v38 = vmul.f32 %v2082_v51, %v6466_v32  ;;  %v1347_v51 = vadd.f32 %v6377_v45, %v6320_v36  ;;  %v2124_v45 = vstv %s6526_s10  ;;  %s4756_s10 = sld [smem:[#allocation7 + $0x44]] }
 0x22c   : > { %v6498_v10 = vpop.permute.xlu1 %1551  ;;  %v6500_v42 = vpop.permute.xlu0 %1549  ;;  %v1403_v36 = vadd.f32 %v6414_v58, %v1347_v51  ;;  %v1362_v58 = vadd.f32 %v6384_v39, %v6345_v41  ;;  %v2126_v39 = vmul.f32 %v2124_v45, %v6466_v32 }
 0x22e   : > { %2061 = vrot.lane.b32.xlu1 %v2056_v15, %s5184_s12  ;;  %2059 = vrot.lane.b32.xlu0 %v2055_v1, %s5184_s12  ;;  %v8854_v15 = vld [vmem:[#allocation18_spill] sm:$0xff] }
 0x22f   : > { %v1452_v1 = vmul.f32 %v1450_v48, %v8854_v15  ;;  %v1458_v62 = vmul.f32 %v1456_v0, %v8854_v15  ;;  %v6556_v37 = vmul.f32 %v1462_v49, %v8854_v15  ;;  %v1348_v48 = vadd.f32 %v6375_v54, %v6318_v33 }
 0x230   : > { %v6515_v53 = vpop.permute.xlu1 %1565  ;;  %v6517_v26 = vpop.permute.xlu0 %1563 }
 0x231   : > { %v1404_v33 = vadd.f32 %v6412_v52, %v1348_v48 }
 0x232   : > { %2075 = vrot.lane.b32.xlu1 %v2070_v6, %s5184_s12  ;;  %2073 = vrot.lane.b32.xlu0 %v2069_v16, %s5184_s12  ;;  %v1588_v6 = vstv %s6504_s27  ;;  %v2096_v16 = vstv %s6506_s30  ;;  %s4751_s27 = sld [smem:[#allocation7 + $0x1f]]  ;;  %s4752_s30 = sld [smem:[#allocation7 + $0x43]] }
 0x233   : > { %v6570_v0 = vmul.f32 %v1588_v6, %v6022_v60  ;;  %v6584_v54 = vmul.f32 %v1588_v6, %v6024_v61  ;;  %v1361_v6 = vadd.f32 %v6386_v40, %v6347_v43  ;;  %v2164_v43 = vstv %s6544_s11  ;;  %s4757_s11 = sld [smem:[#allocation7 + $0x68]] }
 0x234   : > { %v6538_v3 = vpop.permute.xlu1 %1579  ;;  %v6540_v17 = vpop.permute.xlu0 %1577  ;;  %v2178_v40 = vstv %s6546_s16  ;;  %s4758_s16 = sld [smem:[#allocation7 + $0x8c]] }
 0x235   : > { %8852 = vst [vmem:[#allocation19_spill] sm:$0xff] %v6538_v3  ;;  %8853 = vst [vmem:[#allocation20_spill] sm:$0xff] %v6540_v17  ;;  %v6559_v17 = vmul.f32 %v1468_v23, %v8854_v15  ;;  %v1600_v3 = vstv %s6512_s26  ;;  %v2097_v15 = vmul.f32 %v2096_v16, %v6468_v18  ;;  %s4754_s26 = sld [smem:[#allocation7 + $0x8b]] }
 0x236   : > { %2089 = vrot.lane.b32.xlu1 %v2084_v38, %s8822_s19  ;;  %2087 = vrot.lane.b32.xlu0 %v2083_v31, %s8822_s19  ;;  %v2098_v38 = vmul.f32 %v2096_v16, %v6466_v32  ;;  %v2110_v31 = vstv %s6521_s9  ;;  %v6593_v16 = vmul.f32 %v1594_v9, %v6024_v61  ;;  %v6596_v52 = vmul.f32 %v1600_v3, %v6022_v60  ;;  %v6610_v9 = vld [vmem:[#allocation2 + $0xa8] sm:$0xff]  ;;  %s4755_s9 = sld [smem:[#allocation7 + $0x20]] }
 0x237   : > { %v2112_v48 = vmul.f32 %v2110_v31, %v6466_v32  ;;  %v6606_v51 = vmul.f32 %v1600_v3, %v6024_v61  ;;  %v2111_v41 = vmul.f32 %v2110_v31, %v6468_v18  ;;  %v1417_v61 = vadd.f32 %v6422_v7, %v1361_v6 }
 0x238   : > { %v6572_v49 = vpop.permute.xlu1 %1619  ;;  %v6574_v23 = vpop.permute.xlu0 %1617  ;;  %8855 = vst [vmem:[#allocation25_spill] sm:$0xff] %v6596_v52  ;;  %v1418_v52 = vadd.f32 %v6420_v29, %v1362_v58  ;;  %v1454_v3 = vadd.f32 %v1452_v1, %v1404_v33  ;;  %v2125_v31 = vmul.f32 %v2124_v45, %v6468_v18  ;;  %v2165_v20 = vmul.f32 %v2164_v43, %v6610_v9 }
 0x239   : > { %8856 = vst [vmem:[#allocation26_spill] sm:$0xff] %v6606_v51  ;;  %v1453_v51 = vadd.f32 %v1451_v44, %v1403_v36  ;;  %v1459_v36 = vadd.f32 %v6533_v12, %v1417_v61  ;;  %v2179_v6 = vmul.f32 %v2178_v40, %v6610_v9 }
 0x23a   : > { %2103 = vrot.lane.b32.xlu1 %v2098_v38, %s8822_s19  ;;  %2101 = vrot.lane.b32.xlu0 %v2097_v15, %s8822_s19  ;;  %v6612_v38 = vld [vmem:[#allocation2 + $0xb0] sm:$0xff]  ;;  %v1486_v29 = vadd.f32 %v6444_v56, %v1454_v3  ;;  %v2192_v56 = vstv %s6579_s17  ;;  %s4763_s17 = sld [smem:[#allocation7 + $0x22]] }
 0x23b   : > { %v1485_v7 = vadd.f32 %v6446_v5, %v1453_v51  ;;  %v2166_v44 = vmul.f32 %v2164_v43, %v6612_v38  ;;  %v2180_v33 = vmul.f32 %v2178_v40, %v6612_v38  ;;  %v1460_v5 = vadd.f32 %v1458_v62, %v1418_v52 }
 0x23c   : > { %v6614_v60 = vpop.permute.xlu1 %1633  ;;  %v6616_v15 = vpop.permute.xlu0 %1631  ;;  %v1542_v45 = vadd.f32 %v6484_v30, %v1486_v29  ;;  %v1499_v30 = vadd.f32 %v6454_v57, %v1459_v36 }
 0x23d   : > { %8857 = vst [vmem:[#allocation17_spill] sm:$0xff] %v6614_v60  ;;  %v1375_v60 = vadd.f32 %v6394_v28, %v6362_v24  ;;  %v1432_v24 = vadd.f32 %v6428_v34, %v1376_v46  ;;  %v1541_v58 = vadd.f32 %v6486_v21, %v1485_v7  ;;  %v1390_v34 = vadd.f32 %v6404_v11, %v6371_v50 }
 0x23e   : > { %2117 = vrot.lane.b32.xlu1 %v2112_v48, %s8822_s19  ;;  %2115 = vrot.lane.b32.xlu0 %v2111_v41, %s8822_s19  ;;  %v1606_v46 = vstv %s6598_s29  ;;  %v1500_v62 = vadd.f32 %v6452_v2, %v1460_v5  ;;  %v2194_v21 = vmul.f32 %v2192_v56, %v6612_v38  ;;  %v1726_v50 = vstv %s6608_s14  ;;  %s4764_s29 = sld [smem:[#allocation7 + $0x46]]  ;;  %s4765_s14 = sld [smem:[#allocation7 + $0x6a]] }
 0x23f   : > { %v1431_v47 = vadd.f32 %v6430_v22, %v1375_v60  ;;  %v1389_v22 = vadd.f32 %v6406_v59, %v6373_v13  ;;  %v1446_v11 = vadd.f32 %v6436_v14, %v1390_v34  ;;  %v1466_v59 = vadd.f32 %v6556_v37, %v1432_v24  ;;  %v8861_v24 = vld [vmem:[#allocation25_spill] sm:$0xff]  ;;  %v8863_v34 = vld [vmem:[#allocation19_spill] sm:$0xff] }
 0x240   : > { %v6641_v28 = vpop.permute.xlu1 %1647  ;;  %v6643_v1 = vpop.permute.xlu0 %1645  ;;  %v1556_v2 = vadd.f32 %v6498_v10, %v1500_v62  ;;  %v1555_v57 = vadd.f32 %v6500_v42, %v1499_v30  ;;  %v1592_v51 = vadd.f32 %v6570_v0, %v1542_v45  ;;  %v1591_v60 = vadd.f32 %v6584_v54, %v1541_v58 }
 0x241   : > { %v1445_v13 = vadd.f32 %v6438_v35, %v1389_v22  ;;  %v1465_v12 = vadd.f32 %v6536_v8, %v1431_v47  ;;  %v1514_v14 = vadd.f32 %v6460_v4, %v1466_v59  ;;  %v2206_v37 = vstv %s6631_s15  ;;  %s4766_s15 = sld [smem:[#allocation7 + $0x8e]] }
 0x242   : > { %2131 = vrot.lane.b32.xlu1 %v2126_v39, %s8822_s19  ;;  %2129 = vrot.lane.b32.xlu0 %v2125_v31, %s8822_s19  ;;  %v1728_v8 = vmul.f32 %v1726_v50, %v6227_v63  ;;  %v1624_v41 = vadd.f32 %v6572_v49, %v1592_v51  ;;  %v1623_v10 = vadd.f32 %v6574_v23, %v1591_v60  ;;  %v1732_v0 = vstv %s6637_s21  ;;  %v8858_v31 = vld [vmem:[#allocation21_spill] sm:$0xff]  ;;  %s6866_s21 = sld [smem:[#allocation7 + $0x23]] }
 0x243   : > { %v1513_v35 = vadd.f32 %v6462_v19, %v1465_v12  ;;  %v1727_v42 = vmul.f32 %v1726_v50, %v6242_v25  ;;  %v1472_v54 = vadd.f32 %v6559_v17, %v1446_v11  ;;  %v1471_v4 = vadd.f32 %v6550_v55, %v1445_v13  ;;  %v8859_v17 = vld [vmem:[#allocation22_spill] sm:$0xff]  ;;  %v5031_v13 = vld [vmem:[#allocation2 + $0x79] sm:$0xff] }
 0x244   : > { %v6668_v52 = vpop.permute.xlu1 %1661  ;;  %v6670_v48 = vpop.permute.xlu0 %1659  ;;  %v1570_v19 = vadd.f32 %v6515_v53, %v1514_v14  ;;  %v1598_v49 = vadd.f32 %v6590_v27, %v1556_v2  ;;  %v1597_v23 = vadd.f32 %v6593_v16, %v1555_v57  ;;  %v2193_v53 = vmul.f32 %v2192_v56, %v6610_v9  ;;  %v8860_v55 = vld [vmem:[#allocation17_spill] sm:$0xff] }
 0x245   : > { %v1569_v39 = vadd.f32 %v6517_v26, %v1513_v35  ;;  %v1528_v29 = vadd.f32 %v8858_v31, %v1472_v54  ;;  %v1527_v7 = vadd.f32 %v8859_v17, %v1471_v4  ;;  %v1738_v26 = vstv %s6658_s18  ;;  %v5030_v50 = vld [vmem:[#allocation2 + $0x81] sm:$0xff]  ;;  %s6868_s18 = sld [smem:[#allocation7 + $0x1]] }
 0x246   : > { %2171 = vrot.lane.b32.xlu1 %v2166_v44, %s5184_s12  ;;  %2169 = vrot.lane.b32.xlu0 %v2165_v20, %s5184_s12  ;;  %v1638_v44 = vadd.f32 %v8860_v55, %v1598_v49  ;;  %v1637_v27 = vadd.f32 %v6616_v15, %v1597_v23  ;;  %v1604_v47 = vadd.f32 %v8861_v24, %v1570_v19  ;;  %v8864_v15 = vld [vmem:[#allocation20_spill] sm:$0xff]  ;;  %v2234_v23 = vstv %s6710_s22  ;;  %s6876_s22 = sld [smem:[#allocation7 + $0x15]] }
 0x247   : > { %v1734_v56 = vmul.f32 %v1732_v0, %v6227_v63  ;;  %v1733_v58 = vmul.f32 %v1732_v0, %v6242_v25  ;;  %v1584_v22 = vadd.f32 %v8863_v34, %v1528_v29  ;;  %v1608_v11 = vmul.f32 %v5030_v50, %v1606_v46 }
 0x248   : > { %v1676_v43 = vpop.permute.xlu1 %1675  ;;  %v1674_v40 = vpop.permute.xlu0 %1673  ;;  %v1607_v59 = vmul.f32 %v5031_v13, %v1606_v46  ;;  %v2208_v12 = vmul.f32 %v2206_v37, %v6612_v38  ;;  %v1652_v2 = vadd.f32 %v6641_v28, %v1604_v47  ;;  %v2220_v46 = vstv %s6690_s13  ;;  %s6872_s13 = sld [smem:[#allocation7 + $0x25]] }
 0x249   : > { %v1680_v61 = vadd.f32 %v1676_v43, %v1624_v41  ;;  %v1679_v3 = vadd.f32 %v1674_v40, %v1623_v10  ;;  %v1739_v41 = vmul.f32 %v1738_v26, %v6242_v25  ;;  %v1610_v10 = vadd.f32 %v1608_v11, %v1584_v22 }
 0x24a   : > { %2185 = vrot.lane.b32.xlu1 %v2180_v33, %s5184_s12  ;;  %2183 = vrot.lane.b32.xlu0 %v2179_v6, %s5184_s12  ;;  %v8862_v33 = vld [vmem:[#allocation26_spill] sm:$0xff]  ;;  %v1583_v6 = vadd.f32 %v8864_v15, %v1527_v7  ;;  %v2222_v40 = vmul.f32 %v2220_v46, %v6612_v38  ;;  %v2221_v49 = vmul.f32 %v2220_v46, %v6610_v9  ;;  %v2248_v55 = vstv %s6733_s23  ;;  %s6878_s23 = sld [smem:[#allocation7 + $0x39]] }
 0x24b   : > { %v6704_v16 = vadd.f32 %v1728_v8, %v1680_v61  ;;  %v6706_v20 = vadd.f32 %v1727_v42, %v1679_v3  ;;  %v1603_v5 = vadd.f32 %v8862_v33, %v1569_v39  ;;  %v2207_v8 = vmul.f32 %v2206_v37, %v6610_v9 }
 0x24c   : > { %v1690_v36 = vpop.permute.xlu1 %1689  ;;  %v1688_v45 = vpop.permute.xlu0 %1687  ;;  %v1609_v42 = vadd.f32 %v1607_v59, %v1583_v6  ;;  %v1666_v54 = vadd.f32 %v6668_v52, %v1610_v10  ;;  %v2262_v24 = vstv %s4746_s25  ;;  %v2330_v59 = vstv %s4753_s8  ;;  %s6880_s25 = sld [smem:[#allocation7 + $0x5d]]  ;;  %s6901_s8 = sld [smem:[#allocation7 + $0x18]] }
 0x24d   : > { %v1694_v62 = vadd.f32 %v1690_v36, %v1638_v44  ;;  %v1693_v30 = vadd.f32 %v1688_v45, %v1637_v27  ;;  %v1651_v57 = vadd.f32 %v6643_v1, %v1603_v5  ;;  %v1744_v1 = vstv %s6700_s20  ;;  %v6778_v45 = vld [vmem:[#allocation2 + $0x51] sm:$0xff]  ;;  %s6874_s20 = sld [smem:[#allocation7 + $0x49]] }
 0x24e   : > { %2199 = vrot.lane.b32.xlu1 %v2194_v21, %s5184_s12  ;;  %2197 = vrot.lane.b32.xlu0 %v2193_v53, %s5184_s12  ;;  %v1740_v21 = vmul.f32 %v1738_v26, %v6227_v63  ;;  %v1665_v37 = vadd.f32 %v6670_v48, %v1609_v42  ;;  %v1746_v31 = vmul.f32 %v1744_v1, %v6227_v63  ;;  %v2358_v10 = vstv %s4755_s9  ;;  %s6912_s9 = sld [smem:[#allocation7 + $0x3c]] }
 0x24f   : > { %v6725_v51 = vadd.f32 %v1734_v56, %v1694_v62  ;;  %v6727_v60 = vadd.f32 %v1733_v58, %v1693_v30  ;;  %v1745_v52 = vmul.f32 %v1744_v1, %v6242_v25  ;;  %v2236_v53 = vmul.f32 %v2234_v23, %v6612_v38  ;;  %8865 = vst [vmem:[#allocation18_spill] sm:$0xff] %v6778_v45  ;;  %v6780_v56 = vld [vmem:[#allocation2 + $0x49] sm:$0xff] }
 0x250   : > { %v1704_v14 = vpop.permute.xlu1 %1703  ;;  %v1702_v35 = vpop.permute.xlu0 %1701  ;;  %v2235_v26 = vmul.f32 %v2234_v23, %v6610_v9  ;;  %v2250_v44 = vmul.f32 %v2248_v55, %v6612_v38  ;;  %v2249_v27 = vmul.f32 %v2248_v55, %v6610_v9  ;;  %v2264_v5 = vmul.f32 %v2262_v24, %v6612_v38  ;;  %8866 = vst [vmem:[#allocation21_spill] sm:$0xff] %v6780_v56 }
 0x251   : > { %v1708_v28 = vadd.f32 %v1704_v14, %v1652_v2  ;;  %v1707_v0 = vadd.f32 %v1702_v35, %v1651_v57  ;;  %v2263_v36 = vmul.f32 %v2262_v24, %v6610_v9  ;;  %v2302_v58 = vstv %s4751_s27  ;;  %v6848_v24 = vld [vmem:[#allocation2 + $0xa9] sm:$0xff]  ;;  %s6882_s27 = sld [smem:[#allocation7 + $0x81]] }
 0x252   : > { %2213 = vrot.lane.b32.xlu1 %v2208_v12, %s5184_s12  ;;  %2211 = vrot.lane.b32.xlu0 %v2207_v8, %s5184_s12  ;;  %v2304_v15 = vmul.f32 %v2302_v58, %v6778_v45  ;;  %v2303_v6 = vmul.f32 %v2302_v58, %v6780_v56  ;;  %v2316_v62 = vstv %s4752_s30  ;;  %v2332_v57 = vmul.f32 %v2330_v59, %v6778_v45  ;;  %s6890_s30 = sld [smem:[#allocation7 + $0x47]] }
 0x253   : > { %v6740_v4 = vadd.f32 %v1740_v21, %v1708_v28  ;;  %v6742_v19 = vadd.f32 %v1739_v41, %v1707_v0  ;;  %v2318_v11 = vmul.f32 %v2316_v62, %v6778_v45  ;;  %v2317_v13 = vmul.f32 %v2316_v62, %v6780_v56 }
 0x254   : > { %v1718_v39 = vpop.permute.xlu1 %1717  ;;  %v1716_v43 = vpop.permute.xlu0 %1715  ;;  %v2331_v14 = vmul.f32 %v2330_v59, %v6780_v56  ;;  %v2344_v35 = vstv %s4754_s26  ;;  %v2360_v0 = vmul.f32 %v2358_v10, %v6778_v45  ;;  %v2359_v1 = vmul.f32 %v2358_v10, %v6780_v56  ;;  %s6903_s26 = sld [smem:[#allocation7 + $0x6b]] }
 0x255   : > { %v1722_v61 = vadd.f32 %v1718_v39, %v1666_v54  ;;  %v1721_v3 = vadd.f32 %v1716_v43, %v1665_v37  ;;  %v2346_v21 = vmul.f32 %v2344_v35, %v6778_v45  ;;  %v2345_v41 = vmul.f32 %v2344_v35, %v6780_v56 }
 0x256   : > { %2227 = vrot.lane.b32.xlu1 %v2222_v40, %s8822_s19  ;;  %2225 = vrot.lane.b32.xlu0 %v2221_v49, %s8822_s19  ;;  %v2372_v54 = vstv %s4756_s10  ;;  %v2386_v49 = vstv %s4757_s11  ;;  %s6922_s10 = sld [smem:[#allocation7 + $0x8f]]  ;;  %s6949_s11 = sld [smem:[#allocation7 + $0x60]] }
 0x257   : > { %v6751_v48 = vadd.f32 %v1746_v31, %v1722_v61  ;;  %v6753_v29 = vadd.f32 %v1745_v52, %v1721_v3  ;;  %v2374_v43 = vmul.f32 %v2372_v54, %v6778_v45  ;;  %v2373_v40 = vmul.f32 %v2372_v54, %v6780_v56 }
 0x258   : > { %v6755_v17 = vpop.permute.xlu1 %1757  ;;  %v6757_v7 = vpop.permute.xlu0 %1755  ;;  %v2388_v3 = vmul.f32 %v2386_v49, %v6778_v45  ;;  %v2387_v31 = vmul.f32 %v2386_v49, %v6780_v56  ;;  %v2400_v52 = vstv %s4758_s16  ;;  %v2454_v62 = vstv %s4764_s29  ;;  %s6980_s16 = sld [smem:[#allocation7 + $0x6d]]  ;;  %s7009_s29 = sld [smem:[#allocation7 + $0x3f]] }
 0x259   : > { %v2402_v55 = vmul.f32 %v2400_v52, %v6778_v45  ;;  %v2496_v49 = vstv %s6866_s21  ;;  %v8876_v45 = vld [vmem:[#allocation23_spill] sm:$0xff]  ;;  %s7058_s21 = sld [smem:[#allocation7 + $0x2]] }
 0x25a   : > { %2241 = vrot.lane.b32.xlu1 %v2236_v53, %s8822_s19  ;;  %2239 = vrot.lane.b32.xlu0 %v2235_v26, %s8822_s19 }
 0x25c   : > { %v6764_v63 = vpop.permute.xlu1 %1771  ;;  %v6766_v25 = vpop.permute.xlu0 %1769 }
 0x25e   : > { %2255 = vrot.lane.b32.xlu1 %v2250_v44, %s8822_s19  ;;  %2253 = vrot.lane.b32.xlu0 %v2249_v27, %s8822_s19  ;;  %v2401_v44 = vmul.f32 %v2400_v52, %v6780_v56  ;;  %v6846_v27 = vld [vmem:[#allocation2 + $0xb1] sm:$0xff]  ;;  %v2716_v52 = vstv %s6874_s20  ;;  %s7112_s20 = sld [smem:[#allocation7 + $0x4a]] }
 0x25f   : > { %v2456_v59 = vmul.f32 %v2454_v62, %v6846_v27 }
 0x260   : > { %v6772_v47 = vpop.permute.xlu1 %1785  ;;  %v6774_v33 = vpop.permute.xlu0 %1783 }
 0x262   : > { %2269 = vrot.lane.b32.xlu1 %v2264_v5, %s8822_s19  ;;  %2267 = vrot.lane.b32.xlu0 %v2263_v36, %s8822_s19  ;;  %v2440_v5 = vstv %s4763_s17  ;;  %s6990_s17 = sld [smem:[#allocation7 + $0x1b]] }
 0x264   : > { %v6784_v34 = vpop.permute.xlu1 %1799  ;;  %v6786_v22 = vpop.permute.xlu0 %1797 }
 0x266   : > { %2309 = vrot.lane.b32.xlu1 %v2304_v15, %s5184_s12  ;;  %2307 = vrot.lane.b32.xlu0 %v2303_v6, %s5184_s12  ;;  %v2442_v15 = vmul.f32 %v2440_v5, %v6846_v27  ;;  %v2441_v6 = vmul.f32 %v2440_v5, %v6848_v24  ;;  %v1876_v5 = vstv %s6880_s25  ;;  %s4807_s25 = sld [smem:[#allocation7 + $0x28]] }
 0x268   : > { %v6792_v30 = vpop.permute.xlu1 %1813  ;;  %v6794_v50 = vpop.permute.xlu0 %1811 }
 0x26a   : > { %2323 = vrot.lane.b32.xlu1 %v2318_v11, %s5184_s12  ;;  %2321 = vrot.lane.b32.xlu0 %v2317_v13, %s5184_s12 }
 0x26c   : > { %v6800_v12 = vpop.permute.xlu1 %1827  ;;  %v6802_v2 = vpop.permute.xlu0 %1825 }
 0x26e   : > { %2337 = vrot.lane.b32.xlu1 %v2332_v57, %s5184_s12  ;;  %2335 = vrot.lane.b32.xlu0 %v2331_v14, %s5184_s12  ;;  %v2455_v57 = vmul.f32 %v2454_v62, %v6848_v24  ;;  %v2468_v14 = vstv %s4765_s14  ;;  %s7032_s14 = sld [smem:[#allocation7 + $0x84]] }
 0x26f   : > { %v2469_v10 = vmul.f32 %v2468_v14, %v6848_v24 }
 0x270   : > { %v6808_v8 = vpop.permute.xlu1 %1841  ;;  %v6810_v46 = vpop.permute.xlu0 %1839 }
 0x272   : > { %2351 = vrot.lane.b32.xlu1 %v2346_v21, %s5184_s12  ;;  %2349 = vrot.lane.b32.xlu0 %v2345_v41, %s5184_s12  ;;  %v2470_v41 = vmul.f32 %v2468_v14, %v6846_v27  ;;  %v2510_v14 = vstv %s6890_s30  ;;  %s4809_s30 = sld [smem:[#allocation7 + $0x70]] }
 0x274   : > { %v6816_v42 = vpop.permute.xlu1 %1855  ;;  %v6818_v28 = vpop.permute.xlu0 %1853 }
 0x276   : > { %2365 = vrot.lane.b32.xlu1 %v2360_v0, %s8822_s19  ;;  %2363 = vrot.lane.b32.xlu0 %v2359_v1, %s8822_s19  ;;  %v2482_v0 = vstv %s4766_s15  ;;  %s7047_s15 = sld [smem:[#allocation7 + $0x63]] }
 0x278   : > { %v6824_v37 = vpop.permute.xlu1 %1895  ;;  %v6826_v39 = vpop.permute.xlu0 %1893 }
 0x27a   : > { %2379 = vrot.lane.b32.xlu1 %v2374_v43, %s8822_s19  ;;  %2377 = vrot.lane.b32.xlu0 %v2373_v40, %s8822_s19  ;;  %v2484_v43 = vmul.f32 %v2482_v0, %v6846_v27  ;;  %v2483_v40 = vmul.f32 %v2482_v0, %v6848_v24 }
 0x27c   : > { %v6832_v23 = vpop.permute.xlu1 %1909  ;;  %v6834_v61 = vpop.permute.xlu0 %1907 }
 0x27e   : > { %2393 = vrot.lane.b32.xlu1 %v2388_v3, %s8822_s19  ;;  %2391 = vrot.lane.b32.xlu0 %v2387_v31, %s8822_s19  ;;  %v2688_v3 = vstv %s6868_s18  ;;  %v2702_v31 = vstv %s6872_s13  ;;  %s7077_s18 = sld [smem:[#allocation7 + $0x87]]  ;;  %s7085_s13 = sld [smem:[#allocation7 + $0x26]] }
 0x280   : > { %v6840_v53 = vpop.permute.xlu1 %1923  ;;  %v6842_v26 = vpop.permute.xlu0 %1921 }
 0x282   : > { %2407 = vrot.lane.b32.xlu1 %v2402_v55, %s8822_s19  ;;  %2405 = vrot.lane.b32.xlu0 %v2401_v44, %s8822_s19  ;;  %v1864_v55 = vstv %s6876_s22  ;;  %v1870_v44 = vstv %s6878_s23  ;;  %s4801_s22 = sld [smem:[#allocation7 + $0x6e]]  ;;  %s4806_s23 = sld [smem:[#allocation7 + $0x4]] }
 0x284   : > { %v6852_v36 = vpop.permute.xlu1 %1937  ;;  %v6854_v58 = vpop.permute.xlu0 %1935 }
 0x285   : > { %8867 = vst [vmem:[#allocation22_spill] sm:$0xff] %v6852_v36  ;;  %8868 = vst [vmem:[#allocation17_spill] sm:$0xff] %v6854_v58  ;;  %v2524_v36 = vstv %s6903_s26  ;;  %s4811_s26 = sld [smem:[#allocation7 + $0x29]] }
 0x286   : > { %2447 = vrot.lane.b32.xlu1 %v2442_v15, %s5184_s12  ;;  %2445 = vrot.lane.b32.xlu0 %v2441_v6, %s5184_s12  ;;  %v1882_v15 = vstv %s6882_s27  ;;  %s4808_s27 = sld [smem:[#allocation7 + $0x4c]] }
 0x288   : > { %v6860_v11 = vpop.permute.xlu1 %1951  ;;  %v6862_v13 = vpop.permute.xlu0 %1949 }
 0x28a   : > { %2461 = vrot.lane.b32.xlu1 %v2456_v59, %s5184_s12  ;;  %2459 = vrot.lane.b32.xlu0 %v2455_v57, %s5184_s12  ;;  %v2498_v59 = vmul.f32 %v2496_v49, %v6846_v27  ;;  %v2497_v57 = vmul.f32 %v2496_v49, %v6848_v24 }
 0x28c   : > { %v6884_v35 = vpop.permute.xlu1 %1965  ;;  %v6886_v21 = vpop.permute.xlu0 %1963 }
 0x28e   : > { %2475 = vrot.lane.b32.xlu1 %v2470_v41, %s5184_s12  ;;  %2473 = vrot.lane.b32.xlu0 %v2469_v10, %s5184_s12  ;;  %v6925_v41 = vld [vmem:[#allocation2 + $0x1] sm:$0xff] }
 0x28f   : > { %8872 = vst [vmem:[#allocation20_spill] sm:$0xff] %v6925_v41  ;;  %v6928_v10 = vmul.f32 %v6925_v41, %v2688_v3  ;;  %v6931_v0 = vmul.f32 %v6925_v41, %v2702_v31 }
 0x290   : > { %v6894_v1 = vpop.permute.xlu1 %1979  ;;  %v6896_v54 = vpop.permute.xlu0 %1977 }
 0x291   : > { %8869 = vst [vmem:[#allocation25_spill] sm:$0xff] %v6896_v54  ;;  %8873 = vst [vmem:[#allocation27_spill] sm:$0xff] %v6931_v0  ;;  %v1761_v0 = vadd.f32 %v6757_v7, %v6706_v20  ;;  %v2511_v20 = vmul.f32 %v2510_v14, %v6848_v24 }
 0x292   : > { %2489 = vrot.lane.b32.xlu1 %v2484_v43, %s5184_s12  ;;  %2487 = vrot.lane.b32.xlu0 %v2483_v40, %s5184_s12  ;;  %v6934_v43 = vmul.f32 %v6925_v41, %v2716_v52  ;;  %v8875_v40 = vld [vmem:[#allocation24_spill] sm:$0xff]  ;;  %v1871_v41 = vmul.f32 %v1870_v44, %v8876_v45 }
 0x293   : > { %v1866_v56 = vmul.f32 %v1864_v55, %v8875_v40  ;;  %v1872_v49 = vmul.f32 %v1870_v44, %v8875_v40  ;;  %v1817_v7 = vadd.f32 %v6794_v50, %v1761_v0  ;;  %v2002_v44 = vstv %s6901_s8  ;;  %s4810_s8 = sld [smem:[#allocation7 + $0x5]] }
 0x294   : > { %v6916_v6 = vpop.permute.xlu1 %1993  ;;  %v6918_v62 = vpop.permute.xlu0 %1991  ;;  %8874 = vst [vmem:[#allocation28_spill] sm:$0xff] %v6934_v43  ;;  %v6947_v43 = vmul.f32 %v1876_v5, %v8875_v40  ;;  %v2008_v50 = vstv %s6912_s9  ;;  %v2526_v0 = vmul.f32 %v2524_v36, %v6846_v27  ;;  %s4812_s9 = sld [smem:[#allocation7 + $0x4d]] }
 0x295   : > { %8870 = vst [vmem:[#allocation26_spill] sm:$0xff] %v6916_v6  ;;  %8871 = vst [vmem:[#allocation19_spill] sm:$0xff] %v6918_v62  ;;  %v1865_v62 = vmul.f32 %v1864_v55, %v8876_v45  ;;  %v1762_v6 = vadd.f32 %v6755_v17, %v6704_v16  ;;  %v6952_v55 = vmul.f32 %v1876_v5, %v8876_v45 }
 0x296   : > { %2503 = vrot.lane.b32.xlu1 %v2498_v59, %s8822_s19  ;;  %2501 = vrot.lane.b32.xlu0 %v2497_v57, %s8822_s19  ;;  %v6955_v59 = vmul.f32 %v1882_v15, %v8875_v40  ;;  %v2512_v16 = vmul.f32 %v2510_v14, %v6846_v27  ;;  %v6968_v5 = vmul.f32 %v1882_v15, %v8876_v45  ;;  %v6972_v40 = vld [vmem:[#allocation2 + $0x9] sm:$0xff] }
 0x297   : > { %v1818_v17 = vadd.f32 %v6792_v30, %v1762_v6  ;;  %8877 = vst [vmem:[#allocation24_spill] sm:$0xff] %v6972_v40  ;;  %v6975_v54 = vmul.f32 %v6972_v40, %v2688_v3  ;;  %v6978_v14 = vmul.f32 %v6972_v40, %v2702_v31  ;;  %v1776_v30 = vadd.f32 %v6764_v63, %v6725_v51 }
 0x298   : > { %v6957_v57 = vpop.permute.xlu1 %2033  ;;  %v6959_v58 = vpop.permute.xlu0 %2031  ;;  %v1775_v45 = vadd.f32 %v6766_v25, %v6727_v60  ;;  %v6988_v15 = vmul.f32 %v6972_v40, %v2716_v52  ;;  %v2004_v3 = vmul.f32 %v2002_v44, %v6466_v32  ;;  %v2525_v51 = vmul.f32 %v2524_v36, %v6848_v24 }
 0x299   : > { %v2538_v63 = vstv %s6922_s10  ;;  %v1832_v60 = vadd.f32 %v6800_v12, %v1776_v30  ;;  %v1868_v52 = vadd.f32 %v1866_v56, %v1818_v17  ;;  %v1789_v40 = vadd.f32 %v6774_v33, %v6742_v19  ;;  %s4813_s10 = sld [smem:[#allocation7 + $0x71]] }
 0x29a   : > { %2517 = vrot.lane.b32.xlu1 %v2512_v16, %s8822_s19  ;;  %2515 = vrot.lane.b32.xlu0 %v2511_v20, %s8822_s19  ;;  %8878 = vst [vmem:[#allocation23_spill] sm:$0xff] %v6988_v15  ;;  %v1831_v25 = vadd.f32 %v6802_v2, %v1775_v45  ;;  %v1867_v16 = vadd.f32 %v1865_v62, %v1817_v7  ;;  %v2014_v36 = vstv %s6949_s11  ;;  %v2140_v30 = vstv %s6990_s17  ;;  %s4818_s11 = sld [smem:[#allocation7 + $0x7]]  ;;  %s7203_s17 = sld [smem:[#allocation7 + $0x1e]] }
 0x29b   : > { %v1790_v20 = vadd.f32 %v6772_v47, %v6740_v4  ;;  %v2003_v15 = vmul.f32 %v2002_v44, %v6468_v18  ;;  %v1900_v12 = vadd.f32 %v6824_v37, %v1868_v52  ;;  %v2010_v56 = vmul.f32 %v2008_v50, %v6466_v32 }
 0x29c   : > { %v6993_v6 = vpop.permute.xlu1 %2047  ;;  %v6995_v31 = vpop.permute.xlu0 %2045  ;;  %v1899_v2 = vadd.f32 %v6826_v39, %v1867_v16  ;;  %v1845_v19 = vadd.f32 %v6810_v46, %v1789_v40  ;;  %v2540_v62 = vmul.f32 %v2538_v63, %v6846_v27  ;;  %v2539_v17 = vmul.f32 %v2538_v63, %v6848_v24  ;;  %v8879_v63 = vld [vmem:[#allocation25_spill] sm:$0xff] }
 0x29d   : > { %v1846_v4 = vadd.f32 %v6808_v8, %v1790_v20  ;;  %v1874_v37 = vadd.f32 %v1872_v49, %v1832_v60  ;;  %v1873_v7 = vadd.f32 %v1871_v41, %v1831_v25  ;;  %v1956_v39 = vadd.f32 %v6860_v11, %v1900_v12  ;;  %v8880_v12 = vld [vmem:[#allocation22_spill] sm:$0xff] }
 0x29e   : > { %2531 = vrot.lane.b32.xlu1 %v2526_v0, %s8822_s19  ;;  %2529 = vrot.lane.b32.xlu0 %v2525_v51, %s8822_s19  ;;  %v1955_v44 = vadd.f32 %v6862_v13, %v1899_v2  ;;  %v1804_v8 = vadd.f32 %v6784_v34, %v6751_v48  ;;  %v1803_v46 = vadd.f32 %v6786_v22, %v6753_v29  ;;  %v2730_v49 = vstv %s6980_s16  ;;  %v8881_v2 = vld [vmem:[#allocation17_spill] sm:$0xff]  ;;  %s7199_s16 = sld [smem:[#allocation7 + $0x2b]] }
 0x29f   : > { %v2009_v40 = vmul.f32 %v2008_v50, %v6468_v18  ;;  %v1914_v41 = vadd.f32 %v6832_v23, %v1874_v37  ;;  %v1913_v11 = vadd.f32 %v6834_v61, %v1873_v7  ;;  %v2016_v13 = vmul.f32 %v2014_v36, %v6466_v32 }
 0x2a0   : > { %v7017_v47 = vpop.permute.xlu1 %2061  ;;  %v7019_v33 = vpop.permute.xlu0 %2059  ;;  %v1860_v48 = vadd.f32 %v6816_v42, %v1804_v8  ;;  %v1859_v29 = vadd.f32 %v6818_v28, %v1803_v46  ;;  %v1880_v34 = vadd.f32 %v6947_v43, %v1846_v4  ;;  %v1879_v22 = vadd.f32 %v6952_v55, %v1845_v19  ;;  %v8883_v8 = vld [vmem:[#allocation26_spill] sm:$0xff] }
 0x2a1   : > { %v1970_v23 = vadd.f32 %v6884_v35, %v1914_v41  ;;  %v1969_v61 = vadd.f32 %v6886_v21, %v1913_v11  ;;  %v2006_v0 = vadd.f32 %v2004_v3, %v1956_v39  ;;  %v2005_v51 = vadd.f32 %v2003_v15, %v1955_v44 }
 0x2a2   : > { %2545 = vrot.lane.b32.xlu1 %v2540_v62, %s8822_s19  ;;  %2543 = vrot.lane.b32.xlu0 %v2539_v17, %s8822_s19  ;;  %v1928_v42 = vadd.f32 %v6840_v53, %v1880_v34  ;;  %v1927_v28 = vadd.f32 %v6842_v26, %v1879_v22  ;;  %v2015_v43 = vmul.f32 %v2014_v36, %v6468_v18  ;;  %v2146_v55 = vstv %s7009_s29  ;;  %s7213_s29 = sld [smem:[#allocation7 + $0x42]] }
 0x2a3   : > { %v2038_v35 = vadd.f32 %v6957_v57, %v2006_v0  ;;  %v2037_v21 = vadd.f32 %v6959_v58, %v2005_v51  ;;  %v2142_v53 = vmul.f32 %v2140_v30, %v6612_v38  ;;  %v2141_v26 = vmul.f32 %v2140_v30, %v6610_v9  ;;  %v8885_v30 = vld [vmem:[#allocation23_spill] sm:$0xff] }
 0x2a4   : > { %v7043_v45 = vpop.permute.xlu1 %2075  ;;  %v7045_v50 = vpop.permute.xlu0 %2073  ;;  %v1886_v15 = vadd.f32 %v6955_v59, %v1860_v48  ;;  %v1885_v3 = vadd.f32 %v6968_v5, %v1859_v29  ;;  %v2012_v52 = vadd.f32 %v2010_v56, %v1970_v23  ;;  %v2011_v16 = vadd.f32 %v2009_v40, %v1969_v61  ;;  %v8882_v59 = vld [vmem:[#allocation27_spill] sm:$0xff]  ;;  %v8886_v48 = vld [vmem:[#allocation28_spill] sm:$0xff] }
 0x2a5   : > { %v2020_v4 = vstv %s7032_s14  ;;  %v2147_v39 = vmul.f32 %v2146_v55, %v6610_v9  ;;  %v2152_v44 = vstv %s7047_s15  ;;  %v2744_v29 = vstv %s7058_s21  ;;  %s7215_s14 = sld [smem:[#allocation7 + $0x4f]]  ;;  %s7217_s15 = sld [smem:[#allocation7 + $0x66]] }
 0x2a6   : > { %2695 = vrot.lane.b32.xlu1 %v6975_v54, %s5184_s12  ;;  %2693 = vrot.lane.b32.xlu0 %v6928_v10, %s5184_s12  ;;  %v1984_v54 = vadd.f32 %v6894_v1, %v1928_v42  ;;  %v1983_v10 = vadd.f32 %v8879_v63, %v1927_v28  ;;  %v1942_v58 = vadd.f32 %v8880_v12, %v1886_v15  ;;  %v8888_v42 = vld [vmem:[#allocation20_spill] sm:$0xff]  ;;  %s7221_s21 = sld [smem:[#allocation7 + $0x8a]] }
 0x2a7   : > { %v1941_v36 = vadd.f32 %v8881_v2, %v1885_v3  ;;  %v2148_v1 = vmul.f32 %v2146_v55, %v6612_v38  ;;  %v2052_v5 = vadd.f32 %v6993_v6, %v2012_v52  ;;  %v2051_v56 = vadd.f32 %v6995_v31, %v2011_v16  ;;  %v8884_v6 = vld [vmem:[#allocation19_spill] sm:$0xff] }
 0x2a8   : > { %v2090_v60 = vpop.permute.xlu1 %2089  ;;  %v2088_v25 = vpop.permute.xlu0 %2087  ;;  %v2018_v17 = vadd.f32 %v2016_v13, %v1984_v54  ;;  %v2017_v37 = vadd.f32 %v2015_v43, %v1983_v10  ;;  %v1998_v46 = vadd.f32 %v8883_v8, %v1942_v58  ;;  %v2022_v11 = vmul.f32 %v2020_v4, %v6466_v32  ;;  %v5034_v8 = vld [vmem:[#allocation2 + $0x69] sm:$0xff] }
 0x2a9   : > { %v2094_v57 = vadd.f32 %v2090_v60, %v2038_v35  ;;  %v2093_v20 = vadd.f32 %v2088_v25, %v2037_v21  ;;  %v1997_v31 = vadd.f32 %v8884_v6, %v1941_v36  ;;  %v2021_v13 = vmul.f32 %v2020_v4, %v6468_v18  ;;  %v8887_v18 = vld [vmem:[#allocation24_spill] sm:$0xff]  ;;  %v5035_v6 = vld [vmem:[#allocation2 + $0x61] sm:$0xff] }
 0x2aa   : > { %2709 = vrot.lane.b32.xlu1 %v6978_v14, %s5184_s12  ;;  %2707 = vrot.lane.b32.xlu0 %v8882_v59, %s5184_s12  ;;  %v2066_v34 = vadd.f32 %v7017_v47, %v2018_v17  ;;  %v2065_v22 = vadd.f32 %v7019_v33, %v2017_v37  ;;  %v2732_v51 = vmul.f32 %v8887_v18, %v2730_v49  ;;  %v2758_v25 = vstv %s7085_s13  ;;  %s7225_s13 = sld [smem:[#allocation7 + $0x2e]] }
 0x2ab   : > { %v7081_v19 = vadd.f32 %v2142_v53, %v2094_v57  ;;  %v7083_v62 = vadd.f32 %v2141_v26, %v2093_v20  ;;  %v2731_v28 = vmul.f32 %v8888_v42, %v2730_v49  ;;  %v2154_v43 = vmul.f32 %v2152_v44, %v6612_v38 }
 0x2ac   : > { %v2104_v7 = vpop.permute.xlu1 %2103  ;;  %v2102_v14 = vpop.permute.xlu0 %2101  ;;  %v2153_v55 = vmul.f32 %v2152_v44, %v6610_v9  ;;  %v2024_v47 = vadd.f32 %v2022_v11, %v1998_v46  ;;  %v2023_v33 = vadd.f32 %v2021_v13, %v1997_v31  ;;  %v2158_v53 = vstv %s7077_s18  ;;  %s7223_s18 = sld [smem:[#allocation7 + $0xa]] }
 0x2ad   : > { %v2108_v40 = vadd.f32 %v2104_v7, %v2052_v5  ;;  %v2107_v41 = vadd.f32 %v2102_v14, %v2051_v56  ;;  %v2746_v10 = vmul.f32 %v8887_v18, %v2744_v29  ;;  %v2745_v60 = vmul.f32 %v8888_v42, %v2744_v29 }
 0x2ae   : > { %2723 = vrot.lane.b32.xlu1 %v8885_v30, %s5184_s12  ;;  %2721 = vrot.lane.b32.xlu0 %v8886_v48, %s5184_s12  ;;  %v2080_v26 = vadd.f32 %v7043_v45, %v2024_v47  ;;  %v2079_v49 = vadd.f32 %v7045_v50, %v2023_v33  ;;  %v2160_v57 = vmul.f32 %v2158_v53, %v6612_v38  ;;  %v2772_v4 = vstv %s7112_s20  ;;  %s7233_s20 = sld [smem:[#allocation7 + $0x73]] }
 0x2af   : > { %v7100_v23 = vadd.f32 %v2148_v1, %v2108_v40  ;;  %v7102_v61 = vadd.f32 %v2147_v39, %v2107_v41  ;;  %v2159_v45 = vmul.f32 %v2158_v53, %v6610_v9  ;;  %v2760_v2 = vmul.f32 %v8887_v18, %v2758_v25 }
 0x2b0   : > { %v2118_v0 = vpop.permute.xlu1 %2117  ;;  %v2116_v32 = vpop.permute.xlu0 %2115  ;;  %v2759_v36 = vmul.f32 %v8888_v42, %v2758_v25  ;;  %v2774_v59 = vmul.f32 %v8887_v18, %v2772_v4  ;;  %v2773_v1 = vmul.f32 %v8888_v42, %v2772_v4  ;;  %v2786_v5 = vstv %s4801_s22  ;;  %v7209_v4 = vld [vmem:[#allocation2 + $0x2] sm:$0xff]  ;;  %s7235_s22 = sld [smem:[#allocation7 + $0x8]] }
 0x2b1   : > { %v2122_v35 = vadd.f32 %v2118_v0, %v2066_v34  ;;  %v2121_v21 = vadd.f32 %v2116_v32, %v2065_v22  ;;  %v2788_v37 = vmul.f32 %v8887_v18, %v2786_v5  ;;  %v2787_v7 = vmul.f32 %v8888_v42, %v2786_v5 }
 0x2b2   : > { %2737 = vrot.lane.b32.xlu1 %v2732_v51, %s5184_s12  ;;  %2735 = vrot.lane.b32.xlu0 %v2731_v28, %s5184_s12  ;;  %v2826_v14 = vstv %s4806_s23  ;;  %v2840_v40 = vstv %s4807_s25  ;;  %s7238_s23 = sld [smem:[#allocation7 + $0x2c]]  ;;  %s7240_s25 = sld [smem:[#allocation7 + $0x52]] }
 0x2b3   : > { %v7119_v15 = vadd.f32 %v2154_v43, %v2122_v35  ;;  %v7121_v3 = vadd.f32 %v2153_v55, %v2121_v21  ;;  %v2828_v46 = vmul.f32 %v5034_v8, %v2826_v14  ;;  %v2827_v31 = vmul.f32 %v5035_v6, %v2826_v14 }
 0x2b4   : > { %v2132_v54 = vpop.permute.xlu1 %2131  ;;  %v2130_v63 = vpop.permute.xlu0 %2129  ;;  %v2842_v13 = vmul.f32 %v5034_v8, %v2840_v40  ;;  %v2841_v30 = vmul.f32 %v5035_v6, %v2840_v40  ;;  %v2854_v48 = vstv %s4808_s27  ;;  %v2868_v32 = vstv %s4809_s30  ;;  %s7244_s27 = sld [smem:[#allocation7 + $0x50]]  ;;  %s7246_s30 = sld [smem:[#allocation7 + $0x76]] }
 0x2b5   : > { %v2136_v52 = vadd.f32 %v2132_v54, %v2080_v26  ;;  %v2135_v16 = vadd.f32 %v2130_v63, %v2079_v49  ;;  %v2856_v22 = vmul.f32 %v5034_v8, %v2854_v48  ;;  %v2855_v0 = vmul.f32 %v5035_v6, %v2854_v48 }
 0x2b6   : > { %2751 = vrot.lane.b32.xlu1 %v2746_v10, %s8822_s19  ;;  %2749 = vrot.lane.b32.xlu0 %v2745_v60, %s8822_s19  ;;  %v2870_v42 = vmul.f32 %v5034_v8, %v2868_v32  ;;  %v2869_v28 = vmul.f32 %v5035_v6, %v2868_v32  ;;  %v2882_v43 = vstv %s4810_s8  ;;  %v2896_v21 = vstv %s4811_s26  ;;  %s7248_s8 = sld [smem:[#allocation7 + $0x74]]  ;;  %s7250_s26 = sld [smem:[#allocation7 + $0xb]] }
 0x2b7   : > { %v7130_v50 = vadd.f32 %v2160_v57, %v2136_v52  ;;  %v7132_v20 = vadd.f32 %v2159_v45, %v2135_v16  ;;  %v2884_v33 = vmul.f32 %v5034_v8, %v2882_v43  ;;  %v2883_v35 = vmul.f32 %v5035_v6, %v2882_v43 }
 0x2b8   : > { %v7134_v12 = vpop.permute.xlu1 %2171  ;;  %v7136_v58 = vpop.permute.xlu0 %2169  ;;  %v2898_v49 = vmul.f32 %v5034_v8, %v2896_v21  ;;  %v2897_v54 = vmul.f32 %v5035_v6, %v2896_v21  ;;  %v2910_v63 = vstv %s4812_s9  ;;  %v2924_v16 = vstv %s4813_s10  ;;  %s7261_s9 = sld [smem:[#allocation7 + $0x2f]]  ;;  %s7276_s10 = sld [smem:[#allocation7 + $0x21]] }
 0x2b9   : > { %v2912_v25 = vmul.f32 %v5034_v8, %v2910_v63  ;;  %v2911_v52 = vmul.f32 %v5035_v6, %v2910_v63  ;;  %v2284_v48 = vstv %s7213_s29  ;;  %v3020_v21 = vstv %s7235_s22  ;;  %s7374_s29 = sld [smem:[#allocation11]]  ;;  %s7433_s22 = sld [smem:[#allocation10 + $0x5]] }
 0x2ba   : > { %2765 = vrot.lane.b32.xlu1 %v2760_v2, %s8822_s19  ;;  %2763 = vrot.lane.b32.xlu0 %v2759_v36, %s8822_s19  ;;  %v2926_v2 = vmul.f32 %v5034_v8, %v2924_v16  ;;  %v2925_v36 = vmul.f32 %v5035_v6, %v2924_v16  ;;  %v2978_v8 = vstv %s7199_s16  ;;  %v3034_v63 = vstv %s7238_s23  ;;  %s7287_s16 = sld [smem:[#allocation7 + $0x69]] }
 0x2bb   : > { %v2979_v40 = vmul.f32 %v2978_v8, %v7209_v4  ;;  %s7454_s23 = sld [smem:[#allocation10 + $0x9]] }
 0x2bc   : > { %v7143_v9 = vpop.permute.xlu1 %2185  ;;  %v7145_v38 = vpop.permute.xlu0 %2183  ;;  %v3062_v16 = vstv %s7248_s8  ;;  %s7474_s8 = sld [smem:[#allocation10 + $0x3]] }
 0x2be   : > { %2779 = vrot.lane.b32.xlu1 %v2774_v59, %s8822_s19  ;;  %2777 = vrot.lane.b32.xlu0 %v2773_v1, %s8822_s19  ;;  %v7211_v59 = vld [vmem:[#allocation2 + $0xa] sm:$0xff]  ;;  %v2964_v1 = vstv %s4818_s11  ;;  %s7283_s11 = sld [smem:[#allocation7 + $0x45]] }
 0x2bf   : > { %v2965_v14 = vmul.f32 %v2964_v1, %v7209_v4 }
 0x2c0   : > { %v7151_v56 = vpop.permute.xlu1 %2199  ;;  %v7153_v17 = vpop.permute.xlu0 %2197 }
 0x2c2   : > { %2793 = vrot.lane.b32.xlu1 %v2788_v37, %s8822_s19  ;;  %2791 = vrot.lane.b32.xlu0 %v2787_v7, %s8822_s19  ;;  %v2966_v7 = vmul.f32 %v2964_v1, %v7211_v59  ;;  %v3158_v1 = vstv %s7250_s26  ;;  %s7480_s26 = sld [smem:[#allocation10 + $0x7]] }
 0x2c4   : > { %v7159_v39 = vpop.permute.xlu1 %2213  ;;  %v7161_v44 = vpop.permute.xlu0 %2211 }
 0x2c6   : > { %2833 = vrot.lane.b32.xlu1 %v2828_v46, %s5184_s12  ;;  %2831 = vrot.lane.b32.xlu0 %v2827_v31, %s5184_s12  ;;  %v2980_v31 = vmul.f32 %v2978_v8, %v7211_v59 }
 0x2c8   : > { %v7165_v41 = vpop.permute.xlu1 %2227  ;;  %v7167_v11 = vpop.permute.xlu0 %2225 }
 0x2ca   : > { %2847 = vrot.lane.b32.xlu1 %v2842_v13, %s5184_s12  ;;  %2845 = vrot.lane.b32.xlu0 %v2841_v30, %s5184_s12  ;;  %v2992_v13 = vstv %s7215_s14  ;;  %v2278_v30 = vstv %s7203_s17  ;;  %s7302_s17 = sld [smem:[#allocation7 + $0x8d]]  ;;  %s7382_s14 = sld [smem:[#allocation10]] }
 0x2cb   : > { %v2993_v43 = vmul.f32 %v2992_v13, %v7209_v4 }
 0x2cc   : > { %v7171_v29 = vpop.permute.xlu1 %2241  ;;  %v7173_v34 = vpop.permute.xlu0 %2239 }
 0x2ce   : > { %2861 = vrot.lane.b32.xlu1 %v2856_v22, %s5184_s12  ;;  %2859 = vrot.lane.b32.xlu0 %v2855_v0, %s5184_s12  ;;  %v2290_v22 = vstv %s7217_s15  ;;  %v2296_v0 = vstv %s7221_s21  ;;  %s7384_s15 = sld [smem:[#allocation11 + $0x1]]  ;;  %s7396_s21 = sld [smem:[#allocation10 + $0x4]] }
 0x2d0   : > { %v7177_v18 = vpop.permute.xlu1 %2255  ;;  %v7179_v51 = vpop.permute.xlu0 %2253 }
 0x2d2   : > { %2875 = vrot.lane.b32.xlu1 %v2870_v42, %s5184_s12  ;;  %2873 = vrot.lane.b32.xlu0 %v2869_v28, %s5184_s12  ;;  %v2994_v28 = vmul.f32 %v2992_v13, %v7211_v59 }
 0x2d4   : > { %v7183_v55 = vpop.permute.xlu1 %2269  ;;  %v7185_v47 = vpop.permute.xlu0 %2267 }
 0x2d6   : > { %2889 = vrot.lane.b32.xlu1 %v2884_v33, %s8822_s19  ;;  %2887 = vrot.lane.b32.xlu0 %v2883_v35, %s8822_s19  ;;  %v3102_v33 = vstv %s7223_s18  ;;  %v3006_v35 = vstv %s7233_s20  ;;  %s7398_s18 = sld [smem:[#allocation11 + $0x2]]  ;;  %s7431_s20 = sld [smem:[#allocation10 + $0x1]] }
 0x2d7   : > { %v3008_v8 = vmul.f32 %v3006_v35, %v7211_v59 }
 0x2d8   : > { %v7189_v53 = vpop.permute.xlu1 %2309  ;;  %v7191_v26 = vpop.permute.xlu0 %2307 }
 0x2da   : > { %2903 = vrot.lane.b32.xlu1 %v2898_v49, %s8822_s19  ;;  %2901 = vrot.lane.b32.xlu0 %v2897_v54, %s8822_s19  ;;  %v3116_v49 = vstv %s7225_s13  ;;  %v3130_v54 = vstv %s7240_s25  ;;  %s7419_s13 = sld [smem:[#allocation10 + $0x8]]  ;;  %s7460_s25 = sld [smem:[#allocation10 + $0x2]] }
 0x2dc   : > { %v7195_v10 = vpop.permute.xlu1 %2323  ;;  %v7197_v60 = vpop.permute.xlu0 %2321 }
 0x2de   : > { %2917 = vrot.lane.b32.xlu1 %v2912_v25, %s8822_s19  ;;  %2915 = vrot.lane.b32.xlu0 %v2911_v52, %s8822_s19  ;;  %v3144_v25 = vstv %s7246_s30  ;;  %v3048_v52 = vstv %s7244_s27  ;;  %s7462_s27 = sld [smem:[#allocation10 + $0x6]]  ;;  %s7472_s30 = sld [smem:[#allocation10 + $0xa]] }
 0x2e0   : > { %v7205_v57 = vpop.permute.xlu1 %2337  ;;  %v7207_v45 = vpop.permute.xlu0 %2335 }
 0x2e2   : > { %2931 = vrot.lane.b32.xlu1 %v2926_v2, %s8822_s19  ;;  %2929 = vrot.lane.b32.xlu0 %v2925_v36, %s8822_s19  ;;  %v7290_v2 = vld [vmem:[#allocation2 + $0x19] sm:$0xff] }
 0x2e3   : > { %8889 = vst [vmem:[#allocation25_spill] sm:$0xff] %v7290_v2  ;;  %v7293_v36 = vmul.f32 %v7290_v2, %v3102_v33  ;;  %v7308_v13 = vmul.f32 %v7290_v2, %v3130_v54 }
 0x2e4   : > { %v7227_v5 = vpop.permute.xlu1 %2351  ;;  %v7229_v37 = vpop.permute.xlu0 %2349 }
 0x2e5   : > { %8890 = vst [vmem:[#allocation22_spill] sm:$0xff] %v7293_v36  ;;  %8893 = vst [vmem:[#allocation26_spill] sm:$0xff] %v7308_v13 }
 0x2e6   : > { %2971 = vrot.lane.b32.xlu1 %v2966_v7, %s5184_s12  ;;  %2969 = vrot.lane.b32.xlu0 %v2965_v14, %s5184_s12 }
 0x2e8   : > { %v7252_v46 = vpop.permute.xlu1 %2365  ;;  %v7254_v6 = vpop.permute.xlu0 %2363 }
 0x2ea   : > { %2985 = vrot.lane.b32.xlu1 %v2980_v31, %s5184_s12  ;;  %2983 = vrot.lane.b32.xlu0 %v2979_v40, %s5184_s12  ;;  %v3007_v31 = vmul.f32 %v3006_v35, %v7209_v4  ;;  %v7305_v40 = vmul.f32 %v7290_v2, %v3116_v49  ;;  %v7322_v35 = vmul.f32 %v7290_v2, %v3144_v25 }
 0x2ec   : > { %v7267_v32 = vpop.permute.xlu1 %2379  ;;  %v7269_v42 = vpop.permute.xlu0 %2377  ;;  %8892 = vst [vmem:[#allocation27_spill] sm:$0xff] %v7305_v40  ;;  %8898 = vst [vmem:[#allocation20_spill] sm:$0xff] %v7322_v35 }
 0x2ee   : > { %2999 = vrot.lane.b32.xlu1 %v2994_v28, %s5184_s12  ;;  %2997 = vrot.lane.b32.xlu0 %v2993_v43, %s5184_s12  ;;  %v7310_v28 = vld [vmem:[#allocation2 + $0x21] sm:$0xff] }
 0x2ef   : > { %8894 = vst [vmem:[#allocation19_spill] sm:$0xff] %v7310_v28  ;;  %v7313_v43 = vmul.f32 %v7310_v28, %v3102_v33  ;;  %v7316_v36 = vmul.f32 %v7310_v28, %v3116_v49  ;;  %v7327_v13 = vmul.f32 %v7310_v28, %v3144_v25  ;;  %v7330_v40 = vmul.f32 %v7310_v28, %v3158_v1 }
 0x2f0   : > { %v7296_v7 = vpop.permute.xlu1 %2393  ;;  %v7298_v14 = vpop.permute.xlu0 %2391  ;;  %v7333_v33 = vmul.f32 %v7290_v2, %v3158_v1  ;;  %v8790_v49 = vstv %s7261_s9 }
 0x2f1   : > { %8891 = vst [vmem:[#allocation17_spill] sm:$0xff] %v7298_v14  ;;  %8895 = vst [vmem:[#allocation23_spill] sm:$0xff] %v7313_v43  ;;  %v7319_v14 = vmul.f32 %v7310_v28, %v3130_v54  ;;  %v8902_v54 = vld [vmem:[#allocation18_spill] sm:$0xff]  ;;  %v7344_v25 = vmul.f32 %v7310_v28, %v8790_v49  ;;  %v2416_v28 = vstv %s7276_s10  ;;  %s7488_s10 = sld [smem:[#allocation10 + $0xb]] }
 0x2f2   : > { %8896 = vst [vmem:[#allocation28_spill] sm:$0xff] %v7316_v36  ;;  %3013 = vrot.lane.b32.xlu1 %v3008_v8, %s5184_s12  ;;  %3011 = vrot.lane.b32.xlu0 %v3007_v31, %s5184_s12  ;;  %8899 = vst [vmem:[#allocation29_spill] sm:$0xff] %v7327_v13  ;;  %v8903_v36 = vld [vmem:[#allocation21_spill] sm:$0xff]  ;;  %v7339_v35 = vmul.f32 %v2284_v48, %v8902_v54  ;;  %v7350_v31 = vmul.f32 %v2290_v22, %v8902_v54 }
 0x2f3   : > { %8897 = vst [vmem:[#allocation24_spill] sm:$0xff] %v7319_v14  ;;  %8900 = vst [vmem:[#allocation30_spill] sm:$0xff] %v7330_v40  ;;  %v2280_v14 = vmul.f32 %v2278_v30, %v8902_v54  ;;  %v2279_v43 = vmul.f32 %v2278_v30, %v8903_v36  ;;  %v7347_v8 = vmul.f32 %v2284_v48, %v8903_v36 }
 0x2f4   : > { %8901 = vst [vmem:[#allocation31_spill] sm:$0xff] %v7333_v33  ;;  %8904 = vst [vmem:[#allocation18_spill] sm:$0xff] %v7344_v25  ;;  %v7352_v1 = vpop.permute.xlu1 %2407  ;;  %v7354_v2 = vpop.permute.xlu0 %2405  ;;  %v3022_v30 = vmul.f32 %v3020_v21, %v7211_v59  ;;  %v3021_v33 = vmul.f32 %v3020_v21, %v7209_v4  ;;  %v7359_v40 = vmul.f32 %v2290_v22, %v8903_v36  ;;  %v2422_v21 = vstv %s7283_s11  ;;  %s7558_s11 = sld [smem:[#allocation7 + $0x53]] }
 0x2f5   : > { %8905 = vst [vmem:[#allocation21_spill] sm:$0xff] %v7352_v1  ;;  %8906 = vst [vmem:[#allocation32_spill] sm:$0xff] %v7354_v2  ;;  %v7362_v49 = vmul.f32 %v2296_v0, %v8902_v54  ;;  %v7365_v48 = vmul.f32 %v2296_v0, %v8903_v36  ;;  %v3036_v25 = vmul.f32 %v3034_v63, %v7211_v59 }
 0x2f6   : > { %3027 = vrot.lane.b32.xlu1 %v3022_v30, %s8822_s19  ;;  %3025 = vrot.lane.b32.xlu0 %v3021_v33, %s8822_s19  ;;  %v3035_v13 = vmul.f32 %v3034_v63, %v7209_v4  ;;  %v3050_v22 = vmul.f32 %v3048_v52, %v7211_v59  ;;  %v2176_v54 = vadd.f32 %v7134_v12, %v7081_v19  ;;  %v2428_v30 = vstv %s7287_s16  ;;  %s7586_s16 = sld [smem:[#allocation7 + $0x77]] }
 0x2f7   : > { %v2175_v0 = vadd.f32 %v7136_v58, %v7083_v62  ;;  %v3049_v36 = vmul.f32 %v3048_v52, %v7209_v4  ;;  %v7387_v63 = vmul.f32 %v2416_v28, %v6846_v27  ;;  %v3064_v1 = vmul.f32 %v3062_v16, %v7211_v59 }
 0x2f8   : > { %v7389_v33 = vpop.permute.xlu1 %2447  ;;  %v7391_v2 = vpop.permute.xlu0 %2445  ;;  %v3063_v19 = vmul.f32 %v3062_v16, %v7209_v4  ;;  %v2434_v12 = vstv %s7302_s17  ;;  %v2232_v62 = vadd.f32 %v7165_v41, %v2176_v54  ;;  %v7403_v52 = vmul.f32 %v2416_v28, %v6848_v24  ;;  %s4956_s17 = smul.u32 96, %s9069_s28  ;;  %s4868_s28 = sld [smem:[#allocation7 + $0x5b]] }
 0x2f9   : > { %8907 = vst [vmem:[#allocation33_spill] sm:$0xff] %v7389_v33  ;;  %v2231_v58 = vadd.f32 %v7167_v11, %v2175_v0  ;;  %v7406_v33 = vmul.f32 %v2422_v21, %v6846_v27  ;;  %v7411_v4 = vmul.f32 %v2422_v21, %v6848_v24  ;;  %v7414_v59 = vmul.f32 %v2428_v30, %v6846_v27 }
 0x2fa   : > { %3041 = vrot.lane.b32.xlu1 %v3036_v25, %s8822_s19  ;;  %3039 = vrot.lane.b32.xlu0 %v3035_v13, %s8822_s19  ;;  %v7417_v41 = vmul.f32 %v2428_v30, %v6848_v24  ;;  %v2190_v11 = vadd.f32 %v7143_v9, %v7100_v23  ;;  %v2189_v16 = vadd.f32 %v7145_v38, %v7102_v61  ;;  %v2623_v30 = vstv %s7419_s13  ;;  %s4846_s13 = sld [smem:[#allocation7 + $0xe]] }
 0x2fb   : > { %v7426_v28 = vmul.f32 %v2434_v12, %v6846_v27  ;;  %v7429_v13 = vmul.f32 %v2434_v12, %v6848_v24  ;;  %v2204_v25 = vadd.f32 %v7151_v56, %v7119_v15  ;;  %v2203_v21 = vadd.f32 %v7153_v17, %v7121_v3 }
 0x2fc   : > { %v2218_v23 = vadd.f32 %v7159_v39, %v7130_v50  ;;  %v2217_v27 = vadd.f32 %v7161_v44, %v7132_v20  ;;  %v7443_v61 = vpop.permute.xlu1 %2461  ;;  %v7445_v24 = vpop.permute.xlu0 %2459  ;;  %v2246_v9 = vadd.f32 %v7171_v29, %v2190_v11  ;;  %v2245_v38 = vadd.f32 %v7173_v34, %v2189_v16  ;;  %v8909_v11 = vld [vmem:[#allocation23_spill] sm:$0xff]  ;;  %v8911_v16 = vld [vmem:[#allocation21_spill] sm:$0xff] }
 0x2fd   : > { %v2282_v54 = vadd.f32 %v2280_v14, %v2232_v62  ;;  %v2281_v15 = vadd.f32 %v2279_v43, %v2231_v58  ;;  %v2260_v3 = vadd.f32 %v7177_v18, %v2204_v25  ;;  %v2259_v50 = vadd.f32 %v7179_v51, %v2203_v21  ;;  %v8912_v25 = vld [vmem:[#allocation32_spill] sm:$0xff] }
 0x2fe   : > { %v2274_v20 = vadd.f32 %v7183_v55, %v2218_v23  ;;  %3055 = vrot.lane.b32.xlu1 %v3050_v22, %s8822_s19  ;;  %3053 = vrot.lane.b32.xlu0 %v3049_v36, %s8822_s19  ;;  %v2273_v56 = vadd.f32 %v7185_v47, %v2217_v27  ;;  %v2560_v44 = vstv %s7374_s29  ;;  %v2563_v18 = vstv %s7382_s14  ;;  %s7599_s29 = sld [smem:[#allocation7 + $0xd]]  ;;  %s7616_s14 = scalar_lea.vmem %s8768_s7, %s4956_s17 }
 0x2ff   : > { %v2314_v17 = vadd.f32 %v7189_v53, %v2282_v54  ;;  %v2313_v39 = vadd.f32 %v7191_v26, %v2281_v15  ;;  %v2590_v51 = vstv %s7384_s15  ;;  %v2593_v55 = vstv %s7396_s21  ;;  %s7627_s15 = sld [smem:[#allocation7 + $0x31]]  ;;  %s4844_s21 = sld [smem:[#allocation7 + $0x55]] }
 0x300   : > { %v7464_v29 = vpop.permute.xlu1 %2475  ;;  %v7466_v34 = vpop.permute.xlu0 %2473  ;;  %v2620_v14 = vstv %s7398_s18  ;;  %v2288_v47 = vadd.f32 %v7339_v35, %v2246_v9  ;;  %v2287_v53 = vadd.f32 %v7347_v8, %v2245_v38  ;;  %v2294_v22 = vadd.f32 %v7350_v31, %v2260_v3  ;;  %s4845_s18 = sld [smem:[#allocation7 + $0x79]]  ;;  %s4866_s17 = sld [smem:[#allocation7 + $0x13]] }
 0x301   : > { %v2370_v26 = vadd.f32 %v7252_v46, %v2314_v17  ;;  %v2369_v43 = vadd.f32 %v7254_v6, %v2313_v39  ;;  %v2293_v0 = vadd.f32 %v7359_v40, %v2259_v50  ;;  %v2300_v36 = vadd.f32 %v7362_v49, %v2274_v20 }
 0x302   : > { %3069 = vrot.lane.b32.xlu1 %v3064_v1, %s8822_s19  ;;  %3067 = vrot.lane.b32.xlu0 %v3063_v19, %s8822_s19  ;;  %v2328_v35 = vadd.f32 %v7195_v10, %v2288_v47  ;;  %v2299_v46 = vadd.f32 %v7365_v48, %v2273_v56  ;;  %v2569_v6 = vstv %s7431_s20  ;;  %v2599_v8 = vstv %s7433_s22  ;;  %v8914_v47 = vld [vmem:[#allocation28_spill] sm:$0xff]  ;;  %s4847_s20 = sld [smem:[#allocation7 + $0x32]]  ;;  %s4848_s22 = sld [smem:[#allocation7 + $0x56]] }
 0x303   : > { %v2327_v31 = vadd.f32 %v7197_v60, %v2287_v53  ;;  %v2342_v40 = vadd.f32 %v7205_v57, %v2294_v22  ;;  %v2341_v49 = vadd.f32 %v7207_v45, %v2293_v0  ;;  %v2356_v1 = vadd.f32 %v7227_v5, %v2300_v36  ;;  %v8908_v45 = vld [vmem:[#allocation17_spill] sm:$0xff]  ;;  %v8915_v53 = vld [vmem:[#allocation27_spill] sm:$0xff] }
 0x304   : > { %v2490_v12 = vpop.permute.xlu1 %2489  ;;  %v2488_v19 = vpop.permute.xlu0 %2487  ;;  %v2355_v62 = vadd.f32 %v7229_v37, %v2299_v46  ;;  %v2384_v10 = vadd.f32 %v7267_v32, %v2328_v35  ;;  %v2420_v48 = vadd.f32 %v7387_v63, %v2370_v26  ;;  %v2419_v58 = vadd.f32 %v7403_v52, %v2369_v43  ;;  %v8910_v37 = vld [vmem:[#allocation22_spill] sm:$0xff]  ;;  %v8913_v52 = vld [vmem:[#allocation33_spill] sm:$0xff] }
 0x305   : > { %v2383_v60 = vadd.f32 %v7269_v42, %v2327_v31  ;;  %v2398_v57 = vadd.f32 %v7296_v7, %v2342_v40  ;;  %v2397_v5 = vadd.f32 %v8908_v45, %v2341_v49  ;;  %v2629_v32 = vstv %s7454_s23  ;;  %s4849_s23 = sld [smem:[#allocation7 + $0x7a]] }
 0x306   : > { %3109 = vrot.lane.b32.xlu1 %v8909_v11, %s5184_s12  ;;  %3107 = vrot.lane.b32.xlu0 %v8910_v37, %s5184_s12  ;;  %v2412_v63 = vadd.f32 %v8911_v16, %v2356_v1  ;;  %v2411_v21 = vadd.f32 %v8912_v25, %v2355_v62  ;;  %v2452_v23 = vadd.f32 %v8913_v52, %v2420_v48  ;;  %v2575_v9 = vstv %s7460_s25  ;;  %v8918_v25 = vld [vmem:[#allocation29_spill] sm:$0xff]  ;;  %s4854_s25 = sld [smem:[#allocation7 + $0x10]] }
 0x307   : > { %v2451_v42 = vadd.f32 %v7391_v2, %v2419_v58  ;;  %v2605_v38 = vstv %s7462_s27  ;;  %v2635_v54 = vstv %s7472_s30  ;;  %v2581_v15 = vstv %s7474_s8  ;;  %s4855_s27 = sld [smem:[#allocation7 + $0x34]]  ;;  %s4856_s30 = sld [smem:[#allocation7 + $0x58]] }
 0x308   : > { %v2504_v7 = vpop.permute.xlu1 %2503  ;;  %v2502_v27 = vpop.permute.xlu0 %2501  ;;  %v2426_v3 = vadd.f32 %v7406_v33, %v2384_v10  ;;  %v2611_v56 = vstv %s7480_s26  ;;  %v2425_v17 = vadd.f32 %v7411_v4, %v2383_v60  ;;  %v2432_v39 = vadd.f32 %v7414_v59, %v2398_v57  ;;  %s4857_s8 = sld [smem:[#allocation7 + $0x7c]]  ;;  %s4858_s26 = sld [smem:[#allocation7 + $0x11]] }
 0x309   : > { %v2508_v50 = vadd.f32 %v2504_v7, %v2452_v23  ;;  %v2507_v20 = vadd.f32 %v2502_v27, %v2451_v42  ;;  %v2431_v2 = vadd.f32 %v7417_v41, %v2397_v5  ;;  %v2641_v33 = vstv %s7488_s10  ;;  %v8919_v23 = vld [vmem:[#allocation20_spill] sm:$0xff]  ;;  %s4859_s10 = sld [smem:[#allocation7 + $0x35]] }
 0x30a   : > { %3123 = vrot.lane.b32.xlu1 %v8914_v47, %s5184_s12  ;;  %3121 = vrot.lane.b32.xlu0 %v8915_v53, %s5184_s12  ;;  %v2438_v26 = vadd.f32 %v7426_v28, %v2412_v63  ;;  %v2437_v43 = vadd.f32 %v7429_v13, %v2411_v21  ;;  %v2466_v59 = vadd.f32 %v7443_v61, %v2426_v3 }
 0x30b   : > { %v2552_v4 = vmax.f32 %v2508_v50, 0.0  ;;  %v2551_v22 = vmax.f32 %v2507_v20, 0.0  ;;  %v2465_v0 = vadd.f32 %v7445_v24, %v2425_v17  ;;  %v2480_v41 = vadd.f32 %v7464_v29, %v2432_v39 }
 0x30c   : > { %v2479_v36 = vadd.f32 %v7466_v34, %v2431_v2  ;;  %v2518_v35 = vpop.permute.xlu1 %2517  ;;  %v2516_v46 = vpop.permute.xlu0 %2515  ;;  %v8916_v34 = vld [vmem:[#allocation24_spill] sm:$0xff]  ;;  %v2494_v1 = vadd.f32 %v2490_v12, %v2438_v26  ;;  %v2493_v62 = vadd.f32 %v2488_v19, %v2437_v43  ;;  %v8920_v26 = vld [vmem:[#allocation30_spill] sm:$0xff] }
 0x30d   : > { %v2565_v28 = vmul.f32 %v2563_v18, %v2552_v4  ;;  %v2595_v13 = vmul.f32 %v2593_v55, %v2552_v4  ;;  %v2625_v31 = vmul.f32 %v2623_v30, %v2552_v4  ;;  %v2564_v40 = vmul.f32 %v2563_v18, %v2551_v22  ;;  %v8917_v18 = vld [vmem:[#allocation26_spill] sm:$0xff] }
 0x30e   : > { %v2594_v61 = vmul.f32 %v2593_v55, %v2551_v22  ;;  %v2624_v24 = vmul.f32 %v2623_v30, %v2551_v22  ;;  %v2522_v29 = vadd.f32 %v2518_v35, %v2466_v59  ;;  %v2521_v49 = vadd.f32 %v2516_v46, %v2465_v0  ;;  %3137 = vrot.lane.b32.xlu1 %v8916_v34, %s5184_s12  ;;  %v8921_v0 = vld [vmem:[#allocation31_spill] sm:$0xff] }
 0x30f   : > { %v2567_v10 = vadd.f32 %v2565_v28, %v2560_v44  ;;  %v2597_v48 = vadd.f32 %v2595_v13, %v2590_v51  ;;  %3135 = vrot.lane.b32.xlu0 %v8917_v18, %s5184_s12  ;;  %v2627_v55 = vadd.f32 %v2625_v31, %v2620_v14  ;;  %v2566_v30 = vadd.f32 %v2564_v40, %v2560_v44  ;;  %v8923_v31 = vld [vmem:[#allocation25_spill] sm:$0xff] }
 0x310   : > { %v2554_v58 = vmax.f32 %v2522_v29, 0.0  ;;  %v2553_v60 = vmax.f32 %v2521_v49, 0.0  ;;  %v2532_v57 = vpop.permute.xlu1 %2531  ;;  %v2530_v12 = vpop.permute.xlu0 %2529  ;;  %v2596_v19 = vadd.f32 %v2594_v61, %v2590_v51  ;;  %v2626_v45 = vadd.f32 %v2624_v24, %v2620_v14  ;;  %v8924_v24 = vld [vmem:[#allocation18_spill] sm:$0xff]  ;;  %v8925_v29 = vld [vmem:[#allocation19_spill] sm:$0xff] }
 0x311   : > { %v2536_v5 = vadd.f32 %v2532_v57, %v2480_v41  ;;  %v2535_v11 = vadd.f32 %v2530_v12, %v2479_v36  ;;  %v8922_v13 = vstv %s7261_s9  ;;  %v3186_v61 = vstv %s7558_s11  ;;  %s4860_s11 = sld [smem:[#allocation7 + $0x59]]  ;;  %s4869_s9 = sld [smem:[#allocation7 + $0x7f]] }
 0x312   : > { %v2571_v37 = vmul.f32 %v2569_v6, %v2554_v58  ;;  %v2601_v16 = vmul.f32 %v2599_v8, %v2554_v58  ;;  %v2631_v63 = vmul.f32 %v2629_v32, %v2554_v58  ;;  %v2570_v44 = vmul.f32 %v2569_v6, %v2553_v60  ;;  %3151 = vrot.lane.b32.xlu1 %v8918_v25, %s5184_s12  ;;  %v7657_v25 = vld [vmem:[#allocation2 + $0x81] sm:$0xff] }
 0x313   : > { %v2600_v51 = vmul.f32 %v2599_v8, %v2553_v60  ;;  %v2630_v14 = vmul.f32 %v2629_v32, %v2553_v60  ;;  %v2556_v21 = vmax.f32 %v2536_v5, 0.0  ;;  %v2555_v52 = vmax.f32 %v2535_v11, 0.0  ;;  %3149 = vrot.lane.b32.xlu0 %v8919_v23, %s5184_s12 }
 0x314   : > { %v2573_v42 = vadd.f32 %v2571_v37, %v2567_v10  ;;  %v2603_v7 = vadd.f32 %v2601_v16, %v2597_v48  ;;  %v2633_v27 = vadd.f32 %v2631_v63, %v2627_v55  ;;  %v2572_v6 = vadd.f32 %v2570_v44, %v2566_v30  ;;  %v2546_v3 = vpop.permute.xlu1 %2545  ;;  %v2544_v50 = vpop.permute.xlu0 %2543 }
 0x315   : > { %v2602_v20 = vadd.f32 %v2600_v51, %v2596_v19  ;;  %v2632_v17 = vadd.f32 %v2630_v14, %v2626_v45  ;;  %v2577_v39 = vmul.f32 %v2575_v9, %v2556_v21  ;;  %v2607_v8 = vmul.f32 %v2605_v38, %v2556_v21  ;;  %v7660_v14 = vld [vmem:[#allocation2 + $0x79] sm:$0xff] }
 0x316   : > { %v2637_v32 = vmul.f32 %v2635_v54, %v2556_v21  ;;  %v2576_v2 = vmul.f32 %v2575_v9, %v2555_v52  ;;  %v2606_v47 = vmul.f32 %v2605_v38, %v2555_v52  ;;  %v2636_v53 = vmul.f32 %v2635_v54, %v2555_v52  ;;  %3165 = vrot.lane.b32.xlu1 %v8920_v26, %s8822_s19 }
 0x317   : > { %v2579_v43 = vadd.f32 %v2577_v39, %v2573_v42  ;;  %v2609_v4 = vadd.f32 %v2607_v8, %v2603_v7  ;;  %v2550_v22 = vadd.f32 %v2546_v3, %v2494_v1  ;;  %v2549_v59 = vadd.f32 %v2544_v50, %v2493_v62  ;;  %3163 = vrot.lane.b32.xlu0 %v8921_v0, %s8822_s19 }
 0x318   : > { %v2639_v9 = vadd.f32 %v2637_v32, %v2633_v27  ;;  %v2578_v38 = vadd.f32 %v2576_v2, %v2572_v6  ;;  %v2608_v54 = vadd.f32 %v2606_v47, %v2602_v20  ;;  %v2638_v41 = vadd.f32 %v2636_v53, %v2632_v17  ;;  %v7591_v36 = vpop.permute.xlu1 %2695  ;;  %v7593_v35 = vpop.permute.xlu0 %2693 }
 0x319   : > { %v2558_v46 = vmax.f32 %v2550_v22, 0.0  ;;  %v2557_v28 = vmax.f32 %v2549_v59, 0.0  ;;  %v3173_v40 = vmul.f32 %v8923_v31, %v8922_v13  ;;  %v3188_v49 = vmul.f32 %v8925_v29, %v3186_v61 }
 0x31a   : > { %3179 = vrot.lane.b32.xlu1 %v8924_v24, %s8822_s19  ;;  %v3187_v30 = vmul.f32 %v8923_v31, %v3186_v61  ;;  %v3240_v16 = vstv %s7599_s29  ;;  %v3254_v52 = vstv %s7627_s15  ;;  %v3268_v6 = vstv %s4844_s21  ;;  %s4867_s29 = sld [smem:[#allocation7 + $0x37]]  ;;  %s4870_s15 = sld [smem:[#allocation7 + $0x14]] }
 0x31b   : > { %v2583_v34 = vmul.f32 %v2581_v15, %v2558_v46  ;;  %v2613_v1 = vmul.f32 %v2611_v56, %v2558_v46  ;;  %v2643_v62 = vmul.f32 %v2641_v33, %v2558_v46  ;;  %v2582_v10 = vmul.f32 %v2581_v15, %v2557_v28  ;;  %3177 = vrot.lane.b32.xlu0 %v3173_v40, %s8822_s19  ;;  %s4871_s21 = sld [smem:[#allocation7 + $0x38]] }
 0x31c   : > { %v2612_v48 = vmul.f32 %v2611_v56, %v2557_v28  ;;  %v2642_v18 = vmul.f32 %v2641_v33, %v2557_v28  ;;  %v7622_v55 = vpop.permute.xlu1 %2709  ;;  %v7624_v15 = vpop.permute.xlu0 %2707  ;;  %v3200_v33 = vstv %s7586_s16  ;;  %v3242_v51 = vmul.f32 %v7657_v25, %v3240_v16  ;;  %s4861_s16 = sld [smem:[#allocation7 + $0x7d]] }
 0x31d   : > { %v2585_v58 = vadd.f32 %v2583_v34, %v2579_v43  ;;  %v2615_v60 = vadd.f32 %v2613_v1, %v2609_v4  ;;  %v2645_v57 = vadd.f32 %v2643_v62, %v2639_v9  ;;  %v2584_v12 = vadd.f32 %v2582_v10, %v2578_v38  ;;  %v7722_v62 = vld [vmem:[#allocation2 + $0x1a] sm:$0xff] }
 0x31e   : > { %v2614_v56 = vadd.f32 %v2612_v48, %v2608_v54  ;;  %v2644_v19 = vadd.f32 %v2642_v18, %v2638_v41  ;;  %3193 = vrot.lane.b32.xlu1 %v3188_v49, %s8822_s19  ;;  %v3202_v11 = vmul.f32 %v8925_v29, %v3200_v33  ;;  %v3201_v37 = vmul.f32 %v8923_v31, %v3200_v33  ;;  %v7719_v49 = vld [vmem:[#allocation2 + $0x22] sm:$0xff] }
 0x31f   : > { %2588 = vst.msk [vmem:[%s7616_s14 + $0x8] sm:$0xff] %vm2586_vm2, %v2585_v58  ;;  %4780 = vst.msk [vmem:[%s7616_s14 + $0x18] sm:$0xff] %vm2586_vm2, %v2615_v60  ;;  %3191 = vrot.lane.b32.xlu0 %v3187_v30, %s8822_s19  ;;  %v3241_v21 = vmul.f32 %v7660_v14, %v3240_v16  ;;  %v3256_v7 = vmul.f32 %v7657_v25, %v3254_v52  ;;  %v3255_v27 = vmul.f32 %v7660_v14, %v3254_v52 }
 0x320   : > { %4787 = vst.msk [vmem:[%s7616_s14 + $0x28] sm:$0xff] %vm2586_vm2, %v2645_v57  ;;  %2587 = vst.msk [vmem:[%s7616_s14] sm:$0xff] %vm2586_vm2, %v2584_v12  ;;  %v7644_v45 = vpop.permute.xlu1 %2723  ;;  %v7646_v5 = vpop.permute.xlu0 %2721  ;;  %v3270_v20 = vmul.f32 %v7657_v25, %v3268_v6  ;;  %v3269_v17 = vmul.f32 %v7660_v14, %v3268_v6  ;;  %v3282_v39 = vstv %s4845_s18  ;;  %v3296_v53 = vstv %s4846_s13  ;;  %s4872_s18 = sld [smem:[#allocation7 + $0x5c]]  ;;  %s4873_s13 = sld [smem:[#allocation7 + $0x80]] }
 0x321   : > { %4779 = vst.msk [vmem:[%s7616_s14 + $0x10] sm:$0xff] %vm2586_vm2, %v2614_v56  ;;  %4786 = vst.msk [vmem:[%s7616_s14 + $0x20] sm:$0xff] %vm2586_vm2, %v2644_v19  ;;  %v3284_v2 = vmul.f32 %v7657_v25, %v3282_v39  ;;  %v3283_v47 = vmul.f32 %v7660_v14, %v3282_v39  ;;  %v3298_v4 = vmul.f32 %v7657_v25, %v3296_v53  ;;  %v3310_v59 = vstv %s4847_s20  ;;  %s4878_s20 = sld [smem:[#allocation7 + $0x16]] }
 0x322   : > { %3207 = vrot.lane.b32.xlu1 %v3202_v11, %s8822_s19  ;;  %v3297_v22 = vmul.f32 %v7660_v14, %v3296_v53  ;;  %v3312_v38 = vmul.f32 %v7657_v25, %v3310_v59  ;;  %v3311_v54 = vmul.f32 %v7660_v14, %v3310_v59  ;;  %v3324_v41 = vstv %s4848_s22  ;;  %s4879_s22 = sld [smem:[#allocation7 + $0x3a]] }
 0x323   : > { %3205 = vrot.lane.b32.xlu0 %v3201_v37, %s8822_s19  ;;  %v3326_v13 = vmul.f32 %v7657_v25, %v3324_v41  ;;  %v3325_v31 = vmul.f32 %v7660_v14, %v3324_v41  ;;  %v3338_v40 = vstv %s4849_s23  ;;  %v3378_v1 = vstv %s4854_s25  ;;  %s7856_s23 = sld [smem:[#allocation7 + $0x5e]]  ;;  %s7870_s25 = sld [smem:[#allocation7 + $0x82]] }
 0x324   : > { %v7653_v63 = vpop.permute.xlu1 %2737  ;;  %v7655_v44 = vpop.permute.xlu0 %2735  ;;  %v3340_v29 = vmul.f32 %v7657_v25, %v3338_v40  ;;  %v3339_v34 = vmul.f32 %v7660_v14, %v3338_v40  ;;  %v3380_v18 = vmul.f32 %v3378_v1, %v7719_v49  ;;  %v3379_v30 = vmul.f32 %v3378_v1, %v7722_v62 }
 0x325   : > { %v3392_v58 = vstv %s4855_s27  ;;  %v3406_v19 = vstv %s4856_s30  ;;  %v3434_v6 = vstv %s4858_s26  ;;  %v3476_v40 = vstv %s4861_s16  ;;  %s7874_s27 = sld [smem:[#allocation8]]  ;;  %s7887_s26 = sld [smem:[#allocation8 + $0x1]] }
 0x326   : > { %3247 = vrot.lane.b32.xlu1 %v3242_v51, %s5184_s12  ;;  %v3394_v12 = vmul.f32 %v3392_v58, %v7719_v49  ;;  %v3393_v56 = vmul.f32 %v3392_v58, %v7722_v62  ;;  %v3408_v37 = vmul.f32 %v3406_v19, %v7719_v49  ;;  %v3407_v16 = vmul.f32 %v3406_v19, %v7722_v62  ;;  %s7879_s30 = sld [smem:[#allocation7]] }
 0x327   : > { %3245 = vrot.lane.b32.xlu0 %v3241_v21, %s5184_s12  ;;  %v3420_v51 = vstv %s4857_s8  ;;  %v3436_v39 = vmul.f32 %v3434_v6, %v7719_v49  ;;  %v3478_v1 = vmul.f32 %v3476_v40, %v7719_v49  ;;  %s7885_s8 = sld [smem:[#allocation7 + $0x17]]  ;;  %s7894_s16 = sld [smem:[#allocation7 + $0x48]] }
 0x328   : > { %v7666_v23 = vpop.permute.xlu1 %2751  ;;  %v7668_v42 = vpop.permute.xlu0 %2749 }
 0x32a   : > { %3261 = vrot.lane.b32.xlu1 %v3256_v7, %s5184_s12  ;;  %v3422_v7 = vmul.f32 %v3420_v51, %v7719_v49 }
 0x32b   : > { %3259 = vrot.lane.b32.xlu0 %v3255_v27, %s5184_s12  ;;  %v3421_v27 = vmul.f32 %v3420_v51, %v7722_v62  ;;  %v3530_v51 = vstv %s4867_s29  ;;  %s7899_s29 = sld [smem:[#allocation7 + $0x6c]] }
 0x32c   : > { %v7674_v3 = vpop.permute.xlu1 %2765  ;;  %v7676_v50 = vpop.permute.xlu0 %2763 }
 0x32e   : > { %3275 = vrot.lane.b32.xlu1 %v3270_v20, %s5184_s12 }
 0x32f   : > { %3273 = vrot.lane.b32.xlu0 %v3269_v17, %s5184_s12 }
 0x330   : > { %v7682_v8 = vpop.permute.xlu1 %2779  ;;  %v7684_v32 = vpop.permute.xlu0 %2777 }
 0x332   : > { %3289 = vrot.lane.b32.xlu1 %v3284_v2, %s5184_s12  ;;  %v3435_v2 = vmul.f32 %v3434_v6, %v7722_v62 }
 0x333   : > { %3287 = vrot.lane.b32.xlu0 %v3283_v47, %s5184_s12  ;;  %v3448_v47 = vstv %s4859_s10  ;;  %s7889_s10 = sld [smem:[#allocation7 + $0x24]] }
 0x334   : > { %v7690_v26 = vpop.permute.xlu1 %2793  ;;  %v7692_v43 = vpop.permute.xlu0 %2791  ;;  %v3449_v59 = vmul.f32 %v3448_v47, %v7722_v62 }
 0x336   : > { %3303 = vrot.lane.b32.xlu1 %v3298_v4, %s8822_s19 }
 0x337   : > { %3301 = vrot.lane.b32.xlu0 %v3297_v22, %s8822_s19  ;;  %v3450_v22 = vmul.f32 %v3448_v47, %v7719_v49 }
 0x338   : > { %v7698_v0 = vpop.permute.xlu1 %2833  ;;  %v7700_v9 = vpop.permute.xlu0 %2831 }
 0x33a   : > { %3317 = vrot.lane.b32.xlu1 %v3312_v38, %s8822_s19  ;;  %v3462_v38 = vstv %s4860_s11  ;;  %s7892_s11 = sld [smem:[#allocation8 + $0x2]] }
 0x33b   : > { %3315 = vrot.lane.b32.xlu0 %v3311_v54, %s8822_s19 }
 0x33c   : > { %v7706_v46 = vpop.permute.xlu1 %2847  ;;  %v7708_v28 = vpop.permute.xlu0 %2845 }
 0x33e   : > { %3331 = vrot.lane.b32.xlu1 %v3326_v13, %s8822_s19  ;;  %v3464_v13 = vmul.f32 %v3462_v38, %v7719_v49 }
 0x33f   : > { %3329 = vrot.lane.b32.xlu0 %v3325_v31, %s8822_s19  ;;  %v3463_v31 = vmul.f32 %v3462_v38, %v7722_v62 }
 0x340   : > { %v7714_v61 = vpop.permute.xlu1 %2861  ;;  %v7716_v24 = vpop.permute.xlu0 %2859 }
 0x341   : > { %8926 = vst [vmem:[#allocation17_spill] sm:$0xff] %v7714_v61  ;;  %8927 = vst [vmem:[#allocation23_spill] sm:$0xff] %v7716_v24 }
 0x342   : > { %3345 = vrot.lane.b32.xlu1 %v3340_v29, %s8822_s19 }
 0x343   : > { %3343 = vrot.lane.b32.xlu0 %v3339_v34, %s8822_s19 }
 0x344   : > { %v7726_v10 = vpop.permute.xlu1 %2875  ;;  %v7728_v48 = vpop.permute.xlu0 %2873 }
 0x346   : > { %3385 = vrot.lane.b32.xlu1 %v3380_v18, %s5184_s12  ;;  %v3477_v18 = vmul.f32 %v3476_v40, %v7722_v62 }
 0x347   : > { %3383 = vrot.lane.b32.xlu0 %v3379_v30, %s5184_s12  ;;  %v3516_v30 = vstv %s4866_s17  ;;  %s7897_s17 = sld [smem:[#allocation8 + $0x3]] }
 0x348   : > { %v7734_v60 = vpop.permute.xlu1 %2889  ;;  %v7736_v57 = vpop.permute.xlu0 %2887 }
 0x34a   : > { %3399 = vrot.lane.b32.xlu1 %v3394_v12, %s5184_s12 }
 0x34b   : > { %3397 = vrot.lane.b32.xlu0 %v3393_v56, %s5184_s12  ;;  %v7794_v56 = vld [vmem:[#allocation2 + $0x39] sm:$0xff] }
 0x34c   : > { %v7742_v33 = vpop.permute.xlu1 %2903  ;;  %v7744_v11 = vpop.permute.xlu0 %2901  ;;  %8940 = vst [vmem:[#allocation25_spill] sm:$0xff] %v7794_v56  ;;  %v3518_v19 = vmul.f32 %v7794_v56, %v3516_v30  ;;  %v3532_v6 = vmul.f32 %v7794_v56, %v3530_v51 }
 0x34d   : > { %8928 = vst [vmem:[#allocation22_spill] sm:$0xff] %v7742_v33  ;;  %8929 = vst [vmem:[#allocation21_spill] sm:$0xff] %v7744_v11 }
 0x34e   : > { %3413 = vrot.lane.b32.xlu1 %v3408_v37, %s5184_s12  ;;  %v7797_v37 = vld [vmem:[#allocation2 + $0x31] sm:$0xff] }
 0x34f   : > { %3411 = vrot.lane.b32.xlu0 %v3407_v16, %s5184_s12  ;;  %8941 = vst [vmem:[#allocation18_spill] sm:$0xff] %v7797_v37  ;;  %v3517_v16 = vmul.f32 %v7797_v37, %v3516_v30  ;;  %v3572_v30 = vstv %s4870_s15  ;;  %s7912_s15 = sld [smem:[#allocation7 + $0x2a]] }
 0x350   : > { %v7750_v21 = vpop.permute.xlu1 %2917  ;;  %v7752_v52 = vpop.permute.xlu0 %2915 }
 0x351   : > { %8930 = vst [vmem:[#allocation32_spill] sm:$0xff] %v7750_v21  ;;  %8931 = vst [vmem:[#allocation33_spill] sm:$0xff] %v7752_v52 }
 0x352   : > { %3427 = vrot.lane.b32.xlu1 %v3422_v7, %s5184_s12 }
 0x353   : > { %3425 = vrot.lane.b32.xlu0 %v3421_v27, %s5184_s12 }
 0x354   : > { %v7758_v20 = vpop.permute.xlu1 %2931  ;;  %v7760_v17 = vpop.permute.xlu0 %2929 }
 0x356   : > { %3441 = vrot.lane.b32.xlu1 %v3436_v39, %s8822_s19  ;;  %v3531_v39 = vmul.f32 %v7797_v37, %v3530_v51  ;;  %v3574_v51 = vmul.f32 %v7794_v56, %v3572_v30 }
 0x357   : > { %3439 = vrot.lane.b32.xlu0 %v3435_v2, %s8822_s19  ;;  %v3544_v2 = vstv %s4868_s28  ;;  %s7904_s28 = sld [smem:[#allocation7 + $0x6]] }
 0x358   : > { %v7766_v53 = vpop.permute.xlu1 %2971  ;;  %v7768_v4 = vpop.permute.xlu0 %2969  ;;  %v3545_v38 = vmul.f32 %v7797_v37, %v3544_v2 }
 0x359   : > { %8932 = vst [vmem:[#allocation28_spill] sm:$0xff] %v7766_v53  ;;  %8933 = vst [vmem:[#allocation27_spill] sm:$0xff] %v7768_v4  ;;  %v8978_v53 = vstv %s7912_s15  ;;  %s8100_s15 = sld [smem:[#allocation7 + $0x1a]] }
 0x35a   : > { %3455 = vrot.lane.b32.xlu1 %v3450_v22, %s8822_s19  ;;  %v8980_v61 = vmov %v8978_v53 }
 0x35b   : > { %3453 = vrot.lane.b32.xlu0 %v3449_v59, %s8822_s19  ;;  %v3546_v59 = vmul.f32 %v7794_v56, %v3544_v2 }
 0x35c   : > { %v7774_v54 = vpop.permute.xlu1 %2985  ;;  %v7776_v41 = vpop.permute.xlu0 %2983 }
 0x35d   : > { %8934 = vst [vmem:[#allocation24_spill] sm:$0xff] %v7774_v54  ;;  %8935 = vst [vmem:[#allocation26_spill] sm:$0xff] %v7776_v41 }
 0x35e   : > { %3469 = vrot.lane.b32.xlu1 %v3464_v13, %s8822_s19  ;;  %v3558_v13 = vstv %s4869_s9  ;;  %s7910_s9 = sld [smem:[#allocation7 + $0x3b]] }
 0x35f   : > { %3467 = vrot.lane.b32.xlu0 %v3463_v31, %s8822_s19 }
 0x360   : > { %v7782_v29 = vpop.permute.xlu1 %2999  ;;  %v7784_v34 = vpop.permute.xlu0 %2997 }
 0x361   : > { %8936 = vst [vmem:[#allocation29_spill] sm:$0xff] %v7782_v29  ;;  %8937 = vst [vmem:[#allocation20_spill] sm:$0xff] %v7784_v34 }
 0x362   : > { %3483 = vrot.lane.b32.xlu1 %v3478_v1, %s8822_s19  ;;  %v3560_v1 = vmul.f32 %v7794_v56, %v3558_v13 }
 0x363   : > { %3481 = vrot.lane.b32.xlu0 %v3477_v18, %s8822_s19  ;;  %v3559_v18 = vmul.f32 %v7797_v37, %v3558_v13 }
 0x364   : > { %v7790_v58 = vpop.permute.xlu1 %3013  ;;  %v7792_v12 = vpop.permute.xlu0 %3011  ;;  %v3724_v29 = vstv %s7910_s9  ;;  %s8054_s9 = sld [smem:[#allocation7 + $0x61]] }
 0x365   : > { %8938 = vst [vmem:[#allocation30_spill] sm:$0xff] %v7790_v58  ;;  %8939 = vst [vmem:[#allocation31_spill] sm:$0xff] %v7792_v12 }
 0x366   : > { %3523 = vrot.lane.b32.xlu1 %v3518_v19, %s5184_s12 }
 0x367   : > { %3521 = vrot.lane.b32.xlu0 %v3517_v16, %s5184_s12 }
 0x368   : > { %v7802_v7 = vpop.permute.xlu1 %3027  ;;  %v7804_v27 = vpop.permute.xlu0 %3025 }
 0x369   : > { %8942 = vst [vmem:[#allocation19_spill] sm:$0xff] %v7802_v7  ;;  %8943 = vst [vmem:[#allocation34_spill] sm:$0xff] %v7804_v27 }
 0x36a   : > { %3537 = vrot.lane.b32.xlu1 %v3532_v6, %s5184_s12  ;;  %v3573_v6 = vmul.f32 %v7797_v37, %v3572_v30 }
 0x36b   : > { %3535 = vrot.lane.b32.xlu0 %v3531_v39, %s5184_s12  ;;  %v3586_v39 = vstv %s4871_s21  ;;  %s7914_s21 = sld [smem:[#allocation7 + $0x4e]] }
 0x36c   : > { %v7810_v47 = vpop.permute.xlu1 %3041  ;;  %v7812_v22 = vpop.permute.xlu0 %3039  ;;  %v3587_v13 = vmul.f32 %v7797_v37, %v3586_v39 }
 0x36d   : > { %8944 = vst [vmem:[#allocation35_spill] sm:$0xff] %v7810_v47  ;;  %8945 = vst [vmem:[#allocation36_spill] sm:$0xff] %v7812_v22 }
 0x36e   : > { %3551 = vrot.lane.b32.xlu1 %v3546_v59, %s5184_s12 }
 0x36f   : > { %3549 = vrot.lane.b32.xlu0 %v3545_v38, %s5184_s12  ;;  %v3588_v38 = vmul.f32 %v7794_v56, %v3586_v39 }
 0x370   : > { %v7818_v31 = vpop.permute.xlu1 %3055  ;;  %v7820_v40 = vpop.permute.xlu0 %3053 }
 0x371   : > { %8946 = vst [vmem:[#allocation37_spill] sm:$0xff] %v7818_v31  ;;  %8947 = vst [vmem:[#allocation38_spill] sm:$0xff] %v7820_v40  ;;  %v3614_v40 = vstv %s4873_s13  ;;  %s7919_s13 = sld [smem:[#allocation7 + $0x9]] }
 0x372   : > { %3565 = vrot.lane.b32.xlu1 %v3560_v1, %s5184_s12  ;;  %v3600_v1 = vstv %s4872_s18  ;;  %s7917_s18 = sld [smem:[#allocation7 + $0x72]] }
 0x373   : > { %3563 = vrot.lane.b32.xlu0 %v3559_v18, %s5184_s12 }
 0x374   : > { %v7826_v19 = vpop.permute.xlu1 %3069  ;;  %v7828_v16 = vpop.permute.xlu0 %3067 }
 0x375   : > { %8948 = vst [vmem:[#allocation39_spill] sm:$0xff] %v7826_v19  ;;  %8949 = vst [vmem:[#allocation40_spill] sm:$0xff] %v7828_v16  ;;  %v5044_v19 = vld [vmem:[#allocation2 + $0x9] sm:$0xff] }
 0x376   : > { %3579 = vrot.lane.b32.xlu1 %v3574_v51, %s8822_s19  ;;  %v3602_v51 = vmul.f32 %v7794_v56, %v3600_v1 }
 0x377   : > { %3577 = vrot.lane.b32.xlu0 %v3573_v6, %s8822_s19  ;;  %v3601_v6 = vmul.f32 %v7797_v37, %v3600_v1 }
 0x378   : > { %v7834_v2 = vpop.permute.xlu1 %3109  ;;  %v7836_v59 = vpop.permute.xlu0 %3107 }
 0x379   : > { %8950 = vst [vmem:[#allocation41_spill] sm:$0xff] %v7834_v2  ;;  %8951 = vst [vmem:[#allocation42_spill] sm:$0xff] %v7836_v59  ;;  %v2659_v59 = vstv %s7897_s17  ;;  %s8027_s17 = sld [smem:[#allocation7 + $0x54]] }
 0x37a   : > { %3593 = vrot.lane.b32.xlu1 %v3588_v38, %s8822_s19  ;;  %v3616_v38 = vmul.f32 %v7794_v56, %v3614_v40  ;;  %v7867_v56 = vld [vmem:[#allocation2 + $0x91] sm:$0xff] }
 0x37b   : > { %3591 = vrot.lane.b32.xlu0 %v3587_v13, %s8822_s19  ;;  %v3615_v13 = vmul.f32 %v7797_v37, %v3614_v40  ;;  %v3668_v37 = vstv %s4879_s22  ;;  %s7931_s22 = sld [smem:[#allocation7 + $0x3]] }
 0x37c   : > { %v7842_v18 = vpop.permute.xlu1 %3123  ;;  %v7844_v30 = vpop.permute.xlu0 %3121 }
 0x37d   : > { %8952 = vst [vmem:[#allocation43_spill] sm:$0xff] %v7842_v18  ;;  %8953 = vst [vmem:[#allocation44_spill] sm:$0xff] %v7844_v30  ;;  %v3654_v18 = vstv %s4878_s20  ;;  %v3669_v30 = vmul.f32 %v7867_v56, %v3668_v37  ;;  %s7929_s20 = sld [smem:[#allocation7 + $0x5f]] }
 0x37e   : > { %3607 = vrot.lane.b32.xlu1 %v3602_v51, %s8822_s19  ;;  %v7862_v51 = vld [vmem:[#allocation2 + $0x99] sm:$0xff]  ;;  %v3655_v40 = vmul.f32 %v7867_v56, %v3654_v18 }
 0x37f   : > { %3605 = vrot.lane.b32.xlu0 %v3601_v6, %s8822_s19  ;;  %v3656_v6 = vmul.f32 %v7862_v51, %v3654_v18  ;;  %v3682_v18 = vstv %s7856_s23  ;;  %s7933_s23 = sld [smem:[#allocation7 + $0x27]]  ;;  %v3726_v47 = vmul.f32 %v7862_v51, %v3724_v29 }
 0x380   : > { %v7850_v39 = vpop.permute.xlu1 %3137 }
 0x381   : > { %8954 = vst [vmem:[#allocation45_spill] sm:$0xff] %v7850_v39  ;;  %v7853_v31 = vpop.permute.xlu0 %3135 }
 0x382   : > { %8955 = vst [vmem:[#allocation46_spill] sm:$0xff] %v7853_v31  ;;  %3621 = vrot.lane.b32.xlu1 %v3616_v38, %s8822_s19 }
 0x383   : > { %3619 = vrot.lane.b32.xlu0 %v3615_v13, %s8822_s19  ;;  %v3670_v13 = vmul.f32 %v7862_v51, %v3668_v37 }
 0x384   : > { %v7860_v1 = vpop.permute.xlu1 %3151 }
 0x385   : > { %8956 = vst [vmem:[#allocation47_spill] sm:$0xff] %v7860_v1  ;;  %v7865_v39 = vpop.permute.xlu0 %3149  ;;  %v2676_v1 = vstv %s7894_s16  ;;  %v2808_v58 = vstv %s7933_s23  ;;  %s8003_s16 = sld [smem:[#allocation7 + $0x30]]  ;;  %s8223_s23 = sld [smem:[#allocation7 + $0x86]] }
 0x386   : > { %8957 = vst [vmem:[#allocation48_spill] sm:$0xff] %v7865_v39  ;;  %3661 = vrot.lane.b32.xlu1 %v3656_v6, %s5184_s12  ;;  %v3684_v6 = vmul.f32 %v7862_v51, %v3682_v18  ;;  %v3710_v39 = vstv %s7885_s8  ;;  %v2678_v22 = vmul.f32 %v5044_v19, %v2676_v1  ;;  %s7979_s8 = sld [smem:[#allocation7 + $0x2d]] }
 0x387   : > { %3659 = vrot.lane.b32.xlu0 %v3655_v40, %s5184_s12  ;;  %v3711_v2 = vmul.f32 %v7867_v56, %v3710_v39 }
 0x388   : > { %v7876_v38 = vpop.permute.xlu1 %3165 }
 0x389   : > { %8958 = vst [vmem:[#allocation49_spill] sm:$0xff] %v7876_v38  ;;  %v7881_v31 = vpop.permute.xlu0 %3163 }
 0x38a   : > { %8959 = vst [vmem:[#allocation50_spill] sm:$0xff] %v7881_v31  ;;  %3675 = vrot.lane.b32.xlu1 %v3670_v13, %s5184_s12  ;;  %v3683_v13 = vmul.f32 %v7867_v56, %v3682_v18  ;;  %v3696_v31 = vstv %s7870_s25  ;;  %s7938_s25 = sld [smem:[#allocation7 + $0x4b]] }
 0x38b   : > { %3673 = vrot.lane.b32.xlu0 %v3669_v30, %s5184_s12  ;;  %v3698_v18 = vmul.f32 %v7862_v51, %v3696_v31 }
 0x38c   : > { %v7901_v37 = vpop.permute.xlu1 %3179 }
 0x38d   : > { %8960 = vst [vmem:[#allocation51_spill] sm:$0xff] %v7901_v37  ;;  %v7906_v40 = vpop.permute.xlu0 %3177  ;;  %v3697_v37 = vmul.f32 %v7867_v56, %v3696_v31  ;;  %v2653_v31 = vstv %s7887_s26  ;;  %s7981_s26 = sld [smem:[#allocation7 + $0x51]] }
 0x38e   : > { %8961 = vst [vmem:[#allocation52_spill] sm:$0xff] %v7906_v40  ;;  %3689 = vrot.lane.b32.xlu1 %v3684_v6, %s5184_s12  ;;  %v2650_v6 = vstv %s7874_s27  ;;  %s7955_s27 = sld [smem:[#allocation7 + $0x83]] }
 0x38f   : > { %3687 = vrot.lane.b32.xlu0 %v3683_v13, %s5184_s12  ;;  %v2664_v13 = vstv %s7879_s30  ;;  %s7972_s30 = sld [smem:[#allocation7 + $0x19]] }
 0x390   : > { %v7922_v30 = vpop.permute.xlu1 %3193  ;;  %v2666_v54 = vmul.f32 %v5044_v19, %v2664_v13  ;;  %v2814_v21 = vstv %s7938_s25  ;;  %s8256_s25 = sld [smem:[#allocation7 + $0x1c]] }
 0x391   : > { %8962 = vst [vmem:[#allocation53_spill] sm:$0xff] %v7922_v30  ;;  %v7925_v40 = vpop.permute.xlu0 %3191  ;;  %v2656_v30 = vstv %s7892_s11  ;;  %s8001_s11 = sld [smem:[#allocation7 + $0xc]] }
 0x392   : > { %8963 = vst [vmem:[#allocation54_spill] sm:$0xff] %v7925_v40  ;;  %3703 = vrot.lane.b32.xlu1 %v3698_v18, %s5184_s12  ;;  %v2670_v40 = vstv %s7889_s10  ;;  %v3712_v18 = vmul.f32 %v7862_v51, %v3710_v39  ;;  %s7990_s10 = sld [smem:[#allocation7 + $0x75]] }
 0x393   : > { %3701 = vrot.lane.b32.xlu0 %v3697_v37, %s5184_s12  ;;  %v2682_v37 = vstv %s7899_s29  ;;  %v2672_v27 = vmul.f32 %v5044_v19, %v2670_v40  ;;  %s8029_s29 = sld [smem:[#allocation7 + $0x78]] }
 0x394   : > { %v7946_v38 = vpop.permute.xlu1 %3207  ;;  %v2684_v52 = vmul.f32 %v5044_v19, %v2682_v37 }
 0x395   : > { %8964 = vst [vmem:[#allocation55_spill] sm:$0xff] %v7946_v38  ;;  %v7951_v34 = vpop.permute.xlu0 %3205  ;;  %v3725_v38 = vmul.f32 %v7867_v56, %v3724_v29  ;;  %v7984_v29 = vadd.f32 %v2666_v54, %v2650_v6 }
 0x396   : > { %8965 = vst [vmem:[#allocation56_spill] sm:$0xff] %v7951_v34  ;;  %3717 = vrot.lane.b32.xlu1 %v3712_v18, %s8822_s19  ;;  %v5045_v34 = vld [vmem:[#allocation2 + $0x1] sm:$0xff] }
 0x397   : > { %3715 = vrot.lane.b32.xlu0 %v3711_v2, %s8822_s19  ;;  %v2665_v39 = vmul.f32 %v5045_v34, %v2664_v13  ;;  %v2671_v18 = vmul.f32 %v5045_v34, %v2670_v40  ;;  %v3738_v2 = vstv %s7929_s20  ;;  %v2677_v41 = vmul.f32 %v5045_v34, %v2676_v1  ;;  %s8185_s20 = sld [smem:[#allocation7 + $0x62]] }
 0x398   : > { %v7965_v12 = vpop.permute.xlu1 %3247  ;;  %v2683_v7 = vmul.f32 %v5045_v34, %v2682_v37  ;;  %v2802_v13 = vstv %s7931_s22  ;;  %v7988_v1 = vadd.f32 %v2672_v27, %v2653_v31  ;;  %v7999_v37 = vadd.f32 %v2678_v22, %v2656_v30  ;;  %v5047_v22 = vld [vmem:[#allocation2 + $0x61] sm:$0xff]  ;;  %s8215_s22 = sld [smem:[#allocation7 + $0x57]] }
 0x399   : > { %8966 = vst [vmem:[#allocation57_spill] sm:$0xff] %v7965_v12  ;;  %v7968_v16 = vpop.permute.xlu0 %3245  ;;  %v2820_v12 = vstv %s7940_s0  ;;  %v7986_v40 = vadd.f32 %v2665_v39, %v2650_v6  ;;  %s7995_s0 = sld [smem:[#allocation7 + $0x3d]]  ;;  %v7997_v19 = vadd.f32 %v2671_v18, %v2653_v31  ;;  %v3739_v27 = vmul.f32 %v7867_v56, %v3738_v2 }
 0x39a   : > { %8967 = vst [vmem:[#allocation58_spill] sm:$0xff] %v7968_v16  ;;  %3731 = vrot.lane.b32.xlu1 %v3726_v47, %s8822_s19  ;;  %v3740_v47 = vmul.f32 %v7862_v51, %v3738_v2  ;;  %v8009_v6 = vadd.f32 %v2677_v41, %v2656_v30  ;;  %v8011_v39 = vadd.f32 %v2684_v52, %v2659_v59  ;;  %v5046_v16 = vld [vmem:[#allocation2 + $0x69] sm:$0xff] }
 0x39b   : > { %3729 = vrot.lane.b32.xlu0 %v3725_v38, %s8822_s19  ;;  %v3752_v38 = vstv %s7955_s27  ;;  %v8015_v31 = vmul.f32 %v5046_v16, %v2802_v13  ;;  %v8018_v18 = vmul.f32 %v5047_v22, %v2802_v13  ;;  %v8022_v2 = vmul.f32 %v5047_v22, %v2808_v58  ;;  %v8040_v13 = vld [vmem:[#allocation2 + $0x3a] sm:$0xff]  ;;  %s8270_s27 = sld [smem:[#allocation7 + $0x7b]] }
 0x39c   : > { %v7992_v34 = vpop.permute.xlu1 %3261  ;;  %v8024_v41 = vmul.f32 %v5046_v16, %v2814_v21  ;;  %v8031_v52 = vmul.f32 %v5047_v22, %v2814_v21  ;;  %v3754_v30 = vmul.f32 %v7862_v51, %v3752_v38  ;;  %v3792_v51 = vstv %s7972_s30  ;;  %s8296_s30 = sld [smem:[#allocation7 + $0x40]] }
 0x39d   : > { %8968 = vst [vmem:[#allocation59_spill] sm:$0xff] %v7992_v34  ;;  %v8005_v54 = vpop.permute.xlu0 %3259  ;;  %v8013_v34 = vadd.f32 %v2683_v7, %v2659_v59  ;;  %v8033_v7 = vmul.f32 %v5046_v16, %v2820_v12  ;;  %v8035_v59 = vmul.f32 %v5047_v22, %v2820_v12  ;;  %v3753_v22 = vmul.f32 %v7867_v56, %v3752_v38 }
 0x39e   : > { %8969 = vst [vmem:[#allocation60_spill] sm:$0xff] %v8005_v54  ;;  %3745 = vrot.lane.b32.xlu1 %v3740_v47, %s8822_s19  ;;  %v8020_v54 = vmul.f32 %v5046_v16, %v2808_v58  ;;  %8970 = vst [vmem:[#allocation61_spill] sm:$0xff] %v8024_v41  ;;  %v5048_v47 = vld [vmem:[#allocation2 + $0xa] sm:$0xff]  ;;  %v5049_v16 = vld [vmem:[#allocation2 + $0x2] sm:$0xff]  ;;  %v8986_v56 = vstv %s7917_s18  ;;  %s8119_s18 = sld [smem:[#allocation7 + $0x3e]]  ;;  %v3234_v41 = vstv %s8029_s29  ;;  %s8423_s29 = sld [smem:[#allocation7 + $0x5a]] }
 0x39f   : > { %3743 = vrot.lane.b32.xlu0 %v3739_v27, %s8822_s19  ;;  %8971 = vst [vmem:[#allocation62_spill] sm:$0xff] %v8031_v52  ;;  %v8973_v27 = vstv %s7904_s28  ;;  %v8064_v11 = vmul.f32 %v5049_v16, %v8980_v61  ;;  %v8077_v38 = vmul.f32 %v5048_v47, %v8986_v56  ;;  %v3090_v61 = vstv %s7981_s26  ;;  %s8086_s28 = sld [smem:[#allocation7 + $0x85]] }
 0x3a0   : > { %v8037_v58 = vpop.permute.xlu1 %3275  ;;  %v8044_v21 = vmul.f32 %v5048_v47, %v8973_v27  ;;  %v8975_v4 = vmov %v8973_v27  ;;  %v8060_v27 = vmul.f32 %v5048_v47, %v8978_v53  ;;  %v3084_v53 = vstv %s7979_s8  ;;  %s8305_s8 = sld [smem:[#allocation7 + $0x64]]  ;;  %s8312_s26 = sld [smem:[#allocation7 + $0x1d]] }
 0x3a1   : > { %8972 = vst [vmem:[#allocation63_spill] sm:$0xff] %v8037_v58  ;;  %v8048_v24 = vmul.f32 %v5049_v16, %v8975_v4  ;;  %v8050_v12 = vpop.permute.xlu0 %3273  ;;  %v8056_v58 = vld [vmem:[#allocation2 + $0x32] sm:$0xff]  ;;  %8981 = vst [vmem:[#allocation68_spill] sm:$0xff] %v8064_v11  ;;  %v8982_v4 = vstv %s7914_s21  ;;  %s8108_s21 = sld [smem:[#allocation7 + $0xf]] }
 0x3a2   : > { %8974 = vst [vmem:[#allocation64_spill] sm:$0xff] %v8044_v21  ;;  %8977 = vst [vmem:[#allocation66_spill] sm:$0xff] %v8050_v12  ;;  %v8984_v12 = vmov %v8982_v4  ;;  %3759 = vrot.lane.b32.xlu1 %v3754_v30, %s8822_s19  ;;  %v8988_v21 = vmov %v8986_v56 }
 0x3a3   : > { %8976 = vst [vmem:[#allocation65_spill] sm:$0xff] %v8048_v24  ;;  %8979 = vst [vmem:[#allocation67_spill] sm:$0xff] %v8060_v27  ;;  %v8068_v24 = vmul.f32 %v5048_v47, %v8982_v4  ;;  %v8072_v52 = vmul.f32 %v5049_v16, %v8984_v12  ;;  %v8081_v33 = vmul.f32 %v5049_v16, %v8988_v21  ;;  %3757 = vrot.lane.b32.xlu0 %v3753_v22, %s8822_s19  ;;  %v5050_v4 = vld [vmem:[#allocation2 + $0x21] sm:$0xff] }
 0x3a4   : > { %8987 = vst [vmem:[#allocation71_spill] sm:$0xff] %v8077_v38  ;;  %v8990_v12 = vstv %s7919_s13  ;;  %v3096_v47 = vstv %s7990_s10  ;;  %v8097_v56 = vpop.permute.xlu1 %3289  ;;  %v3794_v21 = vmul.f32 %v3792_v51, %v8040_v13  ;;  %v3216_v16 = vstv %s8001_s11  ;;  %s8161_s13 = sld [smem:[#allocation7 + $0x33]]  ;;  %s8352_s10 = sld [smem:[#allocation7 + $0x41]] }
 0x3a5   : > { %8983 = vst [vmem:[#allocation69_spill] sm:$0xff] %v8068_v24  ;;  %8985 = vst [vmem:[#allocation70_spill] sm:$0xff] %v8072_v52  ;;  %v8090_v52 = vmul.f32 %v5050_v4, %v8990_v12  ;;  %v5051_v24 = vld [vmem:[#allocation2 + $0x19] sm:$0xff]  ;;  %v8992_v30 = vmov %v8990_v12  ;;  %v3222_v22 = vstv %s8003_s16  ;;  %v8104_v27 = vpop.permute.xlu0 %3287  ;;  %v3793_v12 = vmul.f32 %v3792_v51, %v8056_v58  ;;  %s8381_s11 = sld [smem:[#allocation7 + $0x88]]  ;;  %s8403_s16 = sld [smem:[#allocation7 + $0x36]] }
 0x3a6   : > { %8989 = vst [vmem:[#allocation72_spill] sm:$0xff] %v8081_v33  ;;  %v8094_v11 = vmul.f32 %v5051_v24, %v8992_v30  ;;  %8994 = vst [vmem:[#allocation75_spill] sm:$0xff] %v8097_v56  ;;  %v8110_v30 = vmul.f32 %v5050_v4, %v3084_v53  ;;  %v8114_v56 = vmul.f32 %v5050_v4, %v3090_v61  ;;  %3799 = vrot.lane.b32.xlu1 %v3794_v21, %s5184_s12 }
 0x3a7   : > { %8991 = vst [vmem:[#allocation73_spill] sm:$0xff] %v8090_v52  ;;  %8995 = vst [vmem:[#allocation76_spill] sm:$0xff] %v8104_v27  ;;  %v3806_v52 = vstv %s7995_s0  ;;  %v8116_v33 = vmul.f32 %v5051_v24, %v3090_v61  ;;  %v8121_v38 = vmul.f32 %v5050_v4, %v3096_v47  ;;  %v8123_v27 = vmul.f32 %v5051_v24, %v3096_v47  ;;  %s8374_s0 = sld [smem:[#allocation7 + $0x12]] }
 0x3a8   : > { %8993 = vst [vmem:[#allocation74_spill] sm:$0xff] %v8094_v11  ;;  %v8112_v11 = vmul.f32 %v5051_v24, %v3084_v53  ;;  %8996 = vst [vmem:[#allocation77_spill] sm:$0xff] %v8114_v56  ;;  %v3228_v51 = vstv %s8027_s17  ;;  %3797 = vrot.lane.b32.xlu0 %v3793_v12, %s5184_s12  ;;  %v8129_v53 = vmul.f32 %v7657_v25, %v3216_v16  ;;  %v8137_v21 = vpop.permute.xlu1 %3303  ;;  %s8417_s17 = sld [smem:[#allocation7 + $0x65]] }
 0x3a9   : > { %8997 = vst [vmem:[#allocation78_spill] sm:$0xff] %v8116_v33  ;;  %v8132_v56 = vmul.f32 %v7660_v14, %v3216_v16  ;;  %v8135_v61 = vmul.f32 %v7657_v25, %v3222_v22  ;;  %9000 = vst [vmem:[#allocation81_spill] sm:$0xff] %v8137_v21  ;;  %v3808_v4 = vmul.f32 %v3806_v52, %v8040_v13  ;;  %v8145_v12 = vpop.permute.xlu0 %3301  ;;  %v3820_v16 = vstv %s8054_s9  ;;  %s8437_s9 = sld [smem:[#allocation7 + $0x1f]] }
 0x3aa   : > { %v2700_v24 = vadd.f32 %v7591_v36, %v7984_v29  ;;  %v8143_v47 = vmul.f32 %v7660_v14, %v3222_v22  ;;  %v3807_v33 = vmul.f32 %v3806_v52, %v8056_v58  ;;  %v8152_v21 = vmul.f32 %v7657_v25, %v3228_v51 }
 0x3ab   : > { %8998 = vst [vmem:[#allocation79_spill] sm:$0xff] %v8132_v56  ;;  %8999 = vst [vmem:[#allocation80_spill] sm:$0xff] %v8135_v61  ;;  %v2699_v61 = vadd.f32 %v7593_v35, %v7986_v40  ;;  %v8155_v56 = vmul.f32 %v7660_v14, %v3228_v51  ;;  %v8158_v36 = vmul.f32 %v7657_v25, %v3234_v41  ;;  %3813 = vrot.lane.b32.xlu1 %v3808_v4, %s5184_s12 }
 0x3ac   : > { %v2742_v29 = vadd.f32 %v7653_v63, %v8011_v39  ;;  %v2756_v52 = vadd.f32 %v7666_v23, %v2700_v24  ;;  %v8167_v35 = vmul.f32 %v7660_v14, %v3234_v41  ;;  %3811 = vrot.lane.b32.xlu0 %v3807_v33, %s5184_s12  ;;  %v3834_v40 = vstv %s8086_s28  ;;  %v8174_v51 = vpop.permute.xlu1 %3317  ;;  %s8445_s28 = sld [smem:[#allocation7 + $0x7e]] }
 0x3ad   : > { %9001 = vst [vmem:[#allocation82_spill] sm:$0xff] %v8155_v56  ;;  %v2741_v25 = vadd.f32 %v7655_v44, %v8013_v34  ;;  %v2755_v22 = vadd.f32 %v7668_v42, %v2699_v61  ;;  %v3822_v4 = vmul.f32 %v3820_v16, %v8040_v13  ;;  %v3848_v56 = vstv %s8100_s15  ;;  %v8181_v23 = vpop.permute.xlu0 %3315  ;;  %s8455_s15 = sld [smem:[#allocation7 + $0x89]] }
 0x3ae   : > { %v2714_v63 = vadd.f32 %v7622_v55, %v7988_v1  ;;  %v2798_v14 = vadd.f32 %v7690_v26, %v2742_v29  ;;  %v3821_v33 = vmul.f32 %v3820_v16, %v8056_v58  ;;  %v3354_v39 = vstv %s8108_s21  ;;  %s8466_s21 = sld [smem:[#allocation7 + $0x43]] }
 0x3af   : > { %v2713_v44 = vadd.f32 %v7624_v15, %v7997_v19  ;;  %v2797_v42 = vadd.f32 %v7692_v43, %v2741_v25  ;;  %3827 = vrot.lane.b32.xlu1 %v3822_v4, %s5184_s12  ;;  %v3836_v34 = vmul.f32 %v3834_v40, %v8040_v13  ;;  %v3862_v41 = vstv %s8119_s18  ;;  %s8478_s18 = sld [smem:[#allocation7 + $0x20]] }
 0x3b0   : > { %v2770_v55 = vadd.f32 %v7674_v3, %v2714_v63  ;;  %v2806_v26 = vadd.f32 %v8015_v31, %v2756_v52  ;;  %3825 = vrot.lane.b32.xlu0 %v3821_v33, %s5184_s12  ;;  %v3835_v1 = vmul.f32 %v3834_v40, %v8056_v58  ;;  %v3850_v61 = vmul.f32 %v3848_v56, %v8040_v13  ;;  %v8200_v19 = vpop.permute.xlu1 %3331  ;;  %v9004_v33 = vld [vmem:[#allocation64_spill] sm:$0xff] }
 0x3b1   : > { %v2769_v15 = vadd.f32 %v7676_v50, %v2713_v44  ;;  %v2805_v43 = vadd.f32 %v8018_v18, %v2755_v22  ;;  %v3849_v24 = vmul.f32 %v3848_v56, %v8056_v58  ;;  %v8204_v16 = vmul.f32 %v3354_v39, %v7719_v49  ;;  %v8210_v52 = vpop.permute.xlu0 %3329 }
 0x3b2   : > { %v2728_v3 = vadd.f32 %v7644_v45, %v7999_v37  ;;  %v2838_v31 = vadd.f32 %v7698_v0, %v2806_v26  ;;  %v2824_v29 = vadd.f32 %v8033_v7, %v2798_v14  ;;  %v8213_v50 = vmul.f32 %v3354_v39, %v7722_v62 }
 0x3b3   : > { %v2727_v18 = vadd.f32 %v7646_v5, %v8009_v6  ;;  %v2837_v56 = vadd.f32 %v7700_v9, %v2805_v43  ;;  %v2823_v40 = vadd.f32 %v8035_v59, %v2797_v42  ;;  %3841 = vrot.lane.b32.xlu1 %v3836_v34, %s5184_s12  ;;  %v3360_v45 = vstv %s8161_s13  ;;  %v9006_v42 = vld [vmem:[#allocation21_spill] sm:$0xff]  ;;  %v9009_v43 = vld [vmem:[#allocation28_spill] sm:$0xff]  ;;  %s4916_s13 = sld [smem:[#allocation7 + $0x67]] }
 0x3b4   : > { %v2784_v0 = vadd.f32 %v7682_v8, %v2728_v3  ;;  %v2812_v37 = vadd.f32 %v8020_v54, %v2770_v55  ;;  %v2880_v7 = vadd.f32 %v7726_v10, %v2824_v29  ;;  %v2894_v25 = vadd.f32 %v7734_v60, %v2838_v31  ;;  %3839 = vrot.lane.b32.xlu0 %v3835_v1, %s5184_s12  ;;  %v8234_v22 = vpop.permute.xlu1 %3345  ;;  %v9010_v3 = vld [vmem:[#allocation71_spill] sm:$0xff] }
 0x3b5   : > { %v2783_v5 = vadd.f32 %v7684_v32, %v2727_v18  ;;  %v2811_v9 = vadd.f32 %v8022_v2, %v2769_v15  ;;  %v2879_v6 = vadd.f32 %v7728_v48, %v2823_v40  ;;  %v2893_v59 = vadd.f32 %v7736_v57, %v2837_v56  ;;  %v8238_v4 = vpop.permute.xlu0 %3343  ;;  %v9002_v2 = vld [vmem:[#allocation61_spill] sm:$0xff]  ;;  %v9011_v56 = vld [vmem:[#allocation23_spill] sm:$0xff] }
 0x3b6   : > { %v2852_v8 = vadd.f32 %v7706_v46, %v2812_v37  ;;  %v2936_v54 = vadd.f32 %v7758_v20, %v2880_v7  ;;  %v3864_v10 = vmul.f32 %v3862_v41, %v8040_v13  ;;  %v3876_v60 = vstv %s8185_s20  ;;  %v9003_v20 = vld [vmem:[#allocation22_spill] sm:$0xff]  ;;  %v9013_v37 = vld [vmem:[#allocation72_spill] sm:$0xff]  ;;  %s8492_s20 = sld [smem:[#allocation7 + $0x44]] }
 0x3b7   : > { %v2851_v63 = vadd.f32 %v7708_v28, %v2811_v9  ;;  %v2935_v32 = vadd.f32 %v7760_v17, %v2879_v6  ;;  %3855 = vrot.lane.b32.xlu1 %v3850_v61, %s8822_s19  ;;  %v3863_v48 = vmul.f32 %v3862_v41, %v8056_v58  ;;  %v8247_v57 = vmul.f32 %v3360_v45, %v7719_v49  ;;  %v9005_v17 = vld [vmem:[#allocation62_spill] sm:$0xff]  ;;  %v9007_v41 = vld [vmem:[#allocation65_spill] sm:$0xff]  ;;  %v9015_v6 = vld [vmem:[#allocation67_spill] sm:$0xff] }
 0x3b8   : > { %v2818_v46 = vadd.f32 %v9002_v2, %v2784_v0  ;;  %v2908_v14 = vadd.f32 %v9003_v20, %v2852_v8  ;;  %v2944_v39 = vadd.f32 %v9004_v33, %v2894_v25  ;;  %3853 = vrot.lane.b32.xlu0 %v3849_v24, %s8822_s19  ;;  %v8254_v28 = vmul.f32 %v3360_v45, %v7722_v62  ;;  %v8261_v26 = vpop.permute.xlu1 %3385  ;;  %v9008_v61 = vld [vmem:[#allocation17_spill] sm:$0xff]  ;;  %v9012_v45 = vld [vmem:[#allocation27_spill] sm:$0xff]  ;;  %v9016_v8 = vld [vmem:[#allocation30_spill] sm:$0xff] }
 0x3b9   : > { %v2817_v44 = vadd.f32 %v9005_v17, %v2783_v5  ;;  %v2907_v34 = vadd.f32 %v9006_v42, %v2851_v63  ;;  %v2943_v55 = vadd.f32 %v9007_v41, %v2893_v59  ;;  %v3878_v1 = vmul.f32 %v3876_v60, %v8040_v13  ;;  %v8267_v29 = vpop.permute.xlu0 %3383  ;;  %v9014_v5 = vld [vmem:[#allocation32_spill] sm:$0xff]  ;;  %v9017_v63 = vld [vmem:[#allocation19_spill] sm:$0xff] }
 0x3ba   : > { %v2866_v15 = vadd.f32 %v9008_v61, %v2818_v46  ;;  %v2976_v24 = vadd.f32 %v9009_v43, %v2944_v39  ;;  %v2962_v31 = vadd.f32 %v9010_v3, %v2936_v54  ;;  %v3366_v18 = vstv %s8215_s22  ;;  %v9018_v46 = vld [vmem:[#allocation33_spill] sm:$0xff]  ;;  %v9019_v33 = vld [vmem:[#allocation68_spill] sm:$0xff]  ;;  %v9020_v17 = vld [vmem:[#allocation31_spill] sm:$0xff]  ;;  %s8495_s22 = sld [smem:[#allocation7 + $0x15]] }
 0x3bb   : > { %v2865_v40 = vadd.f32 %v9011_v56, %v2817_v44  ;;  %v2975_v0 = vadd.f32 %v9012_v45, %v2943_v55  ;;  %v2961_v7 = vadd.f32 %v9013_v37, %v2935_v32  ;;  %3869 = vrot.lane.b32.xlu1 %v3864_v10, %s8822_s19  ;;  %v3890_v25 = vstv %s8223_s23  ;;  %v9021_v32 = vld [vmem:[#allocation34_spill] sm:$0xff]  ;;  %v9022_v41 = vld [vmem:[#allocation24_spill] sm:$0xff]  ;;  %v9023_v61 = vld [vmem:[#allocation39_spill] sm:$0xff]  ;;  %s8500_s23 = sld [smem:[#allocation7 + $0x8b]] }
 0x3bc   : > { %v2922_v9 = vadd.f32 %v9014_v5, %v2866_v15  ;;  %v2950_v59 = vadd.f32 %v9015_v6, %v2908_v14  ;;  %v3018_v54 = vadd.f32 %v9016_v8, %v2962_v31  ;;  %v3032_v2 = vadd.f32 %v9017_v63, %v2976_v24  ;;  %3867 = vrot.lane.b32.xlu0 %v3863_v48, %s8822_s19  ;;  %v8286_v10 = vpop.permute.xlu1 %3399  ;;  %v9025_v3 = vld [vmem:[#allocation40_spill] sm:$0xff]  ;;  %v9026_v45 = vld [vmem:[#allocation69_spill] sm:$0xff] }
 0x3bd   : > { %v2921_v20 = vadd.f32 %v9018_v46, %v2865_v40  ;;  %v2949_v39 = vadd.f32 %v9019_v33, %v2907_v34  ;;  %v3017_v44 = vadd.f32 %v9020_v17, %v2961_v7  ;;  %v3031_v42 = vadd.f32 %v9021_v32, %v2975_v0  ;;  %v8290_v15 = vpop.permute.xlu0 %3397  ;;  %v9024_v34 = vld [vmem:[#allocation26_spill] sm:$0xff]  ;;  %v9027_v0 = vld [vmem:[#allocation35_spill] sm:$0xff]  ;;  %v9028_v7 = vld [vmem:[#allocation73_spill] sm:$0xff] }
 0x3be   : > { %v2990_v55 = vadd.f32 %v9022_v41, %v2950_v59  ;;  %v3074_v14 = vadd.f32 %v9023_v61, %v3018_v54  ;;  %v3877_v43 = vmul.f32 %v3876_v60, %v8056_v58  ;;  %v8294_v48 = vmul.f32 %v3366_v18, %v7719_v49  ;;  %v9031_v54 = vld [vmem:[#allocation74_spill] sm:$0xff]  ;;  %v9033_v17 = vld [vmem:[#allocation41_spill] sm:$0xff] }
 0x3bf   : > { %v2989_v24 = vadd.f32 %v9024_v34, %v2949_v39  ;;  %v3073_v31 = vadd.f32 %v9025_v3, %v3017_v44  ;;  %3883 = vrot.lane.b32.xlu1 %v3878_v1, %s8822_s19  ;;  %v8302_v56 = vmul.f32 %v3366_v18, %v7722_v62  ;;  %v3892_v40 = vmul.f32 %v3890_v25, %v8040_v13  ;;  %v9029_v1 = vld [vmem:[#allocation70_spill] sm:$0xff]  ;;  %v9030_v18 = vld [vmem:[#allocation36_spill] sm:$0xff] }
 0x3c0   : > { %v2956_v60 = vadd.f32 %v9026_v45, %v2922_v9  ;;  %v3046_v37 = vadd.f32 %v9027_v0, %v2990_v55  ;;  %v3082_v5 = vadd.f32 %v9028_v7, %v3032_v2  ;;  %3881 = vrot.lane.b32.xlu0 %v3877_v43, %s8822_s19  ;;  %v3930_v6 = vstv %s8256_s25  ;;  %v8317_v46 = vpop.permute.xlu1 %3413  ;;  %v9032_v9 = vld [vmem:[#allocation29_spill] sm:$0xff]  ;;  %v9034_v55 = vld [vmem:[#allocation20_spill] sm:$0xff]  ;;  %v9039_v7 = vld [vmem:[#allocation38_spill] sm:$0xff]  ;;  %s8503_s25 = sld [smem:[#allocation7 + $0x39]] }
 0x3c1   : > { %v2955_v59 = vadd.f32 %v9029_v1, %v2921_v20  ;;  %v3045_v8 = vadd.f32 %v9030_v18, %v2989_v24  ;;  %v3081_v63 = vadd.f32 %v9031_v54, %v3031_v42  ;;  %v3891_v33 = vmul.f32 %v3890_v25, %v8056_v58  ;;  %v8323_v32 = vpop.permute.xlu0 %3411  ;;  %v9035_v20 = vld [vmem:[#allocation42_spill] sm:$0xff]  ;;  %v8330_v42 = vld [vmem:[#allocation2 + $0x51] sm:$0xff]  ;;  %v9036_v24 = vld [vmem:[#allocation37_spill] sm:$0xff] }
 0x3c2   : > { %v3004_v39 = vadd.f32 %v9032_v9, %v2956_v60  ;;  %v3114_v44 = vadd.f32 %v9033_v17, %v3082_v5  ;;  %v3100_v2 = vadd.f32 %v8121_v38, %v3074_v14  ;;  %v3372_v41 = vstv %s8270_s27  ;;  %v9037_v14 = vld [vmem:[#allocation47_spill] sm:$0xff]  ;;  %v9038_v60 = vld [vmem:[#allocation49_spill] sm:$0xff]  ;;  %v9041_v1 = vld [vmem:[#allocation50_spill] sm:$0xff]  ;;  %s8509_s27 = sld [smem:[#allocation7 + $0x68]] }
 0x3c3   : > { %v3003_v61 = vadd.f32 %v9034_v55, %v2955_v59  ;;  %v3113_v43 = vadd.f32 %v9035_v20, %v3081_v63  ;;  %v3099_v34 = vadd.f32 %v8123_v27, %v3073_v31  ;;  %3897 = vrot.lane.b32.xlu1 %v3892_v40, %s8822_s19  ;;  %v3932_v25 = vmul.f32 %v8330_v42, %v3930_v6  ;;  %v9040_v40 = vld [vmem:[#allocation48_spill] sm:$0xff]  ;;  %v9042_v54 = vld [vmem:[#allocation43_spill] sm:$0xff]  ;;  %v9046_v20 = vld [vmem:[#allocation77_spill] sm:$0xff] }
 0x3c4   : > { %v3060_v3 = vadd.f32 %v9036_v24, %v3004_v39  ;;  %v3088_v38 = vadd.f32 %v8110_v30, %v3046_v37  ;;  %v3156_v45 = vadd.f32 %v9037_v14, %v3100_v2  ;;  %v3170_v0 = vadd.f32 %v9038_v60, %v3114_v44  ;;  %3895 = vrot.lane.b32.xlu0 %v3891_v33, %s8822_s19  ;;  %v8342_v18 = vpop.permute.xlu1 %3427  ;;  %v9043_v37 = vld [vmem:[#allocation55_spill] sm:$0xff]  ;;  %v9045_v44 = vld [vmem:[#allocation56_spill] sm:$0xff]  ;;  %v9048_v14 = vld [vmem:[#allocation78_spill] sm:$0xff] }
 0x3c5   : > { %v3059_v27 = vadd.f32 %v9039_v7, %v3003_v61  ;;  %v3087_v31 = vadd.f32 %v8112_v11, %v3045_v8  ;;  %v3155_v5 = vadd.f32 %v9040_v40, %v3099_v34  ;;  %v3169_v59 = vadd.f32 %v9041_v1, %v3113_v43  ;;  %v8346_v9 = vpop.permute.xlu0 %3425  ;;  %v8348_v39 = vld [vmem:[#allocation2 + $0x49] sm:$0xff]  ;;  %v9044_v11 = vld [vmem:[#allocation44_spill] sm:$0xff] }
 0x3c6   : > { %v3128_v30 = vadd.f32 %v9042_v54, %v3088_v38  ;;  %v3212_v63 = vadd.f32 %v9043_v37, %v3156_v45  ;;  %v3931_v33 = vmul.f32 %v8348_v39, %v3930_v6  ;;  %v3944_v17 = vstv %s8296_s30  ;;  %v9047_v34 = vld [vmem:[#allocation51_spill] sm:$0xff]  ;;  %v9049_v60 = vld [vmem:[#allocation52_spill] sm:$0xff]  ;;  %v9052_v54 = vld [vmem:[#allocation57_spill] sm:$0xff]  ;;  %s8513_s30 = sld [smem:[#allocation7 + $0x5d]] }
 0x3c7   : > { %v3127_v8 = vadd.f32 %v9044_v11, %v3087_v31  ;;  %v3211_v2 = vadd.f32 %v9045_v44, %v3155_v5  ;;  %v3374_v55 = vmul.f32 %v3372_v41, %v7719_v49  ;;  %3937 = vrot.lane.b32.xlu1 %v3932_v25, %s5184_s12  ;;  %v3958_v61 = vstv %s8305_s8  ;;  %v9050_v31 = vld [vmem:[#allocation79_spill] sm:$0xff]  ;;  %v9051_v25 = vld [vmem:[#allocation45_spill] sm:$0xff]  ;;  %s8519_s8 = sld [smem:[#allocation7 + $0x22]] }
 0x3c8   : > { %v3094_v43 = vadd.f32 %v9046_v20, %v3060_v3  ;;  %v3184_v24 = vadd.f32 %v9047_v34, %v3128_v30  ;;  %v3220_v38 = vadd.f32 %v8129_v53, %v3170_v0  ;;  %3935 = vrot.lane.b32.xlu0 %v3931_v33, %s5184_s12  ;;  %v3986_v6 = vstv %s8312_s26  ;;  %v3442_v5 = vpop.permute.xlu1 %3441  ;;  %v9053_v0 = vld [vmem:[#allocation46_spill] sm:$0xff]  ;;  %v9055_v44 = vld [vmem:[#allocation53_spill] sm:$0xff]  ;;  %s8523_s26 = sld [smem:[#allocation7 + $0x81]] }
 0x3c9   : > { %v3093_v45 = vadd.f32 %v9048_v14, %v3059_v27  ;;  %v3183_v7 = vadd.f32 %v9049_v60, %v3127_v8  ;;  %v3219_v40 = vadd.f32 %v9050_v31, %v3169_v59  ;;  %v3946_v49 = vmul.f32 %v8330_v42, %v3944_v17  ;;  %v3440_v37 = vpop.permute.xlu0 %3439  ;;  %v9054_v33 = vld [vmem:[#allocation58_spill] sm:$0xff]  ;;  %v9058_v34 = vld [vmem:[#allocation81_spill] sm:$0xff] }
 0x3ca   : > { %v3142_v1 = vadd.f32 %v9051_v25, %v3094_v43  ;;  %v3252_v3 = vadd.f32 %v9052_v54, %v3220_v38  ;;  %v3238_v30 = vadd.f32 %v8158_v36, %v3212_v63  ;;  %v3945_v53 = vmul.f32 %v8348_v39, %v3944_v17  ;;  %v9056_v63 = vld [vmem:[#allocation80_spill] sm:$0xff]  ;;  %v9057_v17 = vld [vmem:[#allocation75_spill] sm:$0xff]  ;;  %v9059_v14 = vld [vmem:[#allocation54_spill] sm:$0xff] }
 0x3cb   : > { %v3141_v27 = vadd.f32 %v9053_v0, %v3093_v45  ;;  %v3251_v11 = vadd.f32 %v9054_v33, %v3219_v40  ;;  %v3237_v59 = vadd.f32 %v8167_v35, %v3211_v2  ;;  %3951 = vrot.lane.b32.xlu1 %v3946_v49, %s5184_s12  ;;  %v3960_v8 = vmul.f32 %v8330_v42, %v3958_v61  ;;  %v9060_v45 = vld [vmem:[#allocation76_spill] sm:$0xff]  ;;  %v9061_v49 = vld [vmem:[#allocation59_spill] sm:$0xff] }
 0x3cc   : > { %v3198_v36 = vadd.f32 %v9055_v44, %v3142_v1  ;;  %v3226_v20 = vadd.f32 %v9056_v63, %v3184_v24  ;;  %v3294_v43 = vadd.f32 %v9057_v17, %v3238_v30  ;;  %v3308_v38 = vadd.f32 %v9058_v34, %v3252_v3  ;;  %3949 = vrot.lane.b32.xlu0 %v3945_v53, %s5184_s12  ;;  %v3456_v40 = vpop.permute.xlu1 %3455  ;;  %v9062_v3 = vld [vmem:[#allocation60_spill] sm:$0xff] }
 0x3cd   : > { %v3197_v35 = vadd.f32 %v9059_v14, %v3141_v27  ;;  %v3225_v2 = vadd.f32 %v8143_v47, %v3183_v7  ;;  %v3293_v60 = vadd.f32 %v9060_v45, %v3237_v59  ;;  %v3307_v31 = vadd.f32 %v8145_v12, %v3251_v11  ;;  %v3454_v1 = vpop.permute.xlu0 %3453  ;;  %v9063_v27 = vld [vmem:[#allocation82_spill] sm:$0xff] }
 0x3ce   : > { %v3266_v25 = vadd.f32 %v9061_v49, %v3226_v20  ;;  %v3350_v24 = vadd.f32 %v8234_v22, %v3294_v43  ;;  %v3959_v54 = vmul.f32 %v8348_v39, %v3958_v61  ;;  %v4000_v30 = vstv %s8352_s10  ;;  %s8529_s10 = sld [smem:[#allocation7 + $0x8c]] }
 0x3cf   : > { %v3265_v0 = vadd.f32 %v9062_v3, %v3225_v2  ;;  %v3349_v53 = vadd.f32 %v8238_v4, %v3293_v60  ;;  %v3373_v47 = vmul.f32 %v3372_v41, %v7722_v62  ;;  %3965 = vrot.lane.b32.xlu1 %v3960_v8, %s5184_s12  ;;  %v3988_v12 = vmul.f32 %v8330_v42, %v3986_v6  ;;  %v9064_v8 = vld [vmem:[#allocation63_spill] sm:$0xff] }
 0x3d0   : > { %v3232_v22 = vadd.f32 %v8152_v21, %v3198_v36  ;;  %v3322_v7 = vadd.f32 %v8174_v51, %v3266_v25  ;;  %v3358_v61 = vadd.f32 %v8204_v16, %v3308_v38  ;;  %3963 = vrot.lane.b32.xlu0 %v3959_v54, %s5184_s12  ;;  %v3987_v4 = vmul.f32 %v8348_v39, %v3986_v6  ;;  %v3470_v11 = vpop.permute.xlu1 %3469  ;;  %v9065_v6 = vld [vmem:[#allocation66_spill] sm:$0xff] }
 0x3d1   : > { %v3231_v62 = vadd.f32 %v9063_v27, %v3197_v35  ;;  %v3321_v41 = vadd.f32 %v8181_v23, %v3265_v0  ;;  %v3357_v33 = vadd.f32 %v8213_v50, %v3307_v31  ;;  %v4002_v59 = vmul.f32 %v8330_v42, %v4000_v30  ;;  %v3468_v16 = vpop.permute.xlu0 %3467 }
 0x3d2   : > { %v3280_v21 = vadd.f32 %v9064_v8, %v3232_v22  ;;  %v3390_v51 = vadd.f32 %v8261_v26, %v3358_v61  ;;  %v3376_v44 = vadd.f32 %v3374_v55, %v3350_v24  ;;  %v3492_v36 = vstv %s8374_s0  ;;  %s8539_s0 = sld [smem:[#allocation7 + $0x46]] }
 0x3d3   : > { %v3279_v63 = vadd.f32 %v9065_v6, %v3231_v62  ;;  %v3389_v20 = vadd.f32 %v8267_v29, %v3357_v33  ;;  %v3375_v17 = vadd.f32 %v3373_v47, %v3349_v53  ;;  %3993 = vrot.lane.b32.xlu1 %v3988_v12, %s8822_s19  ;;  %v3972_v23 = vstv %s8381_s11  ;;  %s8545_s11 = sld [smem:[#allocation7 + $0x18]] }
 0x3d4   : > { %v3336_v50 = vadd.f32 %v8200_v19, %v3280_v21  ;;  %v3364_v43 = vadd.f32 %v8247_v57, %v3322_v7  ;;  %v3432_v26 = vadd.f32 %v8342_v18, %v3376_v44  ;;  %v3446_v55 = vadd.f32 %v3442_v5, %v3390_v51  ;;  %3991 = vrot.lane.b32.xlu0 %v3987_v4, %s8822_s19  ;;  %v3484_v35 = vpop.permute.xlu1 %3483  ;;  %v9066_v18 = vld [vmem:[#allocation25_spill] sm:$0xff] }
 0x3d5   : > { %v3335_v34 = vadd.f32 %v8210_v52, %v3279_v63  ;;  %v3363_v29 = vadd.f32 %v8254_v28, %v3321_v41  ;;  %v3431_v38 = vadd.f32 %v8346_v9, %v3375_v17  ;;  %v3445_v14 = vadd.f32 %v3440_v37, %v3389_v20  ;;  %v3482_v19 = vpop.permute.xlu0 %3481  ;;  %v9067_v28 = vld [vmem:[#allocation18_spill] sm:$0xff]  ;;  %v8471_v63 = vld [vmem:[#allocation2 + $0xb1] sm:$0xff] }
 0x3d6   : > { %v3404_v2 = vadd.f32 %v8286_v10, %v3364_v43  ;;  %v8433_v45 = vadd.f32 %v3484_v35, %v3432_v26  ;;  %v4001_v57 = vmul.f32 %v8348_v39, %v4000_v30  ;;  %v3494_v5 = vmul.f32 %v9066_v18, %v3492_v36  ;;  %v5057_v26 = vld [vmem:[#allocation2 + $0x39] sm:$0xff] }
 0x3d7   : > { %v3403_v60 = vadd.f32 %v8290_v15, %v3363_v29  ;;  %v8440_v52 = vadd.f32 %v3482_v19, %v3431_v38  ;;  %4007 = vrot.lane.b32.xlu1 %v4002_v59, %s8822_s19  ;;  %v3493_v9 = vmul.f32 %v9067_v28, %v3492_v36  ;;  %v3498_v37 = vstv %s8403_s16  ;;  %s8551_s16 = sld [smem:[#allocation7 + $0x23]] }
 0x3d8   : > { %v3370_v10 = vadd.f32 %v8294_v48, %v3336_v50  ;;  %v3460_v31 = vadd.f32 %v3456_v40, %v3404_v2  ;;  %4005 = vrot.lane.b32.xlu0 %v4001_v57, %s8822_s19  ;;  %v3496_v49 = vadd.f32 %v3494_v5, %v3446_v55  ;;  %v3974_v25 = vmul.f32 %v8330_v42, %v3972_v23  ;;  %v3524_v54 = vpop.permute.xlu1 %3523  ;;  %v8474_v50 = vld [vmem:[#allocation2 + $0xa9] sm:$0xff] }
 0x3d9   : > { %v3369_v15 = vadd.f32 %v8302_v56, %v3335_v34  ;;  %v3459_v24 = vadd.f32 %v3454_v1, %v3403_v60  ;;  %v3495_v30 = vadd.f32 %v3493_v9, %v3445_v14  ;;  %v3973_v3 = vmul.f32 %v8348_v39, %v3972_v23  ;;  %v3522_v47 = vpop.permute.xlu0 %3521 }
 0x3da   : > { %v3418_v0 = vadd.f32 %v8317_v46, %v3370_v10  ;;  %v3528_v53 = vadd.f32 %v3524_v54, %v3496_v49  ;;  %v3500_v48 = vmul.f32 %v9066_v18, %v3498_v37  ;;  %v4014_v40 = vstv %s8417_s17  ;;  %s8554_s17 = sld [smem:[#allocation7 + $0x3c]] }
 0x3db   : > { %v3417_v12 = vadd.f32 %v8323_v32, %v3369_v15  ;;  %v3527_v22 = vadd.f32 %v3522_v47, %v3495_v30  ;;  %3979 = vrot.lane.b32.xlu1 %v3974_v25, %s5184_s12  ;;  %v3499_v56 = vmul.f32 %v9067_v28, %v3498_v37  ;;  %v3504_v1 = vstv %s8423_s29  ;;  %s8560_s29 = sld [smem:[#allocation7 + $0x6a]] }
 0x3dc   : > { %v3474_v7 = vadd.f32 %v3470_v11, %v3418_v0  ;;  %3977 = vrot.lane.b32.xlu0 %v3973_v3, %s5184_s12  ;;  %v3502_v46 = vadd.f32 %v3500_v48, %v3460_v31  ;;  %v3538_v4 = vpop.permute.xlu1 %3537  ;;  %v4016_v62 = vmul.f32 %v8330_v42, %v4014_v40  ;;  %v4015_v32 = vmul.f32 %v8348_v39, %v4014_v40  ;;  %v5054_v11 = vld [vmem:[#allocation2 + $0x31] sm:$0xff] }
 0x3dd   : > { %v3473_v61 = vadd.f32 %v3468_v16, %v3417_v12  ;;  %v3501_v27 = vadd.f32 %v3499_v56, %v3459_v24  ;;  %v3536_v33 = vpop.permute.xlu0 %3535  ;;  %v3506_v59 = vmul.f32 %v9066_v18, %v3504_v1  ;;  %v4068_v8 = vstv %s8437_s9  ;;  %s8564_s9 = sld [smem:[#allocation7 + $0x60]] }
 0x3de   : > { %v3542_v41 = vadd.f32 %v3538_v4, %v3502_v46  ;;  %v3505_v51 = vmul.f32 %v5054_v11, %v3504_v1  ;;  %v3510_v44 = vstv %s8445_s28  ;;  %v4070_v20 = vmul.f32 %v8471_v63, %v4068_v8  ;;  %s8570_s28 = sld [smem:[#allocation7 + $0x47]] }
 0x3df   : > { %v3541_v21 = vadd.f32 %v3536_v33, %v3501_v27  ;;  %4021 = vrot.lane.b32.xlu1 %v4016_v62, %s8822_s19  ;;  %v3508_v16 = vadd.f32 %v3506_v59, %v3474_v7  ;;  %v4069_v43 = vmul.f32 %v8474_v50, %v4068_v8  ;;  %v3512_v55 = vmul.f32 %v5057_v26, %v3510_v44  ;;  %v5058_v62 = vld [vmem:[#allocation2 + $0x99] sm:$0xff]  ;;  %v5059_v59 = vld [vmem:[#allocation2 + $0x91] sm:$0xff] }
 0x3e0   : > { %4019 = vrot.lane.b32.xlu0 %v4015_v32, %s8822_s19  ;;  %v3552_v36 = vpop.permute.xlu1 %3551  ;;  %v3507_v6 = vadd.f32 %v3505_v51, %v3473_v61  ;;  %v4028_v34 = vstv %s8455_s15  ;;  %v3511_v38 = vmul.f32 %v5054_v11, %v3510_v44  ;;  %v4082_v60 = vstv %s8466_s21  ;;  %s8576_s15 = sld [smem:[#allocation7 + $0x84]]  ;;  %s8582_s21 = sld [smem:[#allocation7 + $0x8e]] }
 0x3e1   : > { %v3556_v17 = vadd.f32 %v3552_v36, %v3508_v16  ;;  %v3550_v23 = vpop.permute.xlu0 %3549  ;;  %v3514_v14 = vadd.f32 %v3512_v55, %v8433_v45  ;;  %v4030_v19 = vmul.f32 %v8330_v42, %v4028_v34  ;;  %v4029_v5 = vmul.f32 %v8348_v39, %v4028_v34 }
 0x3e2   : > { %v3555_v29 = vadd.f32 %v3550_v23, %v3507_v6  ;;  %v3513_v2 = vadd.f32 %v3511_v38, %v8440_v52  ;;  %v4084_v45 = vmul.f32 %v8471_v63, %v4082_v60  ;;  %v4083_v52 = vmul.f32 %v8474_v50, %v4082_v60  ;;  %v8541_v60 = vld [vmem:[#allocation2 + $0x4a] sm:$0xff] }
 0x3e3   : > { %4075 = vrot.lane.b32.xlu1 %v4070_v20, %s5184_s12  ;;  %v4124_v31 = vstv %s8478_s18  ;;  %v4096_v3 = vstv %s4916_s13  ;;  %v3630_v1 = vstv %s8495_s22  ;;  %s8592_s18 = sld [smem:[#allocation7 + $0x6b]]  ;;  %s8602_s13 = sld [smem:[#allocation7 + $0x8f]] }
 0x3e4   : > { %4073 = vrot.lane.b32.xlu0 %v4069_v43, %s5184_s12  ;;  %v3566_v35 = vpop.permute.xlu1 %3565  ;;  %v4126_v15 = vmul.f32 %v8471_v63, %v4124_v31  ;;  %v4125_v30 = vmul.f32 %v8474_v50, %v4124_v31  ;;  %v4098_v47 = vmul.f32 %v8471_v63, %v4096_v3  ;;  %v4097_v12 = vmul.f32 %v8474_v50, %v4096_v3  ;;  %s4910_s22 = sld [smem:[#allocation7 + $0x1e]] }
 0x3e5   : > { %v3570_v57 = vadd.f32 %v3566_v35, %v3514_v14  ;;  %v3564_v18 = vpop.permute.xlu0 %3563  ;;  %v4110_v33 = vstv %s8500_s23  ;;  %v3631_v8 = vmul.f32 %v5059_v59, %v3630_v1  ;;  %v4152_v23 = vstv %s8509_s27  ;;  %v8535_v35 = vld [vmem:[#allocation2 + $0x52] sm:$0xff]  ;;  %s4922_s23 = sld [smem:[#allocation7 + $0x21]]  ;;  %s8640_s27 = sld [smem:[#allocation7 + $0x45]] }
 0x3e6   : > { %v3569_v28 = vadd.f32 %v3564_v18, %v3513_v2  ;;  %v4112_v16 = vmul.f32 %v8471_v63, %v4110_v33  ;;  %v4111_v20 = vmul.f32 %v8474_v50, %v4110_v33  ;;  %v3642_v55 = vstv %s8513_s30  ;;  %s8642_s30 = sld [smem:[#allocation7 + $0x87]] }
 0x3e7   : > { %4035 = vrot.lane.b32.xlu1 %v4030_v19, %s8822_s19  ;;  %v4154_v14 = vmul.f32 %v8471_v63, %v4152_v23  ;;  %v3644_v18 = vmul.f32 %v5058_v62, %v3642_v55 }
 0x3e8   : > { %4033 = vrot.lane.b32.xlu0 %v4029_v5, %s8822_s19  ;;  %v3580_v9 = vpop.permute.xlu1 %3579  ;;  %v4206_v5 = vstv %s8519_s8  ;;  %s8644_s8 = sld [smem:[#allocation7 + $0x66]] }
 0x3e9   : > { %v3584_v37 = vadd.f32 %v3580_v9, %v3528_v53  ;;  %v3578_v10 = vpop.permute.xlu0 %3577  ;;  %v3643_v9 = vmul.f32 %v5059_v59, %v3642_v55  ;;  %v4208_v31 = vmul.f32 %v4206_v5, %v8535_v35 }
 0x3ea   : > { %v3583_v49 = vadd.f32 %v3578_v10, %v3527_v22  ;;  %v4138_v22 = vstv %s8492_s20  ;;  %s4899_s20 = sld [smem:[#allocation7 + $0x3f]] }
 0x3eb   : > { %4089 = vrot.lane.b32.xlu1 %v4084_v45, %s5184_s12  ;;  %v4140_v46 = vmul.f32 %v8471_v63, %v4138_v22  ;;  %v4139_v27 = vmul.f32 %v8474_v50, %v4138_v22  ;;  %v3648_v45 = vstv %s8523_s26  ;;  %s8655_s26 = sld [smem:[#allocation7 + $0x69]] }
 0x3ec   : > { %4087 = vrot.lane.b32.xlu0 %v4083_v52, %s5184_s12  ;;  %v3594_v25 = vpop.permute.xlu1 %3593  ;;  %v3633_v44 = vadd.f32 %v3631_v8, %v3583_v49  ;;  %v3649_v3 = vmul.f32 %v5059_v59, %v3648_v45  ;;  %v3774_v8 = vstv %s8554_s17  ;;  %s8697_s17 = sld [smem:[#allocation10 + $0x8]] }
 0x3ed   : > { %v3598_v24 = vadd.f32 %v3594_v25, %v3542_v41  ;;  %v3592_v54 = vpop.permute.xlu0 %3591  ;;  %v3632_v41 = vmul.f32 %v5058_v62, %v3630_v1 }
 0x3ee   : > { %v3597_v0 = vadd.f32 %v3592_v54, %v3541_v21  ;;  %v3636_v21 = vstv %s8503_s25  ;;  %v4166_v54 = vstv %s8529_s10  ;;  %s4911_s25 = sld [smem:[#allocation7 + $0x42]] }
 0x3ef   : > { %4131 = vrot.lane.b32.xlu1 %v4126_v15, %s8822_s19  ;;  %v3634_v11 = vadd.f32 %v3632_v41, %v3584_v37  ;;  %v3637_v26 = vmul.f32 %v5059_v59, %v3636_v21  ;;  %v4207_v15 = vmul.f32 %v4206_v5, %v8541_v60  ;;  %v4167_v22 = vmul.f32 %v8474_v50, %v4166_v54  ;;  %s8659_s10 = sld [smem:[#allocation7 + $0x8a]] }
 0x3f0   : > { %4129 = vrot.lane.b32.xlu0 %v4125_v30, %s8822_s19  ;;  %v3608_v53 = vpop.permute.xlu1 %3607  ;;  %v4262_v41 = vstv %s8551_s16  ;;  %s8695_s16 = sld [smem:[#allocation10 + $0x4]] }
 0x3f1   : > { %v3612_v48 = vadd.f32 %v3608_v53, %v3556_v17  ;;  %v3606_v40 = vpop.permute.xlu0 %3605  ;;  %v3638_v17 = vmul.f32 %v5058_v62, %v3636_v21  ;;  %v3639_v38 = vadd.f32 %v3637_v26, %v3597_v0  ;;  %v3780_v26 = vstv %s8564_s9  ;;  %s8702_s9 = sld [smem:[#allocation11 + $0x1]] }
 0x3f2   : > { %v3611_v56 = vadd.f32 %v3606_v40, %v3555_v29 }
 0x3f3   : > { %4103 = vrot.lane.b32.xlu1 %v4098_v47, %s5184_s12  ;;  %v3640_v34 = vadd.f32 %v3638_v17, %v3598_v24  ;;  %v3646_v37 = vadd.f32 %v3644_v18, %v3612_v48  ;;  %v3650_v24 = vmul.f32 %v5058_v62, %v3648_v45  ;;  %v4168_v48 = vmul.f32 %v8471_v63, %v4166_v54 }
 0x3f4   : > { %4101 = vrot.lane.b32.xlu0 %v4097_v12, %s5184_s12  ;;  %v3622_v7 = vpop.permute.xlu1 %3621  ;;  %v3645_v52 = vadd.f32 %v3643_v9, %v3611_v56  ;;  %v4220_v56 = vstv %s8539_s0  ;;  %v3776_v17 = vmul.f32 %v3774_v8, %v8040_v13  ;;  %v3782_v18 = vmul.f32 %v3780_v26, %v8040_v13  ;;  %s4925_s0 = sld [smem:[#allocation7 + $0x8d]] }
 0x3f5   : > { %v3626_v61 = vadd.f32 %v3622_v7, %v3570_v57  ;;  %v3620_v4 = vpop.permute.xlu0 %3619  ;;  %v4153_v57 = vmul.f32 %v8474_v50, %v4152_v23  ;;  %v3768_v7 = vstv %s8545_s11  ;;  %v4221_v62 = vmul.f32 %v4220_v56, %v8541_v60  ;;  %s8691_s11 = sld [smem:[#allocation10]] }
 0x3f6   : > { %v3625_v32 = vadd.f32 %v3620_v4, %v3569_v28  ;;  %v3770_v33 = vmul.f32 %v3768_v7, %v8040_v13  ;;  %v3769_v59 = vmul.f32 %v3768_v7, %v8056_v58  ;;  %v3786_v9 = vstv %s8576_s15  ;;  %v5060_v13 = vld [vmem:[#allocation2 + $0x3a] sm:$0xff]  ;;  %s8707_s15 = sld [smem:[#allocation10 + $0x1]] }
 0x3f7   : > { %4145 = vrot.lane.b32.xlu1 %v4140_v46, %s8822_s19  ;;  %v3652_v0 = vadd.f32 %v3650_v24, %v3626_v61  ;;  %v4222_v61 = vmul.f32 %v4220_v56, %v8535_v35  ;;  %v3788_v24 = vmul.f32 %v5060_v13, %v3786_v9 }
 0x3f8   : > { %4143 = vrot.lane.b32.xlu0 %v4139_v27, %s8822_s19  ;;  %v3662_v51 = vpop.permute.xlu1 %3661  ;;  %v3651_v47 = vadd.f32 %v3649_v3, %v3625_v32 }
 0x3f9   : > { %v3666_v36 = vadd.f32 %v3662_v51, %v3634_v11  ;;  %v3660_v6 = vpop.permute.xlu0 %3659  ;;  %v4264_v51 = vmul.f32 %v4262_v41, %v8535_v35 }
 0x3fa   : > { %v3665_v43 = vadd.f32 %v3660_v6, %v3633_v44  ;;  %v4263_v6 = vmul.f32 %v4262_v41, %v8541_v60 }
 0x3fb   : > { %4117 = vrot.lane.b32.xlu1 %v4112_v16, %s5184_s12 }
 0x3fc   : > { %4115 = vrot.lane.b32.xlu0 %v4111_v20, %s5184_s12  ;;  %v3676_v29 = vpop.permute.xlu1 %3675  ;;  %v4234_v20 = vstv %s8560_s29  ;;  %s8700_s29 = sld [smem:[#allocation11]] }
 0x3fd   : > { %v3680_v2 = vadd.f32 %v3676_v29, %v3640_v34  ;;  %v3674_v19 = vpop.permute.xlu0 %3673  ;;  %v4236_v29 = vmul.f32 %v4234_v20, %v8535_v35 }
 0x3fe   : > { %v3679_v28 = vadd.f32 %v3674_v19, %v3639_v38  ;;  %v4235_v19 = vmul.f32 %v4234_v20, %v8541_v60 }
 0x3ff   : > { %4159 = vrot.lane.b32.xlu1 %v4154_v14, %s8822_s19 }
 0x400   : > { %4157 = vrot.lane.b32.xlu0 %v4153_v57, %s8822_s19  ;;  %v3690_v10 = vpop.permute.xlu1 %3689  ;;  %v4276_v57 = vstv %s8570_s28  ;;  %s8705_s28 = sld [smem:[#allocation11 + $0x2]] }
 0x401   : > { %v3694_v49 = vadd.f32 %v3690_v10, %v3646_v37  ;;  %v3688_v25 = vpop.permute.xlu0 %3687  ;;  %v4278_v10 = vmul.f32 %v4276_v57, %v8535_v35 }
 0x402   : > { %v3693_v30 = vadd.f32 %v3688_v25, %v3645_v52  ;;  %v4277_v25 = vmul.f32 %v4276_v57, %v8541_v60 }
 0x403   : > { %4213 = vrot.lane.b32.xlu1 %v4208_v31, %s5184_s12 }
 0x404   : > { %4211 = vrot.lane.b32.xlu0 %v4207_v15, %s5184_s12  ;;  %v3704_v53 = vpop.permute.xlu1 %3703  ;;  %v4248_v15 = vstv %s8582_s21  ;;  %s8709_s21 = sld [smem:[#allocation10 + $0x5]] }
 0x405   : > { %v3708_v40 = vadd.f32 %v3704_v53, %v3652_v0  ;;  %v3702_v12 = vpop.permute.xlu0 %3701  ;;  %v4250_v53 = vmul.f32 %v4248_v15, %v8535_v35 }
 0x406   : > { %v3707_v1 = vadd.f32 %v3702_v12, %v3651_v47  ;;  %v4249_v12 = vmul.f32 %v4248_v15, %v8541_v60 }
 0x407   : > { %4173 = vrot.lane.b32.xlu1 %v4168_v48, %s8822_s19 }
 0x408   : > { %4171 = vrot.lane.b32.xlu0 %v4167_v22, %s8822_s19  ;;  %v3718_v46 = vpop.permute.xlu1 %3717  ;;  %v4290_v22 = vstv %s8592_s18  ;;  %s8711_s18 = sld [smem:[#allocation10 + $0x9]] }
 0x409   : > { %v3722_v4 = vadd.f32 %v3718_v46, %v3666_v36  ;;  %v3716_v27 = vpop.permute.xlu0 %3715  ;;  %v4292_v7 = vmul.f32 %v4290_v22, %v8535_v35 }
 0x40a   : > { %v3721_v32 = vadd.f32 %v3716_v27, %v3665_v43  ;;  %v3775_v43 = vmul.f32 %v3774_v8, %v8056_v58  ;;  %v4304_v27 = vstv %s8602_s13  ;;  %s8722_s13 = sld [smem:[#allocation10 + $0x2]] }
 0x40b   : > { %4227 = vrot.lane.b32.xlu1 %v4222_v61, %s5184_s12  ;;  %v3772_v21 = vadd.f32 %v3770_v33, %v3722_v4  ;;  %v4291_v4 = vmul.f32 %v4290_v22, %v8541_v60  ;;  %v4306_v33 = vmul.f32 %v4304_v27, %v8535_v35  ;;  %v4305_v8 = vmul.f32 %v4304_v27, %v8541_v60 }
 0x40c   : > { %4225 = vrot.lane.b32.xlu0 %v4221_v62, %s5184_s12  ;;  %v3732_v11 = vpop.permute.xlu1 %3731  ;;  %v3771_v44 = vadd.f32 %v3769_v59, %v3721_v32 }
 0x40d   : > { %v3736_v16 = vadd.f32 %v3732_v11, %v3680_v2  ;;  %v3730_v36 = vpop.permute.xlu0 %3729 }
 0x40e   : > { %v3735_v23 = vadd.f32 %v3730_v36, %v3679_v28  ;;  %v3781_v28 = vmul.f32 %v3780_v26, %v8056_v58  ;;  %v5061_v58 = vld [vmem:[#allocation2 + $0x32] sm:$0xff] }
 0x40f   : > { %4269 = vrot.lane.b32.xlu1 %v4264_v51, %s8822_s19  ;;  %v3778_v55 = vadd.f32 %v3776_v17, %v3736_v16 }
 0x410   : > { %4267 = vrot.lane.b32.xlu0 %v4263_v6, %s8822_s19  ;;  %v3746_v34 = vpop.permute.xlu1 %3745  ;;  %v3777_v38 = vadd.f32 %v3775_v43, %v3735_v23 }
 0x411   : > { %v3750_v14 = vadd.f32 %v3746_v34, %v3694_v49  ;;  %v3744_v2 = vpop.permute.xlu0 %3743 }
 0x412   : > { %v3749_v5 = vadd.f32 %v3744_v2, %v3693_v30  ;;  %v3787_v30 = vmul.f32 %v5061_v58, %v3786_v9 }
 0x413   : > { %4241 = vrot.lane.b32.xlu1 %v4236_v29, %s5184_s12  ;;  %v3784_v45 = vadd.f32 %v3782_v18, %v3750_v14 }
 0x414   : > { %4239 = vrot.lane.b32.xlu0 %v4235_v19, %s5184_s12  ;;  %v3760_v37 = vpop.permute.xlu1 %3759  ;;  %v3783_v52 = vadd.f32 %v3781_v28, %v3749_v5 }
 0x415   : > { %v3764_v31 = vadd.f32 %v3760_v37, %v3708_v40  ;;  %v3758_v49 = vpop.permute.xlu0 %3757 }
 0x416   : > { %v3763_v54 = vadd.f32 %v3758_v49, %v3707_v1 }
 0x417   : > { %4283 = vrot.lane.b32.xlu1 %v4278_v10, %s8822_s19  ;;  %v3790_v3 = vadd.f32 %v3788_v24, %v3764_v31 }
 0x418   : > { %4281 = vrot.lane.b32.xlu0 %v4277_v25, %s8822_s19  ;;  %v3800_v0 = vpop.permute.xlu1 %3799  ;;  %v3789_v47 = vadd.f32 %v3787_v30, %v3763_v54 }
 0x419   : > { %v3804_v48 = vadd.f32 %v3800_v0, %v3772_v21 }
 0x41a   : > { %v3798_v40 = vpop.permute.xlu0 %3797 }
 0x41b   : > { %v3803_v56 = vadd.f32 %v3798_v40, %v3771_v44  ;;  %4255 = vrot.lane.b32.xlu1 %v4250_v53, %s5184_s12 }
 0x41c   : > { %4253 = vrot.lane.b32.xlu0 %v4249_v12, %s5184_s12  ;;  %s4898_s12 = sld [smem:[#allocation7 + $0x1b]] }
 0x41d   : > { %v3814_v1 = vpop.permute.xlu1 %3813 }
 0x41e   : > { %v3818_v46 = vadd.f32 %v3814_v1, %v3778_v55  ;;  %v3812_v61 = vpop.permute.xlu0 %3811 }
 0x41f   : > { %v3817_v62 = vadd.f32 %v3812_v61, %v3777_v38  ;;  %4297 = vrot.lane.b32.xlu1 %v4292_v7, %s8822_s19 }
 0x420   : > { %4295 = vrot.lane.b32.xlu0 %v4291_v4, %s8822_s19 }
 0x421   : > { %v3828_v41 = vpop.permute.xlu1 %3827 }
 0x422   : > { %v3832_v32 = vadd.f32 %v3828_v41, %v3784_v45  ;;  %v3826_v59 = vpop.permute.xlu0 %3825  ;;  %v3906_v2 = vstv %s4898_s12  ;;  %v3912_v45 = vstv %s4899_s20  ;;  %s8726_s12 = sld [smem:[#allocation10 + $0x6]]  ;;  %s8728_s20 = sld [smem:[#allocation10 + $0xa]] }
 0x423   : > { %v3831_v21 = vadd.f32 %v3826_v59, %v3783_v52  ;;  %4311 = vrot.lane.b32.xlu1 %v4306_v33, %s8822_s19  ;;  %v3908_v5 = vmul.f32 %v8330_v42, %v3906_v2  ;;  %v3907_v9 = vmul.f32 %v8348_v39, %v3906_v2  ;;  %v3914_v25 = vmul.f32 %v8330_v42, %v3912_v45 }
 0x424   : > { %4309 = vrot.lane.b32.xlu0 %v4305_v8, %s8822_s19  ;;  %s4900_s19 = sld [smem:[#allocation7 + $0x63]]  ;;  %v3913_v13 = vmul.f32 %v8348_v39, %v3912_v45 }
 0x425   : > { %v3842_v11 = vpop.permute.xlu1 %3841 }
 0x426   : > { %v3846_v51 = vadd.f32 %v3842_v11, %v3790_v3  ;;  %v3840_v44 = vpop.permute.xlu0 %3839 }
 0x427   : > { %v3845_v16 = vadd.f32 %v3840_v44, %v3789_v47 }
 0x429   : > { %v3856_v36 = vpop.permute.xlu1 %3855 }
 0x42a   : > { %v3860_v6 = vadd.f32 %v3856_v36, %v3804_v48  ;;  %v3854_v20 = vpop.permute.xlu0 %3853  ;;  %v3918_v24 = vstv %s4900_s19  ;;  %s8730_s19 = sld [smem:[#allocation10 + $0x3]] }
 0x42b   : > { %v3859_v17 = vadd.f32 %v3854_v20, %v3803_v56  ;;  %v3920_v53 = vmul.f32 %v8330_v42, %v3918_v24  ;;  %v3919_v48 = vmul.f32 %v8348_v39, %v3918_v24  ;;  %v4188_v24 = vstv %s8640_s27 }
 0x42c   : > { %v3910_v37 = vadd.f32 %v3908_v5, %v3860_v6 }
 0x42d   : > { %v3870_v23 = vpop.permute.xlu1 %3869  ;;  %v3909_v52 = vadd.f32 %v3907_v9, %v3859_v17 }
 0x42e   : > { %v3874_v43 = vadd.f32 %v3870_v23, %v3818_v46  ;;  %v3868_v26 = vpop.permute.xlu0 %3867 }
 0x42f   : > { %v3873_v55 = vadd.f32 %v3868_v26, %v3817_v62  ;;  %v4182_v26 = vstv %s4922_s23  ;;  %s8734_s23 = sld [smem:[#allocation10 + $0xb]] }
 0x430   : > { %v3916_v54 = vadd.f32 %v3914_v25, %v3874_v43  ;;  %v4183_v45 = vmul.f32 %v4182_v26, %v8541_v60 }
 0x431   : > { %v3884_v34 = vpop.permute.xlu1 %3883  ;;  %v3915_v30 = vadd.f32 %v3913_v13, %v3873_v55 }
 0x432   : > { %v3888_v29 = vadd.f32 %v3884_v34, %v3832_v32  ;;  %v3882_v38 = vpop.permute.xlu0 %3881 }
 0x433   : > { %v3887_v14 = vadd.f32 %v3882_v38, %v3831_v21  ;;  %v4044_v21 = vstv %s4910_s22  ;;  %s8732_s22 = sld [smem:[#allocation10 + $0x7]] }
 0x434   : > { %v3922_v40 = vadd.f32 %v3920_v53, %v3888_v29  ;;  %v4046_v36 = vmul.f32 %v8471_v63, %v4044_v21  ;;  %v4045_v6 = vmul.f32 %v8474_v50, %v4044_v21  ;;  %v4050_v29 = vstv %s4911_s25 }
 0x435   : > { %v3898_v19 = vpop.permute.xlu1 %3897  ;;  %v3921_v22 = vadd.f32 %v3919_v48, %v3887_v14 }
 0x436   : > { %v8620_v57 = vadd.f32 %v3898_v19, %v3846_v51  ;;  %v3896_v18 = vpop.permute.xlu0 %3895 }
 0x437   : > { %v8623_v28 = vadd.f32 %v3896_v18, %v3845_v16  ;;  %v4184_v18 = vmul.f32 %v4182_v26, %v8535_v35 }
 0x439   : > { %v3938_v10 = vpop.permute.xlu1 %3937 }
 0x43a   : > { %v3942_v31 = vadd.f32 %v3938_v10, %v3910_v37  ;;  %v3936_v49 = vpop.permute.xlu0 %3935  ;;  %v4052_v37 = vmul.f32 %v8471_v63, %v4050_v29 }
 0x43b   : > { %v3941_v15 = vadd.f32 %v3936_v49, %v3909_v52  ;;  %v4051_v52 = vmul.f32 %v8474_v50, %v4050_v29 }
 0x43d   : > { %v3952_v58 = vpop.permute.xlu1 %3951 }
 0x43e   : > { %v3956_v3 = vadd.f32 %v3952_v58, %v3916_v54  ;;  %v3950_v0 = vpop.permute.xlu0 %3949  ;;  %v3924_v58 = vstv %s8642_s30 }
 0x43f   : > { %v3955_v47 = vadd.f32 %v3950_v0, %v3915_v30 }
 0x441   : > { %v3966_v12 = vpop.permute.xlu1 %3965 }
 0x442   : > { %v3970_v56 = vadd.f32 %v3966_v12, %v3922_v40  ;;  %v3964_v1 = vpop.permute.xlu0 %3963  ;;  %v4190_v40 = vmul.f32 %v4188_v24, %v8535_v35 }
 0x443   : > { %v3969_v7 = vadd.f32 %v3964_v1, %v3921_v22  ;;  %v4189_v1 = vmul.f32 %v4188_v24, %v8541_v60 }
 0x445   : > { %v3994_v46 = vpop.permute.xlu1 %3993 }
 0x446   : > { %v3992_v61 = vpop.permute.xlu0 %3991  ;;  %v3998_v51 = vadd.f32 %v3994_v46, %v3942_v31  ;;  %v3926_v46 = vmul.f32 %v8330_v42, %v3924_v58  ;;  %v4194_v42 = vstv %s8655_s26 }
 0x447   : > { %v3997_v16 = vadd.f32 %v3992_v61, %v3941_v15 }
 0x448   : > { %v4048_v17 = vadd.f32 %v4046_v36, %v3998_v51 }
 0x449   : > { %v4008_v4 = vpop.permute.xlu1 %4007  ;;  %v4047_v43 = vadd.f32 %v4045_v6, %v3997_v16 }
 0x44a   : > { %v4006_v27 = vpop.permute.xlu0 %4005  ;;  %v4012_v14 = vadd.f32 %v4008_v4, %v3956_v3  ;;  %v4056_v3 = vstv %s8644_s8 }
 0x44b   : > { %v4011_v5 = vadd.f32 %v4006_v27, %v3955_v47  ;;  %v4058_v61 = vmul.f32 %v8471_v63, %v4056_v3  ;;  %v3925_v27 = vmul.f32 %v8348_v39, %v3924_v58 }
 0x44c   : > { %v4054_v25 = vadd.f32 %v4052_v37, %v4012_v14 }
 0x44d   : > { %v8630_v62 = vpop.permute.xlu1 %3979  ;;  %v4053_v13 = vadd.f32 %v4051_v52, %v4011_v5  ;;  %v3927_v21 = vadd.f32 %v3925_v27, %v8623_v28 }
 0x44e   : > { %v8632_v41 = vpop.permute.xlu0 %3977 }
 0x44f   : > { %v3983_v6 = vadd.f32 %v8632_v41, %v3927_v21 }
 0x451   : > { %v4022_v33 = vpop.permute.xlu1 %4021 }
 0x452   : > { %v4020_v32 = vpop.permute.xlu0 %4019  ;;  %v4026_v53 = vadd.f32 %v4022_v33, %v3970_v56  ;;  %v4057_v56 = vmul.f32 %v8474_v50, %v4056_v3  ;;  %v4329_v3 = vstv %s8691_s11 }
 0x453   : > { %v4025_v12 = vadd.f32 %v4020_v32, %v3969_v7 }
 0x454   : > { %v4060_v7 = vadd.f32 %v4058_v61, %v4026_v53  ;;  %v4359_v53 = vstv %s8695_s16 }
 0x455   : > { %v4076_v59 = vpop.permute.xlu1 %4075  ;;  %v4059_v51 = vadd.f32 %v4057_v56, %v4025_v12  ;;  %v4326_v12 = vstv %s8700_s29 }
 0x456   : > { %v4074_v8 = vpop.permute.xlu0 %4073  ;;  %v4080_v55 = vadd.f32 %v4076_v59, %v4048_v17 }
 0x457   : > { %v4079_v34 = vadd.f32 %v4074_v8, %v4047_v43  ;;  %v3928_v8 = vadd.f32 %v3926_v46, %v8620_v57  ;;  %v4196_v57 = vmul.f32 %v4194_v42, %v8535_v35 }
 0x459   : > { %v8634_v11 = vpop.permute.xlu1 %4035  ;;  %v3984_v16 = vadd.f32 %v8630_v62, %v3928_v8  ;;  %v4386_v8 = vstv %s8705_s28 }
 0x45a   : > { %v8636_v44 = vpop.permute.xlu0 %4033 }
 0x45d   : > { %v4090_v20 = vpop.permute.xlu1 %4089 }
 0x45e   : > { %v4088_v23 = vpop.permute.xlu0 %4087  ;;  %v4094_v54 = vadd.f32 %v4090_v20, %v4054_v25  ;;  %v4062_v20 = vstv %s8659_s10 }
 0x45f   : > { %v4093_v30 = vadd.f32 %v4088_v23, %v4053_v13  ;;  %v4040_v23 = vadd.f32 %v8634_v11, %v3984_v16  ;;  %v4064_v29 = vmul.f32 %v8471_v63, %v4062_v20  ;;  %v4063_v41 = vmul.f32 %v8474_v50, %v4062_v20 }
 0x460   : > { %v4395_v16 = vstv %s8711_s18 }
 0x461   : > { %v4132_v38 = vpop.permute.xlu1 %4131 }
 0x462   : > { %v4136_v2 = vadd.f32 %v4132_v38, %v4080_v55  ;;  %v4130_v19 = vpop.permute.xlu0 %4129  ;;  %v4039_v55 = vadd.f32 %v8636_v44, %v3983_v6 }
 0x463   : > { %v4135_v9 = vadd.f32 %v4130_v19, %v4079_v34  ;;  %v4195_v34 = vmul.f32 %v4194_v42, %v8541_v60 }
 0x464   : > { %v8649_v10 = vadd.f32 %v4184_v18, %v4136_v2  ;;  %v4066_v2 = vadd.f32 %v4064_v29, %v4040_v23  ;;  %v4065_v19 = vadd.f32 %v4063_v41, %v4039_v55  ;;  %v4200_v18 = vstv %s4925_s0 }
 0x465   : > { %v4104_v31 = vpop.permute.xlu1 %4103  ;;  %v8652_v49 = vadd.f32 %v4183_v45, %v4135_v9  ;;  %v4202_v52 = vmul.f32 %v4200_v18, %v8535_v35  ;;  %v4201_v63 = vmul.f32 %v4200_v18, %v8541_v60 }
 0x466   : > { %v4102_v15 = vpop.permute.xlu0 %4101  ;;  %v4108_v36 = vadd.f32 %v4104_v31, %v4060_v7 }
 0x467   : > { %v4107_v39 = vadd.f32 %v4102_v15, %v4059_v51 }
 0x469   : > { %v4146_v0 = vpop.permute.xlu1 %4145 }
 0x46a   : > { %v4150_v47 = vadd.f32 %v4146_v0, %v4094_v54  ;;  %v4144_v48 = vpop.permute.xlu0 %4143 }
 0x46b   : > { %v4149_v22 = vadd.f32 %v4144_v48, %v4093_v30 }
 0x46c   : > { %v8665_v4 = vadd.f32 %v4190_v40, %v4150_v47  ;;  %v4389_v47 = vstv %s8697_s17 }
 0x46d   : > { %v4118_v33 = vpop.permute.xlu1 %4117  ;;  %v8669_v59 = vadd.f32 %v4189_v1, %v4149_v22  ;;  %v4356_v22 = vstv %s8702_s9 }
 0x46e   : > { %v4116_v32 = vpop.permute.xlu0 %4115  ;;  %v4122_v5 = vadd.f32 %v4118_v33, %v4066_v2 }
 0x46f   : > { %v4121_v9 = vadd.f32 %v4116_v32, %v4065_v19  ;;  %v4335_v32 = vstv %s8707_s15 }
 0x471   : > { %v4160_v17 = vpop.permute.xlu1 %4159 }
 0x472   : > { %v4164_v43 = vadd.f32 %v4160_v17, %v4108_v36  ;;  %v4158_v26 = vpop.permute.xlu0 %4157 }
 0x473   : > { %v4163_v28 = vadd.f32 %v4158_v26, %v4107_v39 }
 0x474   : > { %v8682_v62 = vadd.f32 %v4196_v57, %v4164_v43 }
 0x475   : > { %v4214_v38 = vpop.permute.xlu1 %4213  ;;  %v8685_v14 = vadd.f32 %v4195_v34, %v4163_v28 }
 0x476   : > { %v4212_v11 = vpop.permute.xlu0 %4211  ;;  %v4218_v24 = vadd.f32 %v4214_v38, %v8649_v10 }
 0x477   : > { %v4217_v35 = vadd.f32 %v4212_v11, %v8652_v49 }
 0x479   : > { %v4174_v45 = vpop.permute.xlu1 %4173 }
 0x47a   : > { %v4178_v44 = vadd.f32 %v4174_v45, %v4122_v5  ;;  %v4172_v37 = vpop.permute.xlu0 %4171 }
 0x47b   : > { %v4177_v31 = vadd.f32 %v4172_v37, %v4121_v9 }
 0x47c   : > { %v8689_v25 = vadd.f32 %v4202_v52, %v4178_v44 }
 0x47d   : > { %v4228_v50 = vpop.permute.xlu1 %4227  ;;  %v8693_v15 = vadd.f32 %v4201_v63, %v4177_v31 }
 0x47e   : > { %v4226_v13 = vpop.permute.xlu0 %4225  ;;  %v4232_v40 = vadd.f32 %v4228_v50, %v8665_v4  ;;  %v4365_v4 = vstv %s8709_s21  ;;  %v4341_v50 = vstv %s8722_s13 }
 0x47f   : > { %v4231_v46 = vadd.f32 %v4226_v13, %v8669_v59  ;;  %v4371_v13 = vstv %s8726_s12 }
 0x481   : > { %v4270_v60 = vpop.permute.xlu1 %4269 }
 0x482   : > { %v4274_v54 = vadd.f32 %v4270_v60, %v4218_v24  ;;  %v4268_v58 = vpop.permute.xlu0 %4267  ;;  %v4401_v24 = vstv %s8728_s20 }
 0x483   : > { %v4273_v30 = vadd.f32 %v4268_v58, %v4217_v35 }
 0x484   : > { %v4318_v10 = vmax.f32 %v4274_v54, 0.0  ;;  %v4347_v54 = vstv %s8730_s19 }
 0x485   : > { %v4317_v0 = vmax.f32 %v4273_v30, 0.0  ;;  %v4242_v49 = vpop.permute.xlu1 %4241 }
 0x486   : > { %v4240_v48 = vpop.permute.xlu0 %4239  ;;  %v4331_v1 = vmul.f32 %v4329_v3, %v4318_v10  ;;  %v4361_v61 = vmul.f32 %v4359_v53, %v4318_v10  ;;  %v4391_v27 = vmul.f32 %v4389_v47, %v4318_v10  ;;  %v4246_v11 = vadd.f32 %v4242_v49, %v8682_v62 }
 0x487   : > { %v4330_v56 = vmul.f32 %v4329_v3, %v4317_v0  ;;  %v4360_v7 = vmul.f32 %v4359_v53, %v4317_v0  ;;  %v4390_v42 = vmul.f32 %v4389_v47, %v4317_v0  ;;  %v4245_v9 = vadd.f32 %v4240_v48, %v8685_v14 }
 0x488   : > { %v4333_v59 = vadd.f32 %v4331_v1, %v4326_v12  ;;  %v4363_v39 = vadd.f32 %v4361_v61, %v4356_v22  ;;  %v4393_v20 = vadd.f32 %v4391_v27, %v4386_v8  ;;  %v4377_v14 = vstv %s8732_s22 }
 0x489   : > { %v4284_v33 = vpop.permute.xlu1 %4283  ;;  %v4332_v17 = vadd.f32 %v4330_v56, %v4326_v12  ;;  %v4362_v26 = vadd.f32 %v4360_v7, %v4356_v22  ;;  %v4392_v29 = vadd.f32 %v4390_v42, %v4386_v8  ;;  %v4407_v10 = vstv %s8734_s23 }
 0x48a   : > { %v4288_v21 = vadd.f32 %v4284_v33, %v4232_v40  ;;  %v4282_v51 = vpop.permute.xlu0 %4281 }
 0x48b   : > { %v4287_v36 = vadd.f32 %v4282_v51, %v4231_v46 }
 0x48c   : > { %v4320_v6 = vmax.f32 %v4288_v21, 0.0 }
 0x48d   : > { %v4319_v23 = vmax.f32 %v4287_v36, 0.0  ;;  %v4256_v43 = vpop.permute.xlu1 %4255 }
 0x48e   : > { %v4337_v57 = vmul.f32 %v4335_v32, %v4320_v6  ;;  %v4367_v55 = vmul.f32 %v4365_v4, %v4320_v6  ;;  %v4397_v28 = vmul.f32 %v4395_v16, %v4320_v6  ;;  %v4254_v34 = vpop.permute.xlu0 %4253  ;;  %v4260_v62 = vadd.f32 %v4256_v43, %v8689_v25 }
 0x48f   : > { %v4336_v41 = vmul.f32 %v4335_v32, %v4319_v23  ;;  %v4366_v38 = vmul.f32 %v4365_v4, %v4319_v23  ;;  %v4396_v2 = vmul.f32 %v4395_v16, %v4319_v23  ;;  %v4259_v58 = vadd.f32 %v4254_v34, %v8693_v15 }
 0x490   : > { %v4339_v19 = vadd.f32 %v4337_v57, %v4333_v59  ;;  %v4369_v18 = vadd.f32 %v4367_v55, %v4363_v39  ;;  %v4399_v5 = vadd.f32 %v4397_v28, %v4393_v20 }
 0x491   : > { %v4338_v45 = vadd.f32 %v4336_v41, %v4332_v17  ;;  %v4368_v44 = vadd.f32 %v4366_v38, %v4362_v26  ;;  %v4398_v37 = vadd.f32 %v4396_v2, %v4392_v29  ;;  %v4298_v52 = vpop.permute.xlu1 %4297 }
 0x492   : > { %v4302_v31 = vadd.f32 %v4298_v52, %v4246_v11  ;;  %v4296_v63 = vpop.permute.xlu0 %4295 }
 0x493   : > { %v4301_v35 = vadd.f32 %v4296_v63, %v4245_v9 }
 0x494   : > { %v4322_v60 = vmax.f32 %v4302_v31, 0.0 }
 0x495   : > { %v4321_v30 = vmax.f32 %v4301_v35, 0.0  ;;  %v4312_v3 = vpop.permute.xlu1 %4311 }
 0x496   : > { %v4343_v0 = vmul.f32 %v4341_v50, %v4322_v60  ;;  %v4373_v49 = vmul.f32 %v4371_v13, %v4322_v60  ;;  %v4403_v53 = vmul.f32 %v4401_v24, %v4322_v60  ;;  %v4316_v47 = vadd.f32 %v4312_v3, %v4260_v62  ;;  %v4310_v48 = vpop.permute.xlu0 %4309 }
 0x497   : > { %v4342_v40 = vmul.f32 %v4341_v50, %v4321_v30  ;;  %v4372_v12 = vmul.f32 %v4371_v13, %v4321_v30  ;;  %v4402_v22 = vmul.f32 %v4401_v24, %v4321_v30  ;;  %v4315_v1 = vadd.f32 %v4310_v48, %v4259_v58 }
 0x498   : > { %v4345_v46 = vadd.f32 %v4343_v0, %v4339_v19  ;;  %v4375_v61 = vadd.f32 %v4373_v49, %v4369_v18  ;;  %v4405_v25 = vadd.f32 %v4403_v53, %v4399_v5  ;;  %v4324_v27 = vmax.f32 %v4316_v47, 0.0 }
 0x499   : > { %v4344_v56 = vadd.f32 %v4342_v40, %v4338_v45  ;;  %v4374_v15 = vadd.f32 %v4372_v12, %v4368_v44  ;;  %v4404_v33 = vadd.f32 %v4402_v22, %v4398_v37  ;;  %v4323_v8 = vmax.f32 %v4315_v1, 0.0 }
 0x49a   : > { %v4349_v7 = vmul.f32 %v4347_v54, %v4324_v27  ;;  %v4379_v32 = vmul.f32 %v4377_v14, %v4324_v27  ;;  %v4409_v21 = vmul.f32 %v4407_v10, %v4324_v27 }
 0x49b   : > { %v4348_v51 = vmul.f32 %v4347_v54, %v4323_v8  ;;  %v4378_v42 = vmul.f32 %v4377_v14, %v4323_v8  ;;  %v4408_v4 = vmul.f32 %v4407_v10, %v4323_v8 }
 0x49c   : > { %v4351_v16 = vadd.f32 %v4349_v7, %v4345_v46  ;;  %v4381_v36 = vadd.f32 %v4379_v32, %v4375_v61  ;;  %v4411_v59 = vadd.f32 %v4409_v21, %v4405_v25 }
 0x49d   : > { %v4350_v6 = vadd.f32 %v4348_v51, %v4344_v56  ;;  %v4380_v39 = vadd.f32 %v4378_v42, %v4374_v15  ;;  %v4410_v20 = vadd.f32 %v4408_v4, %v4404_v33 }
 0x49e   : > { %4938 = vst.msk [vmem:[%s7616_s14 + $0x38] sm:$0xff] %vm2586_vm2, %v4351_v16  ;;  %4945 = vst.msk [vmem:[%s7616_s14 + $0x48] sm:$0xff] %vm2586_vm2, %v4381_v36 }
 0x49f   : > { %4952 = vst.msk [vmem:[%s7616_s14 + $0x58] sm:$0xff] %vm2586_vm2, %v4411_v59  ;;  %4937 = vst.msk [vmem:[%s7616_s14 + $0x30] sm:$0xff] %vm2586_vm2, %v4350_v6 }
 0x4a0   : > { %4944 = vst.msk [vmem:[%s7616_s14 + $0x40] sm:$0xff] %vm2586_vm2, %v4380_v39  ;;  %4951 = vst.msk [vmem:[%s7616_s14 + $0x50] sm:$0xff] %vm2586_vm2, %v4410_v20 }
 0x4a1 PF: > { %s21_s24 = sadd.s32 1, %s5174_s24  }
 0x4a2   : > { %p18_p11 = scmp.ge.s32.totalorder %s21_s24, 4  }
 0x4a4   :  { %20 = sbr.rel (!%p18_p11) target bundleno = 6 (0x6), region = 118 }
 0x4ab   :  { %4436 = vsyncpa [#allocation4], 1 }
 0x4ac   :  { %4438 = vsyncpa [#allocation4 + $0x1], 1 }
 0x4ad   :  { %4439 = vsyncpa [#allocation6], 1 }
 0x4ae   :  { %4440 = vsyncpa [#allocation9], 1 }
 0x4af   :  { %4441 = vsyncpa [#allocation12], 1 }

</bundles_post_ra>
